<compile_context>
chip_gen: v5e
topology: v5e:2x2
jax: 0.10.0
libtpu: 0.0.40
codegen_flags: <defaults>
</compile_context>

<pallas_src>
import jax
import jax.numpy as jnp
from jax import lax
from jax.experimental import pallas as pl
from jax.experimental.pallas import tpu as pltpu


# =====================================================================
# Fused Pallas kernel
# =====================================================================

def fused_kernel(dens_ref, mask_ref, lg_ref, lgb_ref, wk_ref, selT_ref, lb_ref,
                 out_ref, rhs_ref, seq_ref):
    L, D, W = dens_ref.shape            # W = 2 * B * D  ([q|a] x batch x width on lanes)
    NL = lg_ref.shape[0]
    f32 = jnp.float32
    bf16 = jnp.bfloat16

    masks = mask_ref[...]               # (2, W) f32, loaded once
    not_start = masks[0:1, :]           # 0 where lane is col 0   of a D-block
    not_end = masks[1:2, :]             # 0 where lane is col D-1 of a D-block

    def write_rhs(x, h):
        # RHS of the folded 3x3/stride-(2,1) conv matmul, stacked on K:
        #   rows [0:2D)  = kw=0 tap: not_start * (x, h) shifted right by 1 lane
        #   rows [2D:4D) = kw=1 tap:              (x, h)
        #   rows [4D:6D) = kw=2 tap: not_end   * (x, h) shifted left  by 1 lane
        # Rolls/masks run in f32 on the VPU (v5e-safe); bf16 cast only at store.
        # TODO(synk): pltpu.roll would pin the shift to the XLU rotate slot, but
        # lane rotate wants a 128-multiple lane dim (W=64 here), so use jnp.roll.
        rhs_ref[0 * D:1 * D] = (not_start * jnp.roll(x, 1, axis=1)).astype(bf16)
        rhs_ref[1 * D:2 * D] = (not_start * jnp.roll(h, 1, axis=1)).astype(bf16)
        rhs_ref[2 * D:3 * D] = x.astype(bf16)
        rhs_ref[3 * D:4 * D] = h.astype(bf16)
        rhs_ref[4 * D:5 * D] = (not_end * jnp.roll(x, -1, axis=1)).astype(bf16)
        rhs_ref[5 * D:6 * D] = (not_end * jnp.roll(h, -1, axis=1)).astype(bf16)

    def cell(lg_l, bias_b, x, h, c):
        # One CNN-LSTM step: single bf16 MXU matmul (row selection, kh taps and
        # gate weights folded into lg_l on K), f32 accumulate, hoisted bias add.
        write_rhs(x, h)
        pre = jnp.dot(lg_l, rhs_ref[...],
                      preferred_element_type=f32) + bias_b        # (4D, W) f32
        gates = jax.nn.sigmoid(pre[0:3 * D])
        fg = gates[0:D]
        ig = gates[D:2 * D]
        og = gates[2 * D:3 * D]
        cs = jnp.tanh(pre[3 * D:4 * D])
        c_new = fg * c + ig * cs
        h_new = og * jnp.tanh(c_new)
        return h_new, c_new

    # ---- CNN-LSTM layers; time loop unrolled, live ranges bounded by scratch ----
    hmax = None
    for layer in range(NL):
        lg_l = lg_ref[layer]                                       # (4D, 6D) bf16
        bias_b = jnp.broadcast_to(lgb_ref[layer], (4 * D, W))      # once per layer
        h = jnp.zeros((D, W), f32)
        c = jnp.zeros((D, W), f32)
        last = layer == NL - 1
        for t in range(L):
            x = dens_ref[t] if layer == 0 else seq_ref[t]
            h, c = cell(lg_l, bias_b, x, h, c)
            if last:
                hmax = h if t == 0 else jnp.maximum(hmax, h)       # streaming max-pool
            else:
                seq_ref[t] = h          # hand-off to next layer (eval dropout = id)

    # ---- linear(2*D*D -> 2) + log-softmax; classes on the sublane axis ----
    rs0 = jnp.sum(hmax * wk_ref[0], axis=0, keepdims=True)         # (1, W)
    rs1 = jnp.sum(hmax * wk_ref[1], axis=0, keepdims=True)
    rs = jnp.concatenate([rs0, rs1], axis=0)                       # (2, W)
    # N=B selection matmul kept (single occurrence, accepted by perf review).
    score_t = jnp.dot(rs, selT_ref[...],
                      preferred_element_type=f32) + lb_ref[...]    # (2, B)
    m = jnp.max(score_t, axis=0, keepdims=True)
    lse = m + jnp.log(jnp.sum(jnp.exp(score_t - m), axis=0, keepdims=True))
    out_ref[...] = score_t - lse


# =====================================================================
# Wrapper (constant packing + single pallas_call)
# =====================================================================

def build_gate_matrices(conv_w, conv_b, D):
    """Fold row selection (stride-2 conv rows over [x;h]), kh taps and gate
    weights into one K-folded left matrix per layer:
        lg[l, g*D+oh, kw*2D+r] = conv_w[l, g, kh, kw]  iff  r == 2*oh + kh - 1
    Returns (lg bf16 (NL, 4D, 6D), bias f32 (NL, 4D, 1))."""
    NL = conv_w.shape[0]
    oh = jnp.arange(D)[:, None]
    r = jnp.arange(2 * D)[None, :]
    sel = jnp.stack([(r == (2 * oh + kh - 1)) for kh in range(3)]).astype(jnp.float32)
    lg = jnp.einsum('lgkw,kor->lgowr', conv_w.astype(jnp.float32), sel)   # (NL,4,D,3,2D)
    lg = lg.reshape(NL, 4 * D, 6 * D).astype(jnp.bfloat16)
    bias = jnp.repeat(conv_b.astype(jnp.float32), D, axis=1).reshape(NL, 4 * D, 1)
    return lg, bias


def nnqlm_forward(q_ids, a_ids, emb_w, conv_w, conv_b, lin_w, lin_b):
    B, L = q_ids.shape
    D = emb_w.shape[1]
    EB = 2 * B                      # q and a stacked on the lane axis
    W = EB * D
    DD = D * D

    # Embedding gather + EXACT density image, precomputed lane-dense (L, D, W):
    # dens[t, row, e*D+col] = v_e[row] * v_e[col] / (||v_e||^2 + 1e-4)
    q_e = jnp.take(emb_w, q_ids, axis=0).astype(jnp.float32)       # (B, L, D)
    a_e = jnp.take(emb_w, a_ids, axis=0).astype(jnp.float32)
    stacked = jnp.concatenate([q_e, a_e], axis=0)                   # (2B, L, D)
    outer = jnp.einsum('eti,etj->etij', stacked, stacked,
                       precision=lax.Precision.HIGHEST)
    nrm = jnp.sum(stacked * stacked, axis=-1)[:, :, None, None]
    dens = (outer / (nrm + 1e-4)).transpose(1, 2, 0, 3).reshape(L, D, W)

    lane = jnp.arange(W)
    col = lane % D
    e_of = lane // D
    edge_masks = jnp.stack([(col != 0), (col != D - 1)]).astype(jnp.float32)   # (2, W)

    lg, lgb = build_gate_matrices(conv_w, conv_b, D)                # bf16 / f32

    # head weights in kernel layout: wk[k, row, e*D+col]
    wq = lin_w[:, :DD].reshape(2, D, D).astype(jnp.float32)
    wa = lin_w[:, DD:].reshape(2, D, D).astype(jnp.float32)
    wk = jnp.concatenate(
        [jnp.tile(wq[:, :, None, :], (1, 1, B, 1)),
         jnp.tile(wa[:, :, None, :], (1, 1, B, 1))], axis=2).reshape(2, D, W)

    b_ids = jnp.arange(B)
    selT = ((e_of[:, None] == b_ids[None, :]) |
            (e_of[:, None] == (B + b_ids)[None, :])).astype(jnp.float32)       # (W, B)
    lb = lin_b.reshape(2, 1).astype(jnp.float32)

    vspec = pl.BlockSpec(memory_space=pltpu.MemorySpace.VMEM)
    score_t = pl.pallas_call(
        fused_kernel,
        out_shape=jax.ShapeDtypeStruct((2, B), jnp.float32),
        in_specs=[vspec] * 7,
        out_specs=vspec,
        scratch_shapes=[pltpu.VMEM((6 * D, W), jnp.bfloat16),    # conv-matmul RHS
                        pltpu.VMEM((L, D, W), jnp.float32)],     # inter-layer h seq
    )(dens, edge_masks, lg, lgb, wk, selT, lb)

    # TODO(synk): is_bi=True even/odd interleave branch not implemented (default is_bi=False).
    # TODO(synk): at production batch (W = 2*B*D >= 256) add a "parallel" lane-block
    # grid axis for v7x megacore and re-budget scratch against 64 MiB VMEM; at
    # B=2 (W=64) the kernel is latency-bound and intentionally gridless.
    return score_t.T                                              # (B, 2) log-probs


# =====================================================================
# Pure-JAX reference (mirrors the PyTorch forward) for validation
# =====================================================================

def _ref_density(x):
    dot = jnp.sum(x * x, axis=-1)[..., None, None]
    outer = jnp.einsum('bli,blj->blij', x, x, precision=lax.Precision.HIGHEST)
    return outer / (dot + 1e-4)


def _ref_conv(inp, w, b):
    out = lax.conv_general_dilated(
        inp, w.reshape(1, 1, 3, 3),
        window_strides=(2, 1), padding=((1, 1), (1, 1)),
        dimension_numbers=('NCHW', 'OIHW', 'NCHW'),
        precision=lax.Precision.HIGHEST)
    return out + b


def _ref_cnn_lstm(x, conv_w, conv_b):
    B, L, D, _ = x.shape
    pre_x = x
    for layer in range(conv_w.shape[0]):
        h = jnp.zeros((B, 1, D, D), jnp.float32)
        c = jnp.zeros((B, 1, D, D), jnp.float32)
        hs = []
        for t in range(L):
            xt = pre_x[:, t][:, None]
            inp = jnp.concatenate([xt, h], axis=2)
            fg = jax.nn.sigmoid(_ref_conv(inp, conv_w[layer, 0], conv_b[layer, 0]))
            ig = jax.nn.sigmoid(_ref_conv(inp, conv_w[layer, 1], conv_b[layer, 1]))
            og = jax.nn.sigmoid(_ref_conv(inp, conv_w[layer, 2], conv_b[layer, 2]))
            cs = jnp.tanh(_ref_conv(inp, conv_w[layer, 3], conv_b[layer, 3]))
            c = fg * c + ig * cs
            h = og * jnp.tanh(c)
            hs.append(h)
        pre_x = jnp.concatenate(hs, axis=1)
    return pre_x


def ref_forward(q_ids, a_ids, emb_w, conv_w, conv_b, lin_w, lin_b):
    B, L = q_ids.shape
    q_e = emb_w[q_ids]
    a_e = emb_w[a_ids]
    q_d = _ref_density(q_e)
    a_d = _ref_density(a_e)
    qf = _ref_cnn_lstm(q_d, conv_w, conv_b).reshape(B, L, -1)
    af = _ref_cnn_lstm(a_d, conv_w, conv_b).reshape(B, L, -1)
    qp = jnp.max(qf, axis=1)
    ap = jnp.max(af, axis=1)
    qa = jnp.concatenate([qp, ap], axis=1)
    score = jnp.dot(qa, lin_w.T, precision=lax.Precision.HIGHEST) + lin_b
    return jax.nn.log_softmax(score, axis=1)


# =====================================================================
# Main
# =====================================================================

if __name__ == "__main__":
    B, L, D, V, NUM_LAYER = 2, 8, 16, 50, 2

    key = jax.random.PRNGKey(0)
    k = jax.random.split(key, 7)
    emb_w = jax.random.normal(k[0], (V, D), jnp.float32) * 0.5           # embedding table
    conv_w = jax.random.normal(k[1], (NUM_LAYER, 4, 3, 3), jnp.float32) * 0.3
    conv_b = jax.random.normal(k[2], (NUM_LAYER, 4), jnp.float32) * 0.1
    lin_w = jax.random.normal(k[3], (2, 2 * D * D), jnp.float32) * 0.05
    lin_b = jax.random.normal(k[4], (2,), jnp.float32) * 0.1
    q_ids = jax.random.randint(k[5], (B, L), 0, V)
    a_ids = jax.random.randint(k[6], (B, L), 0, V)

    score = jax.jit(nnqlm_forward)(q_ids, a_ids, emb_w, conv_w, conv_b, lin_w, lin_b)
    score = jax.block_until_ready(score)
    assert score.shape == (B, 2)

    ref = ref_forward(q_ids, a_ids, emb_w, conv_w, conv_b, lin_w, lin_b)
    # Tolerance covers bf16 MXU operands (perf-review opt #5) propagated through
    # the 2-layer recurrence; density is now exact f32 (no approx reciprocal).
    assert jnp.allclose(score, ref, atol=3e-2, rtol=3e-2), (score, ref)

    print("KERNEL_OK")
</pallas_src>

<mosaic_0001>
module attributes {stable_mosaic.version = 11 : i64} {
  func.func @fused_kernel(%arg0: memref<8x16x64xf32, #tpu.memory_space<vmem>>, %arg1: memref<2x64xf32, #tpu.memory_space<vmem>>, %arg2: memref<2x64x96xbf16, #tpu.memory_space<vmem>>, %arg3: memref<2x64x1xf32, #tpu.memory_space<vmem>>, %arg4: memref<2x16x64xf32, #tpu.memory_space<vmem>>, %arg5: memref<64x2xf32, #tpu.memory_space<vmem>>, %arg6: memref<2x1xf32, #tpu.memory_space<vmem>>, %arg7: memref<2x2xf32, #tpu.memory_space<vmem>>, %arg8: memref<96x64xbf16, #tpu.memory_space<vmem>>, %arg9: memref<8x16x64xf32, #tpu.memory_space<vmem>>) attributes {dimension_semantics = [], scalar_prefetch = 0 : i64, scratch_operands = 2 : i64, tpu.core_type = #tpu.core_type<tc>} {
    %c0 = arith.constant 0 : index
    %c0_0 = arith.constant 0 : index
    %0 = vector.load %arg1[%c0, %c0_0] : memref<2x64xf32, #tpu.memory_space<vmem>>, vector<2x64xf32>
    %1 = vector.extract_strided_slice %0 {offsets = [0, 0], sizes = [1, 64], strides = [1, 1]} : vector<2x64xf32> to vector<1x64xf32>
    %2 = vector.extract_strided_slice %0 {offsets = [1, 0], sizes = [1, 64], strides = [1, 1]} : vector<2x64xf32> to vector<1x64xf32>
    %c0_1 = arith.constant 0 : index
    %c0_2 = arith.constant 0 : index
    %c0_3 = arith.constant 0 : index
    %3 = vector.load %arg2[%c0_1, %c0_2, %c0_3] : memref<2x64x96xbf16, #tpu.memory_space<vmem>>, vector<1x64x96xbf16>
    %4 = vector.shape_cast %3 : vector<1x64x96xbf16> to vector<64x96xbf16>
    %c0_4 = arith.constant 0 : index
    %c0_5 = arith.constant 0 : index
    %c0_6 = arith.constant 0 : index
    %5 = vector.load %arg3[%c0_4, %c0_5, %c0_6] : memref<2x64x1xf32, #tpu.memory_space<vmem>>, vector<1x64x1xf32>
    %6 = vector.shape_cast %5 : vector<1x64x1xf32> to vector<64x1xf32>
    %7 = vector.shape_cast %6 : vector<64x1xf32> to vector<64x1xf32>
    %8 = vector.broadcast %7 : vector<64x1xf32> to vector<64x64xf32>
    %cst = arith.constant 0.000000e+00 : f32
    %9 = vector.broadcast %cst : f32 to vector<16x64xf32>
    %cst_7 = arith.constant 0.000000e+00 : f32
    %10 = vector.broadcast %cst_7 : f32 to vector<16x64xf32>
    %c0_8 = arith.constant 0 : index
    %c0_9 = arith.constant 0 : index
    %c0_10 = arith.constant 0 : index
    %11 = vector.load %arg0[%c0_8, %c0_9, %c0_10] : memref<8x16x64xf32, #tpu.memory_space<vmem>>, vector<1x16x64xf32>
    %12 = vector.shape_cast %11 : vector<1x16x64xf32> to vector<16x64xf32>
    %13 = vector.extract_strided_slice %12 {offsets = [0, 63], sizes = [16, 1], strides = [1, 1]} : vector<16x64xf32> to vector<16x1xf32>
    %14 = vector.extract_strided_slice %12 {offsets = [0, 0], sizes = [16, 63], strides = [1, 1]} : vector<16x64xf32> to vector<16x63xf32>
    %15 = tpu.concatenate %13, %14 in 1 : vector<16x1xf32>, vector<16x63xf32> -> vector<16x64xf32>
    %16 = vector.broadcast %1 : vector<1x64xf32> to vector<16x64xf32>
    %17 = arith.mulf %16, %15 : vector<16x64xf32>
    %18 = arith.truncf %17 : vector<16x64xf32> to vector<16x64xbf16>
    %c0_11 = arith.constant 0 : index
    %c0_12 = arith.constant 0 : index
    %19 = vector.load %arg8[%c0_11, %c0_12] : memref<96x64xbf16, #tpu.memory_space<vmem>>, vector<16x64xbf16>
    tpu.vector_store %arg8[%c0_11, %c0_12], %18 {strides = array<i32>} : memref<96x64xbf16, #tpu.memory_space<vmem>>, vector<16x64xbf16>,
    %20 = vector.extract_strided_slice %9 {offsets = [0, 63], sizes = [16, 1], strides = [1, 1]} : vector<16x64xf32> to vector<16x1xf32>
    %21 = vector.extract_strided_slice %9 {offsets = [0, 0], sizes = [16, 63], strides = [1, 1]} : vector<16x64xf32> to vector<16x63xf32>
    %22 = tpu.concatenate %20, %21 in 1 : vector<16x1xf32>, vector<16x63xf32> -> vector<16x64xf32>
    %23 = vector.broadcast %1 : vector<1x64xf32> to vector<16x64xf32>
    %24 = arith.mulf %23, %22 : vector<16x64xf32>
    %25 = arith.truncf %24 : vector<16x64xf32> to vector<16x64xbf16>
    %c16 = arith.constant 16 : index
    %c0_13 = arith.constant 0 : index
    %26 = vector.load %arg8[%c16, %c0_13] : memref<96x64xbf16, #tpu.memory_space<vmem>>, vector<16x64xbf16>
    tpu.vector_store %arg8[%c16, %c0_13], %25 {strides = array<i32>} : memref<96x64xbf16, #tpu.memory_space<vmem>>, vector<16x64xbf16>,
    %27 = arith.truncf %12 : vector<16x64xf32> to vector<16x64xbf16>
    %c32 = arith.constant 32 : index
    %c0_14 = arith.constant 0 : index
    %28 = vector.load %arg8[%c32, %c0_14] : memref<96x64xbf16, #tpu.memory_space<vmem>>, vector<16x64xbf16>
    tpu.vector_store %arg8[%c32, %c0_14], %27 {strides = array<i32>} : memref<96x64xbf16, #tpu.memory_space<vmem>>, vector<16x64xbf16>,
    %29 = arith.truncf %9 : vector<16x64xf32> to vector<16x64xbf16>
    %c48 = arith.constant 48 : index
    %c0_15 = arith.constant 0 : index
    %30 = vector.load %arg8[%c48, %c0_15] : memref<96x64xbf16, #tpu.memory_space<vmem>>, vector<16x64xbf16>
    tpu.vector_store %arg8[%c48, %c0_15], %29 {strides = array<i32>} : memref<96x64xbf16, #tpu.memory_space<vmem>>, vector<16x64xbf16>,
    %31 = vector.extract_strided_slice %12 {offsets = [0, 1], sizes = [16, 63], strides = [1, 1]} : vector<16x64xf32> to vector<16x63xf32>
    %32 = vector.extract_strided_slice %12 {offsets = [0, 0], sizes = [16, 1], strides = [1, 1]} : vector<16x64xf32> to vector<16x1xf32>
    %33 = tpu.concatenate %31, %32 in 1 : vector<16x63xf32>, vector<16x1xf32> -> vector<16x64xf32>
    %34 = vector.broadcast %2 : vector<1x64xf32> to vector<16x64xf32>
    %35 = arith.mulf %34, %33 : vector<16x64xf32>
    %36 = arith.truncf %35 : vector<16x64xf32> to vector<16x64xbf16>
    %c64 = arith.constant 64 : index
    %c0_16 = arith.constant 0 : index
    %37 = vector.load %arg8[%c64, %c0_16] : memref<96x64xbf16, #tpu.memory_space<vmem>>, vector<16x64xbf16>
    tpu.vector_store %arg8[%c64, %c0_16], %36 {strides = array<i32>} : memref<96x64xbf16, #tpu.memory_space<vmem>>, vector<16x64xbf16>,
    %38 = vector.extract_strided_slice %9 {offsets = [0, 1], sizes = [16, 63], strides = [1, 1]} : vector<16x64xf32> to vector<16x63xf32>
    %39 = vector.extract_strided_slice %9 {offsets = [0, 0], sizes = [16, 1], strides = [1, 1]} : vector<16x64xf32> to vector<16x1xf32>
    %40 = tpu.concatenate %38, %39 in 1 : vector<16x63xf32>, vector<16x1xf32> -> vector<16x64xf32>
    %41 = vector.broadcast %2 : vector<1x64xf32> to vector<16x64xf32>
    %42 = arith.mulf %41, %40 : vector<16x64xf32>
    %43 = arith.truncf %42 : vector<16x64xf32> to vector<16x64xbf16>
    %c80 = arith.constant 80 : index
    %c0_17 = arith.constant 0 : index
    %44 = vector.load %arg8[%c80, %c0_17] : memref<96x64xbf16, #tpu.memory_space<vmem>>, vector<16x64xbf16>
    tpu.vector_store %arg8[%c80, %c0_17], %43 {strides = array<i32>} : memref<96x64xbf16, #tpu.memory_space<vmem>>, vector<16x64xbf16>,
    %c0_18 = arith.constant 0 : index
    %c0_19 = arith.constant 0 : index
    %45 = vector.load %arg8[%c0_18, %c0_19] : memref<96x64xbf16, #tpu.memory_space<vmem>>, vector<96x64xbf16>
    %cst_20 = arith.constant dense<0.000000e+00> : vector<64x64xf32>
    %46 = tpu.matmul %4, %45, %cst_20 {dimension_numbers = #tpu.dot_dimension_numbers<[1], [0], [0], [1], [0, 0, 1, 1], [], []>} : vector<64x96xbf16>, vector<96x64xbf16>, vector<64x64xf32> -> vector<64x64xf32>
    %47 = arith.addf %46, %8 : vector<64x64xf32>
    %48 = vector.extract_strided_slice %47 {offsets = [0, 0], sizes = [48, 64], strides = [1, 1]} : vector<64x64xf32> to vector<48x64xf32>
    %49 = arith.negf %48 : vector<48x64xf32>
    %50 = math.exp %49 : vector<48x64xf32>
    %cst_21 = arith.constant 1.000000e+00 : f32
    %51 = vector.broadcast %cst_21 : f32 to vector<48x64xf32>
    %52 = arith.addf %51, %50 : vector<48x64xf32>
    %53 = arith.divf %51, %52 : vector<48x64xf32>
    %54 = vector.extract_strided_slice %53 {offsets = [0, 0], sizes = [16, 64], strides = [1, 1]} : vector<48x64xf32> to vector<16x64xf32>
    %55 = vector.extract_strided_slice %53 {offsets = [16, 0], sizes = [16, 64], strides = [1, 1]} : vector<48x64xf32> to vector<16x64xf32>
    %56 = vector.extract_strided_slice %53 {offsets = [32, 0], sizes = [16, 64], strides = [1, 1]} : vector<48x64xf32> to vector<16x64xf32>
    %57 = vector.extract_strided_slice %47 {offsets = [48, 0], sizes = [16, 64], strides = [1, 1]} : vector<64x64xf32> to vector<16x64xf32>
    %58 = math.tanh %57 : vector<16x64xf32>
    %59 = arith.mulf %54, %10 : vector<16x64xf32>
    %60 = arith.mulf %55, %58 : vector<16x64xf32>
    %61 = arith.addf %59, %60 : vector<16x64xf32>
    %62 = math.tanh %61 : vector<16x64xf32>
    %63 = arith.mulf %56, %62 : vector<16x64xf32>
    %c0_22 = arith.constant 0 : index
    %c0_23 = arith.constant 0 : index
    %c0_24 = arith.constant 0 : index
    %64 = vector.load %arg9[%c0_22, %c0_23, %c0_24] : memref<8x16x64xf32, #tpu.memory_space<vmem>>, vector<1x16x64xf32>
    %65 = vector.shape_cast %64 : vector<1x16x64xf32> to vector<16x64xf32>
    %66 = vector.shape_cast %63 : vector<16x64xf32> to vector<1x16x64xf32>
    tpu.vector_store %arg9[%c0_22, %c0_23, %c0_24], %66 {strides = array<i32>} : memref<8x16x64xf32, #tpu.memory_space<vmem>>, vector<1x16x64xf32>,
    %c1 = arith.constant 1 : index
    %c0_25 = arith.constant 0 : index
    %c0_26 = arith.constant 0 : index
    %67 = vector.load %arg0[%c1, %c0_25, %c0_26] : memref<8x16x64xf32, #tpu.memory_space<vmem>>, vector<1x16x64xf32>
    %68 = vector.shape_cast %67 : vector<1x16x64xf32> to vector<16x64xf32>
    %69 = vector.extract_strided_slice %68 {offsets = [0, 63], sizes = [16, 1], strides = [1, 1]} : vector<16x64xf32> to vector<16x1xf32>
    %70 = vector.extract_strided_slice %68 {offsets = [0, 0], sizes = [16, 63], strides = [1, 1]} : vector<16x64xf32> to vector<16x63xf32>
    %71 = tpu.concatenate %69, %70 in 1 : vector<16x1xf32>, vector<16x63xf32> -> vector<16x64xf32>
    %72 = vector.broadcast %1 : vector<1x64xf32> to vector<16x64xf32>
    %73 = arith.mulf %72, %71 : vector<16x64xf32>
    %74 = arith.truncf %73 : vector<16x64xf32> to vector<16x64xbf16>
    %c0_27 = arith.constant 0 : index
    %c0_28 = arith.constant 0 : index
    %75 = vector.load %arg8[%c0_27, %c0_28] : memref<96x64xbf16, #tpu.memory_space<vmem>>, vector<16x64xbf16>
    tpu.vector_store %arg8[%c0_27, %c0_28], %74 {strides = array<i32>} : memref<96x64xbf16, #tpu.memory_space<vmem>>, vector<16x64xbf16>,
    %76 = vector.extract_strided_slice %63 {offsets = [0, 63], sizes = [16, 1], strides = [1, 1]} : vector<16x64xf32> to vector<16x1xf32>
    %77 = vector.extract_strided_slice %63 {offsets = [0, 0], sizes = [16, 63], strides = [1, 1]} : vector<16x64xf32> to vector<16x63xf32>
    %78 = tpu.concatenate %76, %77 in 1 : vector<16x1xf32>, vector<16x63xf32> -> vector<16x64xf32>
    %79 = vector.broadcast %1 : vector<1x64xf32> to vector<16x64xf32>
    %80 = arith.mulf %79, %78 : vector<16x64xf32>
    %81 = arith.truncf %80 : vector<16x64xf32> to vector<16x64xbf16>
    %c16_29 = arith.constant 16 : index
    %c0_30 = arith.constant 0 : index
    %82 = vector.load %arg8[%c16_29, %c0_30] : memref<96x64xbf16, #tpu.memory_space<vmem>>, vector<16x64xbf16>
    tpu.vector_store %arg8[%c16_29, %c0_30], %81 {strides = array<i32>} : memref<96x64xbf16, #tpu.memory_space<vmem>>, vector<16x64xbf16>,
    %83 = arith.truncf %68 : vector<16x64xf32> to vector<16x64xbf16>
    %c32_31 = arith.constant 32 : index
    %c0_32 = arith.constant 0 : index
    %84 = vector.load %arg8[%c32_31, %c0_32] : memref<96x64xbf16, #tpu.memory_space<vmem>>, vector<16x64xbf16>
    tpu.vector_store %arg8[%c32_31, %c0_32], %83 {strides = array<i32>} : memref<96x64xbf16, #tpu.memory_space<vmem>>, vector<16x64xbf16>,
    %85 = arith.truncf %63 : vector<16x64xf32> to vector<16x64xbf16>
    %c48_33 = arith.constant 48 : index
    %c0_34 = arith.constant 0 : index
    %86 = vector.load %arg8[%c48_33, %c0_34] : memref<96x64xbf16, #tpu.memory_space<vmem>>, vector<16x64xbf16>
    tpu.vector_store %arg8[%c48_33, %c0_34], %85 {strides = array<i32>} : memref<96x64xbf16, #tpu.memory_space<vmem>>, vector<16x64xbf16>,
    %87 = vector.extract_strided_slice %68 {offsets = [0, 1], sizes = [16, 63], strides = [1, 1]} : vector<16x64xf32> to vector<16x63xf32>
    %88 = vector.extract_strided_slice %68 {offsets = [0, 0], sizes = [16, 1], strides = [1, 1]} : vector<16x64xf32> to vector<16x1xf32>
    %89 = tpu.concatenate %87, %88 in 1 : vector<16x63xf32>, vector<16x1xf32> -> vector<16x64xf32>
    %90 = vector.broadcast %2 : vector<1x64xf32> to vector<16x64xf32>
    %91 = arith.mulf %90, %89 : vector<16x64xf32>
    %92 = arith.truncf %91 : vector<16x64xf32> to vector<16x64xbf16>
    %c64_35 = arith.constant 64 : index
    %c0_36 = arith.constant 0 : index
    %93 = vector.load %arg8[%c64_35, %c0_36] : memref<96x64xbf16, #tpu.memory_space<vmem>>, vector<16x64xbf16>
    tpu.vector_store %arg8[%c64_35, %c0_36], %92 {strides = array<i32>} : memref<96x64xbf16, #tpu.memory_space<vmem>>, vector<16x64xbf16>,
    %94 = vector.extract_strided_slice %63 {offsets = [0, 1], sizes = [16, 63], strides = [1, 1]} : vector<16x64xf32> to vector<16x63xf32>
    %95 = vector.extract_strided_slice %63 {offsets = [0, 0], sizes = [16, 1], strides = [1, 1]} : vector<16x64xf32> to vector<16x1xf32>
    %96 = tpu.concatenate %94, %95 in 1 : vector<16x63xf32>, vector<16x1xf32> -> vector<16x64xf32>
    %97 = vector.broadcast %2 : vector<1x64xf32> to vector<16x64xf32>
    %98 = arith.mulf %97, %96 : vector<16x64xf32>
    %99 = arith.truncf %98 : vector<16x64xf32> to vector<16x64xbf16>
    %c80_37 = arith.constant 80 : index
    %c0_38 = arith.constant 0 : index
    %100 = vector.load %arg8[%c80_37, %c0_38] : memref<96x64xbf16, #tpu.memory_space<vmem>>, vector<16x64xbf16>
    tpu.vector_store %arg8[%c80_37, %c0_38], %99 {strides = array<i32>} : memref<96x64xbf16, #tpu.memory_space<vmem>>, vector<16x64xbf16>,
    %c0_39 = arith.constant 0 : index
    %c0_40 = arith.constant 0 : index
    %101 = vector.load %arg8[%c0_39, %c0_40] : memref<96x64xbf16, #tpu.memory_space<vmem>>, vector<96x64xbf16>
    %cst_41 = arith.constant dense<0.000000e+00> : vector<64x64xf32>
    %102 = tpu.matmul %4, %101, %cst_41 {dimension_numbers = #tpu.dot_dimension_numbers<[1], [0], [0], [1], [0, 0, 1, 1], [], []>} : vector<64x96xbf16>, vector<96x64xbf16>, vector<64x64xf32> -> vector<64x64xf32>
    %103 = arith.addf %102, %8 : vector<64x64xf32>
    %104 = vector.extract_strided_slice %103 {offsets = [0, 0], sizes = [48, 64], strides = [1, 1]} : vector<64x64xf32> to vector<48x64xf32>
    %105 = arith.negf %104 : vector<48x64xf32>
    %106 = math.exp %105 : vector<48x64xf32>
    %cst_42 = arith.constant 1.000000e+00 : f32
    %107 = vector.broadcast %cst_42 : f32 to vector<48x64xf32>
    %108 = arith.addf %107, %106 : vector<48x64xf32>
    %109 = arith.divf %107, %108 : vector<48x64xf32>
    %110 = vector.extract_strided_slice %109 {offsets = [0, 0], sizes = [16, 64], strides = [1, 1]} : vector<48x64xf32> to vector<16x64xf32>
    %111 = vector.extract_strided_slice %109 {offsets = [16, 0], sizes = [16, 64], strides = [1, 1]} : vector<48x64xf32> to vector<16x64xf32>
    %112 = vector.extract_strided_slice %109 {offsets = [32, 0], sizes = [16, 64], strides = [1, 1]} : vector<48x64xf32> to vector<16x64xf32>
    %113 = vector.extract_strided_slice %103 {offsets = [48, 0], sizes = [16, 64], strides = [1, 1]} : vector<64x64xf32> to vector<16x64xf32>
    %114 = math.tanh %113 : vector<16x64xf32>
    %115 = arith.mulf %110, %61 : vector<16x64xf32>
    %116 = arith.mulf %111, %114 : vector<16x64xf32>
    %117 = arith.addf %115, %116 : vector<16x64xf32>
    %118 = math.tanh %117 : vector<16x64xf32>
    %119 = arith.mulf %112, %118 : vector<16x64xf32>
    %c1_43 = arith.constant 1 : index
    %c0_44 = arith.constant 0 : index
    %c0_45 = arith.constant 0 : index
    %120 = vector.load %arg9[%c1_43, %c0_44, %c0_45] : memref<8x16x64xf32, #tpu.memory_space<vmem>>, vector<1x16x64xf32>
    %121 = vector.shape_cast %120 : vector<1x16x64xf32> to vector<16x64xf32>
    %122 = vector.shape_cast %119 : vector<16x64xf32> to vector<1x16x64xf32>
    tpu.vector_store %arg9[%c1_43, %c0_44, %c0_45], %122 {strides = array<i32>} : memref<8x16x64xf32, #tpu.memory_space<vmem>>, vector<1x16x64xf32>,
    %c2 = arith.constant 2 : index
    %c0_46 = arith.constant 0 : index
    %c0_47 = arith.constant 0 : index
    %123 = vector.load %arg0[%c2, %c0_46, %c0_47] : memref<8x16x64xf32, #tpu.memory_space<vmem>>, vector<1x16x64xf32>
    %124 = vector.shape_cast %123 : vector<1x16x64xf32> to vector<16x64xf32>
    %125 = vector.extract_strided_slice %124 {offsets = [0, 63], sizes = [16, 1], strides = [1, 1]} : vector<16x64xf32> to vector<16x1xf32>
    %126 = vector.extract_strided_slice %124 {offsets = [0, 0], sizes = [16, 63], strides = [1, 1]} : vector<16x64xf32> to vector<16x63xf32>
    %127 = tpu.concatenate %125, %126 in 1 : vector<16x1xf32>, vector<16x63xf32> -> vector<16x64xf32>
    %128 = vector.broadcast %1 : vector<1x64xf32> to vector<16x64xf32>
    %129 = arith.mulf %128, %127 : vector<16x64xf32>
    %130 = arith.truncf %129 : vector<16x64xf32> to vector<16x64xbf16>
    %c0_48 = arith.constant 0 : index
    %c0_49 = arith.constant 0 : index
    %131 = vector.load %arg8[%c0_48, %c0_49] : memref<96x64xbf16, #tpu.memory_space<vmem>>, vector<16x64xbf16>
    tpu.vector_store %arg8[%c0_48, %c0_49], %130 {strides = array<i32>} : memref<96x64xbf16, #tpu.memory_space<vmem>>, vector<16x64xbf16>,
    %132 = vector.extract_strided_slice %119 {offsets = [0, 63], sizes = [16, 1], strides = [1, 1]} : vector<16x64xf32> to vector<16x1xf32>
    %133 = vector.extract_strided_slice %119 {offsets = [0, 0], sizes = [16, 63], strides = [1, 1]} : vector<16x64xf32> to vector<16x63xf32>
    %134 = tpu.concatenate %132, %133 in 1 : vector<16x1xf32>, vector<16x63xf32> -> vector<16x64xf32>
    %135 = vector.broadcast %1 : vector<1x64xf32> to vector<16x64xf32>
    %136 = arith.mulf %135, %134 : vector<16x64xf32>
    %137 = arith.truncf %136 : vector<16x64xf32> to vector<16x64xbf16>
    %c16_50 = arith.constant 16 : index
    %c0_51 = arith.constant 0 : index
    %138 = vector.load %arg8[%c16_50, %c0_51] : memref<96x64xbf16, #tpu.memory_space<vmem>>, vector<16x64xbf16>
    tpu.vector_store %arg8[%c16_50, %c0_51], %137 {strides = array<i32>} : memref<96x64xbf16, #tpu.memory_space<vmem>>, vector<16x64xbf16>,
    %139 = arith.truncf %124 : vector<16x64xf32> to vector<16x64xbf16>
    %c32_52 = arith.constant 32 : index
    %c0_53 = arith.constant 0 : index
    %140 = vector.load %arg8[%c32_52, %c0_53] : memref<96x64xbf16, #tpu.memory_space<vmem>>, vector<16x64xbf16>
    tpu.vector_store %arg8[%c32_52, %c0_53], %139 {strides = array<i32>} : memref<96x64xbf16, #tpu.memory_space<vmem>>, vector<16x64xbf16>,
    %141 = arith.truncf %119 : vector<16x64xf32> to vector<16x64xbf16>
    %c48_54 = arith.constant 48 : index
    %c0_55 = arith.constant 0 : index
    %142 = vector.load %arg8[%c48_54, %c0_55] : memref<96x64xbf16, #tpu.memory_space<vmem>>, vector<16x64xbf16>
    tpu.vector_store %arg8[%c48_54, %c0_55], %141 {strides = array<i32>} : memref<96x64xbf16, #tpu.memory_space<vmem>>, vector<16x64xbf16>,
    %143 = vector.extract_strided_slice %124 {offsets = [0, 1], sizes = [16, 63], strides = [1, 1]} : vector<16x64xf32> to vector<16x63xf32>
    %144 = vector.extract_strided_slice %124 {offsets = [0, 0], sizes = [16, 1], strides = [1, 1]} : vector<16x64xf32> to vector<16x1xf32>
    %145 = tpu.concatenate %143, %144 in 1 : vector<16x63xf32>, vector<16x1xf32> -> vector<16x64xf32>
    %146 = vector.broadcast %2 : vector<1x64xf32> to vector<16x64xf32>
    %147 = arith.mulf %146, %145 : vector<16x64xf32>
    %148 = arith.truncf %147 : vector<16x64xf32> to vector<16x64xbf16>
    %c64_56 = arith.constant 64 : index
    %c0_57 = arith.constant 0 : index
    %149 = vector.load %arg8[%c64_56, %c0_57] : memref<96x64xbf16, #tpu.memory_space<vmem>>, vector<16x64xbf16>
    tpu.vector_store %arg8[%c64_56, %c0_57], %148 {strides = array<i32>} : memref<96x64xbf16, #tpu.memory_space<vmem>>, vector<16x64xbf16>,
    %150 = vector.extract_strided_slice %119 {offsets = [0, 1], sizes = [16, 63], strides = [1, 1]} : vector<16x64xf32> to vector<16x63xf32>
    %151 = vector.extract_strided_slice %119 {offsets = [0, 0], sizes = [16, 1], strides = [1, 1]} : vector<16x64xf32> to vector<16x1xf32>
    %152 = tpu.concatenate %150, %151 in 1 : vector<16x63xf32>, vector<16x1xf32> -> vector<16x64xf32>
    %153 = vector.broadcast %2 : vector<1x64xf32> to vector<16x64xf32>
    %154 = arith.mulf %153, %152 : vector<16x64xf32>
    %155 = arith.truncf %154 : vector<16x64xf32> to vector<16x64xbf16>
    %c80_58 = arith.constant 80 : index
    %c0_59 = arith.constant 0 : index
    %156 = vector.load %arg8[%c80_58, %c0_59] : memref<96x64xbf16, #tpu.memory_space<vmem>>, vector<16x64xbf16>
    tpu.vector_store %arg8[%c80_58, %c0_59], %155 {strides = array<i32>} : memref<96x64xbf16, #tpu.memory_space<vmem>>, vector<16x64xbf16>,
    %c0_60 = arith.constant 0 : index
    %c0_61 = arith.constant 0 : index
    %157 = vector.load %arg8[%c0_60, %c0_61] : memref<96x64xbf16, #tpu.memory_space<vmem>>, vector<96x64xbf16>
    %cst_62 = arith.constant dense<0.000000e+00> : vector<64x64xf32>
    %158 = tpu.matmul %4, %157, %cst_62 {dimension_numbers = #tpu.dot_dimension_numbers<[1], [0], [0], [1], [0, 0, 1, 1], [], []>} : vector<64x96xbf16>, vector<96x64xbf16>, vector<64x64xf32> -> vector<64x64xf32>
    %159 = arith.addf %158, %8 : vector<64x64xf32>
    %160 = vector.extract_strided_slice %159 {offsets = [0, 0], sizes = [48, 64], strides = [1, 1]} : vector<64x64xf32> to vector<48x64xf32>
    %161 = arith.negf %160 : vector<48x64xf32>
    %162 = math.exp %161 : vector<48x64xf32>
    %cst_63 = arith.constant 1.000000e+00 : f32
    %163 = vector.broadcast %cst_63 : f32 to vector<48x64xf32>
    %164 = arith.addf %163, %162 : vector<48x64xf32>
    %165 = arith.divf %163, %164 : vector<48x64xf32>
    %166 = vector.extract_strided_slice %165 {offsets = [0, 0], sizes = [16, 64], strides = [1, 1]} : vector<48x64xf32> to vector<16x64xf32>
    %167 = vector.extract_strided_slice %165 {offsets = [16, 0], sizes = [16, 64], strides = [1, 1]} : vector<48x64xf32> to vector<16x64xf32>
    %168 = vector.extract_strided_slice %165 {offsets = [32, 0], sizes = [16, 64], strides = [1, 1]} : vector<48x64xf32> to vector<16x64xf32>
    %169 = vector.extract_strided_slice %159 {offsets = [48, 0], sizes = [16, 64], strides = [1, 1]} : vector<64x64xf32> to vector<16x64xf32>
    %170 = math.tanh %169 : vector<16x64xf32>
    %171 = arith.mulf %166, %117 : vector<16x64xf32>
    %172 = arith.mulf %167, %170 : vector<16x64xf32>
    %173 = arith.addf %171, %172 : vector<16x64xf32>
    %174 = math.tanh %173 : vector<16x64xf32>
    %175 = arith.mulf %168, %174 : vector<16x64xf32>
    %c2_64 = arith.constant 2 : index
    %c0_65 = arith.constant 0 : index
    %c0_66 = arith.constant 0 : index
    %176 = vector.load %arg9[%c2_64, %c0_65, %c0_66] : memref<8x16x64xf32, #tpu.memory_space<vmem>>, vector<1x16x64xf32>
    %177 = vector.shape_cast %176 : vector<1x16x64xf32> to vector<16x64xf32>
    %178 = vector.shape_cast %175 : vector<16x64xf32> to vector<1x16x64xf32>
    tpu.vector_store %arg9[%c2_64, %c0_65, %c0_66], %178 {strides = array<i32>} : memref<8x16x64xf32, #tpu.memory_space<vmem>>, vector<1x16x64xf32>,
    %c3 = arith.constant 3 : index
    %c0_67 = arith.constant 0 : index
    %c0_68 = arith.constant 0 : index
    %179 = vector.load %arg0[%c3, %c0_67, %c0_68] : memref<8x16x64xf32, #tpu.memory_space<vmem>>, vector<1x16x64xf32>
    %180 = vector.shape_cast %179 : vector<1x16x64xf32> to vector<16x64xf32>
    %181 = vector.extract_strided_slice %180 {offsets = [0, 63], sizes = [16, 1], strides = [1, 1]} : vector<16x64xf32> to vector<16x1xf32>
    %182 = vector.extract_strided_slice %180 {offsets = [0, 0], sizes = [16, 63], strides = [1, 1]} : vector<16x64xf32> to vector<16x63xf32>
    %183 = tpu.concatenate %181, %182 in 1 : vector<16x1xf32>, vector<16x63xf32> -> vector<16x64xf32>
    %184 = vector.broadcast %1 : vector<1x64xf32> to vector<16x64xf32>
    %185 = arith.mulf %184, %183 : vector<16x64xf32>
    %186 = arith.truncf %185 : vector<16x64xf32> to vector<16x64xbf16>
    %c0_69 = arith.constant 0 : index
    %c0_70 = arith.constant 0 : index
    %187 = vector.load %arg8[%c0_69, %c0_70] : memref<96x64xbf16, #tpu.memory_space<vmem>>, vector<16x64xbf16>
    tpu.vector_store %arg8[%c0_69, %c0_70], %186 {strides = array<i32>} : memref<96x64xbf16, #tpu.memory_space<vmem>>, vector<16x64xbf16>,
    %188 = vector.extract_strided_slice %175 {offsets = [0, 63], sizes = [16, 1], strides = [1, 1]} : vector<16x64xf32> to vector<16x1xf32>
    %189 = vector.extract_strided_slice %175 {offsets = [0, 0], sizes = [16, 63], strides = [1, 1]} : vector<16x64xf32> to vector<16x63xf32>
    %190 = tpu.concatenate %188, %189 in 1 : vector<16x1xf32>, vector<16x63xf32> -> vector<16x64xf32>
    %191 = vector.broadcast %1 : vector<1x64xf32> to vector<16x64xf32>
    %192 = arith.mulf %191, %190 : vector<16x64xf32>
    %193 = arith.truncf %192 : vector<16x64xf32> to vector<16x64xbf16>
    %c16_71 = arith.constant 16 : index
    %c0_72 = arith.constant 0 : index
    %194 = vector.load %arg8[%c16_71, %c0_72] : memref<96x64xbf16, #tpu.memory_space<vmem>>, vector<16x64xbf16>
    tpu.vector_store %arg8[%c16_71, %c0_72], %193 {strides = array<i32>} : memref<96x64xbf16, #tpu.memory_space<vmem>>, vector<16x64xbf16>,
    %195 = arith.truncf %180 : vector<16x64xf32> to vector<16x64xbf16>
    %c32_73 = arith.constant 32 : index
    %c0_74 = arith.constant 0 : index
    %196 = vector.load %arg8[%c32_73, %c0_74] : memref<96x64xbf16, #tpu.memory_space<vmem>>, vector<16x64xbf16>
    tpu.vector_store %arg8[%c32_73, %c0_74], %195 {strides = array<i32>} : memref<96x64xbf16, #tpu.memory_space<vmem>>, vector<16x64xbf16>,
    %197 = arith.truncf %175 : vector<16x64xf32> to vector<16x64xbf16>
    %c48_75 = arith.constant 48 : index
    %c0_76 = arith.constant 0 : index
    %198 = vector.load %arg8[%c48_75, %c0_76] : memref<96x64xbf16, #tpu.memory_space<vmem>>, vector<16x64xbf16>
    tpu.vector_store %arg8[%c48_75, %c0_76], %197 {strides = array<i32>} : memref<96x64xbf16, #tpu.memory_space<vmem>>, vector<16x64xbf16>,
    %199 = vector.extract_strided_slice %180 {offsets = [0, 1], sizes = [16, 63], strides = [1, 1]} : vector<16x64xf32> to vector<16x63xf32>
    %200 = vector.extract_strided_slice %180 {offsets = [0, 0], sizes = [16, 1], strides = [1, 1]} : vector<16x64xf32> to vector<16x1xf32>
    %201 = tpu.concatenate %199, %200 in 1 : vector<16x63xf32>, vector<16x1xf32> -> vector<16x64xf32>
    %202 = vector.broadcast %2 : vector<1x64xf32> to vector<16x64xf32>
    %203 = arith.mulf %202, %201 : vector<16x64xf32>
    %204 = arith.truncf %203 : vector<16x64xf32> to vector<16x64xbf16>
    %c64_77 = arith.constant 64 : index
    %c0_78 = arith.constant 0 : index
    %205 = vector.load %arg8[%c64_77, %c0_78] : memref<96x64xbf16, #tpu.memory_space<vmem>>, vector<16x64xbf16>
    tpu.vector_store %arg8[%c64_77, %c0_78], %204 {strides = array<i32>} : memref<96x64xbf16, #tpu.memory_space<vmem>>, vector<16x64xbf16>,
    %206 = vector.extract_strided_slice %175 {offsets = [0, 1], sizes = [16, 63], strides = [1, 1]} : vector<16x64xf32> to vector<16x63xf32>
    %207 = vector.extract_strided_slice %175 {offsets = [0, 0], sizes = [16, 1], strides = [1, 1]} : vector<16x64xf32> to vector<16x1xf32>
    %208 = tpu.concatenate %206, %207 in 1 : vector<16x63xf32>, vector<16x1xf32> -> vector<16x64xf32>
    %209 = vector.broadcast %2 : vector<1x64xf32> to vector<16x64xf32>
    %210 = arith.mulf %209, %208 : vector<16x64xf32>
    %211 = arith.truncf %210 : vector<16x64xf32> to vector<16x64xbf16>
    %c80_79 = arith.constant 80 : index
    %c0_80 = arith.constant 0 : index
    %212 = vector.load %arg8[%c80_79, %c0_80] : memref<96x64xbf16, #tpu.memory_space<vmem>>, vector<16x64xbf16>
    tpu.vector_store %arg8[%c80_79, %c0_80], %211 {strides = array<i32>} : memref<96x64xbf16, #tpu.memory_space<vmem>>, vector<16x64xbf16>,
    %c0_81 = arith.constant 0 : index
    %c0_82 = arith.constant 0 : index
    %213 = vector.load %arg8[%c0_81, %c0_82] : memref<96x64xbf16, #tpu.memory_space<vmem>>, vector<96x64xbf16>
    %cst_83 = arith.constant dense<0.000000e+00> : vector<64x64xf32>
    %214 = tpu.matmul %4, %213, %cst_83 {dimension_numbers = #tpu.dot_dimension_numbers<[1], [0], [0], [1], [0, 0, 1, 1], [], []>} : vector<64x96xbf16>, vector<96x64xbf16>, vector<64x64xf32> -> vector<64x64xf32>
    %215 = arith.addf %214, %8 : vector<64x64xf32>
    %216 = vector.extract_strided_slice %215 {offsets = [0, 0], sizes = [48, 64], strides = [1, 1]} : vector<64x64xf32> to vector<48x64xf32>
    %217 = arith.negf %216 : vector<48x64xf32>
    %218 = math.exp %217 : vector<48x64xf32>
    %cst_84 = arith.constant 1.000000e+00 : f32
    %219 = vector.broadcast %cst_84 : f32 to vector<48x64xf32>
    %220 = arith.addf %219, %218 : vector<48x64xf32>
    %221 = arith.divf %219, %220 : vector<48x64xf32>
    %222 = vector.extract_strided_slice %221 {offsets = [0, 0], sizes = [16, 64], strides = [1, 1]} : vector<48x64xf32> to vector<16x64xf32>
    %223 = vector.extract_strided_slice %221 {offsets = [16, 0], sizes = [16, 64], strides = [1, 1]} : vector<48x64xf32> to vector<16x64xf32>
    %224 = vector.extract_strided_slice %221 {offsets = [32, 0], sizes = [16, 64], strides = [1, 1]} : vector<48x64xf32> to vector<16x64xf32>
    %225 = vector.extract_strided_slice %215 {offsets = [48, 0], sizes = [16, 64], strides = [1, 1]} : vector<64x64xf32> to vector<16x64xf32>
    %226 = math.tanh %225 : vector<16x64xf32>
    %227 = arith.mulf %222, %173 : vector<16x64xf32>
    %228 = arith.mulf %223, %226 : vector<16x64xf32>
    %229 = arith.addf %227, %228 : vector<16x64xf32>
    %230 = math.tanh %229 : vector<16x64xf32>
    %231 = arith.mulf %224, %230 : vector<16x64xf32>
    %c3_85 = arith.constant 3 : index
    %c0_86 = arith.constant 0 : index
    %c0_87 = arith.constant 0 : index
    %232 = vector.load %arg9[%c3_85, %c0_86, %c0_87] : memref<8x16x64xf32, #tpu.memory_space<vmem>>, vector<1x16x64xf32>
    %233 = vector.shape_cast %232 : vector<1x16x64xf32> to vector<16x64xf32>
    %234 = vector.shape_cast %231 : vector<16x64xf32> to vector<1x16x64xf32>
    tpu.vector_store %arg9[%c3_85, %c0_86, %c0_87], %234 {strides = array<i32>} : memref<8x16x64xf32, #tpu.memory_space<vmem>>, vector<1x16x64xf32>,
    %c4 = arith.constant 4 : index
    %c0_88 = arith.constant 0 : index
    %c0_89 = arith.constant 0 : index
    %235 = vector.load %arg0[%c4, %c0_88, %c0_89] : memref<8x16x64xf32, #tpu.memory_space<vmem>>, vector<1x16x64xf32>
    %236 = vector.shape_cast %235 : vector<1x16x64xf32> to vector<16x64xf32>
    %237 = vector.extract_strided_slice %236 {offsets = [0, 63], sizes = [16, 1], strides = [1, 1]} : vector<16x64xf32> to vector<16x1xf32>
    %238 = vector.extract_strided_slice %236 {offsets = [0, 0], sizes = [16, 63], strides = [1, 1]} : vector<16x64xf32> to vector<16x63xf32>
    %239 = tpu.concatenate %237, %238 in 1 : vector<16x1xf32>, vector<16x63xf32> -> vector<16x64xf32>
    %240 = vector.broadcast %1 : vector<1x64xf32> to vector<16x64xf32>
    %241 = arith.mulf %240, %239 : vector<16x64xf32>
    %242 = arith.truncf %241 : vector<16x64xf32> to vector<16x64xbf16>
    %c0_90 = arith.constant 0 : index
    %c0_91 = arith.constant 0 : index
    %243 = vector.load %arg8[%c0_90, %c0_91] : memref<96x64xbf16, #tpu.memory_space<vmem>>, vector<16x64xbf16>
    tpu.vector_store %arg8[%c0_90, %c0_91], %242 {strides = array<i32>} : memref<96x64xbf16, #tpu.memory_space<vmem>>, vector<16x64xbf16>,
    %244 = vector.extract_strided_slice %231 {offsets = [0, 63], sizes = [16, 1], strides = [1, 1]} : vector<16x64xf32> to vector<16x1xf32>
    %245 = vector.extract_strided_slice %231 {offsets = [0, 0], sizes = [16, 63], strides = [1, 1]} : vector<16x64xf32> to vector<16x63xf32>
    %246 = tpu.concatenate %244, %245 in 1 : vector<16x1xf32>, vector<16x63xf32> -> vector<16x64xf32>
    %247 = vector.broadcast %1 : vector<1x64xf32> to vector<16x64xf32>
    %248 = arith.mulf %247, %246 : vector<16x64xf32>
    %249 = arith.truncf %248 : vector<16x64xf32> to vector<16x64xbf16>
    %c16_92 = arith.constant 16 : index
    %c0_93 = arith.constant 0 : index
    %250 = vector.load %arg8[%c16_92, %c0_93] : memref<96x64xbf16, #tpu.memory_space<vmem>>, vector<16x64xbf16>
    tpu.vector_store %arg8[%c16_92, %c0_93], %249 {strides = array<i32>} : memref<96x64xbf16, #tpu.memory_space<vmem>>, vector<16x64xbf16>,
    %251 = arith.truncf %236 : vector<16x64xf32> to vector<16x64xbf16>
    %c32_94 = arith.constant 32 : index
    %c0_95 = arith.constant 0 : index
    %252 = vector.load %arg8[%c32_94, %c0_95] : memref<96x64xbf16, #tpu.memory_space<vmem>>, vector<16x64xbf16>
    tpu.vector_store %arg8[%c32_94, %c0_95], %251 {strides = array<i32>} : memref<96x64xbf16, #tpu.memory_space<vmem>>, vector<16x64xbf16>,
    %253 = arith.truncf %231 : vector<16x64xf32> to vector<16x64xbf16>
    %c48_96 = arith.constant 48 : index
    %c0_97 = arith.constant 0 : index
    %254 = vector.load %arg8[%c48_96, %c0_97] : memref<96x64xbf16, #tpu.memory_space<vmem>>, vector<16x64xbf16>
    tpu.vector_store %arg8[%c48_96, %c0_97], %253 {strides = array<i32>} : memref<96x64xbf16, #tpu.memory_space<vmem>>, vector<16x64xbf16>,
    %255 = vector.extract_strided_slice %236 {offsets = [0, 1], sizes = [16, 63], strides = [1, 1]} : vector<16x64xf32> to vector<16x63xf32>
    %256 = vector.extract_strided_slice %236 {offsets = [0, 0], sizes = [16, 1], strides = [1, 1]} : vector<16x64xf32> to vector<16x1xf32>
    %257 = tpu.concatenate %255, %256 in 1 : vector<16x63xf32>, vector<16x1xf32> -> vector<16x64xf32>
    %258 = vector.broadcast %2 : vector<1x64xf32> to vector<16x64xf32>
    %259 = arith.mulf %258, %257 : vector<16x64xf32>
    %260 = arith.truncf %259 : vector<16x64xf32> to vector<16x64xbf16>
    %c64_98 = arith.constant 64 : index
    %c0_99 = arith.constant 0 : index
    %261 = vector.load %arg8[%c64_98, %c0_99] : memref<96x64xbf16, #tpu.memory_space<vmem>>, vector<16x64xbf16>
    tpu.vector_store %arg8[%c64_98, %c0_99], %260 {strides = array<i32>} : memref<96x64xbf16, #tpu.memory_space<vmem>>, vector<16x64xbf16>,
    %262 = vector.extract_strided_slice %231 {offsets = [0, 1], sizes = [16, 63], strides = [1, 1]} : vector<16x64xf32> to vector<16x63xf32>
    %263 = vector.extract_strided_slice %231 {offsets = [0, 0], sizes = [16, 1], strides = [1, 1]} : vector<16x64xf32> to vector<16x1xf32>
    %264 = tpu.concatenate %262, %263 in 1 : vector<16x63xf32>, vector<16x1xf32> -> vector<16x64xf32>
    %265 = vector.broadcast %2 : vector<1x64xf32> to vector<16x64xf32>
    %266 = arith.mulf %265, %264 : vector<16x64xf32>
    %267 = arith.truncf %266 : vector<16x64xf32> to vector<16x64xbf16>
    %c80_100 = arith.constant 80 : index
    %c0_101 = arith.constant 0 : index
    %268 = vector.load %arg8[%c80_100, %c0_101] : memref<96x64xbf16, #tpu.memory_space<vmem>>, vector<16x64xbf16>
    tpu.vector_store %arg8[%c80_100, %c0_101], %267 {strides = array<i32>} : memref<96x64xbf16, #tpu.memory_space<vmem>>, vector<16x64xbf16>,
    %c0_102 = arith.constant 0 : index
    %c0_103 = arith.constant 0 : index
    %269 = vector.load %arg8[%c0_102, %c0_103] : memref<96x64xbf16, #tpu.memory_space<vmem>>, vector<96x64xbf16>
    %cst_104 = arith.constant dense<0.000000e+00> : vector<64x64xf32>
    %270 = tpu.matmul %4, %269, %cst_104 {dimension_numbers = #tpu.dot_dimension_numbers<[1], [0], [0], [1], [0, 0, 1, 1], [], []>} : vector<64x96xbf16>, vector<96x64xbf16>, vector<64x64xf32> -> vector<64x64xf32>
    %271 = arith.addf %270, %8 : vector<64x64xf32>
    %272 = vector.extract_strided_slice %271 {offsets = [0, 0], sizes = [48, 64], strides = [1, 1]} : vector<64x64xf32> to vector<48x64xf32>
    %273 = arith.negf %272 : vector<48x64xf32>
    %274 = math.exp %273 : vector<48x64xf32>
    %cst_105 = arith.constant 1.000000e+00 : f32
    %275 = vector.broadcast %cst_105 : f32 to vector<48x64xf32>
    %276 = arith.addf %275, %274 : vector<48x64xf32>
    %277 = arith.divf %275, %276 : vector<48x64xf32>
    %278 = vector.extract_strided_slice %277 {offsets = [0, 0], sizes = [16, 64], strides = [1, 1]} : vector<48x64xf32> to vector<16x64xf32>
    %279 = vector.extract_strided_slice %277 {offsets = [16, 0], sizes = [16, 64], strides = [1, 1]} : vector<48x64xf32> to vector<16x64xf32>
    %280 = vector.extract_strided_slice %277 {offsets = [32, 0], sizes = [16, 64], strides = [1, 1]} : vector<48x64xf32> to vector<16x64xf32>
    %281 = vector.extract_strided_slice %271 {offsets = [48, 0], sizes = [16, 64], strides = [1, 1]} : vector<64x64xf32> to vector<16x64xf32>
    %282 = math.tanh %281 : vector<16x64xf32>
    %283 = arith.mulf %278, %229 : vector<16x64xf32>
    %284 = arith.mulf %279, %282 : vector<16x64xf32>
    %285 = arith.addf %283, %284 : vector<16x64xf32>
    %286 = math.tanh %285 : vector<16x64xf32>
    %287 = arith.mulf %280, %286 : vector<16x64xf32>
    %c4_106 = arith.constant 4 : index
    %c0_107 = arith.constant 0 : index
    %c0_108 = arith.constant 0 : index
    %288 = vector.load %arg9[%c4_106, %c0_107, %c0_108] : memref<8x16x64xf32, #tpu.memory_space<vmem>>, vector<1x16x64xf32>
    %289 = vector.shape_cast %288 : vector<1x16x64xf32> to vector<16x64xf32>
    %290 = vector.shape_cast %287 : vector<16x64xf32> to vector<1x16x64xf32>
    tpu.vector_store %arg9[%c4_106, %c0_107, %c0_108], %290 {strides = array<i32>} : memref<8x16x64xf32, #tpu.memory_space<vmem>>, vector<1x16x64xf32>,
    %c5 = arith.constant 5 : index
    %c0_109 = arith.constant 0 : index
    %c0_110 = arith.constant 0 : index
    %291 = vector.load %arg0[%c5, %c0_109, %c0_110] : memref<8x16x64xf32, #tpu.memory_space<vmem>>, vector<1x16x64xf32>
    %292 = vector.shape_cast %291 : vector<1x16x64xf32> to vector<16x64xf32>
    %293 = vector.extract_strided_slice %292 {offsets = [0, 63], sizes = [16, 1], strides = [1, 1]} : vector<16x64xf32> to vector<16x1xf32>
    %294 = vector.extract_strided_slice %292 {offsets = [0, 0], sizes = [16, 63], strides = [1, 1]} : vector<16x64xf32> to vector<16x63xf32>
    %295 = tpu.concatenate %293, %294 in 1 : vector<16x1xf32>, vector<16x63xf32> -> vector<16x64xf32>
    %296 = vector.broadcast %1 : vector<1x64xf32> to vector<16x64xf32>
    %297 = arith.mulf %296, %295 : vector<16x64xf32>
    %298 = arith.truncf %297 : vector<16x64xf32> to vector<16x64xbf16>
    %c0_111 = arith.constant 0 : index
    %c0_112 = arith.constant 0 : index
    %299 = vector.load %arg8[%c0_111, %c0_112] : memref<96x64xbf16, #tpu.memory_space<vmem>>, vector<16x64xbf16>
    tpu.vector_store %arg8[%c0_111, %c0_112], %298 {strides = array<i32>} : memref<96x64xbf16, #tpu.memory_space<vmem>>, vector<16x64xbf16>,
    %300 = vector.extract_strided_slice %287 {offsets = [0, 63], sizes = [16, 1], strides = [1, 1]} : vector<16x64xf32> to vector<16x1xf32>
    %301 = vector.extract_strided_slice %287 {offsets = [0, 0], sizes = [16, 63], strides = [1, 1]} : vector<16x64xf32> to vector<16x63xf32>
    %302 = tpu.concatenate %300, %301 in 1 : vector<16x1xf32>, vector<16x63xf32> -> vector<16x64xf32>
    %303 = vector.broadcast %1 : vector<1x64xf32> to vector<16x64xf32>
    %304 = arith.mulf %303, %302 : vector<16x64xf32>
    %305 = arith.truncf %304 : vector<16x64xf32> to vector<16x64xbf16>
    %c16_113 = arith.constant 16 : index
    %c0_114 = arith.constant 0 : index
    %306 = vector.load %arg8[%c16_113, %c0_114] : memref<96x64xbf16, #tpu.memory_space<vmem>>, vector<16x64xbf16>
    tpu.vector_store %arg8[%c16_113, %c0_114], %305 {strides = array<i32>} : memref<96x64xbf16, #tpu.memory_space<vmem>>, vector<16x64xbf16>,
    %307 = arith.truncf %292 : vector<16x64xf32> to vector<16x64xbf16>
    %c32_115 = arith.constant 32 : index
    %c0_116 = arith.constant 0 : index
    %308 = vector.load %arg8[%c32_115, %c0_116] : memref<96x64xbf16, #tpu.memory_space<vmem>>, vector<16x64xbf16>
    tpu.vector_store %arg8[%c32_115, %c0_116], %307 {strides = array<i32>} : memref<96x64xbf16, #tpu.memory_space<vmem>>, vector<16x64xbf16>,
    %309 = arith.truncf %287 : vector<16x64xf32> to vector<16x64xbf16>
    %c48_117 = arith.constant 48 : index
    %c0_118 = arith.constant 0 : index
    %310 = vector.load %arg8[%c48_117, %c0_118] : memref<96x64xbf16, #tpu.memory_space<vmem>>, vector<16x64xbf16>
    tpu.vector_store %arg8[%c48_117, %c0_118], %309 {strides = array<i32>} : memref<96x64xbf16, #tpu.memory_space<vmem>>, vector<16x64xbf16>,
    %311 = vector.extract_strided_slice %292 {offsets = [0, 1], sizes = [16, 63], strides = [1, 1]} : vector<16x64xf32> to vector<16x63xf32>
    %312 = vector.extract_strided_slice %292 {offsets = [0, 0], sizes = [16, 1], strides = [1, 1]} : vector<16x64xf32> to vector<16x1xf32>
    %313 = tpu.concatenate %311, %312 in 1 : vector<16x63xf32>, vector<16x1xf32> -> vector<16x64xf32>
    %314 = vector.broadcast %2 : vector<1x64xf32> to vector<16x64xf32>
    %315 = arith.mulf %314, %313 : vector<16x64xf32>
    %316 = arith.truncf %315 : vector<16x64xf32> to vector<16x64xbf16>
    %c64_119 = arith.constant 64 : index
    %c0_120 = arith.constant 0 : index
    %317 = vector.load %arg8[%c64_119, %c0_120] : memref<96x64xbf16, #tpu.memory_space<vmem>>, vector<16x64xbf16>
    tpu.vector_store %arg8[%c64_119, %c0_120], %316 {strides = array<i32>} : memref<96x64xbf16, #tpu.memory_space<vmem>>, vector<16x64xbf16>,
    %318 = vector.extract_strided_slice %287 {offsets = [0, 1], sizes = [16, 63], strides = [1, 1]} : vector<16x64xf32> to vector<16x63xf32>
    %319 = vector.extract_strided_slice %287 {offsets = [0, 0], sizes = [16, 1], strides = [1, 1]} : vector<16x64xf32> to vector<16x1xf32>
    %320 = tpu.concatenate %318, %319 in 1 : vector<16x63xf32>, vector<16x1xf32> -> vector<16x64xf32>
    %321 = vector.broadcast %2 : vector<1x64xf32> to vector<16x64xf32>
    %322 = arith.mulf %321, %320 : vector<16x64xf32>
    %323 = arith.truncf %322 : vector<16x64xf32> to vector<16x64xbf16>
    %c80_121 = arith.constant 80 : index
    %c0_122 = arith.constant 0 : index
    %324 = vector.load %arg8[%c80_121, %c0_122] : memref<96x64xbf16, #tpu.memory_space<vmem>>, vector<16x64xbf16>
    tpu.vector_store %arg8[%c80_121, %c0_122], %323 {strides = array<i32>} : memref<96x64xbf16, #tpu.memory_space<vmem>>, vector<16x64xbf16>,
    %c0_123 = arith.constant 0 : index
    %c0_124 = arith.constant 0 : index
    %325 = vector.load %arg8[%c0_123, %c0_124] : memref<96x64xbf16, #tpu.memory_space<vmem>>, vector<96x64xbf16>
    %cst_125 = arith.constant dense<0.000000e+00> : vector<64x64xf32>
    %326 = tpu.matmul %4, %325, %cst_125 {dimension_numbers = #tpu.dot_dimension_numbers<[1], [0], [0], [1], [0, 0, 1, 1], [], []>} : vector<64x96xbf16>, vector<96x64xbf16>, vector<64x64xf32> -> vector<64x64xf32>
    %327 = arith.addf %326, %8 : vector<64x64xf32>
    %328 = vector.extract_strided_slice %327 {offsets = [0, 0], sizes = [48, 64], strides = [1, 1]} : vector<64x64xf32> to vector<48x64xf32>
    %329 = arith.negf %328 : vector<48x64xf32>
    %330 = math.exp %329 : vector<48x64xf32>
    %cst_126 = arith.constant 1.000000e+00 : f32
    %331 = vector.broadcast %cst_126 : f32 to vector<48x64xf32>
    %332 = arith.addf %331, %330 : vector<48x64xf32>
    %333 = arith.divf %331, %332 : vector<48x64xf32>
    %334 = vector.extract_strided_slice %333 {offsets = [0, 0], sizes = [16, 64], strides = [1, 1]} : vector<48x64xf32> to vector<16x64xf32>
    %335 = vector.extract_strided_slice %333 {offsets = [16, 0], sizes = [16, 64], strides = [1, 1]} : vector<48x64xf32> to vector<16x64xf32>
    %336 = vector.extract_strided_slice %333 {offsets = [32, 0], sizes = [16, 64], strides = [1, 1]} : vector<48x64xf32> to vector<16x64xf32>
    %337 = vector.extract_strided_slice %327 {offsets = [48, 0], sizes = [16, 64], strides = [1, 1]} : vector<64x64xf32> to vector<16x64xf32>
    %338 = math.tanh %337 : vector<16x64xf32>
    %339 = arith.mulf %334, %285 : vector<16x64xf32>
    %340 = arith.mulf %335, %338 : vector<16x64xf32>
    %341 = arith.addf %339, %340 : vector<16x64xf32>
    %342 = math.tanh %341 : vector<16x64xf32>
    %343 = arith.mulf %336, %342 : vector<16x64xf32>
    %c5_127 = arith.constant 5 : index
    %c0_128 = arith.constant 0 : index
    %c0_129 = arith.constant 0 : index
    %344 = vector.load %arg9[%c5_127, %c0_128, %c0_129] : memref<8x16x64xf32, #tpu.memory_space<vmem>>, vector<1x16x64xf32>
    %345 = vector.shape_cast %344 : vector<1x16x64xf32> to vector<16x64xf32>
    %346 = vector.shape_cast %343 : vector<16x64xf32> to vector<1x16x64xf32>
    tpu.vector_store %arg9[%c5_127, %c0_128, %c0_129], %346 {strides = array<i32>} : memref<8x16x64xf32, #tpu.memory_space<vmem>>, vector<1x16x64xf32>,
    %c6 = arith.constant 6 : index
    %c0_130 = arith.constant 0 : index
    %c0_131 = arith.constant 0 : index
    %347 = vector.load %arg0[%c6, %c0_130, %c0_131] : memref<8x16x64xf32, #tpu.memory_space<vmem>>, vector<1x16x64xf32>
    %348 = vector.shape_cast %347 : vector<1x16x64xf32> to vector<16x64xf32>
    %349 = vector.extract_strided_slice %348 {offsets = [0, 63], sizes = [16, 1], strides = [1, 1]} : vector<16x64xf32> to vector<16x1xf32>
    %350 = vector.extract_strided_slice %348 {offsets = [0, 0], sizes = [16, 63], strides = [1, 1]} : vector<16x64xf32> to vector<16x63xf32>
    %351 = tpu.concatenate %349, %350 in 1 : vector<16x1xf32>, vector<16x63xf32> -> vector<16x64xf32>
    %352 = vector.broadcast %1 : vector<1x64xf32> to vector<16x64xf32>
    %353 = arith.mulf %352, %351 : vector<16x64xf32>
    %354 = arith.truncf %353 : vector<16x64xf32> to vector<16x64xbf16>
    %c0_132 = arith.constant 0 : index
    %c0_133 = arith.constant 0 : index
    %355 = vector.load %arg8[%c0_132, %c0_133] : memref<96x64xbf16, #tpu.memory_space<vmem>>, vector<16x64xbf16>
    tpu.vector_store %arg8[%c0_132, %c0_133], %354 {strides = array<i32>} : memref<96x64xbf16, #tpu.memory_space<vmem>>, vector<16x64xbf16>,
    %356 = vector.extract_strided_slice %343 {offsets = [0, 63], sizes = [16, 1], strides = [1, 1]} : vector<16x64xf32> to vector<16x1xf32>
    %357 = vector.extract_strided_slice %343 {offsets = [0, 0], sizes = [16, 63], strides = [1, 1]} : vector<16x64xf32> to vector<16x63xf32>
    %358 = tpu.concatenate %356, %357 in 1 : vector<16x1xf32>, vector<16x63xf32> -> vector<16x64xf32>
    %359 = vector.broadcast %1 : vector<1x64xf32> to vector<16x64xf32>
    %360 = arith.mulf %359, %358 : vector<16x64xf32>
    %361 = arith.truncf %360 : vector<16x64xf32> to vector<16x64xbf16>
    %c16_134 = arith.constant 16 : index
    %c0_135 = arith.constant 0 : index
    %362 = vector.load %arg8[%c16_134, %c0_135] : memref<96x64xbf16, #tpu.memory_space<vmem>>, vector<16x64xbf16>
    tpu.vector_store %arg8[%c16_134, %c0_135], %361 {strides = array<i32>} : memref<96x64xbf16, #tpu.memory_space<vmem>>, vector<16x64xbf16>,
    %363 = arith.truncf %348 : vector<16x64xf32> to vector<16x64xbf16>
    %c32_136 = arith.constant 32 : index
    %c0_137 = arith.constant 0 : index
    %364 = vector.load %arg8[%c32_136, %c0_137] : memref<96x64xbf16, #tpu.memory_space<vmem>>, vector<16x64xbf16>
    tpu.vector_store %arg8[%c32_136, %c0_137], %363 {strides = array<i32>} : memref<96x64xbf16, #tpu.memory_space<vmem>>, vector<16x64xbf16>,
    %365 = arith.truncf %343 : vector<16x64xf32> to vector<16x64xbf16>
    %c48_138 = arith.constant 48 : index
    %c0_139 = arith.constant 0 : index
    %366 = vector.load %arg8[%c48_138, %c0_139] : memref<96x64xbf16, #tpu.memory_space<vmem>>, vector<16x64xbf16>
    tpu.vector_store %arg8[%c48_138, %c0_139], %365 {strides = array<i32>} : memref<96x64xbf16, #tpu.memory_space<vmem>>, vector<16x64xbf16>,
    %367 = vector.extract_strided_slice %348 {offsets = [0, 1], sizes = [16, 63], strides = [1, 1]} : vector<16x64xf32> to vector<16x63xf32>
    %368 = vector.extract_strided_slice %348 {offsets = [0, 0], sizes = [16, 1], strides = [1, 1]} : vector<16x64xf32> to vector<16x1xf32>
    %369 = tpu.concatenate %367, %368 in 1 : vector<16x63xf32>, vector<16x1xf32> -> vector<16x64xf32>
    %370 = vector.broadcast %2 : vector<1x64xf32> to vector<16x64xf32>
    %371 = arith.mulf %370, %369 : vector<16x64xf32>
    %372 = arith.truncf %371 : vector<16x64xf32> to vector<16x64xbf16>
    %c64_140 = arith.constant 64 : index
    %c0_141 = arith.constant 0 : index
    %373 = vector.load %arg8[%c64_140, %c0_141] : memref<96x64xbf16, #tpu.memory_space<vmem>>, vector<16x64xbf16>
    tpu.vector_store %arg8[%c64_140, %c0_141], %372 {strides = array<i32>} : memref<96x64xbf16, #tpu.memory_space<vmem>>, vector<16x64xbf16>,
    %374 = vector.extract_strided_slice %343 {offsets = [0, 1], sizes = [16, 63], strides = [1, 1]} : vector<16x64xf32> to vector<16x63xf32>
    %375 = vector.extract_strided_slice %343 {offsets = [0, 0], sizes = [16, 1], strides = [1, 1]} : vector<16x64xf32> to vector<16x1xf32>
    %376 = tpu.concatenate %374, %375 in 1 : vector<16x63xf32>, vector<16x1xf32> -> vector<16x64xf32>
    %377 = vector.broadcast %2 : vector<1x64xf32> to vector<16x64xf32>
    %378 = arith.mulf %377, %376 : vector<16x64xf32>
    %379 = arith.truncf %378 : vector<16x64xf32> to vector<16x64xbf16>
    %c80_142 = arith.constant 80 : index
    %c0_143 = arith.constant 0 : index
    %380 = vector.load %arg8[%c80_142, %c0_143] : memref<96x64xbf16, #tpu.memory_space<vmem>>, vector<16x64xbf16>
    tpu.vector_store %arg8[%c80_142, %c0_143], %379 {strides = array<i32>} : memref<96x64xbf16, #tpu.memory_space<vmem>>, vector<16x64xbf16>,
    %c0_144 = arith.constant 0 : index
    %c0_145 = arith.constant 0 : index
    %381 = vector.load %arg8[%c0_144, %c0_145] : memref<96x64xbf16, #tpu.memory_space<vmem>>, vector<96x64xbf16>
    %cst_146 = arith.constant dense<0.000000e+00> : vector<64x64xf32>
    %382 = tpu.matmul %4, %381, %cst_146 {dimension_numbers = #tpu.dot_dimension_numbers<[1], [0], [0], [1], [0, 0, 1, 1], [], []>} : vector<64x96xbf16>, vector<96x64xbf16>, vector<64x64xf32> -> vector<64x64xf32>
    %383 = arith.addf %382, %8 : vector<64x64xf32>
    %384 = vector.extract_strided_slice %383 {offsets = [0, 0], sizes = [48, 64], strides = [1, 1]} : vector<64x64xf32> to vector<48x64xf32>
    %385 = arith.negf %384 : vector<48x64xf32>
    %386 = math.exp %385 : vector<48x64xf32>
    %cst_147 = arith.constant 1.000000e+00 : f32
    %387 = vector.broadcast %cst_147 : f32 to vector<48x64xf32>
    %388 = arith.addf %387, %386 : vector<48x64xf32>
    %389 = arith.divf %387, %388 : vector<48x64xf32>
    %390 = vector.extract_strided_slice %389 {offsets = [0, 0], sizes = [16, 64], strides = [1, 1]} : vector<48x64xf32> to vector<16x64xf32>
    %391 = vector.extract_strided_slice %389 {offsets = [16, 0], sizes = [16, 64], strides = [1, 1]} : vector<48x64xf32> to vector<16x64xf32>
    %392 = vector.extract_strided_slice %389 {offsets = [32, 0], sizes = [16, 64], strides = [1, 1]} : vector<48x64xf32> to vector<16x64xf32>
    %393 = vector.extract_strided_slice %383 {offsets = [48, 0], sizes = [16, 64], strides = [1, 1]} : vector<64x64xf32> to vector<16x64xf32>
    %394 = math.tanh %393 : vector<16x64xf32>
    %395 = arith.mulf %390, %341 : vector<16x64xf32>
    %396 = arith.mulf %391, %394 : vector<16x64xf32>
    %397 = arith.addf %395, %396 : vector<16x64xf32>
    %398 = math.tanh %397 : vector<16x64xf32>
    %399 = arith.mulf %392, %398 : vector<16x64xf32>
    %c6_148 = arith.constant 6 : index
    %c0_149 = arith.constant 0 : index
    %c0_150 = arith.constant 0 : index
    %400 = vector.load %arg9[%c6_148, %c0_149, %c0_150] : memref<8x16x64xf32, #tpu.memory_space<vmem>>, vector<1x16x64xf32>
    %401 = vector.shape_cast %400 : vector<1x16x64xf32> to vector<16x64xf32>
    %402 = vector.shape_cast %399 : vector<16x64xf32> to vector<1x16x64xf32>
    tpu.vector_store %arg9[%c6_148, %c0_149, %c0_150], %402 {strides = array<i32>} : memref<8x16x64xf32, #tpu.memory_space<vmem>>, vector<1x16x64xf32>,
    %c7 = arith.constant 7 : index
    %c0_151 = arith.constant 0 : index
    %c0_152 = arith.constant 0 : index
    %403 = vector.load %arg0[%c7, %c0_151, %c0_152] : memref<8x16x64xf32, #tpu.memory_space<vmem>>, vector<1x16x64xf32>
    %404 = vector.shape_cast %403 : vector<1x16x64xf32> to vector<16x64xf32>
    %405 = vector.extract_strided_slice %404 {offsets = [0, 63], sizes = [16, 1], strides = [1, 1]} : vector<16x64xf32> to vector<16x1xf32>
    %406 = vector.extract_strided_slice %404 {offsets = [0, 0], sizes = [16, 63], strides = [1, 1]} : vector<16x64xf32> to vector<16x63xf32>
    %407 = tpu.concatenate %405, %406 in 1 : vector<16x1xf32>, vector<16x63xf32> -> vector<16x64xf32>
    %408 = vector.broadcast %1 : vector<1x64xf32> to vector<16x64xf32>
    %409 = arith.mulf %408, %407 : vector<16x64xf32>
    %410 = arith.truncf %409 : vector<16x64xf32> to vector<16x64xbf16>
    %c0_153 = arith.constant 0 : index
    %c0_154 = arith.constant 0 : index
    %411 = vector.load %arg8[%c0_153, %c0_154] : memref<96x64xbf16, #tpu.memory_space<vmem>>, vector<16x64xbf16>
    tpu.vector_store %arg8[%c0_153, %c0_154], %410 {strides = array<i32>} : memref<96x64xbf16, #tpu.memory_space<vmem>>, vector<16x64xbf16>,
    %412 = vector.extract_strided_slice %399 {offsets = [0, 63], sizes = [16, 1], strides = [1, 1]} : vector<16x64xf32> to vector<16x1xf32>
    %413 = vector.extract_strided_slice %399 {offsets = [0, 0], sizes = [16, 63], strides = [1, 1]} : vector<16x64xf32> to vector<16x63xf32>
    %414 = tpu.concatenate %412, %413 in 1 : vector<16x1xf32>, vector<16x63xf32> -> vector<16x64xf32>
    %415 = vector.broadcast %1 : vector<1x64xf32> to vector<16x64xf32>
    %416 = arith.mulf %415, %414 : vector<16x64xf32>
    %417 = arith.truncf %416 : vector<16x64xf32> to vector<16x64xbf16>
    %c16_155 = arith.constant 16 : index
    %c0_156 = arith.constant 0 : index
    %418 = vector.load %arg8[%c16_155, %c0_156] : memref<96x64xbf16, #tpu.memory_space<vmem>>, vector<16x64xbf16>
    tpu.vector_store %arg8[%c16_155, %c0_156], %417 {strides = array<i32>} : memref<96x64xbf16, #tpu.memory_space<vmem>>, vector<16x64xbf16>,
    %419 = arith.truncf %404 : vector<16x64xf32> to vector<16x64xbf16>
    %c32_157 = arith.constant 32 : index
    %c0_158 = arith.constant 0 : index
    %420 = vector.load %arg8[%c32_157, %c0_158] : memref<96x64xbf16, #tpu.memory_space<vmem>>, vector<16x64xbf16>
    tpu.vector_store %arg8[%c32_157, %c0_158], %419 {strides = array<i32>} : memref<96x64xbf16, #tpu.memory_space<vmem>>, vector<16x64xbf16>,
    %421 = arith.truncf %399 : vector<16x64xf32> to vector<16x64xbf16>
    %c48_159 = arith.constant 48 : index
    %c0_160 = arith.constant 0 : index
    %422 = vector.load %arg8[%c48_159, %c0_160] : memref<96x64xbf16, #tpu.memory_space<vmem>>, vector<16x64xbf16>
    tpu.vector_store %arg8[%c48_159, %c0_160], %421 {strides = array<i32>} : memref<96x64xbf16, #tpu.memory_space<vmem>>, vector<16x64xbf16>,
    %423 = vector.extract_strided_slice %404 {offsets = [0, 1], sizes = [16, 63], strides = [1, 1]} : vector<16x64xf32> to vector<16x63xf32>
    %424 = vector.extract_strided_slice %404 {offsets = [0, 0], sizes = [16, 1], strides = [1, 1]} : vector<16x64xf32> to vector<16x1xf32>
    %425 = tpu.concatenate %423, %424 in 1 : vector<16x63xf32>, vector<16x1xf32> -> vector<16x64xf32>
    %426 = vector.broadcast %2 : vector<1x64xf32> to vector<16x64xf32>
    %427 = arith.mulf %426, %425 : vector<16x64xf32>
    %428 = arith.truncf %427 : vector<16x64xf32> to vector<16x64xbf16>
    %c64_161 = arith.constant 64 : index
    %c0_162 = arith.constant 0 : index
    %429 = vector.load %arg8[%c64_161, %c0_162] : memref<96x64xbf16, #tpu.memory_space<vmem>>, vector<16x64xbf16>
    tpu.vector_store %arg8[%c64_161, %c0_162], %428 {strides = array<i32>} : memref<96x64xbf16, #tpu.memory_space<vmem>>, vector<16x64xbf16>,
    %430 = vector.extract_strided_slice %399 {offsets = [0, 1], sizes = [16, 63], strides = [1, 1]} : vector<16x64xf32> to vector<16x63xf32>
    %431 = vector.extract_strided_slice %399 {offsets = [0, 0], sizes = [16, 1], strides = [1, 1]} : vector<16x64xf32> to vector<16x1xf32>
    %432 = tpu.concatenate %430, %431 in 1 : vector<16x63xf32>, vector<16x1xf32> -> vector<16x64xf32>
    %433 = vector.broadcast %2 : vector<1x64xf32> to vector<16x64xf32>
    %434 = arith.mulf %433, %432 : vector<16x64xf32>
    %435 = arith.truncf %434 : vector<16x64xf32> to vector<16x64xbf16>
    %c80_163 = arith.constant 80 : index
    %c0_164 = arith.constant 0 : index
    %436 = vector.load %arg8[%c80_163, %c0_164] : memref<96x64xbf16, #tpu.memory_space<vmem>>, vector<16x64xbf16>
    tpu.vector_store %arg8[%c80_163, %c0_164], %435 {strides = array<i32>} : memref<96x64xbf16, #tpu.memory_space<vmem>>, vector<16x64xbf16>,
    %c0_165 = arith.constant 0 : index
    %c0_166 = arith.constant 0 : index
    %437 = vector.load %arg8[%c0_165, %c0_166] : memref<96x64xbf16, #tpu.memory_space<vmem>>, vector<96x64xbf16>
    %cst_167 = arith.constant dense<0.000000e+00> : vector<64x64xf32>
    %438 = tpu.matmul %4, %437, %cst_167 {dimension_numbers = #tpu.dot_dimension_numbers<[1], [0], [0], [1], [0, 0, 1, 1], [], []>} : vector<64x96xbf16>, vector<96x64xbf16>, vector<64x64xf32> -> vector<64x64xf32>
    %439 = arith.addf %438, %8 : vector<64x64xf32>
    %440 = vector.extract_strided_slice %439 {offsets = [0, 0], sizes = [48, 64], strides = [1, 1]} : vector<64x64xf32> to vector<48x64xf32>
    %441 = arith.negf %440 : vector<48x64xf32>
    %442 = math.exp %441 : vector<48x64xf32>
    %cst_168 = arith.constant 1.000000e+00 : f32
    %443 = vector.broadcast %cst_168 : f32 to vector<48x64xf32>
    %444 = arith.addf %443, %442 : vector<48x64xf32>
    %445 = arith.divf %443, %444 : vector<48x64xf32>
    %446 = vector.extract_strided_slice %445 {offsets = [0, 0], sizes = [16, 64], strides = [1, 1]} : vector<48x64xf32> to vector<16x64xf32>
    %447 = vector.extract_strided_slice %445 {offsets = [16, 0], sizes = [16, 64], strides = [1, 1]} : vector<48x64xf32> to vector<16x64xf32>
    %448 = vector.extract_strided_slice %445 {offsets = [32, 0], sizes = [16, 64], strides = [1, 1]} : vector<48x64xf32> to vector<16x64xf32>
    %449 = vector.extract_strided_slice %439 {offsets = [48, 0], sizes = [16, 64], strides = [1, 1]} : vector<64x64xf32> to vector<16x64xf32>
    %450 = math.tanh %449 : vector<16x64xf32>
    %451 = arith.mulf %446, %397 : vector<16x64xf32>
    %452 = arith.mulf %447, %450 : vector<16x64xf32>
    %453 = arith.addf %451, %452 : vector<16x64xf32>
    %454 = math.tanh %453 : vector<16x64xf32>
    %455 = arith.mulf %448, %454 : vector<16x64xf32>
    %c7_169 = arith.constant 7 : index
    %c0_170 = arith.constant 0 : index
    %c0_171 = arith.constant 0 : index
    %456 = vector.load %arg9[%c7_169, %c0_170, %c0_171] : memref<8x16x64xf32, #tpu.memory_space<vmem>>, vector<1x16x64xf32>
    %457 = vector.shape_cast %456 : vector<1x16x64xf32> to vector<16x64xf32>
    %458 = vector.shape_cast %455 : vector<16x64xf32> to vector<1x16x64xf32>
    tpu.vector_store %arg9[%c7_169, %c0_170, %c0_171], %458 {strides = array<i32>} : memref<8x16x64xf32, #tpu.memory_space<vmem>>, vector<1x16x64xf32>,
    %c1_172 = arith.constant 1 : index
    %c0_173 = arith.constant 0 : index
    %c0_174 = arith.constant 0 : index
    %459 = vector.load %arg2[%c1_172, %c0_173, %c0_174] : memref<2x64x96xbf16, #tpu.memory_space<vmem>>, vector<1x64x96xbf16>
    %460 = vector.shape_cast %459 : vector<1x64x96xbf16> to vector<64x96xbf16>
    %c1_175 = arith.constant 1 : index
    %c0_176 = arith.constant 0 : index
    %c0_177 = arith.constant 0 : index
    %461 = vector.load %arg3[%c1_175, %c0_176, %c0_177] : memref<2x64x1xf32, #tpu.memory_space<vmem>>, vector<1x64x1xf32>
    %462 = vector.shape_cast %461 : vector<1x64x1xf32> to vector<64x1xf32>
    %463 = vector.shape_cast %462 : vector<64x1xf32> to vector<64x1xf32>
    %464 = vector.broadcast %463 : vector<64x1xf32> to vector<64x64xf32>
    %cst_178 = arith.constant 0.000000e+00 : f32
    %465 = vector.broadcast %cst_178 : f32 to vector<16x64xf32>
    %cst_179 = arith.constant 0.000000e+00 : f32
    %466 = vector.broadcast %cst_179 : f32 to vector<16x64xf32>
    %c0_180 = arith.constant 0 : index
    %c0_181 = arith.constant 0 : index
    %c0_182 = arith.constant 0 : index
    %467 = vector.load %arg9[%c0_180, %c0_181, %c0_182] : memref<8x16x64xf32, #tpu.memory_space<vmem>>, vector<1x16x64xf32>
    %468 = vector.shape_cast %467 : vector<1x16x64xf32> to vector<16x64xf32>
    %469 = vector.extract_strided_slice %468 {offsets = [0, 63], sizes = [16, 1], strides = [1, 1]} : vector<16x64xf32> to vector<16x1xf32>
    %470 = vector.extract_strided_slice %468 {offsets = [0, 0], sizes = [16, 63], strides = [1, 1]} : vector<16x64xf32> to vector<16x63xf32>
    %471 = tpu.concatenate %469, %470 in 1 : vector<16x1xf32>, vector<16x63xf32> -> vector<16x64xf32>
    %472 = vector.broadcast %1 : vector<1x64xf32> to vector<16x64xf32>
    %473 = arith.mulf %472, %471 : vector<16x64xf32>
    %474 = arith.truncf %473 : vector<16x64xf32> to vector<16x64xbf16>
    %c0_183 = arith.constant 0 : index
    %c0_184 = arith.constant 0 : index
    %475 = vector.load %arg8[%c0_183, %c0_184] : memref<96x64xbf16, #tpu.memory_space<vmem>>, vector<16x64xbf16>
    tpu.vector_store %arg8[%c0_183, %c0_184], %474 {strides = array<i32>} : memref<96x64xbf16, #tpu.memory_space<vmem>>, vector<16x64xbf16>,
    %476 = vector.extract_strided_slice %465 {offsets = [0, 63], sizes = [16, 1], strides = [1, 1]} : vector<16x64xf32> to vector<16x1xf32>
    %477 = vector.extract_strided_slice %465 {offsets = [0, 0], sizes = [16, 63], strides = [1, 1]} : vector<16x64xf32> to vector<16x63xf32>
    %478 = tpu.concatenate %476, %477 in 1 : vector<16x1xf32>, vector<16x63xf32> -> vector<16x64xf32>
    %479 = vector.broadcast %1 : vector<1x64xf32> to vector<16x64xf32>
    %480 = arith.mulf %479, %478 : vector<16x64xf32>
    %481 = arith.truncf %480 : vector<16x64xf32> to vector<16x64xbf16>
    %c16_185 = arith.constant 16 : index
    %c0_186 = arith.constant 0 : index
    %482 = vector.load %arg8[%c16_185, %c0_186] : memref<96x64xbf16, #tpu.memory_space<vmem>>, vector<16x64xbf16>
    tpu.vector_store %arg8[%c16_185, %c0_186], %481 {strides = array<i32>} : memref<96x64xbf16, #tpu.memory_space<vmem>>, vector<16x64xbf16>,
    %483 = arith.truncf %468 : vector<16x64xf32> to vector<16x64xbf16>
    %c32_187 = arith.constant 32 : index
    %c0_188 = arith.constant 0 : index
    %484 = vector.load %arg8[%c32_187, %c0_188] : memref<96x64xbf16, #tpu.memory_space<vmem>>, vector<16x64xbf16>
    tpu.vector_store %arg8[%c32_187, %c0_188], %483 {strides = array<i32>} : memref<96x64xbf16, #tpu.memory_space<vmem>>, vector<16x64xbf16>,
    %485 = arith.truncf %465 : vector<16x64xf32> to vector<16x64xbf16>
    %c48_189 = arith.constant 48 : index
    %c0_190 = arith.constant 0 : index
    %486 = vector.load %arg8[%c48_189, %c0_190] : memref<96x64xbf16, #tpu.memory_space<vmem>>, vector<16x64xbf16>
    tpu.vector_store %arg8[%c48_189, %c0_190], %485 {strides = array<i32>} : memref<96x64xbf16, #tpu.memory_space<vmem>>, vector<16x64xbf16>,
    %487 = vector.extract_strided_slice %468 {offsets = [0, 1], sizes = [16, 63], strides = [1, 1]} : vector<16x64xf32> to vector<16x63xf32>
    %488 = vector.extract_strided_slice %468 {offsets = [0, 0], sizes = [16, 1], strides = [1, 1]} : vector<16x64xf32> to vector<16x1xf32>
    %489 = tpu.concatenate %487, %488 in 1 : vector<16x63xf32>, vector<16x1xf32> -> vector<16x64xf32>
    %490 = vector.broadcast %2 : vector<1x64xf32> to vector<16x64xf32>
    %491 = arith.mulf %490, %489 : vector<16x64xf32>
    %492 = arith.truncf %491 : vector<16x64xf32> to vector<16x64xbf16>
    %c64_191 = arith.constant 64 : index
    %c0_192 = arith.constant 0 : index
    %493 = vector.load %arg8[%c64_191, %c0_192] : memref<96x64xbf16, #tpu.memory_space<vmem>>, vector<16x64xbf16>
    tpu.vector_store %arg8[%c64_191, %c0_192], %492 {strides = array<i32>} : memref<96x64xbf16, #tpu.memory_space<vmem>>, vector<16x64xbf16>,
    %494 = vector.extract_strided_slice %465 {offsets = [0, 1], sizes = [16, 63], strides = [1, 1]} : vector<16x64xf32> to vector<16x63xf32>
    %495 = vector.extract_strided_slice %465 {offsets = [0, 0], sizes = [16, 1], strides = [1, 1]} : vector<16x64xf32> to vector<16x1xf32>
    %496 = tpu.concatenate %494, %495 in 1 : vector<16x63xf32>, vector<16x1xf32> -> vector<16x64xf32>
    %497 = vector.broadcast %2 : vector<1x64xf32> to vector<16x64xf32>
    %498 = arith.mulf %497, %496 : vector<16x64xf32>
    %499 = arith.truncf %498 : vector<16x64xf32> to vector<16x64xbf16>
    %c80_193 = arith.constant 80 : index
    %c0_194 = arith.constant 0 : index
    %500 = vector.load %arg8[%c80_193, %c0_194] : memref<96x64xbf16, #tpu.memory_space<vmem>>, vector<16x64xbf16>
    tpu.vector_store %arg8[%c80_193, %c0_194], %499 {strides = array<i32>} : memref<96x64xbf16, #tpu.memory_space<vmem>>, vector<16x64xbf16>,
    %c0_195 = arith.constant 0 : index
    %c0_196 = arith.constant 0 : index
    %501 = vector.load %arg8[%c0_195, %c0_196] : memref<96x64xbf16, #tpu.memory_space<vmem>>, vector<96x64xbf16>
    %cst_197 = arith.constant dense<0.000000e+00> : vector<64x64xf32>
    %502 = tpu.matmul %460, %501, %cst_197 {dimension_numbers = #tpu.dot_dimension_numbers<[1], [0], [0], [1], [0, 0, 1, 1], [], []>} : vector<64x96xbf16>, vector<96x64xbf16>, vector<64x64xf32> -> vector<64x64xf32>
    %503 = arith.addf %502, %464 : vector<64x64xf32>
    %504 = vector.extract_strided_slice %503 {offsets = [0, 0], sizes = [48, 64], strides = [1, 1]} : vector<64x64xf32> to vector<48x64xf32>
    %505 = arith.negf %504 : vector<48x64xf32>
    %506 = math.exp %505 : vector<48x64xf32>
    %cst_198 = arith.constant 1.000000e+00 : f32
    %507 = vector.broadcast %cst_198 : f32 to vector<48x64xf32>
    %508 = arith.addf %507, %506 : vector<48x64xf32>
    %509 = arith.divf %507, %508 : vector<48x64xf32>
    %510 = vector.extract_strided_slice %509 {offsets = [0, 0], sizes = [16, 64], strides = [1, 1]} : vector<48x64xf32> to vector<16x64xf32>
    %511 = vector.extract_strided_slice %509 {offsets = [16, 0], sizes = [16, 64], strides = [1, 1]} : vector<48x64xf32> to vector<16x64xf32>
    %512 = vector.extract_strided_slice %509 {offsets = [32, 0], sizes = [16, 64], strides = [1, 1]} : vector<48x64xf32> to vector<16x64xf32>
    %513 = vector.extract_strided_slice %503 {offsets = [48, 0], sizes = [16, 64], strides = [1, 1]} : vector<64x64xf32> to vector<16x64xf32>
    %514 = math.tanh %513 : vector<16x64xf32>
    %515 = arith.mulf %510, %466 : vector<16x64xf32>
    %516 = arith.mulf %511, %514 : vector<16x64xf32>
    %517 = arith.addf %515, %516 : vector<16x64xf32>
    %518 = math.tanh %517 : vector<16x64xf32>
    %519 = arith.mulf %512, %518 : vector<16x64xf32>
    %c1_199 = arith.constant 1 : index
    %c0_200 = arith.constant 0 : index
    %c0_201 = arith.constant 0 : index
    %520 = vector.load %arg9[%c1_199, %c0_200, %c0_201] : memref<8x16x64xf32, #tpu.memory_space<vmem>>, vector<1x16x64xf32>
    %521 = vector.shape_cast %520 : vector<1x16x64xf32> to vector<16x64xf32>
    %522 = vector.extract_strided_slice %521 {offsets = [0, 63], sizes = [16, 1], strides = [1, 1]} : vector<16x64xf32> to vector<16x1xf32>
    %523 = vector.extract_strided_slice %521 {offsets = [0, 0], sizes = [16, 63], strides = [1, 1]} : vector<16x64xf32> to vector<16x63xf32>
    %524 = tpu.concatenate %522, %523 in 1 : vector<16x1xf32>, vector<16x63xf32> -> vector<16x64xf32>
    %525 = vector.broadcast %1 : vector<1x64xf32> to vector<16x64xf32>
    %526 = arith.mulf %525, %524 : vector<16x64xf32>
    %527 = arith.truncf %526 : vector<16x64xf32> to vector<16x64xbf16>
    %c0_202 = arith.constant 0 : index
    %c0_203 = arith.constant 0 : index
    %528 = vector.load %arg8[%c0_202, %c0_203] : memref<96x64xbf16, #tpu.memory_space<vmem>>, vector<16x64xbf16>
    tpu.vector_store %arg8[%c0_202, %c0_203], %527 {strides = array<i32>} : memref<96x64xbf16, #tpu.memory_space<vmem>>, vector<16x64xbf16>,
    %529 = vector.extract_strided_slice %519 {offsets = [0, 63], sizes = [16, 1], strides = [1, 1]} : vector<16x64xf32> to vector<16x1xf32>
    %530 = vector.extract_strided_slice %519 {offsets = [0, 0], sizes = [16, 63], strides = [1, 1]} : vector<16x64xf32> to vector<16x63xf32>
    %531 = tpu.concatenate %529, %530 in 1 : vector<16x1xf32>, vector<16x63xf32> -> vector<16x64xf32>
    %532 = vector.broadcast %1 : vector<1x64xf32> to vector<16x64xf32>
    %533 = arith.mulf %532, %531 : vector<16x64xf32>
    %534 = arith.truncf %533 : vector<16x64xf32> to vector<16x64xbf16>
    %c16_204 = arith.constant 16 : index
    %c0_205 = arith.constant 0 : index
    %535 = vector.load %arg8[%c16_204, %c0_205] : memref<96x64xbf16, #tpu.memory_space<vmem>>, vector<16x64xbf16>
    tpu.vector_store %arg8[%c16_204, %c0_205], %534 {strides = array<i32>} : memref<96x64xbf16, #tpu.memory_space<vmem>>, vector<16x64xbf16>,
    %536 = arith.truncf %521 : vector<16x64xf32> to vector<16x64xbf16>
    %c32_206 = arith.constant 32 : index
    %c0_207 = arith.constant 0 : index
    %537 = vector.load %arg8[%c32_206, %c0_207] : memref<96x64xbf16, #tpu.memory_space<vmem>>, vector<16x64xbf16>
    tpu.vector_store %arg8[%c32_206, %c0_207], %536 {strides = array<i32>} : memref<96x64xbf16, #tpu.memory_space<vmem>>, vector<16x64xbf16>,
    %538 = arith.truncf %519 : vector<16x64xf32> to vector<16x64xbf16>
    %c48_208 = arith.constant 48 : index
    %c0_209 = arith.constant 0 : index
    %539 = vector.load %arg8[%c48_208, %c0_209] : memref<96x64xbf16, #tpu.memory_space<vmem>>, vector<16x64xbf16>
    tpu.vector_store %arg8[%c48_208, %c0_209], %538 {strides = array<i32>} : memref<96x64xbf16, #tpu.memory_space<vmem>>, vector<16x64xbf16>,
    %540 = vector.extract_strided_slice %521 {offsets = [0, 1], sizes = [16, 63], strides = [1, 1]} : vector<16x64xf32> to vector<16x63xf32>
    %541 = vector.extract_strided_slice %521 {offsets = [0, 0], sizes = [16, 1], strides = [1, 1]} : vector<16x64xf32> to vector<16x1xf32>
    %542 = tpu.concatenate %540, %541 in 1 : vector<16x63xf32>, vector<16x1xf32> -> vector<16x64xf32>
    %543 = vector.broadcast %2 : vector<1x64xf32> to vector<16x64xf32>
    %544 = arith.mulf %543, %542 : vector<16x64xf32>
    %545 = arith.truncf %544 : vector<16x64xf32> to vector<16x64xbf16>
    %c64_210 = arith.constant 64 : index
    %c0_211 = arith.constant 0 : index
    %546 = vector.load %arg8[%c64_210, %c0_211] : memref<96x64xbf16, #tpu.memory_space<vmem>>, vector<16x64xbf16>
    tpu.vector_store %arg8[%c64_210, %c0_211], %545 {strides = array<i32>} : memref<96x64xbf16, #tpu.memory_space<vmem>>, vector<16x64xbf16>,
    %547 = vector.extract_strided_slice %519 {offsets = [0, 1], sizes = [16, 63], strides = [1, 1]} : vector<16x64xf32> to vector<16x63xf32>
    %548 = vector.extract_strided_slice %519 {offsets = [0, 0], sizes = [16, 1], strides = [1, 1]} : vector<16x64xf32> to vector<16x1xf32>
    %549 = tpu.concatenate %547, %548 in 1 : vector<16x63xf32>, vector<16x1xf32> -> vector<16x64xf32>
    %550 = vector.broadcast %2 : vector<1x64xf32> to vector<16x64xf32>
    %551 = arith.mulf %550, %549 : vector<16x64xf32>
    %552 = arith.truncf %551 : vector<16x64xf32> to vector<16x64xbf16>
    %c80_212 = arith.constant 80 : index
    %c0_213 = arith.constant 0 : index
    %553 = vector.load %arg8[%c80_212, %c0_213] : memref<96x64xbf16, #tpu.memory_space<vmem>>, vector<16x64xbf16>
    tpu.vector_store %arg8[%c80_212, %c0_213], %552 {strides = array<i32>} : memref<96x64xbf16, #tpu.memory_space<vmem>>, vector<16x64xbf16>,
    %c0_214 = arith.constant 0 : index
    %c0_215 = arith.constant 0 : index
    %554 = vector.load %arg8[%c0_214, %c0_215] : memref<96x64xbf16, #tpu.memory_space<vmem>>, vector<96x64xbf16>
    %cst_216 = arith.constant dense<0.000000e+00> : vector<64x64xf32>
    %555 = tpu.matmul %460, %554, %cst_216 {dimension_numbers = #tpu.dot_dimension_numbers<[1], [0], [0], [1], [0, 0, 1, 1], [], []>} : vector<64x96xbf16>, vector<96x64xbf16>, vector<64x64xf32> -> vector<64x64xf32>
    %556 = arith.addf %555, %464 : vector<64x64xf32>
    %557 = vector.extract_strided_slice %556 {offsets = [0, 0], sizes = [48, 64], strides = [1, 1]} : vector<64x64xf32> to vector<48x64xf32>
    %558 = arith.negf %557 : vector<48x64xf32>
    %559 = math.exp %558 : vector<48x64xf32>
    %cst_217 = arith.constant 1.000000e+00 : f32
    %560 = vector.broadcast %cst_217 : f32 to vector<48x64xf32>
    %561 = arith.addf %560, %559 : vector<48x64xf32>
    %562 = arith.divf %560, %561 : vector<48x64xf32>
    %563 = vector.extract_strided_slice %562 {offsets = [0, 0], sizes = [16, 64], strides = [1, 1]} : vector<48x64xf32> to vector<16x64xf32>
    %564 = vector.extract_strided_slice %562 {offsets = [16, 0], sizes = [16, 64], strides = [1, 1]} : vector<48x64xf32> to vector<16x64xf32>
    %565 = vector.extract_strided_slice %562 {offsets = [32, 0], sizes = [16, 64], strides = [1, 1]} : vector<48x64xf32> to vector<16x64xf32>
    %566 = vector.extract_strided_slice %556 {offsets = [48, 0], sizes = [16, 64], strides = [1, 1]} : vector<64x64xf32> to vector<16x64xf32>
    %567 = math.tanh %566 : vector<16x64xf32>
    %568 = arith.mulf %563, %517 : vector<16x64xf32>
    %569 = arith.mulf %564, %567 : vector<16x64xf32>
    %570 = arith.addf %568, %569 : vector<16x64xf32>
    %571 = math.tanh %570 : vector<16x64xf32>
    %572 = arith.mulf %565, %571 : vector<16x64xf32>
    %573 = arith.maximumf %519, %572 : vector<16x64xf32>
    %c2_218 = arith.constant 2 : index
    %c0_219 = arith.constant 0 : index
    %c0_220 = arith.constant 0 : index
    %574 = vector.load %arg9[%c2_218, %c0_219, %c0_220] : memref<8x16x64xf32, #tpu.memory_space<vmem>>, vector<1x16x64xf32>
    %575 = vector.shape_cast %574 : vector<1x16x64xf32> to vector<16x64xf32>
    %576 = vector.extract_strided_slice %575 {offsets = [0, 63], sizes = [16, 1], strides = [1, 1]} : vector<16x64xf32> to vector<16x1xf32>
    %577 = vector.extract_strided_slice %575 {offsets = [0, 0], sizes = [16, 63], strides = [1, 1]} : vector<16x64xf32> to vector<16x63xf32>
    %578 = tpu.concatenate %576, %577 in 1 : vector<16x1xf32>, vector<16x63xf32> -> vector<16x64xf32>
    %579 = vector.broadcast %1 : vector<1x64xf32> to vector<16x64xf32>
    %580 = arith.mulf %579, %578 : vector<16x64xf32>
    %581 = arith.truncf %580 : vector<16x64xf32> to vector<16x64xbf16>
    %c0_221 = arith.constant 0 : index
    %c0_222 = arith.constant 0 : index
    %582 = vector.load %arg8[%c0_221, %c0_222] : memref<96x64xbf16, #tpu.memory_space<vmem>>, vector<16x64xbf16>
    tpu.vector_store %arg8[%c0_221, %c0_222], %581 {strides = array<i32>} : memref<96x64xbf16, #tpu.memory_space<vmem>>, vector<16x64xbf16>,
    %583 = vector.extract_strided_slice %572 {offsets = [0, 63], sizes = [16, 1], strides = [1, 1]} : vector<16x64xf32> to vector<16x1xf32>
    %584 = vector.extract_strided_slice %572 {offsets = [0, 0], sizes = [16, 63], strides = [1, 1]} : vector<16x64xf32> to vector<16x63xf32>
    %585 = tpu.concatenate %583, %584 in 1 : vector<16x1xf32>, vector<16x63xf32> -> vector<16x64xf32>
    %586 = vector.broadcast %1 : vector<1x64xf32> to vector<16x64xf32>
    %587 = arith.mulf %586, %585 : vector<16x64xf32>
    %588 = arith.truncf %587 : vector<16x64xf32> to vector<16x64xbf16>
    %c16_223 = arith.constant 16 : index
    %c0_224 = arith.constant 0 : index
    %589 = vector.load %arg8[%c16_223, %c0_224] : memref<96x64xbf16, #tpu.memory_space<vmem>>, vector<16x64xbf16>
    tpu.vector_store %arg8[%c16_223, %c0_224], %588 {strides = array<i32>} : memref<96x64xbf16, #tpu.memory_space<vmem>>, vector<16x64xbf16>,
    %590 = arith.truncf %575 : vector<16x64xf32> to vector<16x64xbf16>
    %c32_225 = arith.constant 32 : index
    %c0_226 = arith.constant 0 : index
    %591 = vector.load %arg8[%c32_225, %c0_226] : memref<96x64xbf16, #tpu.memory_space<vmem>>, vector<16x64xbf16>
    tpu.vector_store %arg8[%c32_225, %c0_226], %590 {strides = array<i32>} : memref<96x64xbf16, #tpu.memory_space<vmem>>, vector<16x64xbf16>,
    %592 = arith.truncf %572 : vector<16x64xf32> to vector<16x64xbf16>
    %c48_227 = arith.constant 48 : index
    %c0_228 = arith.constant 0 : index
    %593 = vector.load %arg8[%c48_227, %c0_228] : memref<96x64xbf16, #tpu.memory_space<vmem>>, vector<16x64xbf16>
    tpu.vector_store %arg8[%c48_227, %c0_228], %592 {strides = array<i32>} : memref<96x64xbf16, #tpu.memory_space<vmem>>, vector<16x64xbf16>,
    %594 = vector.extract_strided_slice %575 {offsets = [0, 1], sizes = [16, 63], strides = [1, 1]} : vector<16x64xf32> to vector<16x63xf32>
    %595 = vector.extract_strided_slice %575 {offsets = [0, 0], sizes = [16, 1], strides = [1, 1]} : vector<16x64xf32> to vector<16x1xf32>
    %596 = tpu.concatenate %594, %595 in 1 : vector<16x63xf32>, vector<16x1xf32> -> vector<16x64xf32>
    %597 = vector.broadcast %2 : vector<1x64xf32> to vector<16x64xf32>
    %598 = arith.mulf %597, %596 : vector<16x64xf32>
    %599 = arith.truncf %598 : vector<16x64xf32> to vector<16x64xbf16>
    %c64_229 = arith.constant 64 : index
    %c0_230 = arith.constant 0 : index
    %600 = vector.load %arg8[%c64_229, %c0_230] : memref<96x64xbf16, #tpu.memory_space<vmem>>, vector<16x64xbf16>
    tpu.vector_store %arg8[%c64_229, %c0_230], %599 {strides = array<i32>} : memref<96x64xbf16, #tpu.memory_space<vmem>>, vector<16x64xbf16>,
    %601 = vector.extract_strided_slice %572 {offsets = [0, 1], sizes = [16, 63], strides = [1, 1]} : vector<16x64xf32> to vector<16x63xf32>
    %602 = vector.extract_strided_slice %572 {offsets = [0, 0], sizes = [16, 1], strides = [1, 1]} : vector<16x64xf32> to vector<16x1xf32>
    %603 = tpu.concatenate %601, %602 in 1 : vector<16x63xf32>, vector<16x1xf32> -> vector<16x64xf32>
    %604 = vector.broadcast %2 : vector<1x64xf32> to vector<16x64xf32>
    %605 = arith.mulf %604, %603 : vector<16x64xf32>
    %606 = arith.truncf %605 : vector<16x64xf32> to vector<16x64xbf16>
    %c80_231 = arith.constant 80 : index
    %c0_232 = arith.constant 0 : index
    %607 = vector.load %arg8[%c80_231, %c0_232] : memref<96x64xbf16, #tpu.memory_space<vmem>>, vector<16x64xbf16>
    tpu.vector_store %arg8[%c80_231, %c0_232], %606 {strides = array<i32>} : memref<96x64xbf16, #tpu.memory_space<vmem>>, vector<16x64xbf16>,
    %c0_233 = arith.constant 0 : index
    %c0_234 = arith.constant 0 : index
    %608 = vector.load %arg8[%c0_233, %c0_234] : memref<96x64xbf16, #tpu.memory_space<vmem>>, vector<96x64xbf16>
    %cst_235 = arith.constant dense<0.000000e+00> : vector<64x64xf32>
    %609 = tpu.matmul %460, %608, %cst_235 {dimension_numbers = #tpu.dot_dimension_numbers<[1], [0], [0], [1], [0, 0, 1, 1], [], []>} : vector<64x96xbf16>, vector<96x64xbf16>, vector<64x64xf32> -> vector<64x64xf32>
    %610 = arith.addf %609, %464 : vector<64x64xf32>
    %611 = vector.extract_strided_slice %610 {offsets = [0, 0], sizes = [48, 64], strides = [1, 1]} : vector<64x64xf32> to vector<48x64xf32>
    %612 = arith.negf %611 : vector<48x64xf32>
    %613 = math.exp %612 : vector<48x64xf32>
    %cst_236 = arith.constant 1.000000e+00 : f32
    %614 = vector.broadcast %cst_236 : f32 to vector<48x64xf32>
    %615 = arith.addf %614, %613 : vector<48x64xf32>
    %616 = arith.divf %614, %615 : vector<48x64xf32>
    %617 = vector.extract_strided_slice %616 {offsets = [0, 0], sizes = [16, 64], strides = [1, 1]} : vector<48x64xf32> to vector<16x64xf32>
    %618 = vector.extract_strided_slice %616 {offsets = [16, 0], sizes = [16, 64], strides = [1, 1]} : vector<48x64xf32> to vector<16x64xf32>
    %619 = vector.extract_strided_slice %616 {offsets = [32, 0], sizes = [16, 64], strides = [1, 1]} : vector<48x64xf32> to vector<16x64xf32>
    %620 = vector.extract_strided_slice %610 {offsets = [48, 0], sizes = [16, 64], strides = [1, 1]} : vector<64x64xf32> to vector<16x64xf32>
    %621 = math.tanh %620 : vector<16x64xf32>
    %622 = arith.mulf %617, %570 : vector<16x64xf32>
    %623 = arith.mulf %618, %621 : vector<16x64xf32>
    %624 = arith.addf %622, %623 : vector<16x64xf32>
    %625 = math.tanh %624 : vector<16x64xf32>
    %626 = arith.mulf %619, %625 : vector<16x64xf32>
    %627 = arith.maximumf %573, %626 : vector<16x64xf32>
    %c3_237 = arith.constant 3 : index
    %c0_238 = arith.constant 0 : index
    %c0_239 = arith.constant 0 : index
    %628 = vector.load %arg9[%c3_237, %c0_238, %c0_239] : memref<8x16x64xf32, #tpu.memory_space<vmem>>, vector<1x16x64xf32>
    %629 = vector.shape_cast %628 : vector<1x16x64xf32> to vector<16x64xf32>
    %630 = vector.extract_strided_slice %629 {offsets = [0, 63], sizes = [16, 1], strides = [1, 1]} : vector<16x64xf32> to vector<16x1xf32>
    %631 = vector.extract_strided_slice %629 {offsets = [0, 0], sizes = [16, 63], strides = [1, 1]} : vector<16x64xf32> to vector<16x63xf32>
    %632 = tpu.concatenate %630, %631 in 1 : vector<16x1xf32>, vector<16x63xf32> -> vector<16x64xf32>
    %633 = vector.broadcast %1 : vector<1x64xf32> to vector<16x64xf32>
    %634 = arith.mulf %633, %632 : vector<16x64xf32>
    %635 = arith.truncf %634 : vector<16x64xf32> to vector<16x64xbf16>
    %c0_240 = arith.constant 0 : index
    %c0_241 = arith.constant 0 : index
    %636 = vector.load %arg8[%c0_240, %c0_241] : memref<96x64xbf16, #tpu.memory_space<vmem>>, vector<16x64xbf16>
    tpu.vector_store %arg8[%c0_240, %c0_241], %635 {strides = array<i32>} : memref<96x64xbf16, #tpu.memory_space<vmem>>, vector<16x64xbf16>,
    %637 = vector.extract_strided_slice %626 {offsets = [0, 63], sizes = [16, 1], strides = [1, 1]} : vector<16x64xf32> to vector<16x1xf32>
    %638 = vector.extract_strided_slice %626 {offsets = [0, 0], sizes = [16, 63], strides = [1, 1]} : vector<16x64xf32> to vector<16x63xf32>
    %639 = tpu.concatenate %637, %638 in 1 : vector<16x1xf32>, vector<16x63xf32> -> vector<16x64xf32>
    %640 = vector.broadcast %1 : vector<1x64xf32> to vector<16x64xf32>
    %641 = arith.mulf %640, %639 : vector<16x64xf32>
    %642 = arith.truncf %641 : vector<16x64xf32> to vector<16x64xbf16>
    %c16_242 = arith.constant 16 : index
    %c0_243 = arith.constant 0 : index
    %643 = vector.load %arg8[%c16_242, %c0_243] : memref<96x64xbf16, #tpu.memory_space<vmem>>, vector<16x64xbf16>
    tpu.vector_store %arg8[%c16_242, %c0_243], %642 {strides = array<i32>} : memref<96x64xbf16, #tpu.memory_space<vmem>>, vector<16x64xbf16>,
    %644 = arith.truncf %629 : vector<16x64xf32> to vector<16x64xbf16>
    %c32_244 = arith.constant 32 : index
    %c0_245 = arith.constant 0 : index
    %645 = vector.load %arg8[%c32_244, %c0_245] : memref<96x64xbf16, #tpu.memory_space<vmem>>, vector<16x64xbf16>
    tpu.vector_store %arg8[%c32_244, %c0_245], %644 {strides = array<i32>} : memref<96x64xbf16, #tpu.memory_space<vmem>>, vector<16x64xbf16>,
    %646 = arith.truncf %626 : vector<16x64xf32> to vector<16x64xbf16>
    %c48_246 = arith.constant 48 : index
    %c0_247 = arith.constant 0 : index
    %647 = vector.load %arg8[%c48_246, %c0_247] : memref<96x64xbf16, #tpu.memory_space<vmem>>, vector<16x64xbf16>
    tpu.vector_store %arg8[%c48_246, %c0_247], %646 {strides = array<i32>} : memref<96x64xbf16, #tpu.memory_space<vmem>>, vector<16x64xbf16>,
    %648 = vector.extract_strided_slice %629 {offsets = [0, 1], sizes = [16, 63], strides = [1, 1]} : vector<16x64xf32> to vector<16x63xf32>
    %649 = vector.extract_strided_slice %629 {offsets = [0, 0], sizes = [16, 1], strides = [1, 1]} : vector<16x64xf32> to vector<16x1xf32>
    %650 = tpu.concatenate %648, %649 in 1 : vector<16x63xf32>, vector<16x1xf32> -> vector<16x64xf32>
    %651 = vector.broadcast %2 : vector<1x64xf32> to vector<16x64xf32>
    %652 = arith.mulf %651, %650 : vector<16x64xf32>
    %653 = arith.truncf %652 : vector<16x64xf32> to vector<16x64xbf16>
    %c64_248 = arith.constant 64 : index
    %c0_249 = arith.constant 0 : index
    %654 = vector.load %arg8[%c64_248, %c0_249] : memref<96x64xbf16, #tpu.memory_space<vmem>>, vector<16x64xbf16>
    tpu.vector_store %arg8[%c64_248, %c0_249], %653 {strides = array<i32>} : memref<96x64xbf16, #tpu.memory_space<vmem>>, vector<16x64xbf16>,
    %655 = vector.extract_strided_slice %626 {offsets = [0, 1], sizes = [16, 63], strides = [1, 1]} : vector<16x64xf32> to vector<16x63xf32>
    %656 = vector.extract_strided_slice %626 {offsets = [0, 0], sizes = [16, 1], strides = [1, 1]} : vector<16x64xf32> to vector<16x1xf32>
    %657 = tpu.concatenate %655, %656 in 1 : vector<16x63xf32>, vector<16x1xf32> -> vector<16x64xf32>
    %658 = vector.broadcast %2 : vector<1x64xf32> to vector<16x64xf32>
    %659 = arith.mulf %658, %657 : vector<16x64xf32>
    %660 = arith.truncf %659 : vector<16x64xf32> to vector<16x64xbf16>
    %c80_250 = arith.constant 80 : index
    %c0_251 = arith.constant 0 : index
    %661 = vector.load %arg8[%c80_250, %c0_251] : memref<96x64xbf16, #tpu.memory_space<vmem>>, vector<16x64xbf16>
    tpu.vector_store %arg8[%c80_250, %c0_251], %660 {strides = array<i32>} : memref<96x64xbf16, #tpu.memory_space<vmem>>, vector<16x64xbf16>,
    %c0_252 = arith.constant 0 : index
    %c0_253 = arith.constant 0 : index
    %662 = vector.load %arg8[%c0_252, %c0_253] : memref<96x64xbf16, #tpu.memory_space<vmem>>, vector<96x64xbf16>
    %cst_254 = arith.constant dense<0.000000e+00> : vector<64x64xf32>
    %663 = tpu.matmul %460, %662, %cst_254 {dimension_numbers = #tpu.dot_dimension_numbers<[1], [0], [0], [1], [0, 0, 1, 1], [], []>} : vector<64x96xbf16>, vector<96x64xbf16>, vector<64x64xf32> -> vector<64x64xf32>
    %664 = arith.addf %663, %464 : vector<64x64xf32>
    %665 = vector.extract_strided_slice %664 {offsets = [0, 0], sizes = [48, 64], strides = [1, 1]} : vector<64x64xf32> to vector<48x64xf32>
    %666 = arith.negf %665 : vector<48x64xf32>
    %667 = math.exp %666 : vector<48x64xf32>
    %cst_255 = arith.constant 1.000000e+00 : f32
    %668 = vector.broadcast %cst_255 : f32 to vector<48x64xf32>
    %669 = arith.addf %668, %667 : vector<48x64xf32>
    %670 = arith.divf %668, %669 : vector<48x64xf32>
    %671 = vector.extract_strided_slice %670 {offsets = [0, 0], sizes = [16, 64], strides = [1, 1]} : vector<48x64xf32> to vector<16x64xf32>
    %672 = vector.extract_strided_slice %670 {offsets = [16, 0], sizes = [16, 64], strides = [1, 1]} : vector<48x64xf32> to vector<16x64xf32>
    %673 = vector.extract_strided_slice %670 {offsets = [32, 0], sizes = [16, 64], strides = [1, 1]} : vector<48x64xf32> to vector<16x64xf32>
    %674 = vector.extract_strided_slice %664 {offsets = [48, 0], sizes = [16, 64], strides = [1, 1]} : vector<64x64xf32> to vector<16x64xf32>
    %675 = math.tanh %674 : vector<16x64xf32>
    %676 = arith.mulf %671, %624 : vector<16x64xf32>
    %677 = arith.mulf %672, %675 : vector<16x64xf32>
    %678 = arith.addf %676, %677 : vector<16x64xf32>
    %679 = math.tanh %678 : vector<16x64xf32>
    %680 = arith.mulf %673, %679 : vector<16x64xf32>
    %681 = arith.maximumf %627, %680 : vector<16x64xf32>
    %c4_256 = arith.constant 4 : index
    %c0_257 = arith.constant 0 : index
    %c0_258 = arith.constant 0 : index
    %682 = vector.load %arg9[%c4_256, %c0_257, %c0_258] : memref<8x16x64xf32, #tpu.memory_space<vmem>>, vector<1x16x64xf32>
    %683 = vector.shape_cast %682 : vector<1x16x64xf32> to vector<16x64xf32>
    %684 = vector.extract_strided_slice %683 {offsets = [0, 63], sizes = [16, 1], strides = [1, 1]} : vector<16x64xf32> to vector<16x1xf32>
    %685 = vector.extract_strided_slice %683 {offsets = [0, 0], sizes = [16, 63], strides = [1, 1]} : vector<16x64xf32> to vector<16x63xf32>
    %686 = tpu.concatenate %684, %685 in 1 : vector<16x1xf32>, vector<16x63xf32> -> vector<16x64xf32>
    %687 = vector.broadcast %1 : vector<1x64xf32> to vector<16x64xf32>
    %688 = arith.mulf %687, %686 : vector<16x64xf32>
    %689 = arith.truncf %688 : vector<16x64xf32> to vector<16x64xbf16>
    %c0_259 = arith.constant 0 : index
    %c0_260 = arith.constant 0 : index
    %690 = vector.load %arg8[%c0_259, %c0_260] : memref<96x64xbf16, #tpu.memory_space<vmem>>, vector<16x64xbf16>
    tpu.vector_store %arg8[%c0_259, %c0_260], %689 {strides = array<i32>} : memref<96x64xbf16, #tpu.memory_space<vmem>>, vector<16x64xbf16>,
    %691 = vector.extract_strided_slice %680 {offsets = [0, 63], sizes = [16, 1], strides = [1, 1]} : vector<16x64xf32> to vector<16x1xf32>
    %692 = vector.extract_strided_slice %680 {offsets = [0, 0], sizes = [16, 63], strides = [1, 1]} : vector<16x64xf32> to vector<16x63xf32>
    %693 = tpu.concatenate %691, %692 in 1 : vector<16x1xf32>, vector<16x63xf32> -> vector<16x64xf32>
    %694 = vector.broadcast %1 : vector<1x64xf32> to vector<16x64xf32>
    %695 = arith.mulf %694, %693 : vector<16x64xf32>
    %696 = arith.truncf %695 : vector<16x64xf32> to vector<16x64xbf16>
    %c16_261 = arith.constant 16 : index
    %c0_262 = arith.constant 0 : index
    %697 = vector.load %arg8[%c16_261, %c0_262] : memref<96x64xbf16, #tpu.memory_space<vmem>>, vector<16x64xbf16>
    tpu.vector_store %arg8[%c16_261, %c0_262], %696 {strides = array<i32>} : memref<96x64xbf16, #tpu.memory_space<vmem>>, vector<16x64xbf16>,
    %698 = arith.truncf %683 : vector<16x64xf32> to vector<16x64xbf16>
    %c32_263 = arith.constant 32 : index
    %c0_264 = arith.constant 0 : index
    %699 = vector.load %arg8[%c32_263, %c0_264] : memref<96x64xbf16, #tpu.memory_space<vmem>>, vector<16x64xbf16>
    tpu.vector_store %arg8[%c32_263, %c0_264], %698 {strides = array<i32>} : memref<96x64xbf16, #tpu.memory_space<vmem>>, vector<16x64xbf16>,
    %700 = arith.truncf %680 : vector<16x64xf32> to vector<16x64xbf16>
    %c48_265 = arith.constant 48 : index
    %c0_266 = arith.constant 0 : index
    %701 = vector.load %arg8[%c48_265, %c0_266] : memref<96x64xbf16, #tpu.memory_space<vmem>>, vector<16x64xbf16>
    tpu.vector_store %arg8[%c48_265, %c0_266], %700 {strides = array<i32>} : memref<96x64xbf16, #tpu.memory_space<vmem>>, vector<16x64xbf16>,
    %702 = vector.extract_strided_slice %683 {offsets = [0, 1], sizes = [16, 63], strides = [1, 1]} : vector<16x64xf32> to vector<16x63xf32>
    %703 = vector.extract_strided_slice %683 {offsets = [0, 0], sizes = [16, 1], strides = [1, 1]} : vector<16x64xf32> to vector<16x1xf32>
    %704 = tpu.concatenate %702, %703 in 1 : vector<16x63xf32>, vector<16x1xf32> -> vector<16x64xf32>
    %705 = vector.broadcast %2 : vector<1x64xf32> to vector<16x64xf32>
    %706 = arith.mulf %705, %704 : vector<16x64xf32>
    %707 = arith.truncf %706 : vector<16x64xf32> to vector<16x64xbf16>
    %c64_267 = arith.constant 64 : index
    %c0_268 = arith.constant 0 : index
    %708 = vector.load %arg8[%c64_267, %c0_268] : memref<96x64xbf16, #tpu.memory_space<vmem>>, vector<16x64xbf16>
    tpu.vector_store %arg8[%c64_267, %c0_268], %707 {strides = array<i32>} : memref<96x64xbf16, #tpu.memory_space<vmem>>, vector<16x64xbf16>,
    %709 = vector.extract_strided_slice %680 {offsets = [0, 1], sizes = [16, 63], strides = [1, 1]} : vector<16x64xf32> to vector<16x63xf32>
    %710 = vector.extract_strided_slice %680 {offsets = [0, 0], sizes = [16, 1], strides = [1, 1]} : vector<16x64xf32> to vector<16x1xf32>
    %711 = tpu.concatenate %709, %710 in 1 : vector<16x63xf32>, vector<16x1xf32> -> vector<16x64xf32>
    %712 = vector.broadcast %2 : vector<1x64xf32> to vector<16x64xf32>
    %713 = arith.mulf %712, %711 : vector<16x64xf32>
    %714 = arith.truncf %713 : vector<16x64xf32> to vector<16x64xbf16>
    %c80_269 = arith.constant 80 : index
    %c0_270 = arith.constant 0 : index
    %715 = vector.load %arg8[%c80_269, %c0_270] : memref<96x64xbf16, #tpu.memory_space<vmem>>, vector<16x64xbf16>
    tpu.vector_store %arg8[%c80_269, %c0_270], %714 {strides = array<i32>} : memref<96x64xbf16, #tpu.memory_space<vmem>>, vector<16x64xbf16>,
    %c0_271 = arith.constant 0 : index
    %c0_272 = arith.constant 0 : index
    %716 = vector.load %arg8[%c0_271, %c0_272] : memref<96x64xbf16, #tpu.memory_space<vmem>>, vector<96x64xbf16>
    %cst_273 = arith.constant dense<0.000000e+00> : vector<64x64xf32>
    %717 = tpu.matmul %460, %716, %cst_273 {dimension_numbers = #tpu.dot_dimension_numbers<[1], [0], [0], [1], [0, 0, 1, 1], [], []>} : vector<64x96xbf16>, vector<96x64xbf16>, vector<64x64xf32> -> vector<64x64xf32>
    %718 = arith.addf %717, %464 : vector<64x64xf32>
    %719 = vector.extract_strided_slice %718 {offsets = [0, 0], sizes = [48, 64], strides = [1, 1]} : vector<64x64xf32> to vector<48x64xf32>
    %720 = arith.negf %719 : vector<48x64xf32>
    %721 = math.exp %720 : vector<48x64xf32>
    %cst_274 = arith.constant 1.000000e+00 : f32
    %722 = vector.broadcast %cst_274 : f32 to vector<48x64xf32>
    %723 = arith.addf %722, %721 : vector<48x64xf32>
    %724 = arith.divf %722, %723 : vector<48x64xf32>
    %725 = vector.extract_strided_slice %724 {offsets = [0, 0], sizes = [16, 64], strides = [1, 1]} : vector<48x64xf32> to vector<16x64xf32>
    %726 = vector.extract_strided_slice %724 {offsets = [16, 0], sizes = [16, 64], strides = [1, 1]} : vector<48x64xf32> to vector<16x64xf32>
    %727 = vector.extract_strided_slice %724 {offsets = [32, 0], sizes = [16, 64], strides = [1, 1]} : vector<48x64xf32> to vector<16x64xf32>
    %728 = vector.extract_strided_slice %718 {offsets = [48, 0], sizes = [16, 64], strides = [1, 1]} : vector<64x64xf32> to vector<16x64xf32>
    %729 = math.tanh %728 : vector<16x64xf32>
    %730 = arith.mulf %725, %678 : vector<16x64xf32>
    %731 = arith.mulf %726, %729 : vector<16x64xf32>
    %732 = arith.addf %730, %731 : vector<16x64xf32>
    %733 = math.tanh %732 : vector<16x64xf32>
    %734 = arith.mulf %727, %733 : vector<16x64xf32>
    %735 = arith.maximumf %681, %734 : vector<16x64xf32>
    %c5_275 = arith.constant 5 : index
    %c0_276 = arith.constant 0 : index
    %c0_277 = arith.constant 0 : index
    %736 = vector.load %arg9[%c5_275, %c0_276, %c0_277] : memref<8x16x64xf32, #tpu.memory_space<vmem>>, vector<1x16x64xf32>
    %737 = vector.shape_cast %736 : vector<1x16x64xf32> to vector<16x64xf32>
    %738 = vector.extract_strided_slice %737 {offsets = [0, 63], sizes = [16, 1], strides = [1, 1]} : vector<16x64xf32> to vector<16x1xf32>
    %739 = vector.extract_strided_slice %737 {offsets = [0, 0], sizes = [16, 63], strides = [1, 1]} : vector<16x64xf32> to vector<16x63xf32>
    %740 = tpu.concatenate %738, %739 in 1 : vector<16x1xf32>, vector<16x63xf32> -> vector<16x64xf32>
    %741 = vector.broadcast %1 : vector<1x64xf32> to vector<16x64xf32>
    %742 = arith.mulf %741, %740 : vector<16x64xf32>
    %743 = arith.truncf %742 : vector<16x64xf32> to vector<16x64xbf16>
    %c0_278 = arith.constant 0 : index
    %c0_279 = arith.constant 0 : index
    %744 = vector.load %arg8[%c0_278, %c0_279] : memref<96x64xbf16, #tpu.memory_space<vmem>>, vector<16x64xbf16>
    tpu.vector_store %arg8[%c0_278, %c0_279], %743 {strides = array<i32>} : memref<96x64xbf16, #tpu.memory_space<vmem>>, vector<16x64xbf16>,
    %745 = vector.extract_strided_slice %734 {offsets = [0, 63], sizes = [16, 1], strides = [1, 1]} : vector<16x64xf32> to vector<16x1xf32>
    %746 = vector.extract_strided_slice %734 {offsets = [0, 0], sizes = [16, 63], strides = [1, 1]} : vector<16x64xf32> to vector<16x63xf32>
    %747 = tpu.concatenate %745, %746 in 1 : vector<16x1xf32>, vector<16x63xf32> -> vector<16x64xf32>
    %748 = vector.broadcast %1 : vector<1x64xf32> to vector<16x64xf32>
    %749 = arith.mulf %748, %747 : vector<16x64xf32>
    %750 = arith.truncf %749 : vector<16x64xf32> to vector<16x64xbf16>
    %c16_280 = arith.constant 16 : index
    %c0_281 = arith.constant 0 : index
    %751 = vector.load %arg8[%c16_280, %c0_281] : memref<96x64xbf16, #tpu.memory_space<vmem>>, vector<16x64xbf16>
    tpu.vector_store %arg8[%c16_280, %c0_281], %750 {strides = array<i32>} : memref<96x64xbf16, #tpu.memory_space<vmem>>, vector<16x64xbf16>,
    %752 = arith.truncf %737 : vector<16x64xf32> to vector<16x64xbf16>
    %c32_282 = arith.constant 32 : index
    %c0_283 = arith.constant 0 : index
    %753 = vector.load %arg8[%c32_282, %c0_283] : memref<96x64xbf16, #tpu.memory_space<vmem>>, vector<16x64xbf16>
    tpu.vector_store %arg8[%c32_282, %c0_283], %752 {strides = array<i32>} : memref<96x64xbf16, #tpu.memory_space<vmem>>, vector<16x64xbf16>,
    %754 = arith.truncf %734 : vector<16x64xf32> to vector<16x64xbf16>
    %c48_284 = arith.constant 48 : index
    %c0_285 = arith.constant 0 : index
    %755 = vector.load %arg8[%c48_284, %c0_285] : memref<96x64xbf16, #tpu.memory_space<vmem>>, vector<16x64xbf16>
    tpu.vector_store %arg8[%c48_284, %c0_285], %754 {strides = array<i32>} : memref<96x64xbf16, #tpu.memory_space<vmem>>, vector<16x64xbf16>,
    %756 = vector.extract_strided_slice %737 {offsets = [0, 1], sizes = [16, 63], strides = [1, 1]} : vector<16x64xf32> to vector<16x63xf32>
    %757 = vector.extract_strided_slice %737 {offsets = [0, 0], sizes = [16, 1], strides = [1, 1]} : vector<16x64xf32> to vector<16x1xf32>
    %758 = tpu.concatenate %756, %757 in 1 : vector<16x63xf32>, vector<16x1xf32> -> vector<16x64xf32>
    %759 = vector.broadcast %2 : vector<1x64xf32> to vector<16x64xf32>
    %760 = arith.mulf %759, %758 : vector<16x64xf32>
    %761 = arith.truncf %760 : vector<16x64xf32> to vector<16x64xbf16>
    %c64_286 = arith.constant 64 : index
    %c0_287 = arith.constant 0 : index
    %762 = vector.load %arg8[%c64_286, %c0_287] : memref<96x64xbf16, #tpu.memory_space<vmem>>, vector<16x64xbf16>
    tpu.vector_store %arg8[%c64_286, %c0_287], %761 {strides = array<i32>} : memref<96x64xbf16, #tpu.memory_space<vmem>>, vector<16x64xbf16>,
    %763 = vector.extract_strided_slice %734 {offsets = [0, 1], sizes = [16, 63], strides = [1, 1]} : vector<16x64xf32> to vector<16x63xf32>
    %764 = vector.extract_strided_slice %734 {offsets = [0, 0], sizes = [16, 1], strides = [1, 1]} : vector<16x64xf32> to vector<16x1xf32>
    %765 = tpu.concatenate %763, %764 in 1 : vector<16x63xf32>, vector<16x1xf32> -> vector<16x64xf32>
    %766 = vector.broadcast %2 : vector<1x64xf32> to vector<16x64xf32>
    %767 = arith.mulf %766, %765 : vector<16x64xf32>
    %768 = arith.truncf %767 : vector<16x64xf32> to vector<16x64xbf16>
    %c80_288 = arith.constant 80 : index
    %c0_289 = arith.constant 0 : index
    %769 = vector.load %arg8[%c80_288, %c0_289] : memref<96x64xbf16, #tpu.memory_space<vmem>>, vector<16x64xbf16>
    tpu.vector_store %arg8[%c80_288, %c0_289], %768 {strides = array<i32>} : memref<96x64xbf16, #tpu.memory_space<vmem>>, vector<16x64xbf16>,
    %c0_290 = arith.constant 0 : index
    %c0_291 = arith.constant 0 : index
    %770 = vector.load %arg8[%c0_290, %c0_291] : memref<96x64xbf16, #tpu.memory_space<vmem>>, vector<96x64xbf16>
    %cst_292 = arith.constant dense<0.000000e+00> : vector<64x64xf32>
    %771 = tpu.matmul %460, %770, %cst_292 {dimension_numbers = #tpu.dot_dimension_numbers<[1], [0], [0], [1], [0, 0, 1, 1], [], []>} : vector<64x96xbf16>, vector<96x64xbf16>, vector<64x64xf32> -> vector<64x64xf32>
    %772 = arith.addf %771, %464 : vector<64x64xf32>
    %773 = vector.extract_strided_slice %772 {offsets = [0, 0], sizes = [48, 64], strides = [1, 1]} : vector<64x64xf32> to vector<48x64xf32>
    %774 = arith.negf %773 : vector<48x64xf32>
    %775 = math.exp %774 : vector<48x64xf32>
    %cst_293 = arith.constant 1.000000e+00 : f32
    %776 = vector.broadcast %cst_293 : f32 to vector<48x64xf32>
    %777 = arith.addf %776, %775 : vector<48x64xf32>
    %778 = arith.divf %776, %777 : vector<48x64xf32>
    %779 = vector.extract_strided_slice %778 {offsets = [0, 0], sizes = [16, 64], strides = [1, 1]} : vector<48x64xf32> to vector<16x64xf32>
    %780 = vector.extract_strided_slice %778 {offsets = [16, 0], sizes = [16, 64], strides = [1, 1]} : vector<48x64xf32> to vector<16x64xf32>
    %781 = vector.extract_strided_slice %778 {offsets = [32, 0], sizes = [16, 64], strides = [1, 1]} : vector<48x64xf32> to vector<16x64xf32>
    %782 = vector.extract_strided_slice %772 {offsets = [48, 0], sizes = [16, 64], strides = [1, 1]} : vector<64x64xf32> to vector<16x64xf32>
    %783 = math.tanh %782 : vector<16x64xf32>
    %784 = arith.mulf %779, %732 : vector<16x64xf32>
    %785 = arith.mulf %780, %783 : vector<16x64xf32>
    %786 = arith.addf %784, %785 : vector<16x64xf32>
    %787 = math.tanh %786 : vector<16x64xf32>
    %788 = arith.mulf %781, %787 : vector<16x64xf32>
    %789 = arith.maximumf %735, %788 : vector<16x64xf32>
    %c6_294 = arith.constant 6 : index
    %c0_295 = arith.constant 0 : index
    %c0_296 = arith.constant 0 : index
    %790 = vector.load %arg9[%c6_294, %c0_295, %c0_296] : memref<8x16x64xf32, #tpu.memory_space<vmem>>, vector<1x16x64xf32>
    %791 = vector.shape_cast %790 : vector<1x16x64xf32> to vector<16x64xf32>
    %792 = vector.extract_strided_slice %791 {offsets = [0, 63], sizes = [16, 1], strides = [1, 1]} : vector<16x64xf32> to vector<16x1xf32>
    %793 = vector.extract_strided_slice %791 {offsets = [0, 0], sizes = [16, 63], strides = [1, 1]} : vector<16x64xf32> to vector<16x63xf32>
    %794 = tpu.concatenate %792, %793 in 1 : vector<16x1xf32>, vector<16x63xf32> -> vector<16x64xf32>
    %795 = vector.broadcast %1 : vector<1x64xf32> to vector<16x64xf32>
    %796 = arith.mulf %795, %794 : vector<16x64xf32>
    %797 = arith.truncf %796 : vector<16x64xf32> to vector<16x64xbf16>
    %c0_297 = arith.constant 0 : index
    %c0_298 = arith.constant 0 : index
    %798 = vector.load %arg8[%c0_297, %c0_298] : memref<96x64xbf16, #tpu.memory_space<vmem>>, vector<16x64xbf16>
    tpu.vector_store %arg8[%c0_297, %c0_298], %797 {strides = array<i32>} : memref<96x64xbf16, #tpu.memory_space<vmem>>, vector<16x64xbf16>,
    %799 = vector.extract_strided_slice %788 {offsets = [0, 63], sizes = [16, 1], strides = [1, 1]} : vector<16x64xf32> to vector<16x1xf32>
    %800 = vector.extract_strided_slice %788 {offsets = [0, 0], sizes = [16, 63], strides = [1, 1]} : vector<16x64xf32> to vector<16x63xf32>
    %801 = tpu.concatenate %799, %800 in 1 : vector<16x1xf32>, vector<16x63xf32> -> vector<16x64xf32>
    %802 = vector.broadcast %1 : vector<1x64xf32> to vector<16x64xf32>
    %803 = arith.mulf %802, %801 : vector<16x64xf32>
    %804 = arith.truncf %803 : vector<16x64xf32> to vector<16x64xbf16>
    %c16_299 = arith.constant 16 : index
    %c0_300 = arith.constant 0 : index
    %805 = vector.load %arg8[%c16_299, %c0_300] : memref<96x64xbf16, #tpu.memory_space<vmem>>, vector<16x64xbf16>
    tpu.vector_store %arg8[%c16_299, %c0_300], %804 {strides = array<i32>} : memref<96x64xbf16, #tpu.memory_space<vmem>>, vector<16x64xbf16>,
    %806 = arith.truncf %791 : vector<16x64xf32> to vector<16x64xbf16>
    %c32_301 = arith.constant 32 : index
    %c0_302 = arith.constant 0 : index
    %807 = vector.load %arg8[%c32_301, %c0_302] : memref<96x64xbf16, #tpu.memory_space<vmem>>, vector<16x64xbf16>
    tpu.vector_store %arg8[%c32_301, %c0_302], %806 {strides = array<i32>} : memref<96x64xbf16, #tpu.memory_space<vmem>>, vector<16x64xbf16>,
    %808 = arith.truncf %788 : vector<16x64xf32> to vector<16x64xbf16>
    %c48_303 = arith.constant 48 : index
    %c0_304 = arith.constant 0 : index
    %809 = vector.load %arg8[%c48_303, %c0_304] : memref<96x64xbf16, #tpu.memory_space<vmem>>, vector<16x64xbf16>
    tpu.vector_store %arg8[%c48_303, %c0_304], %808 {strides = array<i32>} : memref<96x64xbf16, #tpu.memory_space<vmem>>, vector<16x64xbf16>,
    %810 = vector.extract_strided_slice %791 {offsets = [0, 1], sizes = [16, 63], strides = [1, 1]} : vector<16x64xf32> to vector<16x63xf32>
    %811 = vector.extract_strided_slice %791 {offsets = [0, 0], sizes = [16, 1], strides = [1, 1]} : vector<16x64xf32> to vector<16x1xf32>
    %812 = tpu.concatenate %810, %811 in 1 : vector<16x63xf32>, vector<16x1xf32> -> vector<16x64xf32>
    %813 = vector.broadcast %2 : vector<1x64xf32> to vector<16x64xf32>
    %814 = arith.mulf %813, %812 : vector<16x64xf32>
    %815 = arith.truncf %814 : vector<16x64xf32> to vector<16x64xbf16>
    %c64_305 = arith.constant 64 : index
    %c0_306 = arith.constant 0 : index
    %816 = vector.load %arg8[%c64_305, %c0_306] : memref<96x64xbf16, #tpu.memory_space<vmem>>, vector<16x64xbf16>
    tpu.vector_store %arg8[%c64_305, %c0_306], %815 {strides = array<i32>} : memref<96x64xbf16, #tpu.memory_space<vmem>>, vector<16x64xbf16>,
    %817 = vector.extract_strided_slice %788 {offsets = [0, 1], sizes = [16, 63], strides = [1, 1]} : vector<16x64xf32> to vector<16x63xf32>
    %818 = vector.extract_strided_slice %788 {offsets = [0, 0], sizes = [16, 1], strides = [1, 1]} : vector<16x64xf32> to vector<16x1xf32>
    %819 = tpu.concatenate %817, %818 in 1 : vector<16x63xf32>, vector<16x1xf32> -> vector<16x64xf32>
    %820 = vector.broadcast %2 : vector<1x64xf32> to vector<16x64xf32>
    %821 = arith.mulf %820, %819 : vector<16x64xf32>
    %822 = arith.truncf %821 : vector<16x64xf32> to vector<16x64xbf16>
    %c80_307 = arith.constant 80 : index
    %c0_308 = arith.constant 0 : index
    %823 = vector.load %arg8[%c80_307, %c0_308] : memref<96x64xbf16, #tpu.memory_space<vmem>>, vector<16x64xbf16>
    tpu.vector_store %arg8[%c80_307, %c0_308], %822 {strides = array<i32>} : memref<96x64xbf16, #tpu.memory_space<vmem>>, vector<16x64xbf16>,
    %c0_309 = arith.constant 0 : index
    %c0_310 = arith.constant 0 : index
    %824 = vector.load %arg8[%c0_309, %c0_310] : memref<96x64xbf16, #tpu.memory_space<vmem>>, vector<96x64xbf16>
    %cst_311 = arith.constant dense<0.000000e+00> : vector<64x64xf32>
    %825 = tpu.matmul %460, %824, %cst_311 {dimension_numbers = #tpu.dot_dimension_numbers<[1], [0], [0], [1], [0, 0, 1, 1], [], []>} : vector<64x96xbf16>, vector<96x64xbf16>, vector<64x64xf32> -> vector<64x64xf32>
    %826 = arith.addf %825, %464 : vector<64x64xf32>
    %827 = vector.extract_strided_slice %826 {offsets = [0, 0], sizes = [48, 64], strides = [1, 1]} : vector<64x64xf32> to vector<48x64xf32>
    %828 = arith.negf %827 : vector<48x64xf32>
    %829 = math.exp %828 : vector<48x64xf32>
    %cst_312 = arith.constant 1.000000e+00 : f32
    %830 = vector.broadcast %cst_312 : f32 to vector<48x64xf32>
    %831 = arith.addf %830, %829 : vector<48x64xf32>
    %832 = arith.divf %830, %831 : vector<48x64xf32>
    %833 = vector.extract_strided_slice %832 {offsets = [0, 0], sizes = [16, 64], strides = [1, 1]} : vector<48x64xf32> to vector<16x64xf32>
    %834 = vector.extract_strided_slice %832 {offsets = [16, 0], sizes = [16, 64], strides = [1, 1]} : vector<48x64xf32> to vector<16x64xf32>
    %835 = vector.extract_strided_slice %832 {offsets = [32, 0], sizes = [16, 64], strides = [1, 1]} : vector<48x64xf32> to vector<16x64xf32>
    %836 = vector.extract_strided_slice %826 {offsets = [48, 0], sizes = [16, 64], strides = [1, 1]} : vector<64x64xf32> to vector<16x64xf32>
    %837 = math.tanh %836 : vector<16x64xf32>
    %838 = arith.mulf %833, %786 : vector<16x64xf32>
    %839 = arith.mulf %834, %837 : vector<16x64xf32>
    %840 = arith.addf %838, %839 : vector<16x64xf32>
    %841 = math.tanh %840 : vector<16x64xf32>
    %842 = arith.mulf %835, %841 : vector<16x64xf32>
    %843 = arith.maximumf %789, %842 : vector<16x64xf32>
    %c7_313 = arith.constant 7 : index
    %c0_314 = arith.constant 0 : index
    %c0_315 = arith.constant 0 : index
    %844 = vector.load %arg9[%c7_313, %c0_314, %c0_315] : memref<8x16x64xf32, #tpu.memory_space<vmem>>, vector<1x16x64xf32>
    %845 = vector.shape_cast %844 : vector<1x16x64xf32> to vector<16x64xf32>
    %846 = vector.extract_strided_slice %845 {offsets = [0, 63], sizes = [16, 1], strides = [1, 1]} : vector<16x64xf32> to vector<16x1xf32>
    %847 = vector.extract_strided_slice %845 {offsets = [0, 0], sizes = [16, 63], strides = [1, 1]} : vector<16x64xf32> to vector<16x63xf32>
    %848 = tpu.concatenate %846, %847 in 1 : vector<16x1xf32>, vector<16x63xf32> -> vector<16x64xf32>
    %849 = vector.broadcast %1 : vector<1x64xf32> to vector<16x64xf32>
    %850 = arith.mulf %849, %848 : vector<16x64xf32>
    %851 = arith.truncf %850 : vector<16x64xf32> to vector<16x64xbf16>
    %c0_316 = arith.constant 0 : index
    %c0_317 = arith.constant 0 : index
    %852 = vector.load %arg8[%c0_316, %c0_317] : memref<96x64xbf16, #tpu.memory_space<vmem>>, vector<16x64xbf16>
    tpu.vector_store %arg8[%c0_316, %c0_317], %851 {strides = array<i32>} : memref<96x64xbf16, #tpu.memory_space<vmem>>, vector<16x64xbf16>,
    %853 = vector.extract_strided_slice %842 {offsets = [0, 63], sizes = [16, 1], strides = [1, 1]} : vector<16x64xf32> to vector<16x1xf32>
    %854 = vector.extract_strided_slice %842 {offsets = [0, 0], sizes = [16, 63], strides = [1, 1]} : vector<16x64xf32> to vector<16x63xf32>
    %855 = tpu.concatenate %853, %854 in 1 : vector<16x1xf32>, vector<16x63xf32> -> vector<16x64xf32>
    %856 = vector.broadcast %1 : vector<1x64xf32> to vector<16x64xf32>
    %857 = arith.mulf %856, %855 : vector<16x64xf32>
    %858 = arith.truncf %857 : vector<16x64xf32> to vector<16x64xbf16>
    %c16_318 = arith.constant 16 : index
    %c0_319 = arith.constant 0 : index
    %859 = vector.load %arg8[%c16_318, %c0_319] : memref<96x64xbf16, #tpu.memory_space<vmem>>, vector<16x64xbf16>
    tpu.vector_store %arg8[%c16_318, %c0_319], %858 {strides = array<i32>} : memref<96x64xbf16, #tpu.memory_space<vmem>>, vector<16x64xbf16>,
    %860 = arith.truncf %845 : vector<16x64xf32> to vector<16x64xbf16>
    %c32_320 = arith.constant 32 : index
    %c0_321 = arith.constant 0 : index
    %861 = vector.load %arg8[%c32_320, %c0_321] : memref<96x64xbf16, #tpu.memory_space<vmem>>, vector<16x64xbf16>
    tpu.vector_store %arg8[%c32_320, %c0_321], %860 {strides = array<i32>} : memref<96x64xbf16, #tpu.memory_space<vmem>>, vector<16x64xbf16>,
    %862 = arith.truncf %842 : vector<16x64xf32> to vector<16x64xbf16>
    %c48_322 = arith.constant 48 : index
    %c0_323 = arith.constant 0 : index
    %863 = vector.load %arg8[%c48_322, %c0_323] : memref<96x64xbf16, #tpu.memory_space<vmem>>, vector<16x64xbf16>
    tpu.vector_store %arg8[%c48_322, %c0_323], %862 {strides = array<i32>} : memref<96x64xbf16, #tpu.memory_space<vmem>>, vector<16x64xbf16>,
    %864 = vector.extract_strided_slice %845 {offsets = [0, 1], sizes = [16, 63], strides = [1, 1]} : vector<16x64xf32> to vector<16x63xf32>
    %865 = vector.extract_strided_slice %845 {offsets = [0, 0], sizes = [16, 1], strides = [1, 1]} : vector<16x64xf32> to vector<16x1xf32>
    %866 = tpu.concatenate %864, %865 in 1 : vector<16x63xf32>, vector<16x1xf32> -> vector<16x64xf32>
    %867 = vector.broadcast %2 : vector<1x64xf32> to vector<16x64xf32>
    %868 = arith.mulf %867, %866 : vector<16x64xf32>
    %869 = arith.truncf %868 : vector<16x64xf32> to vector<16x64xbf16>
    %c64_324 = arith.constant 64 : index
    %c0_325 = arith.constant 0 : index
    %870 = vector.load %arg8[%c64_324, %c0_325] : memref<96x64xbf16, #tpu.memory_space<vmem>>, vector<16x64xbf16>
    tpu.vector_store %arg8[%c64_324, %c0_325], %869 {strides = array<i32>} : memref<96x64xbf16, #tpu.memory_space<vmem>>, vector<16x64xbf16>,
    %871 = vector.extract_strided_slice %842 {offsets = [0, 1], sizes = [16, 63], strides = [1, 1]} : vector<16x64xf32> to vector<16x63xf32>
    %872 = vector.extract_strided_slice %842 {offsets = [0, 0], sizes = [16, 1], strides = [1, 1]} : vector<16x64xf32> to vector<16x1xf32>
    %873 = tpu.concatenate %871, %872 in 1 : vector<16x63xf32>, vector<16x1xf32> -> vector<16x64xf32>
    %874 = vector.broadcast %2 : vector<1x64xf32> to vector<16x64xf32>
    %875 = arith.mulf %874, %873 : vector<16x64xf32>
    %876 = arith.truncf %875 : vector<16x64xf32> to vector<16x64xbf16>
    %c80_326 = arith.constant 80 : index
    %c0_327 = arith.constant 0 : index
    %877 = vector.load %arg8[%c80_326, %c0_327] : memref<96x64xbf16, #tpu.memory_space<vmem>>, vector<16x64xbf16>
    tpu.vector_store %arg8[%c80_326, %c0_327], %876 {strides = array<i32>} : memref<96x64xbf16, #tpu.memory_space<vmem>>, vector<16x64xbf16>,
    %c0_328 = arith.constant 0 : index
    %c0_329 = arith.constant 0 : index
    %878 = vector.load %arg8[%c0_328, %c0_329] : memref<96x64xbf16, #tpu.memory_space<vmem>>, vector<96x64xbf16>
    %cst_330 = arith.constant dense<0.000000e+00> : vector<64x64xf32>
    %879 = tpu.matmul %460, %878, %cst_330 {dimension_numbers = #tpu.dot_dimension_numbers<[1], [0], [0], [1], [0, 0, 1, 1], [], []>} : vector<64x96xbf16>, vector<96x64xbf16>, vector<64x64xf32> -> vector<64x64xf32>
    %880 = arith.addf %879, %464 : vector<64x64xf32>
    %881 = vector.extract_strided_slice %880 {offsets = [0, 0], sizes = [48, 64], strides = [1, 1]} : vector<64x64xf32> to vector<48x64xf32>
    %882 = arith.negf %881 : vector<48x64xf32>
    %883 = math.exp %882 : vector<48x64xf32>
    %cst_331 = arith.constant 1.000000e+00 : f32
    %884 = vector.broadcast %cst_331 : f32 to vector<48x64xf32>
    %885 = arith.addf %884, %883 : vector<48x64xf32>
    %886 = arith.divf %884, %885 : vector<48x64xf32>
    %887 = vector.extract_strided_slice %886 {offsets = [0, 0], sizes = [16, 64], strides = [1, 1]} : vector<48x64xf32> to vector<16x64xf32>
    %888 = vector.extract_strided_slice %886 {offsets = [16, 0], sizes = [16, 64], strides = [1, 1]} : vector<48x64xf32> to vector<16x64xf32>
    %889 = vector.extract_strided_slice %886 {offsets = [32, 0], sizes = [16, 64], strides = [1, 1]} : vector<48x64xf32> to vector<16x64xf32>
    %890 = vector.extract_strided_slice %880 {offsets = [48, 0], sizes = [16, 64], strides = [1, 1]} : vector<64x64xf32> to vector<16x64xf32>
    %891 = math.tanh %890 : vector<16x64xf32>
    %892 = arith.mulf %887, %840 : vector<16x64xf32>
    %893 = arith.mulf %888, %891 : vector<16x64xf32>
    %894 = arith.addf %892, %893 : vector<16x64xf32>
    %895 = math.tanh %894 : vector<16x64xf32>
    %896 = arith.mulf %889, %895 : vector<16x64xf32>
    %897 = arith.maximumf %843, %896 : vector<16x64xf32>
    %c0_332 = arith.constant 0 : index
    %c0_333 = arith.constant 0 : index
    %c0_334 = arith.constant 0 : index
    %898 = vector.load %arg4[%c0_332, %c0_333, %c0_334] : memref<2x16x64xf32, #tpu.memory_space<vmem>>, vector<1x16x64xf32>
    %899 = vector.shape_cast %898 : vector<1x16x64xf32> to vector<16x64xf32>
    %900 = arith.mulf %897, %899 : vector<16x64xf32>
    %cst_335 = arith.constant dense<0.000000e+00> : vector<64xf32>
    %901 = vector.multi_reduction <add>, %900, %cst_335 [0] : vector<16x64xf32> to vector<64xf32>
    %902 = vector.shape_cast %901 : vector<64xf32> to vector<1x64xf32>
    %c1_336 = arith.constant 1 : index
    %c0_337 = arith.constant 0 : index
    %c0_338 = arith.constant 0 : index
    %903 = vector.load %arg4[%c1_336, %c0_337, %c0_338] : memref<2x16x64xf32, #tpu.memory_space<vmem>>, vector<1x16x64xf32>
    %904 = vector.shape_cast %903 : vector<1x16x64xf32> to vector<16x64xf32>
    %905 = arith.mulf %897, %904 : vector<16x64xf32>
    %cst_339 = arith.constant dense<0.000000e+00> : vector<64xf32>
    %906 = vector.multi_reduction <add>, %905, %cst_339 [0] : vector<16x64xf32> to vector<64xf32>
    %907 = vector.shape_cast %906 : vector<64xf32> to vector<1x64xf32>
    %908 = tpu.concatenate %902, %907 in 0 : vector<1x64xf32>, vector<1x64xf32> -> vector<2x64xf32>
    %c0_340 = arith.constant 0 : index
    %c0_341 = arith.constant 0 : index
    %909 = vector.load %arg5[%c0_340, %c0_341] : memref<64x2xf32, #tpu.memory_space<vmem>>, vector<64x2xf32>
    %cst_342 = arith.constant dense<0.000000e+00> : vector<2x2xf32>
    %910 = tpu.matmul %908, %909, %cst_342 {dimension_numbers = #tpu.dot_dimension_numbers<[1], [0], [0], [1], [0, 0, 1, 1], [], []>} : vector<2x64xf32>, vector<64x2xf32>, vector<2x2xf32> -> vector<2x2xf32>
    %c0_343 = arith.constant 0 : index
    %c0_344 = arith.constant 0 : index
    %911 = vector.load %arg6[%c0_343, %c0_344] : memref<2x1xf32, #tpu.memory_space<vmem>>, vector<2x1xf32>
    %912 = vector.broadcast %911 : vector<2x1xf32> to vector<2x2xf32>
    %913 = arith.addf %910, %912 : vector<2x2xf32>
    %cst_345 = arith.constant dense<0xFF800000> : vector<2xf32>
    %914 = vector.multi_reduction <maximumf>, %913, %cst_345 [0] : vector<2x2xf32> to vector<2xf32>
    %915 = vector.shape_cast %914 : vector<2xf32> to vector<1x2xf32>
    %916 = vector.broadcast %915 : vector<1x2xf32> to vector<2x2xf32>
    %917 = arith.subf %913, %916 : vector<2x2xf32>
    %918 = math.exp %917 : vector<2x2xf32>
    %cst_346 = arith.constant dense<0.000000e+00> : vector<2xf32>
    %919 = vector.multi_reduction <add>, %918, %cst_346 [0] : vector<2x2xf32> to vector<2xf32>
    %920 = vector.shape_cast %919 : vector<2xf32> to vector<1x2xf32>
    %921 = math.log %920 : vector<1x2xf32>
    %922 = arith.addf %915, %921 : vector<1x2xf32>
    %923 = vector.broadcast %922 : vector<1x2xf32> to vector<2x2xf32>
    %924 = arith.subf %913, %923 : vector<2x2xf32>
    %c0_347 = arith.constant 0 : index
    %c0_348 = arith.constant 0 : index
    %925 = vector.load %arg7[%c0_347, %c0_348] : memref<2x2xf32, #tpu.memory_space<vmem>>, vector<2x2xf32>
    tpu.vector_store %arg7[%c0_347, %c0_348], %924 {strides = array<i32>} : memref<2x2xf32, #tpu.memory_space<vmem>>, vector<2x2xf32>,
    return
  }
}

</mosaic_0001>

<bundles_post_ra>
// kernel: nnqlm_forward.1
= control target key start
LH: loop header
LB: loop body
LE: loop exit
PB: predicated region body
PF: predicated region fallthrough
CT: control target
= control target key end

     0   :  { %s6309_s28 = smov 63   ;;  %s6310_s29 = smov 127   ;;  %vm108_vm0 = vcmask 519168   ;;  %v6313_v9 = vmov 0   ;;  %vm133_vm1 = vcmask 515072   ;;  %vm100_vm2 = vcmask 7168   ;;  %s9581_s0 = inlined_call_operand.vmem [shape: f32[8,16,64], index: 0, kind: input, shape index: {}]   ;;  %s9582_s1 = inlined_call_operand.vmem [shape: f32[2,64], index: 1, kind: input, shape index: {}]   ;;  %s9583_s3 = inlined_call_operand.vmem [shape: f32[2,64,1], index: 3, kind: input, shape index: {}]   ;;  %s9584_s2 = inlined_call_operand.vmem [shape: bf16[2,64,96], index: 2, kind: input, shape index: {}]   ;;  %s9585_s6 = inlined_call_operand.vmem [shape: f32[2,1], index: 6, kind: input, shape index: {}]   ;;  %s9586_s5 = inlined_call_operand.vmem [shape: f32[64,2], index: 5, kind: input, shape index: {}]   ;;  %s9587_s4 = inlined_call_operand.vmem [shape: f32[2,16,64], index: 4, kind: input, shape index: {}]   ;;  %s9588_s7 = inlined_call_operand.vmem [shape: f32[2,2], index: 7, kind: output, shape index: {}]  }
   0x1   :  { %v84_v0 = vld [vmem:[%s9581_s0] sm:$0xff]  ;;  %v85_v1 = vld [vmem:[%s9581_s0 + $0x8] sm:$0xff]  ;;  %s6311_s30 = smov 65   ;;  %s6312_s8 = smov 1   ;;  %119 = vst.msk [vmem:[#allocation2 + $0x18] sm:$0xf] %vm108_vm0, %v6313_v9  ;;  %5745 = vset.pattern.permute.xlu0 %v6313_v9  ;;  %5746 = vset.pattern.permute.xlu1 %v6313_v9 }
   0x2   :  { %127 = vrot.lane.b32.xlu1 %v84_v0, %s6309_s28  ;;  %v115_v2 = vpack.c.bf16 %v84_v0, %v84_v0  ;;  %121 = vrot.lane.b32.xlu0 %v84_v0, %s6310_s29  ;;  %v116_v3 = vpack.c.bf16 %v85_v1, %v85_v1  ;;  %v27_v4 = vld [vmem:[%s9582_s1] sm:$0x3]  ;;  %120 = vst.msk [vmem:[#allocation2 + $0x1c] sm:$0xf] %vm108_vm0, %v6313_v9  ;;  %v37_v39 = vld [vmem:[%s9583_s3 + $0x8] sm:$0xff]  ;;  %vm215_vm3 = vcmask 785408  }
   0x3   :  { %88 = vrot.lane.b32.xlu2 %v84_v0, %s6311_s30  ;;  %v6373_v5 = vperm.slane %v27_v4, 1  ;;  %v6389_v10 = vperm.slane %v27_v4, 0  ;;  %v38_v40 = vld [vmem:[%s9583_s3 + $0x10] sm:$0xff]  ;;  %v6419_v46 = vld [vmem:[%s9584_s2] sm:$0xff]  ;;  %v43_v50 = vld [vmem:[%s9583_s3 + $0x38] sm:$0xff] }
   0x4   :  { %117 = vst.msk [vmem:[#allocation2 + $0x10] sm:$0xf] %vm108_vm0, %v115_v2  ;;  %5744 = vset.pattern.permute.xlu2 %v6313_v9  ;;  %v36_v47 = vld [vmem:[%s9583_s3] sm:$0xff]  ;;  %v42_v49 = vld [vmem:[%s9583_s3 + $0x30] sm:$0xff]  ;;  %v6438_v51 = vld [vmem:[%s9584_s2 + $0x8] sm:$0xff] }
   0x5   :  { %118 = vst.msk [vmem:[#allocation2 + $0x14] sm:$0xf] %vm108_vm0, %v116_v3  ;;  %v143_v6 = vmul.f32 0.0, %v6373_v5  ;;  %v111_v11 = vmul.f32 0.0, %v6389_v10  ;;  %v40_v48 = vld [vmem:[%s9583_s3 + $0x20] sm:$0xff]  ;;  %v39_v52 = vld [vmem:[%s9583_s3 + $0x18] sm:$0xff] }
   0x6   :  { %v41_v53 = vld [vmem:[%s9583_s3 + $0x28] sm:$0xff]  ;;  %v6451_v54 = vld [vmem:[%s9584_s2 + $0x10] sm:$0xff]  ;;  %v6458_v55 = vld [vmem:[%s9584_s2 + $0x18] sm:$0xff] }
   0x7   :  { %v6376_v7 = vpack.c.bf16 %v143_v6, %v143_v6  ;;  %v6392_v12 = vpack.c.bf16 %v111_v11, %v111_v11  ;;  %v6465_v56 = vld [vmem:[%s9581_s0 + $0x10] sm:$0xff]  ;;  %v6470_v57 = vld [vmem:[%s9581_s0 + $0x18] sm:$0xff]  ;;  %v6490_v63 = vld [vmem:[%s9581_s0 + $0x20] sm:$0xff] }
   0x8   :  { %v433_v59 = vpack.c.bf16 %v6465_v56, %v6465_v56  ;;  %v434_v60 = vpack.c.bf16 %v6470_v57, %v6470_v57  ;;  %v734_v2 = vpack.c.bf16 %v6490_v63, %v6490_v63 }
   0x9   :  { %145 = vst.msk [vmem:[#allocation2 + $0x28] sm:$0xf] %vm108_vm0, %v6376_v7  ;;  %v5642_v36 = vld [vmem:[#allocation2 + $0x18] sm:$0xff] }
   0xa   :  { %129 = vrot.lane.b32.xlu1 %v85_v1, %s6309_s28  ;;  %123 = vrot.lane.b32.xlu0 %v85_v1, %s6310_s29  ;;  %146 = vst.msk [vmem:[#allocation2 + $0x2c] sm:$0xf] %vm108_vm0, %v6376_v7 }
   0xb   :  { %90 = vrot.lane.b32.xlu2 %v85_v1, %s6311_s30  ;;  %113 = vst.msk [vmem:[#allocation2 + $0x8] sm:$0xf] %vm108_vm0, %v6392_v12  ;;  %v5052_v37 = vld [vmem:[#allocation2 + $0x10] sm:$0xf] }
   0xc   :  { %114 = vst.msk [vmem:[#allocation2 + $0xc] sm:$0xf] %vm108_vm0, %v6392_v12  ;;  %v5641_v38 = vld [vmem:[#allocation2 + $0x10] sm:$0xf0] }
   0xd   :  { %v5053_v41 = vor.u32 %v5641_v38, %v5052_v37  ;;  %435 = vst.msk [vmem:[#allocation2 + $0x10] sm:$0xf] %vm108_vm0, %v433_v59 }
   0xe   :  { %436 = vst.msk [vmem:[#allocation2 + $0x14] sm:$0xf] %vm108_vm0, %v434_v60 }
  0x11   :  { %v5644_v8 = vld [vmem:[#allocation2 + $0x28] sm:$0xff] }
  0x12   :  { %96 = vrot.lane.b32.xlu1 %v85_v1, %s6312_s8  ;;  %94 = vrot.lane.b32.xlu0 %v84_v0, %s6312_s8  ;;  %v6495_v0 = vld [vmem:[%s9581_s0 + $0x28] sm:$0xff] }
  0x13   :  { %230 = vmatpush.bf16.msra.mxu0 %v5644_v8  ;;  %v5640_v42 = vld [vmem:[#allocation2 + $0x8] sm:$0xff]  ;;  %46 = vperm.xlu2 %5744, %v36_v47   ;;  %v735_v3 = vpack.c.bf16 %v6495_v0, %v6495_v0 }
  0x14   :  { %v6503_v6 = vld [vmem:[#allocation2 + $0x10] sm:$0xf] }
  0x15   :  { %v6505_v11 = vld [vmem:[#allocation2 + $0x10] sm:$0xf0]  ;;  %736 = vst.msk [vmem:[#allocation2 + $0x10] sm:$0xf] %vm108_vm0, %v734_v2 }
  0x16   :  { %737 = vst.msk [vmem:[#allocation2 + $0x14] sm:$0xf] %vm108_vm0, %v735_v3 }
  0x1a   :  { %51 = vperm.xlu0 %5745, %v37_v39   ;;  %56 = vperm.xlu1 %5746, %v38_v40  }
  0x1b   :  { %61 = vperm.xlu2 %5744, %v39_v52  }
  0x22   :  { %66 = vperm.xlu1 %5746, %v40_v48   ;;  %76 = vperm.xlu0 %5745, %v42_v49  }
  0x23   :  { %71 = vperm.xlu2 %5744, %v41_v53  }
  0x2a   :  { %81 = vperm.xlu1 %5746, %v43_v50   ;;  %441 = vrot.lane.b32.xlu0 %v6465_v56, %s6310_s29 }
  0x2b   :  { %447 = vrot.lane.b32.xlu2 %v6465_v56, %s6309_s28 }
  0x32   :  { %443 = vrot.lane.b32.xlu1 %v6470_v57, %s6310_s29 }
  0x5d   :  { %v89_v18 = vpop.permute.xlu2 %88 }
  0x65   :  { %v91_v24 = vpop.permute.xlu2 %90 }
  0x6d   :  { %v6483_v61 = vpop.permute.xlu2 %46 }
  0x74   :  { %v128_v13 = vpop.permute.xlu1 %127  ;;  %v122_v14 = vpop.permute.xlu0 %121 }
  0x75   :  { %v134_v15 = vsel %vm133_vm1, %v122_v14, %v128_v13 }
  0x76   :  { %v137_v16 = vmul.f32 %v6373_v5, %v134_v15 }
  0x78   :  { %v139_v17 = vpack.c.bf16 %v137_v16, %v137_v16 }
  0x7a   :  { %141 = vst.msk [vmem:[#allocation2 + $0x20] sm:$0xf] %vm108_vm0, %v139_v17  ;;  %v6515_v17 = vld [vmem:[%s9581_s0 + $0x30] sm:$0xff] }
  0x7c   :  { %v130_v19 = vpop.permute.xlu1 %129  ;;  %v124_v20 = vpop.permute.xlu0 %123 }
  0x7d   :  { %v135_v21 = vsel %vm133_vm1, %v124_v20, %v130_v19  ;;  %v1035_v20 = vpack.c.bf16 %v6515_v17, %v6515_v17 }
  0x7e   :  { %v138_v22 = vmul.f32 %v6373_v5, %v135_v21 }
  0x80   :  { %v140_v23 = vpack.c.bf16 %v138_v22, %v138_v22  ;;  %v6527_v22 = vld [vmem:[#allocation2 + $0x10] sm:$0xff] }
  0x81   :  { %v5060_v33 = vld [vmem:[#allocation2 + $0x20] sm:$0xf]  ;;  %1037 = vst.msk [vmem:[#allocation2 + $0x10] sm:$0xf] %vm108_vm0, %v1035_v20 }
  0x82   :  { %142 = vst.msk [vmem:[#allocation2 + $0x24] sm:$0xf] %vm108_vm0, %v140_v23 }
  0x84   :  { %v97_v25 = vpop.permute.xlu1 %96  ;;  %v95_v26 = vpop.permute.xlu0 %94 }
  0x85   :  { %v102_v27 = vsel %vm100_vm2, %v91_v24, %v97_v25  ;;  %v101_v28 = vsel %vm100_vm2, %v89_v18, %v95_v26  ;;  %v6520_v18 = vld [vmem:[%s9581_s0 + $0x38] sm:$0xff]  ;;  %v6533_v26 = vpop.permute.xlu2 %61 }
  0x86   :  { %v105_v29 = vmul.f32 %v6389_v10, %v102_v27  ;;  %v104_v30 = vmul.f32 %v6389_v10, %v101_v28  ;;  %v1036_v21 = vpack.c.bf16 %v6520_v18, %v6520_v18 }
  0x88   :  { %v107_v31 = vpack.c.bf16 %v105_v29, %v105_v29  ;;  %v106_v32 = vpack.c.bf16 %v104_v30, %v104_v30  ;;  %1038 = vst.msk [vmem:[#allocation2 + $0x14] sm:$0xf] %vm108_vm0, %v1036_v21  ;;  %v5184_v29 = vld [vmem:[%s9581_s0 + $0x40] sm:$0xff]  ;;  %v5185_v30 = vld [vmem:[%s9581_s0 + $0x48] sm:$0xff] }
  0x89   :  { %v5643_v34 = vld [vmem:[#allocation2 + $0x20] sm:$0xf0] }
  0x8a   :  { %110 = vst.msk [vmem:[#allocation2 + $0x4] sm:$0xf] %vm108_vm0, %v107_v31  ;;  %v5061_v35 = vor.u32 %v5643_v34, %v5060_v33  ;;  %v1337_v33 = vpack.c.bf16 %v5185_v30, %v5185_v30 }
  0x8b   :  { %109 = vst.msk [vmem:[#allocation2] sm:$0xf] %vm108_vm0, %v106_v32  ;;  %v1336_v32 = vpack.c.bf16 %v5184_v29, %v5184_v29 }
  0x8c   :  { %231 = vmatpush.bf16.msra.mxu0 %v5061_v35  ;;  %v6501_v4 = vpop.permute.xlu0 %51  ;;  %v6510_v14 = vpop.permute.xlu1 %56 }
  0x90   :  { %232 = vmatpush.bf16.msra.mxu0 %v5642_v36  ;;  %v6543_v36 = vld [vmem:[#allocation2 + $0x10] sm:$0xff] }
  0x91   :  { %v5639_v43 = vld [vmem:[#allocation2] sm:$0xf0]  ;;  %1338 = vst.msk [vmem:[#allocation2 + $0x10] sm:$0xf] %vm108_vm0, %v1336_v32 }
  0x92   :  { %v5044_v44 = vld [vmem:[#allocation2] sm:$0xf]  ;;  %1339 = vst.msk [vmem:[#allocation2 + $0x14] sm:$0xf] %vm108_vm0, %v1337_v33 }
  0x93   :  { %v5045_v45 = vor.u32 %v5639_v43, %v5044_v44  ;;  %v5220_v43 = vld [vmem:[%s9581_s0 + $0x50] sm:$0xff]  ;;  %v5221_v44 = vld [vmem:[%s9581_s0 + $0x58] sm:$0xff] }
  0x94   :  { %233 = vmatpush.bf16.msra.mxu0 %v5053_v41  ;;  %v6552_v39 = vpop.permute.xlu1 %66  ;;  %v1638_v47 = vpack.c.bf16 %v5221_v44, %v5221_v44  ;;  %v6603_v33 = vpop.permute.xlu0 %76  ;;  %v5292_v44 = vld [vmem:[%s9581_s0 + $0x70] sm:$0xff] }
  0x98   :  { %234 = vmatpush.bf16.msra.mxu0 %v5640_v42 }
  0x9c   :  { %235 = vmatpush.bf16.msra.mxu0 %v5045_v45  ;;  %v1637_v45 = vpack.c.bf16 %v5220_v43, %v5220_v43 }
  0x9f   :  { %5066 = vmatmul.msk.bf16.vlgmr.msra.gmra.mxu0 %vm215_vm3, %v6419_v46 }
  0xaf   :  { %5067 = vmatmul.msk.bf16.gmra.mxu0 %vm215_vm3, %v6438_v51 }
  0xbf   :  { %5068 = vmatmul.msk.bf16.gmra.mxu0 %vm215_vm3, %v6451_v54 }
  0xcf   :  { %5069 = vmatmul.msk.bf16.gmra.mxu0 %vm215_vm3, %v6458_v55 }
 0x11c   :  { %v237_v58 = vpop.f32.mrf.mxu0 }
 0x11d   :  { %v238_v62 = vadd.f32 %v237_v58, %v6483_v61  ;;  %v6570_v58 = vld [vmem:[#allocation2 + $0x10] sm:$0xff] }
 0x11e   :  { %1639 = vst.msk [vmem:[#allocation2 + $0x10] sm:$0xf] %vm108_vm0, %v1637_v45 }
 0x11f   :  { %v5070_v8 = vmul.f32 -1.442695, %v238_v62  ;;  %1640 = vst.msk [vmem:[#allocation2 + $0x14] sm:$0xf] %vm108_vm0, %v1638_v47 }
 0x121   :  { %5747 = vpow2.f32 %v5070_v8 }
 0x124   :  { %v239_v1 = vpop.f32.mrf.mxu0 }
 0x125   :  { %v240_v13 = vadd.f32 %v239_v1, %v6501_v4  ;;  %v6579_v1 = vpop.permute.xlu2 %71 }
 0x126   :  { %v6595_v29 = vld [vmem:[#allocation2 + $0x10] sm:$0xff] }
 0x127   :  { %v5071_v15 = vmul.f32 -1.442695, %v240_v13  ;;  %v5748_v24 = vpop.eup %5747  ;;  %v5256_v13 = vld [vmem:[%s9581_s0 + $0x60] sm:$0xff] }
 0x128   :  { %v6531_v25 = vadd.f32 1.0, %v5748_v24  ;;  %v1938_v21 = vpack.c.bf16 %v5256_v13, %v5256_v13 }
 0x129   :  { %5749 = vpow2.f32 %v5071_v15  ;;  %v5257_v15 = vld [vmem:[%s9581_s0 + $0x68] sm:$0xff] }
 0x12a   :  { %1940 = vst.msk [vmem:[#allocation2 + $0x10] sm:$0xf] %vm108_vm0, %v1938_v21  ;;  %vm286_vm5 = vweird.f32 %v6531_v25  ;;  %v290_v43 = vand.u32 2147483647, %v6531_v25 }
 0x12c   :  { %v242_v16 = vpop.f32.mrf.mxu0  ;;  %vm291_vm9 = vcmp.eq.f32.partialorder %v290_v43, 8.507059e+37 }
 0x12d   :  { %v243_v19 = vadd.f32 %v242_v16, %v6510_v14 }
 0x12f   :  { %v5072_v23 = vmul.f32 -1.442695, %v243_v19  ;;  %v5750_v31 = vpop.eup %5749 }
 0x130   :  { %v6549_v38 = vadd.f32 1.0, %v5750_v31 }
 0x131   :  { %5751 = vpow2.f32 %v5072_v23  ;;  %v1939_v23 = vpack.c.bf16 %v5257_v15, %v5257_v15 }
 0x132   :  { %5753 = vrcp.f32 %v6531_v25  ;;  %vm301_vm12 = vweird.f32 %v6549_v38 }
 0x133   :  { %1941 = vst.msk [vmem:[#allocation2 + $0x14] sm:$0xf] %vm108_vm0, %v1939_v23 }
 0x134   :  { %v244_v27 = vpop.f32.mrf.mxu0 }
 0x135   :  { %v245_v28 = vadd.f32 %v244_v27, %v6533_v26 }
 0x137   :  { %v5752_v34 = vpop.eup %5751  ;;  %v5073_v35 = vmul.f32 -1.442695, %v245_v28 }
 0x138   :  { %v6545_v37 = vadd.f32 1.0, %v5752_v34  ;;  %v6554_v41 = vpop.eup %5753 }
 0x139   :  { %5755 = vpow2.f32 %v5073_v35  ;;  %v282_v52 = vmul.f32 %v6554_v41, %v6531_v25  ;;  %vm287_vm4 = vweird.f32 %v6554_v41 }
 0x13a   :  { %5757 = vrcp.f32 %v6545_v37  ;;  %vm6620_vm7 = vmor %vm286_vm5, %vm287_vm4  ;;  %vm316_vm8 = vweird.f32 %v6545_v37  ;;  %v320_v15 = vand.u32 2147483647, %v6545_v37 }
 0x13b   :  { %5759 = vrcp.f32 %v6549_v38  ;;  %v283_v62 = vsub.f32 1.0, %v282_v52 }
 0x13c   :  { %v247_v40 = vpop.f32.mrf.mxu0  ;;  %vm321_vm13 = vcmp.eq.f32.partialorder %v320_v15, 8.507059e+37 }
 0x13d   :  { %v248_v42 = vadd.f32 %v247_v40, %v6552_v39  ;;  %v284_v27 = vmul.f32 %v6554_v41, %v283_v62  ;;  %v292_v40 = vand.u32 2147483648, %v6531_v25  ;;  %v322_v25 = vand.u32 2147483648, %v6545_v37 }
 0x13f   :  { %v5756_v48 = vpop.eup %5755  ;;  %v5074_v49 = vmul.f32 -1.442695, %v248_v42  ;;  %v285_v35 = vadd.f32 %v6554_v41, %v284_v27 }
 0x140   :  { %v6564_v50 = vpop.eup %5757  ;;  %v6568_v53 = vadd.f32 1.0, %v5756_v48  ;;  %v2239_v48 = vpack.c.bf16 %v5292_v44, %v5292_v44  ;;  %v305_v44 = vand.u32 2147483647, %v6549_v38 }
 0x141   :  { %5761 = vpow2.f32 %v5074_v49  ;;  %v312_v59 = vmul.f32 %v6564_v50, %v6545_v37  ;;  %v6577_v60 = vpop.eup %5759  ;;  %vm317_vm6 = vweird.f32 %v6564_v50  ;;  %v5293_v49 = vld [vmem:[%s9581_s0 + $0x78] sm:$0xff]  ;;  %v289_v13 = vsel %vm6620_vm7, %v6554_v41, %v285_v35 }
 0x142   :  { %5763 = vrcp.f32 %v6568_v53  ;;  %v297_v19 = vmul.f32 %v6577_v60, %v6549_v38  ;;  %2241 = vst.msk [vmem:[#allocation2 + $0x10] sm:$0xf] %vm108_vm0, %v2239_v48  ;;  %vm6639_vm10 = vmor %vm316_vm8, %vm317_vm6  ;;  %vm302_vm11 = vweird.f32 %v6577_v60  ;;  %vm331_vm4 = vweird.f32 %v6568_v53 }
 0x143   :  { %v313_v8 = vsub.f32 1.0, %v312_v59  ;;  %vm6662_vm14 = vmor %vm301_vm12, %vm302_vm11  ;;  %vm306_vm6 = vcmp.eq.f32.partialorder %v305_v44, 8.507059e+37  ;;  %vm383_vm12 = vcmask 523264  }
 0x144   :  { %v249_v2 = vpop.f32.mrf.mxu0  ;;  %v298_v32 = vsub.f32 1.0, %v297_v19 }
 0x145   :  { %v250_v3 = vadd.f32 %v249_v2, %v6579_v1  ;;  %v314_v31 = vmul.f32 %v6564_v50, %v313_v8  ;;  %v2240_v2 = vpack.c.bf16 %v5293_v49, %v5293_v49 }
 0x146   :  { %v299_v59 = vmul.f32 %v6577_v60, %v298_v32  ;;  %v307_v32 = vand.u32 2147483648, %v6549_v38 }
 0x147   :  { %v5762_v16 = vpop.eup %5761  ;;  %v5075_v20 = vmul.f32 -1.442695, %v250_v3  ;;  %v315_v47 = vadd.f32 %v6564_v50, %v314_v31 }
 0x148   :  { %v6590_v24 = vpop.eup %5763  ;;  %v6593_v28 = vadd.f32 1.0, %v5762_v16  ;;  %v293_v16 = vor.u32 1.1754944e-38, %v292_v40  ;;  %v300_v31 = vadd.f32 %v6577_v60, %v299_v59  ;;  %v337_v59 = vand.u32 2147483648, %v6568_v53 }
 0x149   :  { %5765 = vpow2.f32 %v5075_v20  ;;  %v327_v30 = vmul.f32 %v6590_v24, %v6568_v53  ;;  %v6643_v21 = vld [vmem:[#allocation2 + $0x10] sm:$0xff]  ;;  %v319_v37 = vsel %vm6639_vm10, %v6564_v50, %v315_v47  ;;  %vm332_vm15 = vweird.f32 %v6590_v24 }
 0x14a   :  { %5767 = vrcp.f32 %v6593_v28  ;;  %2242 = vst.msk [vmem:[#allocation2 + $0x14] sm:$0xf] %vm108_vm0, %v2240_v2  ;;  %v294_v27 = vsel %vm291_vm9, %v293_v16, %v289_v13  ;;  %v308_v62 = vor.u32 1.1754944e-38, %v307_v32  ;;  %v335_v2 = vand.u32 2147483647, %v6568_v53  ;;  %vm333_vm7 = vmor %vm331_vm4, %vm332_vm15 }
 0x14b   :  { %v328_v45 = vsub.f32 1.0, %v327_v30  ;;  %v323_v30 = vor.u32 1.1754944e-38, %v322_v25  ;;  %vm346_vm8 = vweird.f32 %v6593_v28  ;;  %v350_v20 = vand.u32 2147483647, %v6593_v28 }
 0x14c   :  { %v252_v34 = vpop.f32.mrf.mxu0  ;;  %vm336_vm10 = vcmp.eq.f32.partialorder %v335_v2, 8.507059e+37 }
 0x14d   :  { %v253_v42 = vadd.f32 %v252_v34, %v6603_v33  ;;  %v329_v41 = vmul.f32 %v6590_v24, %v328_v45  ;;  %v6655_v34 = vpop.permute.xlu1 %81  ;;  %v373_v45 = vmul.f32 0.0, %v294_v27  ;;  %vm351_vm11 = vcmp.eq.f32.partialorder %v350_v20, 8.507059e+37 }
 0x14f   :  { %v5766_v52 = vpop.eup %5765  ;;  %5769 = vtanh.f32 %v253_v42  ;;  %v324_v42 = vsel %vm321_vm13, %v323_v30, %v319_v37  ;;  %v330_v49 = vadd.f32 %v6590_v24, %v329_v41  ;;  %v338_v37 = vor.u32 1.1754944e-38, %v337_v59 }
 0x150   :  { %v6625_v3 = vpop.eup %5767  ;;  %v6627_v8 = vadd.f32 1.0, %v5766_v52  ;;  %v304_v52 = vsel %vm6662_vm14, %v6577_v60, %v300_v31  ;;  %v352_v60 = vand.u32 2147483648, %v6593_v28 }
 0x151   :  { %v342_v19 = vmul.f32 %v6625_v3, %v6593_v28  ;;  %vm347_vm5 = vweird.f32 %v6625_v3  ;;  %v309_v16 = vsel %vm306_vm6, %v308_v62, %v304_v52 }
 0x152   :  { %5771 = vrcp.f32 %v6627_v8  ;;  %vm348_vm9 = vmor %vm346_vm8, %vm347_vm5  ;;  %v353_v31 = vor.u32 1.1754944e-38, %v352_v60  ;;  %v374_v32 = vmul.f32 0.0, %v309_v16  ;;  %vm361_vm14 = vweird.f32 %v6627_v8  ;;  %v442_v60 = vpop.permute.xlu0 %441 }
 0x153   :  { %v343_v23 = vsub.f32 1.0, %v342_v19  ;;  %v334_v19 = vsel %vm333_vm7, %v6590_v24, %v330_v49 }
 0x154   :  { %v254_v35 = vpop.f32.mrf.mxu0  ;;  %v339_v30 = vsel %vm336_vm10, %v338_v37, %v334_v19 }
 0x155   :  { %v5770_v50 = vpop.eup %5769  ;;  %v344_v40 = vmul.f32 %v6625_v3, %v343_v23  ;;  %v255_v43 = vadd.f32 %v254_v35, %v6655_v34 }
 0x156   :  { %v375_v47 = vmul.f32 %v5770_v50, %v324_v42 }
 0x157   :  { %5773 = vtanh.f32 %v255_v43  ;;  %v345_v13 = vadd.f32 %v6625_v3, %v344_v40  ;;  %v367_v43 = vand.u32 2147483648, %v6627_v8 }
 0x158   :  { %v5772_v38 = vpop.eup %5771  ;;  %v6672_v25 = vadd.f32 %v375_v47, %v373_v45 }
 0x159   :  { %v357_v15 = vmul.f32 %v5772_v38, %v6627_v8  ;;  %v349_v23 = vsel %vm348_vm9, %v6625_v3, %v345_v13  ;;  %vm362_vm13 = vweird.f32 %v5772_v38  ;;  %v365_v3 = vand.u32 2147483647, %v6627_v8 }
 0x15a   :  { %5775 = vtanh.f32 %v6672_v25  ;;  %v354_v24 = vsel %vm351_vm11, %v353_v31, %v349_v23  ;;  %vm363_vm15 = vmor %vm361_vm14, %vm362_vm13  ;;  %v368_v47 = vor.u32 1.1754944e-38, %v367_v43 }
 0x15b   :  { %v358_v53 = vsub.f32 1.0, %v357_v15  ;;  %vm366_vm4 = vcmp.eq.f32.partialorder %v365_v3, 8.507059e+37  ;;  %v448_v15 = vpop.permute.xlu2 %447 }
 0x15d   :  { %v5774_v41 = vpop.eup %5773  ;;  %v359_v27 = vmul.f32 %v5772_v38, %v358_v53  ;;  %v444_v53 = vpop.permute.xlu1 %443 }
 0x15e   :  { %v376_v35 = vmul.f32 %v5774_v41, %v339_v30 }
 0x15f   :  { %v360_v42 = vadd.f32 %v5772_v38, %v359_v27 }
 0x160   :  { %v5776_v50 = vpop.eup %5775  ;;  %v6685_v40 = vadd.f32 %v376_v35, %v374_v32 }
 0x161   :  { %v381_v28 = vmul.f32 %v5776_v50, %v354_v24  ;;  %v364_v45 = vsel %vm363_vm15, %v5772_v38, %v360_v42 }
 0x162   :  { %5777 = vtanh.f32 %v6685_v40  ;;  %v369_v49 = vsel %vm366_vm4, %v368_v47, %v364_v45 }
 0x163   :  { %467 = vrot.lane.b32.xlu1 %v381_v28, %s6309_s28  ;;  %384 = vst.msk [vmem:[#allocation3] sm:$0xff] %vm383_vm12, %v381_v28  ;;  %v437_v44 = vpack.c.bf16 %v381_v28, %v381_v28  ;;  %461 = vrot.lane.b32.xlu2 %v381_v28, %s6310_s29 }
 0x165   :  { %439 = vst.msk [vmem:[#allocation2 + $0x18] sm:$0xf] %vm108_vm0, %v437_v44 }
 0x168   :  { %v5778_v48 = vpop.eup %5777 }
 0x169   :  { %v382_v52 = vmul.f32 %v5778_v48, %v369_v49 }
 0x16a   :  { %v2551_v59 = vld [vmem:[#allocation3] sm:$0xff] }
 0x16b   :  { %463 = vrot.lane.b32.xlu0 %v382_v52, %s6310_s29  ;;  %385 = vst.msk [vmem:[#allocation3 + $0x8] sm:$0xff] %vm383_vm12, %v382_v52  ;;  %v438_v8 = vpack.c.bf16 %v382_v52, %v382_v52  ;;  %413 = vrot.lane.b32.xlu1 %v381_v28, %s6311_s30  ;;  %v2577_v62 = vpack.c.bf16 %v2551_v59, %v2551_v59 }
 0x16c   :  { %469 = vrot.lane.b32.xlu2 %v382_v52, %s6309_s28 }
 0x16d   :  { %440 = vst.msk [vmem:[#allocation2 + $0x1c] sm:$0xf] %vm108_vm0, %v438_v8 }
 0x16e   :  { %2579 = vst.msk [vmem:[#allocation2 + $0x10] sm:$0xf] %vm108_vm0, %v2577_v62 }
 0x172   :  { %v2552_v38 = vld [vmem:[#allocation3 + $0x8] sm:$0xff] }
 0x173   :  { %449 = vrot.lane.b32.xlu0 %v6470_v57, %s6309_s28  ;;  %421 = vrot.lane.b32.xlu1 %v382_v52, %s6312_s8  ;;  %v2578_v13 = vpack.c.bf16 %v2552_v38, %v2552_v38 }
 0x174   :  { %391 = vrot.lane.b32.xlu2 %v6465_v56, %s6311_s30 }
 0x175   :  { %v6701_v2 = vld [vmem:[#allocation2 + $0x10] sm:$0xff] }
 0x176   :  { %2580 = vst.msk [vmem:[#allocation2 + $0x14] sm:$0xf] %vm108_vm0, %v2578_v13 }
 0x17b   :  { %419 = vrot.lane.b32.xlu0 %v381_v28, %s6312_s8  ;;  %397 = vrot.lane.b32.xlu1 %v6465_v56, %s6312_s8  ;;  %v453_v56 = vsel %vm133_vm1, %v442_v60, %v448_v15 }
 0x17c   :  { %415 = vrot.lane.b32.xlu2 %v382_v52, %s6311_s30  ;;  %v455_v16 = vmul.f32 %v453_v56, %v6373_v5 }
 0x17e   :  { %v457_v19 = vpack.c.bf16 %v455_v16, %v455_v16 }
 0x180   :  { %459 = vst.msk [vmem:[#allocation2 + $0x20] sm:$0xf] %vm108_vm0, %v457_v19 }
 0x183   :  { %393 = vrot.lane.b32.xlu0 %v6470_v57, %s6311_s30  ;;  %742 = vrot.lane.b32.xlu1 %v6490_v63, %s6310_s29 }
 0x184   :  { %399 = vrot.lane.b32.xlu2 %v6470_v57, %s6312_s8 }
 0x18b   :  { %748 = vrot.lane.b32.xlu0 %v6490_v63, %s6309_s28 }
 0x18c   :  { %744 = vrot.lane.b32.xlu2 %v6495_v0, %s6310_s29 }
 0x1bd   :  { %v462_v20 = vpop.permute.xlu2 %461 }
 0x1c6   :  { %v470_v37 = vpop.permute.xlu2 %469 }
 0x1ce   :  { %v392_v30 = vpop.permute.xlu2 %391 }
 0x1d5   :  { %v468_v41 = vpop.permute.xlu1 %467 }
 0x1d6   :  { %v473_v57 = vsel %vm133_vm1, %v462_v20, %v468_v41  ;;  %v416_v42 = vpop.permute.xlu2 %415  ;;  %v5096_v20 = vld [vmem:[#allocation2 + $0x20] sm:$0xf] }
 0x1d7   :  { %v475_v23 = vmul.f32 %v473_v57, %v6373_v5 }
 0x1d9   :  { %v477_v27 = vpack.c.bf16 %v475_v23, %v475_v23 }
 0x1db   :  { %479 = vst.msk [vmem:[#allocation2 + $0x28] sm:$0xf] %vm108_vm0, %v477_v27 }
 0x1dd   :  { %v464_v31 = vpop.permute.xlu0 %463  ;;  %v414_v32 = vpop.permute.xlu1 %413 }
 0x1de   :  { %v474_v35 = vsel %vm133_vm1, %v464_v31, %v470_v37  ;;  %v400_v41 = vpop.permute.xlu2 %399 }
 0x1df   :  { %v476_v50 = vmul.f32 %v474_v35, %v6373_v5 }
 0x1e1   :  { %v478_v24 = vpack.c.bf16 %v476_v50, %v476_v50 }
 0x1e2   :  { %v5100_v52 = vld [vmem:[#allocation2 + $0x28] sm:$0xf] }
 0x1e3   :  { %480 = vst.msk [vmem:[#allocation2 + $0x2c] sm:$0xf] %vm108_vm0, %v478_v24 }
 0x1e5   :  { %v450_v28 = vpop.permute.xlu0 %449  ;;  %v422_v43 = vpop.permute.xlu1 %421 }
 0x1e6   :  { %v454_v3 = vsel %vm133_vm1, %v444_v53, %v450_v28  ;;  %v426_v44 = vsel %vm100_vm2, %v416_v42, %v422_v43 }
 0x1e7   :  { %v456_v45 = vmul.f32 %v454_v3, %v6373_v5  ;;  %v428_v47 = vmul.f32 %v426_v44, %v6389_v10 }
 0x1e9   :  { %v458_v48 = vpack.c.bf16 %v456_v45, %v456_v45  ;;  %v430_v49 = vpack.c.bf16 %v428_v47, %v428_v47 }
 0x1ea   :  { %v5650_v59 = vld [vmem:[#allocation2 + $0x28] sm:$0xf0] }
 0x1eb   :  { %460 = vst.msk [vmem:[#allocation2 + $0x24] sm:$0xf] %vm108_vm0, %v458_v48  ;;  %v5101_v8 = vor.u32 %v5650_v59, %v5100_v52 }
 0x1ec   :  { %432 = vst.msk [vmem:[#allocation2 + $0xc] sm:$0xf] %vm108_vm0, %v430_v49 }
 0x1ed   :  { %v420_v62 = vpop.permute.xlu0 %419  ;;  %v398_v38 = vpop.permute.xlu1 %397  ;;  %531 = vmatpush.bf16.msra.mxu1 %v5101_v8 }
 0x1ee   :  { %v425_v13 = vsel %vm100_vm2, %v414_v32, %v420_v62  ;;  %v403_v15 = vsel %vm100_vm2, %v392_v30, %v398_v38  ;;  %v5648_v30 = vld [vmem:[#allocation2 + $0x18] sm:$0xff]  ;;  %v5089_v32 = vor.u32 %v6505_v11, %v6503_v6 }
 0x1ef   :  { %v427_v60 = vmul.f32 %v425_v13, %v6389_v10  ;;  %v405_v56 = vmul.f32 %v403_v15, %v6389_v10 }
 0x1f1   :  { %v429_v16 = vpack.c.bf16 %v427_v60, %v427_v60  ;;  %v407_v19 = vpack.c.bf16 %v405_v56, %v405_v56 }
 0x1f2   :  { %v5649_v53 = vld [vmem:[#allocation2 + $0x20] sm:$0xf0] }
 0x1f3   :  { %431 = vst.msk [vmem:[#allocation2 + $0x8] sm:$0xf] %vm108_vm0, %v429_v16  ;;  %v5097_v37 = vor.u32 %v5649_v53, %v5096_v20  ;;  %v5646_v50 = vld [vmem:[#allocation2 + $0x8] sm:$0xf0] }
 0x1f4   :  { %409 = vst.msk [vmem:[#allocation2] sm:$0xf] %vm108_vm0, %v407_v19 }
 0x1f5   :  { %v394_v57 = vpop.permute.xlu0 %393  ;;  %532 = vmatpush.bf16.msra.mxu1 %v5097_v37 }
 0x1f6   :  { %v404_v23 = vsel %vm100_vm2, %v394_v57, %v400_v41 }
 0x1f7   :  { %v406_v27 = vmul.f32 %v404_v23, %v6389_v10 }
 0x1f9   :  { %v408_v31 = vpack.c.bf16 %v406_v27, %v406_v27  ;;  %533 = vmatpush.bf16.msra.mxu1 %v5648_v30 }
 0x1fa   :  { %v5084_v35 = vld [vmem:[#allocation2 + $0x8] sm:$0xf] }
 0x1fb   :  { %410 = vst.msk [vmem:[#allocation2 + $0x4] sm:$0xf] %vm108_vm0, %v408_v31  ;;  %v5085_v24 = vor.u32 %v5646_v50, %v5084_v35  ;;  %v5080_v42 = vld [vmem:[#allocation2] sm:$0xf] }
 0x1fd   :  { %534 = vmatpush.bf16.msra.mxu1 %v5089_v32 }
 0x201   :  { %535 = vmatpush.bf16.msra.mxu1 %v5085_v24 }
 0x202   :  { %v5645_v28 = vld [vmem:[#allocation2] sm:$0xf0] }
 0x203   :  { %v5081_v43 = vor.u32 %v5645_v28, %v5080_v42 }
 0x205   :  { %536 = vmatpush.bf16.msra.mxu1 %v5081_v43 }
 0x208   :  { %5102 = vmatmul.msk.bf16.vlgmr.msra.gmra.mxu1 %vm215_vm3, %v6419_v46 }
 0x218   :  { %5103 = vmatmul.msk.bf16.gmra.mxu1 %vm215_vm3, %v6438_v51 }
 0x228   :  { %5104 = vmatmul.msk.bf16.gmra.mxu1 %vm215_vm3, %v6451_v54 }
 0x238   :  { %5105 = vmatmul.msk.bf16.gmra.mxu1 %vm215_vm3, %v6458_v55 }
 0x285   :  { %v538_v6 = vpop.f32.mrf.mxu1 }
 0x286   :  { %v539_v11 = vadd.f32 %v538_v6, %v6483_v61 }
 0x288   :  { %v5106_v44 = vmul.f32 -1.442695, %v539_v11 }
 0x28a   :  { %5779 = vpow2.f32 %v5106_v44 }
 0x28d   :  { %v540_v3 = vpop.f32.mrf.mxu1 }
 0x28e   :  { %v541_v45 = vadd.f32 %v540_v3, %v6501_v4 }
 0x290   :  { %v5107_v47 = vmul.f32 -1.442695, %v541_v45  ;;  %v5780_v51 = vpop.eup %5779 }
 0x291   :  { %v576_v54 = vadd.f32 1.0, %v5780_v51 }
 0x292   :  { %5781 = vpow2.f32 %v5107_v47 }
 0x293   :  { %v593_v45 = vand.u32 2147483648, %v576_v54  ;;  %vm587_vm6 = vweird.f32 %v576_v54 }
 0x295   :  { %v543_v48 = vpop.f32.mrf.mxu1 }
 0x296   :  { %v544_v46 = vadd.f32 %v543_v48, %v6510_v14  ;;  %v591_v48 = vand.u32 2147483647, %v576_v54 }
 0x298   :  { %v5108_v49 = vmul.f32 -1.442695, %v544_v46  ;;  %v5782_v59 = vpop.eup %5781  ;;  %vm592_vm10 = vcmp.eq.f32.partialorder %v591_v48, 8.507059e+37 }
 0x299   :  { %v6763_v13 = vadd.f32 1.0, %v5782_v59 }
 0x29a   :  { %5783 = vpow2.f32 %v5108_v49 }
 0x29b   :  { %5785 = vrcp.f32 %v576_v54  ;;  %vm602_vm14 = vweird.f32 %v6763_v13 }
 0x29d   :  { %v545_v52 = vpop.f32.mrf.mxu1 }
 0x29e   :  { %v546_v55 = vadd.f32 %v545_v52, %v6533_v26 }
 0x2a0   :  { %v5784_v8 = vpop.eup %5783  ;;  %v5109_v62 = vmul.f32 -1.442695, %v546_v55 }
 0x2a1   :  { %v6761_v38 = vadd.f32 1.0, %v5784_v8  ;;  %v5786_v60 = vpop.eup %5785 }
 0x2a2   :  { %5787 = vpow2.f32 %v5109_v62  ;;  %v583_v53 = vmul.f32 %v5786_v60, %v576_v54  ;;  %vm588_vm5 = vweird.f32 %v5786_v60 }
 0x2a3   :  { %5789 = vrcp.f32 %v6761_v38  ;;  %vm6785_vm8 = vmor %vm587_vm6, %vm588_vm5  ;;  %v623_v59 = vand.u32 2147483648, %v6761_v38  ;;  %vm617_vm9 = vweird.f32 %v6761_v38 }
 0x2a4   :  { %5791 = vrcp.f32 %v6763_v13  ;;  %v584_v23 = vsub.f32 1.0, %v583_v53 }
 0x2a5   :  { %v548_v15 = vpop.f32.mrf.mxu1 }
 0x2a6   :  { %v549_v56 = vadd.f32 %v548_v15, %v6552_v39  ;;  %v585_v42 = vmul.f32 %v5786_v60, %v584_v23  ;;  %v621_v15 = vand.u32 2147483647, %v6761_v38  ;;  %v624_v23 = vor.u32 1.1754944e-38, %v623_v59 }
 0x2a8   :  { %v5788_v16 = vpop.eup %5787  ;;  %v5110_v19 = vmul.f32 -1.442695, %v549_v56  ;;  %v586_v44 = vadd.f32 %v5786_v60, %v585_v42  ;;  %v594_v56 = vor.u32 1.1754944e-38, %v593_v45  ;;  %vm622_vm15 = vcmp.eq.f32.partialorder %v621_v15, 8.507059e+37 }
 0x2a9   :  { %v5790_v20 = vpop.eup %5789  ;;  %v6768_v37 = vadd.f32 1.0, %v5788_v16 }
 0x2aa   :  { %5793 = vpow2.f32 %v5110_v19  ;;  %v613_v41 = vmul.f32 %v5790_v20, %v6761_v38  ;;  %v6772_v57 = vpop.eup %5791  ;;  %vm618_vm7 = vweird.f32 %v5790_v20  ;;  %v590_v54 = vsel %vm6785_vm8, %v5786_v60, %v586_v44 }
 0x2ab   :  { %5795 = vrcp.f32 %v6768_v37  ;;  %v598_v35 = vmul.f32 %v6772_v57, %v6763_v13  ;;  %vm6801_vm11 = vmor %vm617_vm9, %vm618_vm7  ;;  %vm603_vm13 = vweird.f32 %v6772_v57  ;;  %v595_v38 = vsel %vm592_vm10, %v594_v56, %v590_v54 }
 0x2ac   :  { %v614_v31 = vsub.f32 1.0, %v613_v41  ;;  %vm6818_vm4 = vmor %vm602_vm14, %vm603_vm13  ;;  %v638_v45 = vand.u32 2147483648, %v6768_v37  ;;  %vm632_vm6 = vweird.f32 %v6768_v37 }
 0x2ad   :  { %v550_v27 = vpop.f32.mrf.mxu1  ;;  %v599_v11 = vsub.f32 1.0, %v598_v35 }
 0x2ae   :  { %v551_v30 = vadd.f32 %v550_v27, %v6579_v1  ;;  %v615_v6 = vmul.f32 %v5790_v20, %v614_v31  ;;  %v639_v59 = vor.u32 1.1754944e-38, %v638_v45 }
 0x2af   :  { %v600_v55 = vmul.f32 %v6772_v57, %v599_v11 }
 0x2b0   :  { %v5794_v32 = vpop.eup %5793  ;;  %v5111_v50 = vmul.f32 -1.442695, %v551_v30  ;;  %v616_v49 = vadd.f32 %v5790_v20, %v615_v6  ;;  %v608_v30 = vand.u32 2147483648, %v6763_v13  ;;  %v674_v6 = vmul.f32 %v595_v38, %v6672_v25 }
 0x2b1   :  { %v6777_v24 = vpop.eup %5795  ;;  %v6779_v28 = vadd.f32 1.0, %v5794_v32  ;;  %v601_v27 = vadd.f32 %v6772_v57, %v600_v55  ;;  %v636_v25 = vand.u32 2147483647, %v6768_v37 }
 0x2b2   :  { %5797 = vpow2.f32 %v5111_v50  ;;  %v628_v43 = vmul.f32 %v6777_v24, %v6768_v37  ;;  %v620_v60 = vsel %vm6801_vm11, %v5790_v20, %v616_v49  ;;  %v606_v20 = vand.u32 2147483647, %v6763_v13 }
 0x2b3   :  { %5799 = vrcp.f32 %v6779_v28  ;;  %v625_v50 = vsel %vm622_vm15, %v624_v23, %v620_v60  ;;  %vm633_vm5 = vweird.f32 %v6777_v24  ;;  %v605_v44 = vsel %vm6818_vm4, %v6772_v57, %v601_v27 }
 0x2b4   :  { %v629_v46 = vsub.f32 1.0, %v628_v43  ;;  %vm607_vm8 = vcmp.eq.f32.partialorder %v606_v20, 8.507059e+37  ;;  %vm634_vm9 = vmor %vm632_vm6, %vm633_vm5  ;;  %v653_v57 = vand.u32 2147483648, %v6779_v28  ;;  %vm647_vm10 = vweird.f32 %v6779_v28 }
 0x2b5   :  { %v553_v3 = vpop.f32.mrf.mxu1  ;;  %v651_v55 = vand.u32 2147483647, %v6779_v28  ;;  %vm637_vm13 = vcmp.eq.f32.partialorder %v636_v25, 8.507059e+37 }
 0x2b6   :  { %v554_v47 = vadd.f32 %v553_v3, %v6603_v33  ;;  %v630_v53 = vmul.f32 %v6777_v24, %v629_v46  ;;  %v654_v19 = vor.u32 1.1754944e-38, %v653_v57 }
 0x2b7   :  { %vm652_vm14 = vcmp.eq.f32.partialorder %v651_v55, 8.507059e+37 }
 0x2b8   :  { %v5798_v51 = vpop.eup %5797  ;;  %5801 = vtanh.f32 %v554_v47  ;;  %v631_v3 = vadd.f32 %v6777_v24, %v630_v53  ;;  %v609_v47 = vor.u32 1.1754944e-38, %v608_v30 }
 0x2b9   :  { %v6791_v8 = vpop.eup %5799  ;;  %v6793_v62 = vadd.f32 1.0, %v5798_v51 }
 0x2ba   :  { %v643_v16 = vmul.f32 %v6791_v8, %v6779_v28  ;;  %vm648_vm7 = vweird.f32 %v6791_v8  ;;  %v610_v51 = vsel %vm607_vm8, %v609_v47, %v605_v44  ;;  %v635_v52 = vsel %vm634_vm9, %v6777_v24, %v631_v3  ;;  %v749_v3 = vpop.permute.xlu0 %748  ;;  %v743_v44 = vpop.permute.xlu1 %742 }
 0x2bb   :  { %5803 = vrcp.f32 %v6793_v62  ;;  %vm649_vm11 = vmor %vm647_vm10, %vm648_vm7  ;;  %v675_v60 = vmul.f32 %v610_v51, %v6685_v40  ;;  %v668_v27 = vand.u32 2147483648, %v6793_v62  ;;  %vm662_vm4 = vweird.f32 %v6793_v62  ;;  %v745_v47 = vpop.permute.xlu2 %744 }
 0x2bc   :  { %v644_v41 = vsub.f32 1.0, %v643_v16  ;;  %v640_v16 = vsel %vm637_vm13, %v639_v59, %v635_v52 }
 0x2bd   :  { %v555_v31 = vpop.f32.mrf.mxu1 }
 0x2be   :  { %v5802_v32 = vpop.eup %5801  ;;  %v645_v35 = vmul.f32 %v6791_v8, %v644_v41  ;;  %v556_v42 = vadd.f32 %v555_v31, %v6655_v34  ;;  %v669_v31 = vor.u32 1.1754944e-38, %v668_v27 }
 0x2bf   :  { %v676_v11 = vmul.f32 %v5802_v32, %v625_v50 }
 0x2c0   :  { %5805 = vtanh.f32 %v556_v42  ;;  %v646_v46 = vadd.f32 %v6791_v8, %v645_v35 }
 0x2c1   :  { %v5804_v13 = vpop.eup %5803  ;;  %v6829_v48 = vadd.f32 %v676_v11, %v674_v6 }
 0x2c2   :  { %v658_v49 = vmul.f32 %v5804_v13, %v6793_v62  ;;  %v650_v15 = vsel %vm649_vm11, %v6791_v8, %v646_v46  ;;  %vm663_vm15 = vweird.f32 %v5804_v13  ;;  %v666_v8 = vand.u32 2147483647, %v6793_v62 }
 0x2c3   :  { %5807 = vtanh.f32 %v6829_v48  ;;  %v655_v38 = vsel %vm652_vm14, %v654_v19, %v650_v15  ;;  %vm664_vm5 = vmor %vm662_vm4, %vm663_vm15 }
 0x2c4   :  { %v659_v37 = vsub.f32 1.0, %v658_v49  ;;  %vm667_vm6 = vcmp.eq.f32.partialorder %v666_v8, 8.507059e+37 }
 0x2c6   :  { %v5806_v54 = vpop.eup %5805  ;;  %v660_v56 = vmul.f32 %v5804_v13, %v659_v37 }
 0x2c7   :  { %v677_v53 = vmul.f32 %v5806_v54, %v640_v16 }
 0x2c8   :  { %v661_v23 = vadd.f32 %v5804_v13, %v660_v56 }
 0x2c9   :  { %v5808_v41 = vpop.eup %5807  ;;  %v6843_v24 = vadd.f32 %v677_v53, %v675_v60 }
 0x2ca   :  { %v682_v28 = vmul.f32 %v5808_v41, %v655_v38  ;;  %v665_v30 = vsel %vm664_vm5, %v5804_v13, %v661_v23 }
 0x2cb   :  { %5809 = vtanh.f32 %v6843_v24  ;;  %v670_v35 = vsel %vm667_vm6, %v669_v31, %v665_v30 }
 0x2cc   :  { %768 = vrot.lane.b32.xlu2 %v682_v28, %s6309_s28  ;;  %685 = vst.msk [vmem:[#allocation3 + $0x10] sm:$0xff] %vm383_vm12, %v682_v28  ;;  %v738_v40 = vpack.c.bf16 %v682_v28, %v682_v28  ;;  %762 = vrot.lane.b32.xlu0 %v682_v28, %s6310_s29 }
 0x2ce   :  { %740 = vst.msk [vmem:[#allocation2 + $0x18] sm:$0xf] %vm108_vm0, %v738_v40 }
 0x2d1   :  { %v5810_v32 = vpop.eup %5809 }
 0x2d2   :  { %v683_v50 = vmul.f32 %v5810_v32, %v670_v35 }
 0x2d3   :  { %v2840_v42 = vld [vmem:[#allocation3 + $0x10] sm:$0xff] }
 0x2d4   :  { %764 = vrot.lane.b32.xlu1 %v683_v50, %s6310_s29  ;;  %686 = vst.msk [vmem:[#allocation3 + $0x18] sm:$0xff] %vm383_vm12, %v683_v50  ;;  %v739_v62 = vpack.c.bf16 %v683_v50, %v683_v50  ;;  %714 = vrot.lane.b32.xlu2 %v682_v28, %s6311_s30  ;;  %v2886_v20 = vpack.c.bf16 %v2840_v42, %v2840_v42 }
 0x2d5   :  { %770 = vrot.lane.b32.xlu0 %v683_v50, %s6309_s28 }
 0x2d6   :  { %741 = vst.msk [vmem:[#allocation2 + $0x1c] sm:$0xf] %vm108_vm0, %v739_v62 }
 0x2d7   :  { %2888 = vst.msk [vmem:[#allocation2 + $0x10] sm:$0xf] %vm108_vm0, %v2886_v20 }
 0x2db   :  { %v2841_v43 = vld [vmem:[#allocation3 + $0x18] sm:$0xff] }
 0x2dc   :  { %750 = vrot.lane.b32.xlu1 %v6495_v0, %s6309_s28  ;;  %722 = vrot.lane.b32.xlu2 %v683_v50, %s6312_s8  ;;  %v2887_v6 = vpack.c.bf16 %v2841_v43, %v2841_v43 }
 0x2dd   :  { %692 = vrot.lane.b32.xlu0 %v6490_v63, %s6311_s30 }
 0x2de   :  { %v6864_v11 = vld [vmem:[#allocation2 + $0x10] sm:$0xff] }
 0x2df   :  { %2889 = vst.msk [vmem:[#allocation2 + $0x14] sm:$0xf] %vm108_vm0, %v2887_v6 }
 0x2e4   :  { %720 = vrot.lane.b32.xlu1 %v682_v28, %s6312_s8  ;;  %698 = vrot.lane.b32.xlu2 %v6490_v63, %s6312_s8  ;;  %v754_v63 = vsel %vm133_vm1, %v743_v44, %v749_v3 }
 0x2e5   :  { %716 = vrot.lane.b32.xlu0 %v683_v50, %s6311_s30  ;;  %v756_v45 = vmul.f32 %v754_v63, %v6373_v5  ;;  %v5654_v63 = vld [vmem:[#allocation2 + $0x18] sm:$0xff] }
 0x2e7   :  { %v758_v13 = vpack.c.bf16 %v756_v45, %v756_v45 }
 0x2e9   :  { %760 = vst.msk [vmem:[#allocation2 + $0x20] sm:$0xf] %vm108_vm0, %v758_v13 }
 0x2ec   :  { %694 = vrot.lane.b32.xlu1 %v6495_v0, %s6311_s30  ;;  %1043 = vrot.lane.b32.xlu2 %v6515_v17, %s6310_s29 }
 0x2ed   :  { %700 = vrot.lane.b32.xlu0 %v6495_v0, %s6312_s8 }
 0x2f0   :  { %v5132_v42 = vld [vmem:[#allocation2 + $0x20] sm:$0xf] }
 0x2f4   :  { %1049 = vrot.lane.b32.xlu1 %v6515_v17, %s6309_s28 }
 0x2f5   :  { %1045 = vrot.lane.b32.xlu0 %v6520_v18, %s6310_s29 }
 0x326   :  { %v769_v25 = vpop.permute.xlu2 %768 }
 0x32e   :  { %v715_v46 = vpop.permute.xlu2 %714 }
 0x336   :  { %v723_v18 = vpop.permute.xlu2 %722 }
 0x33e   :  { %v763_v49 = vpop.permute.xlu0 %762  ;;  %v699_v54 = vpop.permute.xlu2 %698 }
 0x33f   :  { %v774_v0 = vsel %vm133_vm1, %v763_v49, %v769_v25 }
 0x340   :  { %v776_v17 = vmul.f32 %v774_v0, %v6373_v5 }
 0x342   :  { %v778_v57 = vpack.c.bf16 %v776_v17, %v776_v17 }
 0x344   :  { %780 = vst.msk [vmem:[#allocation2 + $0x28] sm:$0xf] %vm108_vm0, %v778_v57  ;;  %v6909_v57 = vld [vmem:[%s9584_s2] sm:$0xff] }
 0x346   :  { %v765_v51 = vpop.permute.xlu1 %764 }
 0x347   :  { %v771_v52 = vpop.permute.xlu0 %770 }
 0x348   :  { %v775_v55 = vsel %vm133_vm1, %v765_v51, %v771_v52  ;;  %v6930_v51 = vld [vmem:[%s9584_s2 + $0x18] sm:$0xff] }
 0x349   :  { %v777_v37 = vmul.f32 %v775_v55, %v6373_v5 }
 0x34b   :  { %v779_v59 = vpack.c.bf16 %v777_v37, %v777_v37  ;;  %v5136_v23 = vld [vmem:[#allocation2 + $0x28] sm:$0xf] }
 0x34d   :  { %781 = vst.msk [vmem:[#allocation2 + $0x2c] sm:$0xf] %vm108_vm0, %v779_v59 }
 0x34e   :  { %v751_v15 = vpop.permute.xlu1 %750 }
 0x34f   :  { %v755_v56 = vsel %vm133_vm1, %v745_v47, %v751_v15  ;;  %v693_v16 = vpop.permute.xlu0 %692 }
 0x350   :  { %v757_v19 = vmul.f32 %v755_v56, %v6373_v5  ;;  %v704_v60 = vsel %vm100_vm2, %v693_v16, %v699_v54 }
 0x351   :  { %v706_v53 = vmul.f32 %v704_v60, %v6389_v10 }
 0x352   :  { %v759_v41 = vpack.c.bf16 %v757_v19, %v757_v19 }
 0x353   :  { %v708_v38 = vpack.c.bf16 %v706_v53, %v706_v53 }
 0x354   :  { %v5656_v28 = vld [vmem:[#allocation2 + $0x28] sm:$0xf0]  ;;  %761 = vst.msk [vmem:[#allocation2 + $0x24] sm:$0xf] %vm108_vm0, %v759_v41 }
 0x355   :  { %710 = vst.msk [vmem:[#allocation2] sm:$0xf] %vm108_vm0, %v708_v38  ;;  %v5137_v27 = vor.u32 %v5656_v28, %v5136_v23 }
 0x356   :  { %v721_v8 = vpop.permute.xlu1 %720 }
 0x357   :  { %v726_v40 = vsel %vm100_vm2, %v715_v46, %v721_v8  ;;  %832 = vmatpush.bf16.msra.mxu2 %v5137_v27  ;;  %v717_v30 = vpop.permute.xlu0 %716 }
 0x358   :  { %v728_v31 = vmul.f32 %v726_v40, %v6389_v10  ;;  %v727_v32 = vsel %vm100_vm2, %v717_v30, %v723_v18  ;;  %v6916_v18 = vld [vmem:[%s9584_s2 + $0x8] sm:$0xff] }
 0x359   :  { %v729_v35 = vmul.f32 %v727_v32, %v6389_v10 }
 0x35a   :  { %v730_v50 = vpack.c.bf16 %v728_v31, %v728_v31 }
 0x35b   :  { %v5655_v62 = vld [vmem:[#allocation2 + $0x20] sm:$0xf0]  ;;  %v731_v20 = vpack.c.bf16 %v729_v35, %v729_v35 }
 0x35c   :  { %732 = vst.msk [vmem:[#allocation2 + $0x8] sm:$0xf] %vm108_vm0, %v730_v50  ;;  %v5133_v43 = vor.u32 %v5655_v62, %v5132_v42  ;;  %v5116_v49 = vld [vmem:[#allocation2] sm:$0xf] }
 0x35d   :  { %733 = vst.msk [vmem:[#allocation2 + $0xc] sm:$0xf] %vm108_vm0, %v731_v20 }
 0x35e   :  { %v695_v6 = vpop.permute.xlu1 %694  ;;  %833 = vmatpush.bf16.msra.mxu2 %v5133_v43 }
 0x35f   :  { %v701_v3 = vpop.permute.xlu0 %700 }
 0x360   :  { %v705_v44 = vsel %vm100_vm2, %v695_v6, %v701_v3 }
 0x361   :  { %v707_v45 = vmul.f32 %v705_v44, %v6389_v10 }
 0x362   :  { %834 = vmatpush.bf16.msra.mxu2 %v5654_v63 }
 0x363   :  { %v709_v13 = vpack.c.bf16 %v707_v45, %v707_v45  ;;  %v5120_v47 = vld [vmem:[#allocation2 + $0x8] sm:$0xf] }
 0x364   :  { %v5652_v25 = vld [vmem:[#allocation2 + $0x8] sm:$0xf0] }
 0x365   :  { %711 = vst.msk [vmem:[#allocation2 + $0x4] sm:$0xf] %vm108_vm0, %v709_v13  ;;  %v5121_v46 = vor.u32 %v5652_v25, %v5120_v47 }
 0x366   :  { %835 = vmatpush.bf16.msra.mxu2 %v6527_v22  ;;  %v6923_v22 = vld [vmem:[%s9584_s2 + $0x10] sm:$0xff] }
 0x36a   :  { %836 = vmatpush.bf16.msra.mxu2 %v5121_v46 }
 0x36c   :  { %v5651_v0 = vld [vmem:[#allocation2] sm:$0xf0] }
 0x36d   :  { %v5117_v17 = vor.u32 %v5651_v0, %v5116_v49 }
 0x36f   :  { %837 = vmatpush.bf16.msra.mxu2 %v5117_v17 }
 0x372   :  { %5138 = vmatmul.msk.bf16.vlgmr.msra.gmra.mxu2 %vm215_vm3, %v6909_v57 }
 0x382   :  { %5139 = vmatmul.msk.bf16.gmra.mxu2 %vm215_vm3, %v6916_v18 }
 0x392   :  { %5140 = vmatmul.msk.bf16.gmra.mxu2 %vm215_vm3, %v6923_v22 }
 0x3a2   :  { %5141 = vmatmul.msk.bf16.gmra.mxu2 %vm215_vm3, %v6930_v51 }
 0x3f5   :  { %v839_v52 = vpop.f32.mrf.mxu2 }
 0x3f6   :  { %v840_v55 = vadd.f32 %v839_v52, %v6483_v61 }
 0x3f8   :  { %v5142_v59 = vmul.f32 -1.442695, %v840_v55 }
 0x3fa   :  { %5811 = vpow2.f32 %v5142_v59 }
 0x3fd   :  { %v841_v37 = vpop.f32.mrf.mxu2 }
 0x3fe   :  { %v842_v54 = vadd.f32 %v841_v37, %v6501_v4 }
 0x400   :  { %v5143_v15 = vmul.f32 -1.442695, %v842_v54  ;;  %v5812_v60 = vpop.eup %5811 }
 0x401   :  { %v877_v53 = vadd.f32 1.0, %v5812_v60 }
 0x402   :  { %5813 = vpow2.f32 %v5143_v15 }
 0x403   :  { %v894_v54 = vand.u32 2147483648, %v877_v53  ;;  %vm888_vm8 = vweird.f32 %v877_v53 }
 0x405   :  { %v844_v56 = vpop.f32.mrf.mxu2 }
 0x406   :  { %v845_v16 = vadd.f32 %v844_v56, %v6510_v14  ;;  %v892_v56 = vand.u32 2147483647, %v877_v53 }
 0x408   :  { %v5144_v19 = vmul.f32 -1.442695, %v845_v16  ;;  %v5814_v23 = vpop.eup %5813  ;;  %vm893_vm13 = vcmp.eq.f32.partialorder %v892_v56, 8.507059e+37 }
 0x409   :  { %v6940_v40 = vadd.f32 1.0, %v5814_v23 }
 0x40a   :  { %5815 = vpow2.f32 %v5144_v19 }
 0x40b   :  { %5817 = vrcp.f32 %v877_v53  ;;  %vm903_vm4 = vweird.f32 %v6940_v40 }
 0x40d   :  { %v846_v41 = vpop.f32.mrf.mxu2 }
 0x40e   :  { %v847_v38 = vadd.f32 %v846_v41, %v6533_v26 }
 0x410   :  { %v5816_v28 = vpop.eup %5815  ;;  %v5145_v27 = vmul.f32 -1.442695, %v847_v38 }
 0x411   :  { %v6938_v8 = vadd.f32 1.0, %v5816_v28  ;;  %v5818_v31 = vpop.eup %5817 }
 0x412   :  { %5819 = vpow2.f32 %v5145_v27  ;;  %v884_v62 = vmul.f32 %v5818_v31, %v877_v53  ;;  %vm889_vm7 = vweird.f32 %v5818_v31 }
 0x413   :  { %5821 = vrcp.f32 %v6938_v8  ;;  %vm6962_vm10 = vmor %vm888_vm8, %vm889_vm7  ;;  %v924_v23 = vand.u32 2147483648, %v6938_v8  ;;  %vm918_vm11 = vweird.f32 %v6938_v8 }
 0x414   :  { %5823 = vrcp.f32 %v6940_v40  ;;  %v885_v3 = vsub.f32 1.0, %v884_v62 }
 0x415   :  { %v849_v30 = vpop.f32.mrf.mxu2 }
 0x416   :  { %v850_v32 = vadd.f32 %v849_v30, %v6552_v39  ;;  %v886_v49 = vmul.f32 %v5818_v31, %v885_v3  ;;  %v922_v30 = vand.u32 2147483647, %v6938_v8  ;;  %v925_v3 = vor.u32 1.1754944e-38, %v924_v23 }
 0x418   :  { %v5820_v35 = vpop.eup %5819  ;;  %v5146_v50 = vmul.f32 -1.442695, %v850_v32  ;;  %v887_v59 = vadd.f32 %v5818_v31, %v886_v49  ;;  %v895_v32 = vor.u32 1.1754944e-38, %v894_v54  ;;  %vm923_vm5 = vcmp.eq.f32.partialorder %v922_v30, 8.507059e+37 }
 0x419   :  { %v5822_v42 = vpop.eup %5821  ;;  %v6945_v20 = vadd.f32 1.0, %v5820_v35 }
 0x41a   :  { %5825 = vpow2.f32 %v5146_v50  ;;  %v914_v43 = vmul.f32 %v5822_v42, %v6938_v8  ;;  %v6949_v6 = vpop.eup %5823  ;;  %vm919_vm9 = vweird.f32 %v5822_v42  ;;  %v891_v53 = vsel %vm6962_vm10, %v5818_v31, %v887_v59 }
 0x41b   :  { %5827 = vrcp.f32 %v6945_v20  ;;  %v899_v47 = vmul.f32 %v6949_v6, %v6940_v40  ;;  %vm6978_vm14 = vmor %vm918_vm11, %vm919_vm9  ;;  %vm904_vm15 = vweird.f32 %v6949_v6  ;;  %v896_v8 = vsel %vm893_vm13, %v895_v32, %v891_v53 }
 0x41c   :  { %v915_v45 = vsub.f32 1.0, %v914_v43  ;;  %vm6995_vm6 = vmor %vm903_vm4, %vm904_vm15  ;;  %v939_v54 = vand.u32 2147483648, %v6945_v20  ;;  %vm933_vm8 = vweird.f32 %v6945_v20 }
 0x41d   :  { %v851_v44 = vpop.f32.mrf.mxu2  ;;  %v900_v55 = vsub.f32 1.0, %v899_v47 }
 0x41e   :  { %v852_v63 = vadd.f32 %v851_v44, %v6579_v1  ;;  %v916_v52 = vmul.f32 %v5822_v42, %v915_v45  ;;  %v940_v23 = vor.u32 1.1754944e-38, %v939_v54  ;;  %v7055_v54 = vld [vmem:[%s9581_s0 + $0x40] sm:$0xff] }
 0x41f   :  { %v901_v38 = vmul.f32 %v6949_v6, %v900_v55 }
 0x420   :  { %v5826_v13 = vpop.eup %5825  ;;  %v5147_v25 = vmul.f32 -1.442695, %v852_v63  ;;  %v917_v19 = vadd.f32 %v5822_v42, %v916_v52  ;;  %v909_v63 = vand.u32 2147483648, %v6940_v40  ;;  %v975_v52 = vmul.f32 %v896_v8, %v6829_v48 }
 0x421   :  { %v6954_v46 = vpop.eup %5827  ;;  %v6956_v0 = vadd.f32 1.0, %v5826_v13  ;;  %v902_v44 = vadd.f32 %v6949_v6, %v901_v38  ;;  %v937_v48 = vand.u32 2147483647, %v6945_v20 }
 0x422   :  { %5829 = vpow2.f32 %v5147_v25  ;;  %v929_v17 = vmul.f32 %v6954_v46, %v6945_v20  ;;  %v921_v31 = vsel %vm6978_vm14, %v5822_v42, %v917_v19  ;;  %v907_v42 = vand.u32 2147483647, %v6940_v40 }
 0x423   :  { %5831 = vrcp.f32 %v6956_v0  ;;  %v926_v25 = vsel %vm923_vm5, %v925_v3, %v921_v31  ;;  %vm934_vm7 = vweird.f32 %v6954_v46  ;;  %v906_v59 = vsel %vm6995_vm6, %v6949_v6, %v902_v44 }
 0x424   :  { %v930_v16 = vsub.f32 1.0, %v929_v17  ;;  %vm908_vm10 = vcmp.eq.f32.partialorder %v907_v42, 8.507059e+37  ;;  %vm935_vm11 = vmor %vm933_vm8, %vm934_vm7  ;;  %v954_v6 = vand.u32 2147483648, %v6956_v0  ;;  %vm948_vm13 = vweird.f32 %v6956_v0 }
 0x425   :  { %v854_v37 = vpop.f32.mrf.mxu2  ;;  %v952_v38 = vand.u32 2147483647, %v6956_v0  ;;  %vm938_vm15 = vcmp.eq.f32.partialorder %v937_v48, 8.507059e+37  ;;  %v1050_v48 = vpop.permute.xlu1 %1049 }
 0x426   :  { %v855_v15 = vadd.f32 %v854_v37, %v6603_v33  ;;  %v931_v62 = vmul.f32 %v6954_v46, %v930_v16  ;;  %v955_v50 = vor.u32 1.1754944e-38, %v954_v6 }
 0x427   :  { %vm953_vm4 = vcmp.eq.f32.partialorder %v952_v38, 8.507059e+37 }
 0x428   :  { %v5830_v60 = vpop.eup %5829  ;;  %5833 = vtanh.f32 %v855_v15  ;;  %v932_v37 = vadd.f32 %v6954_v46, %v931_v62  ;;  %v910_v15 = vor.u32 1.1754944e-38, %v909_v63 }
 0x429   :  { %v6968_v28 = vpop.eup %5831  ;;  %v6970_v27 = vadd.f32 1.0, %v5830_v60 }
 0x42a   :  { %v944_v35 = vmul.f32 %v6968_v28, %v6956_v0  ;;  %vm949_vm9 = vweird.f32 %v6968_v28  ;;  %v911_v60 = vsel %vm908_vm10, %v910_v15, %v906_v59  ;;  %v936_v41 = vsel %vm935_vm11, %v6954_v46, %v932_v37  ;;  %v6268_v37 = vld [vmem:[%s9581_s0 + $0x30] sm:$0xff]  ;;  %v1044_v15 = vpop.permute.xlu2 %1043 }
 0x42b   :  { %5835 = vrcp.f32 %v6970_v27  ;;  %vm950_vm14 = vmor %vm948_vm13, %vm949_vm9  ;;  %v976_v31 = vmul.f32 %v911_v60, %v6843_v24  ;;  %v969_v44 = vand.u32 2147483648, %v6970_v27  ;;  %vm963_vm6 = vweird.f32 %v6970_v27 }
 0x42c   :  { %v945_v43 = vsub.f32 1.0, %v944_v35  ;;  %v941_v35 = vsel %vm938_vm15, %v940_v23, %v936_v41  ;;  %v1046_v41 = vpop.permute.xlu0 %1045 }
 0x42d   :  { %v856_v45 = vpop.f32.mrf.mxu2 }
 0x42e   :  { %v5834_v13 = vpop.eup %5833  ;;  %v946_v47 = vmul.f32 %v6968_v28, %v945_v43  ;;  %v857_v49 = vadd.f32 %v856_v45, %v6655_v34  ;;  %v970_v45 = vor.u32 1.1754944e-38, %v969_v44 }
 0x42f   :  { %v977_v55 = vmul.f32 %v5834_v13, %v926_v25 }
 0x430   :  { %5837 = vtanh.f32 %v857_v49  ;;  %v947_v16 = vadd.f32 %v6968_v28, %v946_v47 }
 0x431   :  { %v5836_v40 = vpop.eup %5835  ;;  %v7006_v56 = vadd.f32 %v977_v55, %v975_v52  ;;  %v6267_v52 = vld [vmem:[%s9581_s0 + $0x38] sm:$0xff] }
 0x432   :  { %v959_v19 = vmul.f32 %v5836_v40, %v6970_v27  ;;  %v951_v30 = vsel %vm950_vm14, %v6968_v28, %v947_v16  ;;  %vm964_vm5 = vweird.f32 %v5836_v40  ;;  %v967_v28 = vand.u32 2147483647, %v6970_v27 }
 0x433   :  { %5839 = vtanh.f32 %v7006_v56  ;;  %v956_v8 = vsel %vm953_vm4, %v955_v50, %v951_v30  ;;  %vm965_vm7 = vmor %vm963_vm6, %vm964_vm5  ;;  %v1055_v16 = vsel %vm133_vm1, %v1044_v15, %v1050_v48 }
 0x434   :  { %v960_v20 = vsub.f32 1.0, %v959_v19  ;;  %vm968_vm8 = vcmp.eq.f32.partialorder %v967_v28, 8.507059e+37  ;;  %v1057_v19 = vmul.f32 %v1055_v16, %v6373_v5 }
 0x436   :  { %v5838_v53 = vpop.eup %5837  ;;  %v961_v32 = vmul.f32 %v5836_v40, %v960_v20  ;;  %v1059_v6 = vpack.c.bf16 %v1057_v19, %v1057_v19 }
 0x437   :  { %v978_v62 = vmul.f32 %v5838_v53, %v941_v35 }
 0x438   :  { %v962_v3 = vadd.f32 %v5836_v40, %v961_v32  ;;  %1061 = vst.msk [vmem:[#allocation2 + $0x20] sm:$0xf] %vm108_vm0, %v1059_v6 }
 0x439   :  { %v5840_v43 = vpop.eup %5839  ;;  %v7020_v46 = vadd.f32 %v978_v62, %v976_v31 }
 0x43a   :  { %v983_v0 = vmul.f32 %v5840_v43, %v956_v8  ;;  %v966_v63 = vsel %vm965_vm7, %v5836_v40, %v962_v3  ;;  %v7065_v40 = vld [vmem:[%s9581_s0 + $0x48] sm:$0xff] }
 0x43b   :  { %5841 = vtanh.f32 %v7020_v46  ;;  %v971_v47 = vsel %vm968_vm8, %v970_v45, %v966_v63 }
 0x43c   :  { %1069 = vrot.lane.b32.xlu0 %v983_v0, %s6309_s28  ;;  %986 = vst.msk [vmem:[#allocation3 + $0x20] sm:$0xff] %vm383_vm12, %v983_v0  ;;  %v1039_v24 = vpack.c.bf16 %v983_v0, %v983_v0  ;;  %1063 = vrot.lane.b32.xlu1 %v983_v0, %s6310_s29 }
 0x43e   :  { %1041 = vst.msk [vmem:[#allocation2 + $0x18] sm:$0xf] %vm108_vm0, %v1039_v24 }
 0x441   :  { %v5842_v13 = vpop.eup %5841 }
 0x442   :  { %v984_v25 = vmul.f32 %v5842_v13, %v971_v47 }
 0x443   :  { %v3139_v49 = vld [vmem:[#allocation3 + $0x20] sm:$0xff] }
 0x444   :  { %1065 = vrot.lane.b32.xlu2 %v984_v25, %s6310_s29  ;;  %987 = vst.msk [vmem:[#allocation3 + $0x28] sm:$0xff] %vm383_vm12, %v984_v25  ;;  %v1040_v27 = vpack.c.bf16 %v984_v25, %v984_v25  ;;  %1015 = vrot.lane.b32.xlu0 %v983_v0, %s6311_s30  ;;  %v3185_v42 = vpack.c.bf16 %v3139_v49, %v3139_v49 }
 0x445   :  { %1071 = vrot.lane.b32.xlu1 %v984_v25, %s6309_s28 }
 0x446   :  { %1042 = vst.msk [vmem:[#allocation2 + $0x1c] sm:$0xf] %vm108_vm0, %v1040_v27 }
 0x447   :  { %3187 = vst.msk [vmem:[#allocation2 + $0x10] sm:$0xf] %vm108_vm0, %v3185_v42 }
 0x44b   :  { %v3140_v17 = vld [vmem:[#allocation3 + $0x28] sm:$0xff] }
 0x44c   :  { %1051 = vrot.lane.b32.xlu2 %v6267_v52, %s6309_s28  ;;  %1023 = vrot.lane.b32.xlu0 %v984_v25, %s6312_s8  ;;  %v3186_v55 = vpack.c.bf16 %v3140_v17, %v3140_v17 }
 0x44d   :  { %993 = vrot.lane.b32.xlu1 %v6268_v37, %s6311_s30  ;;  %v5660_v48 = vld [vmem:[#allocation2 + $0x18] sm:$0xff] }
 0x44e   :  { %v7045_v59 = vld [vmem:[#allocation2 + $0x10] sm:$0xff] }
 0x44f   :  { %3188 = vst.msk [vmem:[#allocation2 + $0x14] sm:$0xf] %vm108_vm0, %v3186_v55 }
 0x454   :  { %1021 = vrot.lane.b32.xlu2 %v983_v0, %s6312_s8  ;;  %999 = vrot.lane.b32.xlu0 %v6268_v37, %s6312_s8 }
 0x455   :  { %1017 = vrot.lane.b32.xlu1 %v984_v25, %s6311_s30 }
 0x45c   :  { %995 = vrot.lane.b32.xlu2 %v6267_v52, %s6311_s30  ;;  %1344 = vrot.lane.b32.xlu0 %v7055_v54, %s6310_s29 }
 0x45d   :  { %1001 = vrot.lane.b32.xlu1 %v6267_v52, %s6312_s8 }
 0x464   :  { %1350 = vrot.lane.b32.xlu2 %v7055_v54, %s6309_s28 }
 0x465   :  { %1346 = vrot.lane.b32.xlu1 %v7065_v40, %s6310_s29 }
 0x49e   :  { %v1066_v60 = vpop.permute.xlu2 %1065 }
 0x4a6   :  { %v1052_v38 = vpop.permute.xlu2 %1051 }
 0x4a7   :  { %v1056_v20 = vsel %vm133_vm1, %v1046_v41, %v1052_v38 }
 0x4a8   :  { %v1058_v23 = vmul.f32 %v1056_v20, %v6373_v5 }
 0x4aa   :  { %v1060_v53 = vpack.c.bf16 %v1058_v23, %v1058_v23 }
 0x4ac   :  { %1062 = vst.msk [vmem:[#allocation2 + $0x24] sm:$0xf] %vm108_vm0, %v1060_v53 }
 0x4ae   :  { %v1070_v30 = vpop.permute.xlu0 %1069  ;;  %v1064_v32 = vpop.permute.xlu1 %1063 }
 0x4af   :  { %v1075_v35 = vsel %vm133_vm1, %v1064_v32, %v1070_v30  ;;  %v1022_v62 = vpop.permute.xlu2 %1021 }
 0x4b0   :  { %v1077_v50 = vmul.f32 %v1075_v35, %v6373_v5 }
 0x4b2   :  { %v1079_v31 = vpack.c.bf16 %v1077_v50, %v1077_v50 }
 0x4b3   :  { %v5661_v52 = vld [vmem:[#allocation2 + $0x20] sm:$0xff] }
 0x4b4   :  { %1081 = vst.msk [vmem:[#allocation2 + $0x28] sm:$0xf] %vm108_vm0, %v1079_v31 }
 0x4b6   :  { %v1016_v43 = vpop.permute.xlu0 %1015 }
 0x4b7   :  { %v1027_v8 = vsel %vm100_vm2, %v1016_v43, %v1022_v62  ;;  %v1072_v3 = vpop.permute.xlu1 %1071  ;;  %v996_v16 = vpop.permute.xlu2 %995 }
 0x4b8   :  { %v1029_v0 = vmul.f32 %v1027_v8, %v6389_v10  ;;  %v1076_v44 = vsel %vm133_vm1, %v1066_v60, %v1072_v3 }
 0x4b9   :  { %v1078_v28 = vmul.f32 %v1076_v44, %v6373_v5 }
 0x4ba   :  { %v1031_v24 = vpack.c.bf16 %v1029_v0, %v1029_v0 }
 0x4bb   :  { %v1080_v63 = vpack.c.bf16 %v1078_v28, %v1078_v28 }
 0x4bc   :  { %1033 = vst.msk [vmem:[#allocation2 + $0x8] sm:$0xf] %vm108_vm0, %v1031_v24 }
 0x4bd   :  { %1082 = vst.msk [vmem:[#allocation2 + $0x2c] sm:$0xf] %vm108_vm0, %v1080_v63 }
 0x4be   :  { %v1024_v45 = vpop.permute.xlu0 %1023 }
 0x4bf   :  { %v994_v13 = vpop.permute.xlu1 %993 }
 0x4c4   :  { %v5662_v47 = vld [vmem:[#allocation2 + $0x28] sm:$0xff] }
 0x4c5   :  { %1133 = vmatpush.bf16.msra.mxu3 %v5662_v47 }
 0x4c6   :  { %v1000_v25 = vpop.permute.xlu0 %999 }
 0x4c7   :  { %v1005_v49 = vsel %vm100_vm2, %v994_v13, %v1000_v25  ;;  %v1018_v27 = vpop.permute.xlu1 %1017 }
 0x4c8   :  { %v1007_v42 = vmul.f32 %v1005_v49, %v6389_v10  ;;  %v1028_v17 = vsel %vm100_vm2, %v1018_v27, %v1024_v45 }
 0x4c9   :  { %v1030_v55 = vmul.f32 %v1028_v17, %v6389_v10  ;;  %1134 = vmatpush.bf16.msra.mxu3 %v5661_v52 }
 0x4ca   :  { %v1009_v37 = vpack.c.bf16 %v1007_v42, %v1007_v42 }
 0x4cb   :  { %v1032_v15 = vpack.c.bf16 %v1030_v55, %v1030_v55 }
 0x4cc   :  { %1011 = vst.msk [vmem:[#allocation2] sm:$0xf] %vm108_vm0, %v1009_v37 }
 0x4cd   :  { %1034 = vst.msk [vmem:[#allocation2 + $0xc] sm:$0xf] %vm108_vm0, %v1032_v15  ;;  %1135 = vmatpush.bf16.msra.mxu3 %v5660_v48 }
 0x4cf   :  { %v1002_v19 = vpop.permute.xlu1 %1001 }
 0x4d0   :  { %v1006_v6 = vsel %vm100_vm2, %v996_v16, %v1002_v19 }
 0x4d1   :  { %v1008_v60 = vmul.f32 %v1006_v6, %v6389_v10  ;;  %1136 = vmatpush.bf16.msra.mxu3 %v6543_v36 }
 0x4d3   :  { %v1010_v41 = vpack.c.bf16 %v1008_v60, %v1008_v60 }
 0x4d4   :  { %v5658_v38 = vld [vmem:[#allocation2 + $0x8] sm:$0xff] }
 0x4d5   :  { %1012 = vst.msk [vmem:[#allocation2 + $0x4] sm:$0xf] %vm108_vm0, %v1010_v41  ;;  %1137 = vmatpush.bf16.msra.mxu3 %v5658_v38 }
 0x4dc   :  { %v5657_v20 = vld [vmem:[#allocation2] sm:$0xff] }
 0x4dd   :  { %1138 = vmatpush.bf16.msra.mxu3 %v5657_v20 }
 0x4e0   :  { %5174 = vmatmul.msk.bf16.vlgmr.msra.gmra.mxu3 %vm215_vm3, %v6909_v57 }
 0x4f0   :  { %5175 = vmatmul.msk.bf16.gmra.mxu3 %vm215_vm3, %v6916_v18 }
 0x500   :  { %5176 = vmatmul.msk.bf16.gmra.mxu3 %vm215_vm3, %v6923_v22 }
 0x510   :  { %5177 = vmatmul.msk.bf16.gmra.mxu3 %vm215_vm3, %v6930_v51 }
 0x563   :  { %v1140_v36 = vpop.f32.mrf.mxu3 }
 0x564   :  { %v1141_v23 = vadd.f32 %v1140_v36, %v6483_v61 }
 0x566   :  { %v5178_v30 = vmul.f32 -1.442695, %v1141_v23 }
 0x568   :  { %5843 = vpow2.f32 %v5178_v30 }
 0x56b   :  { %v1142_v53 = vpop.f32.mrf.mxu3 }
 0x56c   :  { %v1143_v32 = vadd.f32 %v1142_v53, %v6501_v4 }
 0x56e   :  { %v5179_v35 = vmul.f32 -1.442695, %v1143_v32  ;;  %v5844_v43 = vpop.eup %5843 }
 0x56f   :  { %v1178_v8 = vadd.f32 1.0, %v5844_v43 }
 0x570   :  { %5845 = vpow2.f32 %v5179_v35 }
 0x571   :  { %vm1189_vm10 = vweird.f32 %v1178_v8 }
 0x573   :  { %v1145_v50 = vpop.f32.mrf.mxu3 }
 0x574   :  { %v1146_v31 = vadd.f32 %v1145_v50, %v6510_v14  ;;  %v1195_v50 = vand.u32 2147483648, %v1178_v8 }
 0x576   :  { %v5180_v62 = vmul.f32 -1.442695, %v1146_v31  ;;  %v5846_v44 = vpop.eup %5845 }
 0x577   :  { %v7108_v45 = vadd.f32 1.0, %v5846_v44 }
 0x578   :  { %5847 = vpow2.f32 %v5180_v62  ;;  %v1193_v62 = vand.u32 2147483647, %v1178_v8 }
 0x579   :  { %5849 = vrcp.f32 %v1178_v8  ;;  %vm1204_vm6 = vweird.f32 %v7108_v45 }
 0x57a   :  { %vm1194_vm15 = vcmp.eq.f32.partialorder %v1193_v62, 8.507059e+37 }
 0x57b   :  { %v1147_v3 = vpop.f32.mrf.mxu3 }
 0x57c   :  { %v1148_v0 = vadd.f32 %v1147_v3, %v6533_v26 }
 0x57e   :  { %v5848_v28 = vpop.eup %5847  ;;  %v5181_v24 = vmul.f32 -1.442695, %v1148_v0 }
 0x57f   :  { %v7106_v63 = vadd.f32 1.0, %v5848_v28  ;;  %v5850_v47 = vpop.eup %5849 }
 0x580   :  { %5851 = vpow2.f32 %v5181_v24  ;;  %v1185_v17 = vmul.f32 %v5850_v47, %v1178_v8  ;;  %vm1190_vm9 = vweird.f32 %v5850_v47 }
 0x581   :  { %5853 = vrcp.f32 %v7106_v63  ;;  %vm7130_vm13 = vmor %vm1189_vm10, %vm1190_vm9  ;;  %v1225_v24 = vand.u32 2147483648, %v7106_v63  ;;  %vm1219_vm14 = vweird.f32 %v7106_v63 }
 0x582   :  { %5855 = vrcp.f32 %v7108_v45  ;;  %v1186_v15 = vsub.f32 1.0, %v1185_v17 }
 0x583   :  { %v1150_v13 = vpop.f32.mrf.mxu3 }
 0x584   :  { %v1151_v25 = vadd.f32 %v1150_v13, %v6552_v39  ;;  %v1187_v20 = vmul.f32 %v5850_v47, %v1186_v15 }
 0x586   :  { %v5852_v49 = vpop.eup %5851  ;;  %v5182_v27 = vmul.f32 -1.442695, %v1151_v25  ;;  %v1188_v35 = vadd.f32 %v5850_v47, %v1187_v20 }
 0x587   :  { %v5854_v42 = vpop.eup %5853  ;;  %v7113_v52 = vadd.f32 1.0, %v5852_v49  ;;  %v1223_v49 = vand.u32 2147483647, %v7106_v63 }
 0x588   :  { %5857 = vpow2.f32 %v5182_v27  ;;  %v1215_v55 = vmul.f32 %v5854_v42, %v7106_v63  ;;  %v7117_v37 = vpop.eup %5855  ;;  %vm1220_vm11 = vweird.f32 %v5854_v42  ;;  %v1192_v8 = vsel %vm7130_vm13, %v5850_v47, %v1188_v35 }
 0x589   :  { %5859 = vrcp.f32 %v7113_v52  ;;  %v1200_v60 = vmul.f32 %v7117_v37, %v7108_v45  ;;  %v1196_v27 = vor.u32 1.1754944e-38, %v1195_v50  ;;  %vm7146_vm4 = vmor %vm1219_vm14, %vm1220_vm11  ;;  %vm1205_vm5 = vweird.f32 %v7117_v37 }
 0x58a   :  { %v1216_v19 = vsub.f32 1.0, %v1215_v55  ;;  %vm1224_vm7 = vcmp.eq.f32.partialorder %v1223_v49, 8.507059e+37  ;;  %vm7163_vm8 = vmor %vm1204_vm6, %vm1205_vm5  ;;  %v1240_v62 = vand.u32 2147483648, %v7113_v52  ;;  %vm1234_vm10 = vweird.f32 %v7113_v52 }
 0x58b   :  { %v1152_v48 = vpop.f32.mrf.mxu3  ;;  %v1201_v30 = vsub.f32 1.0, %v1200_v60  ;;  %v1197_v63 = vsel %vm1194_vm15, %v1196_v27, %v1192_v8 }
 0x58c   :  { %v1153_v16 = vadd.f32 %v1152_v48, %v6579_v1  ;;  %v1217_v53 = vmul.f32 %v5854_v42, %v1216_v19  ;;  %v1241_v49 = vor.u32 1.1754944e-38, %v1240_v62  ;;  %v7221_v62 = vld [vmem:[%s9581_s0 + $0x50] sm:$0xff] }
 0x58d   :  { %v1202_v28 = vmul.f32 %v7117_v37, %v1201_v30 }
 0x58e   :  { %v5858_v6 = vpop.eup %5857  ;;  %v5183_v41 = vmul.f32 -1.442695, %v1153_v16  ;;  %v1218_v3 = vadd.f32 %v5854_v42, %v1217_v53  ;;  %v1226_v16 = vor.u32 1.1754944e-38, %v1225_v24 }
 0x58f   :  { %v7122_v38 = vpop.eup %5859  ;;  %v7124_v36 = vadd.f32 1.0, %v5858_v6  ;;  %v1203_v19 = vadd.f32 %v7117_v37, %v1202_v28  ;;  %v1210_v6 = vand.u32 2147483648, %v7108_v45 }
 0x590   :  { %5861 = vpow2.f32 %v5183_v41  ;;  %v1230_v23 = vmul.f32 %v7122_v38, %v7113_v52  ;;  %v1222_v47 = vsel %vm7146_vm4, %v5854_v42, %v1218_v3  ;;  %v1208_v42 = vand.u32 2147483647, %v7108_v45 }
 0x591   :  { %5863 = vrcp.f32 %v7124_v36  ;;  %vm1235_vm9 = vweird.f32 %v7122_v38  ;;  %vm1249_vm15 = vweird.f32 %v7124_v36  ;;  %v1253_v8 = vand.u32 2147483647, %v7124_v36 }
 0x592   :  { %v1231_v43 = vsub.f32 1.0, %v1230_v23  ;;  %v1227_v23 = vsel %vm1224_vm7, %v1226_v16, %v1222_v47  ;;  %vm1209_vm13 = vcmp.eq.f32.partialorder %v1208_v42, 8.507059e+37  ;;  %vm1236_vm14 = vmor %vm1234_vm10, %vm1235_vm9 }
 0x593   :  { %v1155_v32 = vpop.f32.mrf.mxu3  ;;  %vm1254_vm6 = vcmp.eq.f32.partialorder %v1253_v8, 8.507059e+37 }
 0x594   :  { %v1156_v31 = vadd.f32 %v1155_v32, %v6603_v33  ;;  %v1232_v15 = vmul.f32 %v7122_v38, %v1231_v43  ;;  %v1276_v32 = vmul.f32 %v1197_v63, %v7006_v56  ;;  %v1211_v43 = vor.u32 1.1754944e-38, %v1210_v6 }
 0x595   :  { %v1238_v56 = vand.u32 2147483647, %v7113_v52 }
 0x596   :  { %v5862_v0 = vpop.eup %5861  ;;  %5865 = vtanh.f32 %v1156_v31  ;;  %v1233_v50 = vadd.f32 %v7122_v38, %v1232_v15  ;;  %v1207_v31 = vsel %vm7163_vm8, %v7117_v37, %v1203_v19  ;;  %v1255_v37 = vand.u32 2147483648, %v7124_v36 }
 0x597   :  { %v7136_v13 = vpop.eup %5863  ;;  %v7138_v25 = vadd.f32 1.0, %v5862_v0  ;;  %v1212_v28 = vsel %vm1209_vm13, %v1211_v43, %v1207_v31  ;;  %vm1239_vm5 = vcmp.eq.f32.partialorder %v1238_v56, 8.507059e+37  ;;  %v1345_v43 = vpop.permute.xlu0 %1344 }
 0x598   :  { %v1245_v17 = vmul.f32 %v7136_v13, %v7124_v36  ;;  %vm1250_vm11 = vweird.f32 %v7136_v13  ;;  %v1237_v24 = vsel %vm1236_vm14, %v7122_v38, %v1233_v50  ;;  %v1256_v15 = vor.u32 1.1754944e-38, %v1255_v37  ;;  %v1347_v37 = vpop.permute.xlu1 %1346 }
 0x599   :  { %5867 = vrcp.f32 %v7138_v25  ;;  %vm1251_vm4 = vmor %vm1249_vm15, %vm1250_vm11  ;;  %v1242_v47 = vsel %vm1239_vm5, %v1241_v49, %v1237_v24  ;;  %vm1264_vm8 = vweird.f32 %v7138_v25 }
 0x59a   :  { %v1246_v48 = vsub.f32 1.0, %v1245_v17 }
 0x59b   :  { %v1157_v60 = vpop.f32.mrf.mxu3 }
 0x59c   :  { %v5866_v41 = vpop.eup %5865  ;;  %v1247_v20 = vmul.f32 %v7136_v13, %v1246_v48  ;;  %v1158_v53 = vadd.f32 %v1157_v60, %v6655_v34  ;;  %v1277_v48 = vmul.f32 %v1212_v28, %v7020_v46  ;;  %v1270_v60 = vand.u32 2147483648, %v7138_v25 }
 0x59d   :  { %v1278_v35 = vmul.f32 %v5866_v41, %v1227_v23 }
 0x59e   :  { %5869 = vtanh.f32 %v1158_v53  ;;  %v1248_v0 = vadd.f32 %v7136_v13, %v1247_v20  ;;  %v1271_v20 = vor.u32 1.1754944e-38, %v1270_v60 }
 0x59f   :  { %v5868_v45 = vpop.eup %5867  ;;  %v7174_v3 = vadd.f32 %v1278_v35, %v1276_v32 }
 0x5a0   :  { %v1260_v44 = vmul.f32 %v5868_v45, %v7138_v25  ;;  %v1252_v17 = vsel %vm1251_vm4, %v7136_v13, %v1248_v0  ;;  %vm1265_vm7 = vweird.f32 %v5868_v45  ;;  %v1268_v13 = vand.u32 2147483647, %v7138_v25 }
 0x5a1   :  { %5871 = vtanh.f32 %v7174_v3  ;;  %v1257_v19 = vsel %vm1254_vm6, %v1256_v15, %v1252_v17  ;;  %vm1266_vm9 = vmor %vm1264_vm8, %vm1265_vm7 }
 0x5a2   :  { %v1261_v52 = vsub.f32 1.0, %v1260_v44  ;;  %vm1269_vm10 = vcmp.eq.f32.partialorder %v1268_v13, 8.507059e+37 }
 0x5a4   :  { %v5870_v27 = vpop.eup %5869  ;;  %v1262_v55 = vmul.f32 %v5868_v45, %v1261_v52 }
 0x5a5   :  { %v1279_v63 = vmul.f32 %v5870_v27, %v1242_v47 }
 0x5a6   :  { %v1263_v6 = vadd.f32 %v5868_v45, %v1262_v55 }
 0x5a7   :  { %v5872_v16 = vpop.eup %5871  ;;  %v7188_v38 = vadd.f32 %v1279_v63, %v1277_v48 }
 0x5a8   :  { %v1284_v36 = vmul.f32 %v5872_v16, %v1257_v19  ;;  %v1267_v41 = vsel %vm1266_vm9, %v5868_v45, %v1263_v6  ;;  %v1351_v45 = vpop.permute.xlu2 %1350 }
 0x5a9   :  { %5873 = vtanh.f32 %v7188_v38  ;;  %v1272_v53 = vsel %vm1269_vm10, %v1271_v20, %v1267_v41  ;;  %v1356_v56 = vsel %vm133_vm1, %v1345_v43, %v1351_v45 }
 0x5aa   :  { %1370 = vrot.lane.b32.xlu1 %v1284_v36, %s6309_s28  ;;  %1287 = vst.msk [vmem:[#allocation3 + $0x30] sm:$0xff] %vm383_vm12, %v1284_v36  ;;  %v1340_v46 = vpack.c.bf16 %v1284_v36, %v1284_v36  ;;  %1364 = vrot.lane.b32.xlu2 %v1284_v36, %s6310_s29  ;;  %v1358_v0 = vmul.f32 %v1356_v56, %v6373_v5 }
 0x5ac   :  { %1342 = vst.msk [vmem:[#allocation2 + $0x18] sm:$0xf] %vm108_vm0, %v1340_v46  ;;  %v1360_v44 = vpack.c.bf16 %v1358_v0, %v1358_v0 }
 0x5ae   :  { %1362 = vst.msk [vmem:[#allocation2 + $0x20] sm:$0xf] %vm108_vm0, %v1360_v44 }
 0x5af   :  { %v5874_v23 = vpop.eup %5873 }
 0x5b0   :  { %v1285_v42 = vmul.f32 %v5874_v23, %v1272_v53 }
 0x5b1   :  { %v3438_v30 = vld [vmem:[#allocation3 + $0x30] sm:$0xff] }
 0x5b2   :  { %1366 = vrot.lane.b32.xlu0 %v1285_v42, %s6310_s29  ;;  %1288 = vst.msk [vmem:[#allocation3 + $0x38] sm:$0xff] %vm383_vm12, %v1285_v42  ;;  %v1341_v25 = vpack.c.bf16 %v1285_v42, %v1285_v42  ;;  %1316 = vrot.lane.b32.xlu1 %v1284_v36, %s6311_s30  ;;  %v3484_v32 = vpack.c.bf16 %v3438_v30, %v3438_v30 }
 0x5b3   :  { %1372 = vrot.lane.b32.xlu2 %v1285_v42, %s6309_s28 }
 0x5b4   :  { %1343 = vst.msk [vmem:[#allocation2 + $0x1c] sm:$0xf] %vm108_vm0, %v1341_v25 }
 0x5b5   :  { %3486 = vst.msk [vmem:[#allocation2 + $0x10] sm:$0xf] %vm108_vm0, %v3484_v32 }
 0x5b9   :  { %v3439_v35 = vld [vmem:[#allocation3 + $0x38] sm:$0xff] }
 0x5ba   :  { %1352 = vrot.lane.b32.xlu0 %v7065_v40, %s6309_s28  ;;  %1324 = vrot.lane.b32.xlu1 %v1285_v42, %s6312_s8  ;;  %v3485_v50 = vpack.c.bf16 %v3439_v35, %v3439_v35 }
 0x5bb   :  { %1294 = vrot.lane.b32.xlu2 %v7055_v54, %s6311_s30  ;;  %v5666_v44 = vld [vmem:[#allocation2 + $0x18] sm:$0xff] }
 0x5bc   :  { %v7209_v31 = vld [vmem:[#allocation2 + $0x10] sm:$0xff] }
 0x5bd   :  { %3487 = vst.msk [vmem:[#allocation2 + $0x14] sm:$0xf] %vm108_vm0, %v3485_v50 }
 0x5c2   :  { %1322 = vrot.lane.b32.xlu0 %v1284_v36, %s6312_s8  ;;  %1300 = vrot.lane.b32.xlu1 %v7055_v54, %s6312_s8  ;;  %v7232_v54 = vld [vmem:[%s9581_s0 + $0x58] sm:$0xff] }
 0x5c3   :  { %1318 = vrot.lane.b32.xlu2 %v1285_v42, %s6311_s30 }
 0x5ca   :  { %1296 = vrot.lane.b32.xlu0 %v7065_v40, %s6311_s30  ;;  %1645 = vrot.lane.b32.xlu1 %v7221_v62, %s6310_s29 }
 0x5cb   :  { %1302 = vrot.lane.b32.xlu2 %v7065_v40, %s6312_s8 }
 0x5d2   :  { %1651 = vrot.lane.b32.xlu0 %v7221_v62, %s6309_s28 }
 0x5d3   :  { %1647 = vrot.lane.b32.xlu2 %v7232_v54, %s6310_s29 }
 0x604   :  { %v1365_v40 = vpop.permute.xlu2 %1364 }
 0x60d   :  { %v1373_v28 = vpop.permute.xlu2 %1372 }
 0x615   :  { %v1295_v27 = vpop.permute.xlu2 %1294 }
 0x61c   :  { %v1371_v24 = vpop.permute.xlu1 %1370 }
 0x61d   :  { %v1376_v8 = vsel %vm133_vm1, %v1365_v40, %v1371_v24  ;;  %v1319_v63 = vpop.permute.xlu2 %1318 }
 0x61e   :  { %v1378_v52 = vmul.f32 %v1376_v8, %v6373_v5 }
 0x620   :  { %v1380_v49 = vpack.c.bf16 %v1378_v52, %v1378_v52 }
 0x622   :  { %1382 = vst.msk [vmem:[#allocation2 + $0x28] sm:$0xf] %vm108_vm0, %v1380_v49 }
 0x624   :  { %v1367_v17 = vpop.permute.xlu0 %1366  ;;  %v1317_v55 = vpop.permute.xlu1 %1316 }
 0x625   :  { %v1377_v47 = vsel %vm133_vm1, %v1367_v17, %v1373_v28  ;;  %v1303_v43 = vpop.permute.xlu2 %1302 }
 0x626   :  { %v1379_v15 = vmul.f32 %v1377_v47, %v6373_v5 }
 0x628   :  { %v1381_v48 = vpack.c.bf16 %v1379_v15, %v1379_v15 }
 0x62a   :  { %1383 = vst.msk [vmem:[#allocation2 + $0x2c] sm:$0xf] %vm108_vm0, %v1381_v48 }
 0x62c   :  { %v1353_v16 = vpop.permute.xlu0 %1352  ;;  %v1325_v19 = vpop.permute.xlu1 %1324 }
 0x62d   :  { %v1357_v6 = vsel %vm133_vm1, %v1347_v37, %v1353_v16  ;;  %v1329_v36 = vsel %vm100_vm2, %v1319_v63, %v1325_v19 }
 0x62e   :  { %v1359_v60 = vmul.f32 %v1357_v6, %v6373_v5  ;;  %v1331_v13 = vmul.f32 %v1329_v36, %v6389_v10 }
 0x630   :  { %v1361_v46 = vpack.c.bf16 %v1359_v60, %v1359_v60  ;;  %v1333_v41 = vpack.c.bf16 %v1331_v13, %v1331_v13 }
 0x631   :  { %v5668_v20 = vld [vmem:[#allocation2 + $0x28] sm:$0xff] }
 0x632   :  { %1363 = vst.msk [vmem:[#allocation2 + $0x24] sm:$0xf] %vm108_vm0, %v1361_v46  ;;  %1434 = vmatpush.bf16.msrb.mxu0 %v5668_v20 }
 0x633   :  { %1335 = vst.msk [vmem:[#allocation2 + $0xc] sm:$0xf] %vm108_vm0, %v1333_v41 }
 0x634   :  { %v1323_v23 = vpop.permute.xlu0 %1322  ;;  %v1301_v53 = vpop.permute.xlu1 %1300 }
 0x635   :  { %v1328_v42 = vsel %vm100_vm2, %v1317_v55, %v1323_v23  ;;  %v1306_v30 = vsel %vm100_vm2, %v1295_v27, %v1301_v53 }
 0x636   :  { %v1330_v25 = vmul.f32 %v1328_v42, %v6389_v10  ;;  %v1308_v32 = vmul.f32 %v1306_v30, %v6389_v10 }
 0x638   :  { %v1332_v35 = vpack.c.bf16 %v1330_v25, %v1330_v25  ;;  %v1310_v50 = vpack.c.bf16 %v1308_v32, %v1308_v32 }
 0x639   :  { %v5667_v45 = vld [vmem:[#allocation2 + $0x20] sm:$0xff] }
 0x63a   :  { %1334 = vst.msk [vmem:[#allocation2 + $0x8] sm:$0xf] %vm108_vm0, %v1332_v35  ;;  %1435 = vmatpush.bf16.msrb.mxu0 %v5667_v45 }
 0x63b   :  { %1312 = vst.msk [vmem:[#allocation2] sm:$0xf] %vm108_vm0, %v1310_v50 }
 0x63c   :  { %v1297_v56 = vpop.permute.xlu0 %1296 }
 0x63d   :  { %v1307_v0 = vsel %vm100_vm2, %v1297_v56, %v1303_v43 }
 0x63e   :  { %v1309_v40 = vmul.f32 %v1307_v0, %v6389_v10  ;;  %1436 = vmatpush.bf16.msrb.mxu0 %v5666_v44 }
 0x640   :  { %v1311_v37 = vpack.c.bf16 %v1309_v40, %v1309_v40 }
 0x641   :  { %v5664_v28 = vld [vmem:[#allocation2 + $0x8] sm:$0xff] }
 0x642   :  { %1313 = vst.msk [vmem:[#allocation2 + $0x4] sm:$0xf] %vm108_vm0, %v1311_v37  ;;  %1437 = vmatpush.bf16.msrb.mxu0 %v6570_v58 }
 0x646   :  { %1438 = vmatpush.bf16.msrb.mxu0 %v5664_v28 }
 0x649   :  { %v5663_v24 = vld [vmem:[#allocation2] sm:$0xff] }
 0x64a   :  { %1439 = vmatpush.bf16.msrb.mxu0 %v5663_v24 }
 0x64d   :  { %5210 = vmatmul.msk.bf16.vlgmr.msrb.gmra.mxu0 %vm215_vm3, %v6909_v57 }
 0x65d   :  { %5211 = vmatmul.msk.bf16.gmra.mxu0 %vm215_vm3, %v6916_v18 }
 0x66d   :  { %5212 = vmatmul.msk.bf16.gmra.mxu0 %vm215_vm3, %v6923_v22 }
 0x67d   :  { %5213 = vmatmul.msk.bf16.gmra.mxu0 %vm215_vm3, %v6930_v51 }
 0x6ca   :  { %v1441_v8 = vpop.f32.mrf.mxu0 }
 0x6cb   :  { %v1442_v52 = vadd.f32 %v1441_v8, %v6483_v61 }
 0x6cd   :  { %v5214_v49 = vmul.f32 -1.442695, %v1442_v52 }
 0x6cf   :  { %5875 = vpow2.f32 %v5214_v49 }
 0x6d2   :  { %v1443_v58 = vpop.f32.mrf.mxu0 }
 0x6d3   :  { %v1444_v27 = vadd.f32 %v1443_v58, %v6501_v4 }
 0x6d5   :  { %v5215_v17 = vmul.f32 -1.442695, %v1444_v27  ;;  %v5876_v18 = vpop.eup %5875 }
 0x6d6   :  { %v1479_v22 = vadd.f32 1.0, %v5876_v18 }
 0x6d7   :  { %5877 = vpow2.f32 %v5215_v17 }
 0x6d8   :  { %v1496_v58 = vand.u32 2147483648, %v1479_v22  ;;  %v1494_v27 = vand.u32 2147483647, %v1479_v22  ;;  %vm1490_vm13 = vweird.f32 %v1479_v22 }
 0x6da   :  { %v1446_v55 = vpop.f32.mrf.mxu0  ;;  %vm1495_vm5 = vcmp.eq.f32.partialorder %v1494_v27, 8.507059e+37 }
 0x6db   :  { %v1447_v57 = vadd.f32 %v1446_v55, %v6510_v14 }
 0x6dd   :  { %v5216_v47 = vmul.f32 -1.442695, %v1447_v57  ;;  %v5878_v48 = vpop.eup %5877 }
 0x6de   :  { %v7275_v6 = vadd.f32 1.0, %v5878_v48 }
 0x6df   :  { %5879 = vpow2.f32 %v5216_v47 }
 0x6e0   :  { %5881 = vrcp.f32 %v1479_v22  ;;  %vm1505_vm8 = vweird.f32 %v7275_v6 }
 0x6e2   :  { %v1448_v15 = vpop.f32.mrf.mxu0 }
 0x6e3   :  { %v1449_v51 = vadd.f32 %v1448_v15, %v6533_v26 }
 0x6e5   :  { %v5880_v63 = vpop.eup %5879  ;;  %v5217_v16 = vmul.f32 -1.442695, %v1449_v51 }
 0x6e6   :  { %v7273_v19 = vadd.f32 1.0, %v5880_v63  ;;  %v5882_v60 = vpop.eup %5881 }
 0x6e7   :  { %5883 = vpow2.f32 %v5217_v16  ;;  %v1486_v23 = vmul.f32 %v5882_v60, %v1479_v22  ;;  %vm1491_vm11 = vweird.f32 %v5882_v60 }
 0x6e8   :  { %5885 = vrcp.f32 %v7273_v19  ;;  %vm7298_vm15 = vmor %vm1490_vm13, %vm1491_vm11  ;;  %v1526_v15 = vand.u32 2147483648, %v7273_v19  ;;  %vm1520_vm4 = vweird.f32 %v7273_v19  ;;  %v1524_v63 = vand.u32 2147483647, %v7273_v19 }
 0x6e9   :  { %5887 = vrcp.f32 %v7275_v6  ;;  %v1487_v25 = vsub.f32 1.0, %v1486_v23 }
 0x6ea   :  { %v1451_v36 = vpop.f32.mrf.mxu0  ;;  %v1527_v23 = vor.u32 1.1754944e-38, %v1526_v15  ;;  %vm1525_vm9 = vcmp.eq.f32.partialorder %v1524_v63, 8.507059e+37 }
 0x6eb   :  { %v1452_v13 = vadd.f32 %v1451_v36, %v6552_v39  ;;  %v1488_v44 = vmul.f32 %v5882_v60, %v1487_v25  ;;  %v1497_v36 = vor.u32 1.1754944e-38, %v1496_v58  ;;  %v1511_v25 = vand.u32 2147483648, %v7275_v6 }
 0x6ed   :  { %v5884_v46 = vpop.eup %5883  ;;  %v5218_v41 = vmul.f32 -1.442695, %v1452_v13  ;;  %v1489_v52 = vadd.f32 %v5882_v60, %v1488_v44 }
 0x6ee   :  { %v5886_v20 = vpop.eup %5885  ;;  %v7280_v53 = vadd.f32 1.0, %v5884_v46 }
 0x6ef   :  { %5889 = vpow2.f32 %v5218_v41  ;;  %v1516_v42 = vmul.f32 %v5886_v20, %v7273_v19  ;;  %v7284_v30 = vpop.eup %5887  ;;  %vm1521_vm14 = vweird.f32 %v5886_v20  ;;  %v1493_v22 = vsel %vm7298_vm15, %v5882_v60, %v1489_v52 }
 0x6f0   :  { %5891 = vrcp.f32 %v7280_v53  ;;  %v1501_v43 = vmul.f32 %v7284_v30, %v7275_v6  ;;  %vm7313_vm6 = vmor %vm1520_vm4, %vm1521_vm14  ;;  %vm1506_vm7 = vweird.f32 %v7284_v30  ;;  %v1498_v19 = vsel %vm1495_vm5, %v1497_v36, %v1493_v22 }
 0x6f1   :  { %v1517_v50 = vsub.f32 1.0, %v1516_v42  ;;  %vm7330_vm10 = vmor %vm1505_vm8, %vm1506_vm7  ;;  %v1577_v44 = vmul.f32 %v1498_v19, %v7174_v3  ;;  %v1512_v52 = vor.u32 1.1754944e-38, %v1511_v25  ;;  %vm1535_vm13 = vweird.f32 %v7280_v53 }
 0x6f2   :  { %v1453_v32 = vpop.f32.mrf.mxu0  ;;  %v1502_v24 = vsub.f32 1.0, %v1501_v43  ;;  %v1539_v3 = vand.u32 2147483647, %v7280_v53 }
 0x6f3   :  { %v1454_v35 = vadd.f32 %v1453_v32, %v6579_v1  ;;  %v1518_v28 = vmul.f32 %v5886_v20, %v1517_v50 }
 0x6f4   :  { %v1503_v47 = vmul.f32 %v7284_v30, %v1502_v24  ;;  %vm1540_vm7 = vcmp.eq.f32.partialorder %v1539_v3, 8.507059e+37 }
 0x6f5   :  { %v5890_v45 = vpop.eup %5889  ;;  %v5219_v56 = vmul.f32 -1.442695, %v1454_v35  ;;  %v1519_v55 = vadd.f32 %v5886_v20, %v1518_v28 }
 0x6f6   :  { %v7289_v0 = vpop.eup %5891  ;;  %v7291_v40 = vadd.f32 1.0, %v5890_v45  ;;  %v1504_v42 = vadd.f32 %v7284_v30, %v1503_v47 }
 0x6f7   :  { %5893 = vpow2.f32 %v5219_v56  ;;  %v1531_v37 = vmul.f32 %v7289_v0, %v7280_v53  ;;  %v1523_v60 = vsel %vm7313_vm6, %v5886_v20, %v1519_v55  ;;  %v1509_v20 = vand.u32 2147483647, %v7275_v6 }
 0x6f8   :  { %5895 = vrcp.f32 %v7291_v40  ;;  %v1528_v45 = vsel %vm1525_vm9, %v1527_v23, %v1523_v60  ;;  %vm1536_vm11 = vweird.f32 %v7289_v0  ;;  %v1508_v24 = vsel %vm7330_vm10, %v7284_v30, %v1504_v42 }
 0x6f9   :  { %v1532_v17 = vsub.f32 1.0, %v1531_v37  ;;  %vm1510_vm15 = vcmp.eq.f32.partialorder %v1509_v20, 8.507059e+37  ;;  %vm1537_vm4 = vmor %vm1535_vm13, %vm1536_vm11  ;;  %v1556_v30 = vand.u32 2147483648, %v7291_v40  ;;  %vm1550_vm5 = vweird.f32 %v7291_v40 }
 0x6fa   :  { %v1456_v8 = vpop.f32.mrf.mxu0 }
 0x6fb   :  { %v1457_v49 = vadd.f32 %v1456_v8, %v6603_v33  ;;  %v1533_v46 = vmul.f32 %v7289_v0, %v1532_v17  ;;  %v1541_v8 = vand.u32 2147483648, %v7280_v53  ;;  %v1513_v17 = vsel %vm1510_vm15, %v1512_v52, %v1508_v24 }
 0x6fc   :  { %v1578_v36 = vmul.f32 %v1513_v17, %v7188_v38 }
 0x6fd   :  { %v5894_v57 = vpop.eup %5893  ;;  %5897 = vtanh.f32 %v1457_v49  ;;  %v1534_v28 = vadd.f32 %v7289_v0, %v1533_v46  ;;  %v1542_v47 = vor.u32 1.1754944e-38, %v1541_v8 }
 0x6fe   :  { %v7303_v51 = vpop.eup %5895  ;;  %v7305_v48 = vadd.f32 1.0, %v5894_v57  ;;  %v1554_v57 = vand.u32 2147483647, %v7291_v40 }
 0x6ff   :  { %v1546_v16 = vmul.f32 %v7303_v51, %v7291_v40  ;;  %vm1551_vm14 = vweird.f32 %v7303_v51  ;;  %v1538_v55 = vsel %vm1537_vm4, %v7289_v0, %v1534_v28  ;;  %v1646_v28 = vpop.permute.xlu1 %1645 }
 0x700   :  { %5899 = vrcp.f32 %v7305_v48  ;;  %vm1552_vm6 = vmor %vm1550_vm5, %vm1551_vm14  ;;  %v1543_v63 = vsel %vm1540_vm7, %v1542_v47, %v1538_v55  ;;  %vm1555_vm8 = vcmp.eq.f32.partialorder %v1554_v57, 8.507059e+37  ;;  %v1571_v19 = vand.u32 2147483648, %v7305_v48 }
 0x701   :  { %v1547_v41 = vsub.f32 1.0, %v1546_v16  ;;  %v1557_v16 = vor.u32 1.1754944e-38, %v1556_v30  ;;  %vm1565_vm10 = vweird.f32 %v7305_v48 }
 0x702   :  { %v1458_v32 = vpop.f32.mrf.mxu0  ;;  %v1572_v42 = vor.u32 1.1754944e-38, %v1571_v19 }
 0x703   :  { %v5898_v35 = vpop.eup %5897  ;;  %v1548_v50 = vmul.f32 %v7303_v51, %v1547_v41  ;;  %v1459_v43 = vadd.f32 %v1458_v32, %v6655_v34 }
 0x704   :  { %v1579_v37 = vmul.f32 %v5898_v35, %v1528_v45 }
 0x705   :  { %5901 = vtanh.f32 %v1459_v43  ;;  %v1549_v49 = vadd.f32 %v7303_v51, %v1548_v50 }
 0x706   :  { %v5900_v6 = vpop.eup %5899  ;;  %v7341_v58 = vadd.f32 %v1579_v37, %v1577_v44  ;;  %v7388_v44 = vld [vmem:[%s9581_s0 + $0x60] sm:$0xff]  ;;  %v1652_v37 = vpop.permute.xlu0 %1651 }
 0x707   :  { %v1561_v27 = vmul.f32 %v5900_v6, %v7305_v48  ;;  %v1553_v15 = vsel %vm1552_vm6, %v7303_v51, %v1549_v49  ;;  %vm1566_vm9 = vweird.f32 %v5900_v6  ;;  %v1569_v51 = vand.u32 2147483647, %v7305_v48 }
 0x708   :  { %5903 = vtanh.f32 %v7341_v58  ;;  %v1558_v46 = vsel %vm1555_vm8, %v1557_v16, %v1553_v15  ;;  %vm1567_vm11 = vmor %vm1565_vm10, %vm1566_vm9  ;;  %v1657_v24 = vsel %vm133_vm1, %v1646_v28, %v1652_v37 }
 0x709   :  { %v1562_v53 = vsub.f32 1.0, %v1561_v27  ;;  %vm1570_vm13 = vcmp.eq.f32.partialorder %v1569_v51, 8.507059e+37  ;;  %v1659_v8 = vmul.f32 %v1657_v24, %v6373_v5 }
 0x70b   :  { %v5902_v18 = vpop.eup %5901  ;;  %v1563_v22 = vmul.f32 %v5900_v6, %v1562_v53 }
 0x70c   :  { %v1580_v13 = vmul.f32 %v5902_v18, %v1543_v63 }
 0x70d   :  { %v1564_v41 = vadd.f32 %v5900_v6, %v1563_v22 }
 0x70e   :  { %v5904_v60 = vpop.eup %5903  ;;  %v7355_v0 = vadd.f32 %v1580_v13, %v1578_v36 }
 0x70f   :  { %v1585_v40 = vmul.f32 %v5904_v60, %v1558_v46  ;;  %v1568_v23 = vsel %vm1567_vm11, %v5900_v6, %v1564_v41  ;;  %v1661_v6 = vpack.c.bf16 %v1659_v8, %v1659_v8 }
 0x710   :  { %5905 = vtanh.f32 %v7355_v0  ;;  %v1573_v32 = vsel %vm1570_vm13, %v1572_v42, %v1568_v23 }
 0x711   :  { %1671 = vrot.lane.b32.xlu2 %v1585_v40, %s6309_s28  ;;  %1588 = vst.msk [vmem:[#allocation3 + $0x40] sm:$0xff] %vm383_vm12, %v1585_v40  ;;  %v1641_v38 = vpack.c.bf16 %v1585_v40, %v1585_v40  ;;  %1665 = vrot.lane.b32.xlu0 %v1585_v40, %s6310_s29 }
 0x712   :  { %1663 = vst.msk [vmem:[#allocation2 + $0x20] sm:$0xf] %vm108_vm0, %v1661_v6 }
 0x713   :  { %1643 = vst.msk [vmem:[#allocation2 + $0x18] sm:$0xf] %vm108_vm0, %v1641_v38 }
 0x716   :  { %v5906_v25 = vpop.eup %5905 }
 0x717   :  { %v1586_v35 = vmul.f32 %v5906_v25, %v1573_v32 }
 0x718   :  { %v3737_v50 = vld [vmem:[#allocation3 + $0x40] sm:$0xff] }
 0x719   :  { %1667 = vrot.lane.b32.xlu1 %v1586_v35, %s6310_s29  ;;  %1589 = vst.msk [vmem:[#allocation3 + $0x48] sm:$0xff] %vm383_vm12, %v1586_v35  ;;  %v1642_v48 = vpack.c.bf16 %v1586_v35, %v1586_v35  ;;  %1617 = vrot.lane.b32.xlu2 %v1585_v40, %s6311_s30  ;;  %v3783_v45 = vpack.c.bf16 %v3737_v50, %v3737_v50 }
 0x71a   :  { %1673 = vrot.lane.b32.xlu0 %v1586_v35, %s6309_s28 }
 0x71b   :  { %1644 = vst.msk [vmem:[#allocation2 + $0x1c] sm:$0xf] %vm108_vm0, %v1642_v48 }
 0x71c   :  { %3785 = vst.msk [vmem:[#allocation2 + $0x10] sm:$0xf] %vm108_vm0, %v3783_v45 }
 0x720   :  { %v3738_v43 = vld [vmem:[#allocation3 + $0x48] sm:$0xff] }
 0x721   :  { %1653 = vrot.lane.b32.xlu1 %v7232_v54, %s6309_s28  ;;  %1625 = vrot.lane.b32.xlu2 %v1586_v35, %s6312_s8  ;;  %v3784_v20 = vpack.c.bf16 %v3738_v43, %v3738_v43 }
 0x722   :  { %1595 = vrot.lane.b32.xlu0 %v7221_v62, %s6311_s30 }
 0x723   :  { %v7376_v56 = vld [vmem:[#allocation2 + $0x10] sm:$0xff] }
 0x724   :  { %3786 = vst.msk [vmem:[#allocation2 + $0x14] sm:$0xf] %vm108_vm0, %v3784_v20  ;;  %v5672_v20 = vld [vmem:[#allocation2 + $0x18] sm:$0xff] }
 0x729   :  { %1623 = vrot.lane.b32.xlu1 %v1585_v40, %s6312_s8  ;;  %1601 = vrot.lane.b32.xlu2 %v7221_v62, %s6312_s8  ;;  %v7399_v62 = vld [vmem:[%s9581_s0 + $0x68] sm:$0xff] }
 0x72a   :  { %1619 = vrot.lane.b32.xlu0 %v1586_v35, %s6311_s30 }
 0x731   :  { %1597 = vrot.lane.b32.xlu1 %v7232_v54, %s6311_s30  ;;  %1946 = vrot.lane.b32.xlu2 %v7388_v44, %s6310_s29 }
 0x732   :  { %1603 = vrot.lane.b32.xlu0 %v7232_v54, %s6312_s8  ;;  %v1648_v54 = vpop.permute.xlu2 %1647 }
 0x739   :  { %1952 = vrot.lane.b32.xlu1 %v7388_v44, %s6309_s28 }
 0x73a   :  { %1948 = vrot.lane.b32.xlu0 %v7399_v62, %s6310_s29 }
 0x76b   :  { %v1672_v52 = vpop.permute.xlu2 %1671 }
 0x773   :  { %v1618_v3 = vpop.permute.xlu2 %1617 }
 0x77b   :  { %v1626_v55 = vpop.permute.xlu2 %1625 }
 0x783   :  { %v1666_v49 = vpop.permute.xlu0 %1665  ;;  %v1602_v22 = vpop.permute.xlu2 %1601 }
 0x784   :  { %v1677_v27 = vsel %vm133_vm1, %v1666_v49, %v1672_v52  ;;  %v7438_v52 = vld [vmem:[%s9584_s2 + $0x8] sm:$0xff] }
 0x785   :  { %v1679_v30 = vmul.f32 %v1677_v27, %v6373_v5 }
 0x787   :  { %v1681_v17 = vpack.c.bf16 %v1679_v30, %v1679_v30 }
 0x789   :  { %1683 = vst.msk [vmem:[#allocation2 + $0x28] sm:$0xf] %vm108_vm0, %v1681_v17 }
 0x78b   :  { %v1668_v57 = vpop.permute.xlu1 %1667 }
 0x78c   :  { %v1674_v53 = vpop.permute.xlu0 %1673 }
 0x78d   :  { %v1678_v47 = vsel %vm133_vm1, %v1668_v57, %v1674_v53 }
 0x78e   :  { %v1680_v18 = vmul.f32 %v1678_v47, %v6373_v5 }
 0x790   :  { %v1682_v15 = vpack.c.bf16 %v1680_v18, %v1680_v18 }
 0x792   :  { %1684 = vst.msk [vmem:[#allocation2 + $0x2c] sm:$0xf] %vm108_vm0, %v1682_v15 }
 0x793   :  { %v1654_v63 = vpop.permute.xlu1 %1653 }
 0x794   :  { %v1658_v16 = vsel %vm133_vm1, %v1648_v54, %v1654_v63  ;;  %v1596_v36 = vpop.permute.xlu0 %1595  ;;  %v7431_v54 = vld [vmem:[%s9584_s2] sm:$0xff] }
 0x795   :  { %v1660_v13 = vmul.f32 %v1658_v16, %v6373_v5  ;;  %v1607_v60 = vsel %vm100_vm2, %v1596_v36, %v1602_v22 }
 0x796   :  { %v1609_v46 = vmul.f32 %v1607_v60, %v6389_v10 }
 0x797   :  { %v1662_v41 = vpack.c.bf16 %v1660_v13, %v1660_v13 }
 0x798   :  { %v1611_v40 = vpack.c.bf16 %v1609_v46, %v1609_v46 }
 0x799   :  { %1664 = vst.msk [vmem:[#allocation2 + $0x24] sm:$0xf] %vm108_vm0, %v1662_v41  ;;  %v5674_v19 = vld [vmem:[#allocation2 + $0x28] sm:$0xff] }
 0x79a   :  { %1613 = vst.msk [vmem:[#allocation2] sm:$0xf] %vm108_vm0, %v1611_v40  ;;  %1735 = vmatpush.bf16.msrb.mxu1 %v5674_v19 }
 0x79b   :  { %v1624_v51 = vpop.permute.xlu1 %1623 }
 0x79c   :  { %v1629_v38 = vsel %vm100_vm2, %v1618_v3, %v1624_v51  ;;  %v1620_v23 = vpop.permute.xlu0 %1619  ;;  %v7452_v3 = vld [vmem:[%s9584_s2 + $0x18] sm:$0xff] }
 0x79d   :  { %v1631_v42 = vmul.f32 %v1629_v38, %v6389_v10  ;;  %v1630_v25 = vsel %vm100_vm2, %v1620_v23, %v1626_v55 }
 0x79e   :  { %v1632_v32 = vmul.f32 %v1630_v25, %v6389_v10 }
 0x79f   :  { %v1633_v35 = vpack.c.bf16 %v1631_v42, %v1631_v42 }
 0x7a0   :  { %v1634_v50 = vpack.c.bf16 %v1632_v32, %v1632_v32  ;;  %v5673_v48 = vld [vmem:[#allocation2 + $0x20] sm:$0xff] }
 0x7a1   :  { %1635 = vst.msk [vmem:[#allocation2 + $0x8] sm:$0xf] %vm108_vm0, %v1633_v35  ;;  %1736 = vmatpush.bf16.msrb.mxu1 %v5673_v48 }
 0x7a2   :  { %1636 = vst.msk [vmem:[#allocation2 + $0xc] sm:$0xf] %vm108_vm0, %v1634_v50 }
 0x7a3   :  { %v1598_v45 = vpop.permute.xlu1 %1597 }
 0x7a4   :  { %v1604_v43 = vpop.permute.xlu0 %1603 }
 0x7a5   :  { %v1608_v37 = vsel %vm100_vm2, %v1598_v45, %v1604_v43  ;;  %1737 = vmatpush.bf16.msrb.mxu1 %v5672_v20 }
 0x7a6   :  { %v1610_v28 = vmul.f32 %v1608_v37, %v6389_v10 }
 0x7a8   :  { %v1612_v24 = vpack.c.bf16 %v1610_v28, %v1610_v28 }
 0x7a9   :  { %1738 = vmatpush.bf16.msrb.mxu1 %v6595_v29  ;;  %v5670_v8 = vld [vmem:[#allocation2 + $0x8] sm:$0xff]  ;;  %v7445_v29 = vld [vmem:[%s9584_s2 + $0x10] sm:$0xff] }
 0x7aa   :  { %1614 = vst.msk [vmem:[#allocation2 + $0x4] sm:$0xf] %vm108_vm0, %v1612_v24 }
 0x7ad   :  { %1739 = vmatpush.bf16.msrb.mxu1 %v5670_v8 }
 0x7b1   :  { %v5669_v6 = vld [vmem:[#allocation2] sm:$0xff] }
 0x7b2   :  { %1740 = vmatpush.bf16.msrb.mxu1 %v5669_v6 }
 0x7b5   :  { %5246 = vmatmul.msk.bf16.vlgmr.msrb.gmra.mxu1 %vm215_vm3, %v7431_v54 }
 0x7c5   :  { %5247 = vmatmul.msk.bf16.gmra.mxu1 %vm215_vm3, %v7438_v52 }
 0x7d5   :  { %5248 = vmatmul.msk.bf16.gmra.mxu1 %vm215_vm3, %v7445_v29 }
 0x7e5   :  { %5249 = vmatmul.msk.bf16.gmra.mxu1 %vm215_vm3, %v7452_v3 }
 0x832   :  { %v1742_v49 = vpop.f32.mrf.mxu1 }
 0x833   :  { %v1743_v27 = vadd.f32 %v1742_v49, %v6483_v61 }
 0x835   :  { %v5250_v17 = vmul.f32 -1.442695, %v1743_v27 }
 0x837   :  { %5907 = vpow2.f32 %v5250_v17 }
 0x83a   :  { %v1744_v30 = vpop.f32.mrf.mxu1 }
 0x83b   :  { %v1745_v55 = vadd.f32 %v1744_v30, %v6501_v4 }
 0x83d   :  { %v5251_v57 = vmul.f32 -1.442695, %v1745_v55  ;;  %v5908_v15 = vpop.eup %5907 }
 0x83e   :  { %v1780_v22 = vadd.f32 1.0, %v5908_v15 }
 0x83f   :  { %5909 = vpow2.f32 %v5251_v57 }
 0x840   :  { %vm1791_vm15 = vweird.f32 %v1780_v22 }
 0x842   :  { %v1747_v53 = vpop.f32.mrf.mxu1 }
 0x843   :  { %v1748_v47 = vadd.f32 %v1747_v53, %v6510_v14  ;;  %v1797_v53 = vand.u32 2147483648, %v1780_v22 }
 0x845   :  { %v5252_v18 = vmul.f32 -1.442695, %v1748_v47  ;;  %v5910_v36 = vpop.eup %5909 }
 0x846   :  { %v7462_v41 = vadd.f32 1.0, %v5910_v36 }
 0x847   :  { %5911 = vpow2.f32 %v5252_v18  ;;  %v1795_v18 = vand.u32 2147483647, %v1780_v22 }
 0x848   :  { %5913 = vrcp.f32 %v1780_v22  ;;  %vm1806_vm10 = vweird.f32 %v7462_v41 }
 0x849   :  { %vm1796_vm7 = vcmp.eq.f32.partialorder %v1795_v18, 8.507059e+37 }
 0x84a   :  { %v1749_v63 = vpop.f32.mrf.mxu1 }
 0x84b   :  { %v1750_v16 = vadd.f32 %v1749_v63, %v6533_v26 }
 0x84d   :  { %v5912_v13 = vpop.eup %5911  ;;  %v5253_v60 = vmul.f32 -1.442695, %v1750_v16 }
 0x84e   :  { %v7460_v46 = vadd.f32 1.0, %v5912_v13  ;;  %v5914_v19 = vpop.eup %5913 }
 0x84f   :  { %5915 = vpow2.f32 %v5253_v60  ;;  %v1787_v25 = vmul.f32 %v5914_v19, %v1780_v22  ;;  %vm1792_vm14 = vweird.f32 %v5914_v19 }
 0x850   :  { %5917 = vrcp.f32 %v7460_v46  ;;  %vm7484_vm5 = vmor %vm1791_vm15, %vm1792_vm14  ;;  %v1827_v60 = vand.u32 2147483648, %v7460_v46  ;;  %vm1821_vm6 = vweird.f32 %v7460_v46 }
 0x851   :  { %5919 = vrcp.f32 %v7462_v41  ;;  %v1788_v48 = vsub.f32 1.0, %v1787_v25 }
 0x852   :  { %v1752_v40 = vpop.f32.mrf.mxu1 }
 0x853   :  { %v1753_v51 = vadd.f32 %v1752_v40, %v6552_v39  ;;  %v1789_v6 = vmul.f32 %v5914_v19, %v1788_v48 }
 0x855   :  { %v5916_v38 = vpop.eup %5915  ;;  %v5254_v23 = vmul.f32 -1.442695, %v1753_v51  ;;  %v1790_v57 = vadd.f32 %v5914_v19, %v1789_v6 }
 0x856   :  { %v5918_v42 = vpop.eup %5917  ;;  %v7467_v32 = vadd.f32 1.0, %v5916_v38  ;;  %v1825_v38 = vand.u32 2147483647, %v7460_v46 }
 0x857   :  { %5921 = vpow2.f32 %v5254_v23  ;;  %v1817_v35 = vmul.f32 %v5918_v42, %v7460_v46  ;;  %v7471_v50 = vpop.eup %5919  ;;  %vm1822_vm4 = vweird.f32 %v5918_v42  ;;  %v1794_v22 = vsel %vm7484_vm5, %v5914_v19, %v1790_v57 }
 0x858   :  { %5923 = vrcp.f32 %v7467_v32  ;;  %v1802_v28 = vmul.f32 %v7471_v50, %v7462_v41  ;;  %v1798_v23 = vor.u32 1.1754944e-38, %v1797_v53  ;;  %vm7500_vm8 = vmor %vm1821_vm6, %vm1822_vm4  ;;  %vm1807_vm9 = vweird.f32 %v7471_v50 }
 0x859   :  { %v1818_v20 = vsub.f32 1.0, %v1817_v35  ;;  %vm1826_vm11 = vcmp.eq.f32.partialorder %v1825_v38, 8.507059e+37  ;;  %vm7517_vm13 = vmor %vm1806_vm10, %vm1807_vm9  ;;  %v1842_v18 = vand.u32 2147483648, %v7467_v32  ;;  %vm1836_vm15 = vweird.f32 %v7467_v32 }
 0x85a   :  { %v1754_v45 = vpop.f32.mrf.mxu1  ;;  %v1803_v17 = vsub.f32 1.0, %v1802_v28  ;;  %v1799_v46 = vsel %vm1796_vm7, %v1798_v23, %v1794_v22 }
 0x85b   :  { %v1755_v43 = vadd.f32 %v1754_v45, %v6579_v1  ;;  %v1819_v30 = vmul.f32 %v5918_v42, %v1818_v20  ;;  %v1843_v38 = vor.u32 1.1754944e-38, %v1842_v18  ;;  %v7575_v18 = vld [vmem:[%s9581_s0 + $0x70] sm:$0xff] }
 0x85c   :  { %v1804_v13 = vmul.f32 %v7471_v50, %v1803_v17 }
 0x85d   :  { %v5922_v37 = vpop.eup %5921  ;;  %v5255_v24 = vmul.f32 -1.442695, %v1755_v43  ;;  %v1820_v63 = vadd.f32 %v5918_v42, %v1819_v30  ;;  %v1828_v43 = vor.u32 1.1754944e-38, %v1827_v60 }
 0x85e   :  { %v7476_v8 = vpop.eup %5923  ;;  %v7478_v49 = vadd.f32 1.0, %v5922_v37  ;;  %v1805_v20 = vadd.f32 %v7471_v50, %v1804_v13  ;;  %v1812_v37 = vand.u32 2147483648, %v7462_v41 }
 0x85f   :  { %5925 = vpow2.f32 %v5255_v24  ;;  %v1832_v27 = vmul.f32 %v7476_v8, %v7467_v32  ;;  %v1824_v19 = vsel %vm7500_vm8, %v5918_v42, %v1820_v63  ;;  %v1810_v42 = vand.u32 2147483647, %v7462_v41 }
 0x860   :  { %5927 = vrcp.f32 %v7478_v49  ;;  %vm1837_vm14 = vweird.f32 %v7476_v8  ;;  %vm1851_vm7 = vweird.f32 %v7478_v49  ;;  %v1855_v22 = vand.u32 2147483647, %v7478_v49 }
 0x861   :  { %v1833_v15 = vsub.f32 1.0, %v1832_v27  ;;  %v1829_v27 = vsel %vm1826_vm11, %v1828_v43, %v1824_v19  ;;  %vm1811_vm5 = vcmp.eq.f32.partialorder %v1810_v42, 8.507059e+37  ;;  %vm1838_vm6 = vmor %vm1836_vm15, %vm1837_vm14 }
 0x862   :  { %v1757_v55 = vpop.f32.mrf.mxu1  ;;  %vm1856_vm10 = vcmp.eq.f32.partialorder %v1855_v22, 8.507059e+37 }
 0x863   :  { %v1758_v47 = vadd.f32 %v1757_v55, %v6603_v33  ;;  %v1834_v48 = vmul.f32 %v7476_v8, %v1833_v15  ;;  %v1878_v55 = vmul.f32 %v1799_v46, %v7341_v58  ;;  %v1813_v15 = vor.u32 1.1754944e-38, %v1812_v37 }
 0x864   :  { %v1840_v58 = vand.u32 2147483647, %v7467_v32 }
 0x865   :  { %v5926_v16 = vpop.eup %5925  ;;  %5929 = vtanh.f32 %v1758_v47  ;;  %v1835_v53 = vadd.f32 %v7476_v8, %v1834_v48  ;;  %v1809_v47 = vsel %vm7517_vm13, %v7471_v50, %v1805_v20  ;;  %v1857_v50 = vand.u32 2147483648, %v7478_v49 }
 0x866   :  { %v7490_v40 = vpop.eup %5927  ;;  %v7492_v51 = vadd.f32 1.0, %v5926_v16  ;;  %v1814_v13 = vsel %vm1811_vm5, %v1813_v15, %v1809_v47  ;;  %vm1841_vm9 = vcmp.eq.f32.partialorder %v1840_v58, 8.507059e+37  ;;  %v1947_v15 = vpop.permute.xlu2 %1946 }
 0x867   :  { %v1847_v25 = vmul.f32 %v7490_v40, %v7478_v49  ;;  %vm1852_vm4 = vweird.f32 %v7490_v40  ;;  %v1839_v60 = vsel %vm1838_vm6, %v7476_v8, %v1835_v53  ;;  %v1858_v48 = vor.u32 1.1754944e-38, %v1857_v50  ;;  %v1953_v58 = vpop.permute.xlu1 %1952 }
 0x868   :  { %5931 = vrcp.f32 %v7492_v51  ;;  %vm1853_vm8 = vmor %vm1851_vm7, %vm1852_vm4  ;;  %v1844_v19 = vsel %vm1841_vm9, %v1843_v38, %v1839_v60  ;;  %vm1866_vm13 = vweird.f32 %v7492_v51  ;;  %v1949_v60 = vpop.permute.xlu0 %1948 }
 0x869   :  { %v1848_v45 = vsub.f32 1.0, %v1847_v25 }
 0x86a   :  { %v1759_v28 = vpop.f32.mrf.mxu1 }
 0x86b   :  { %v5930_v24 = vpop.eup %5929  ;;  %v1849_v6 = vmul.f32 %v7490_v40, %v1848_v45  ;;  %v1760_v30 = vadd.f32 %v1759_v28, %v6655_v34  ;;  %v1879_v45 = vmul.f32 %v1814_v13, %v7355_v0  ;;  %v1872_v28 = vand.u32 2147483648, %v7492_v51 }
 0x86c   :  { %v1880_v57 = vmul.f32 %v5930_v24, %v1829_v27 }
 0x86d   :  { %5933 = vtanh.f32 %v1760_v30  ;;  %v1850_v16 = vadd.f32 %v7490_v40, %v1849_v6  ;;  %v1873_v6 = vor.u32 1.1754944e-38, %v1872_v28 }
 0x86e   :  { %v5932_v41 = vpop.eup %5931  ;;  %v7528_v63 = vadd.f32 %v1880_v57, %v1878_v55 }
 0x86f   :  { %v1862_v36 = vmul.f32 %v5932_v41, %v7492_v51  ;;  %v1854_v25 = vsel %vm1853_vm8, %v7490_v40, %v1850_v16  ;;  %vm1867_vm11 = vweird.f32 %v5932_v41  ;;  %v1870_v40 = vand.u32 2147483647, %v7492_v51 }
 0x870   :  { %5935 = vtanh.f32 %v7528_v63  ;;  %v1859_v20 = vsel %vm1856_vm10, %v1858_v48, %v1854_v25  ;;  %vm1868_vm14 = vmor %vm1866_vm13, %vm1867_vm11  ;;  %v1958_v16 = vsel %vm133_vm1, %v1947_v15, %v1953_v58 }
 0x871   :  { %v1863_v32 = vsub.f32 1.0, %v1862_v36  ;;  %vm1871_vm15 = vcmp.eq.f32.partialorder %v1870_v40, 8.507059e+37  ;;  %v1960_v36 = vmul.f32 %v1958_v16, %v6373_v5 }
 0x873   :  { %v5934_v23 = vpop.eup %5933  ;;  %v1864_v35 = vmul.f32 %v5932_v41, %v1863_v32  ;;  %v1962_v50 = vpack.c.bf16 %v1960_v36, %v1960_v36 }
 0x874   :  { %v1881_v46 = vmul.f32 %v5934_v23, %v1844_v19 }
 0x875   :  { %v1865_v37 = vadd.f32 %v5932_v41, %v1864_v35  ;;  %1964 = vst.msk [vmem:[#allocation2 + $0x20] sm:$0xf] %vm108_vm0, %v1962_v50 }
 0x876   :  { %v5936_v43 = vpop.eup %5935  ;;  %v7542_v8 = vadd.f32 %v1881_v46, %v1879_v45 }
 0x877   :  { %v1886_v49 = vmul.f32 %v5936_v43, %v1859_v20  ;;  %v1869_v24 = vsel %vm1868_vm14, %v5932_v41, %v1865_v37  ;;  %v7592_v41 = vld [vmem:[#allocation3 + $0x8] sm:$0xff] }
 0x878   :  { %5937 = vtanh.f32 %v7542_v8  ;;  %v1874_v30 = vsel %vm1871_vm15, %v1873_v6, %v1869_v24 }
 0x879   :  { %1972 = vrot.lane.b32.xlu0 %v1886_v49, %s6309_s28  ;;  %1889 = vst.msk [vmem:[#allocation3 + $0x50] sm:$0xff] %vm383_vm12, %v1886_v49  ;;  %v1942_v0 = vpack.c.bf16 %v1886_v49, %v1886_v49  ;;  %1966 = vrot.lane.b32.xlu1 %v1886_v49, %s6310_s29 }
 0x87b   :  { %1944 = vst.msk [vmem:[#allocation2 + $0x18] sm:$0xf] %vm108_vm0, %v1942_v0 }
 0x87e   :  { %v5938_v27 = vpop.eup %5937 }
 0x87f   :  { %v1887_v42 = vmul.f32 %v5938_v27, %v1874_v30 }
 0x880   :  { %v4036_v17 = vld [vmem:[#allocation3 + $0x50] sm:$0xff] }
 0x881   :  { %1968 = vrot.lane.b32.xlu2 %v1887_v42, %s6310_s29  ;;  %1890 = vst.msk [vmem:[#allocation3 + $0x58] sm:$0xff] %vm383_vm12, %v1887_v42  ;;  %v1943_v51 = vpack.c.bf16 %v1887_v42, %v1887_v42  ;;  %1918 = vrot.lane.b32.xlu0 %v1886_v49, %s6311_s30  ;;  %v4082_v55 = vpack.c.bf16 %v4036_v17, %v4036_v17 }
 0x882   :  { %1974 = vrot.lane.b32.xlu1 %v1887_v42, %s6309_s28 }
 0x883   :  { %1945 = vst.msk [vmem:[#allocation2 + $0x1c] sm:$0xf] %vm108_vm0, %v1943_v51 }
 0x884   :  { %4084 = vst.msk [vmem:[#allocation2 + $0x10] sm:$0xf] %vm108_vm0, %v4082_v55 }
 0x888   :  { %v4037_v57 = vld [vmem:[#allocation3 + $0x58] sm:$0xff] }
 0x889   :  { %1954 = vrot.lane.b32.xlu2 %v7399_v62, %s6309_s28  ;;  %1926 = vrot.lane.b32.xlu0 %v1887_v42, %s6312_s8  ;;  %v4083_v53 = vpack.c.bf16 %v4037_v57, %v4037_v57 }
 0x88a   :  { %1896 = vrot.lane.b32.xlu1 %v7388_v44, %s6311_s30  ;;  %v5678_v50 = vld [vmem:[#allocation2 + $0x18] sm:$0xff] }
 0x88b   :  { %v7563_v47 = vld [vmem:[#allocation2 + $0x10] sm:$0xff] }
 0x88c   :  { %4085 = vst.msk [vmem:[#allocation2 + $0x14] sm:$0xf] %vm108_vm0, %v4083_v53 }
 0x891   :  { %1924 = vrot.lane.b32.xlu2 %v1886_v49, %s6312_s8  ;;  %1902 = vrot.lane.b32.xlu0 %v7388_v44, %s6312_s8  ;;  %v7586_v44 = vld [vmem:[%s9581_s0 + $0x78] sm:$0xff] }
 0x892   :  { %1920 = vrot.lane.b32.xlu1 %v1887_v42, %s6311_s30 }
 0x899   :  { %1898 = vrot.lane.b32.xlu2 %v7399_v62, %s6311_s30  ;;  %2247 = vrot.lane.b32.xlu0 %v7575_v18, %s6310_s29 }
 0x89a   :  { %1904 = vrot.lane.b32.xlu1 %v7399_v62, %s6312_s8  ;;  %v7596_v62 = vld [vmem:[#allocation3] sm:$0xff] }
 0x8a1   :  { %2253 = vrot.lane.b32.xlu2 %v7575_v18, %s6309_s28  ;;  %2255 = vrot.lane.b32.xlu0 %v7586_v44, %s6309_s28 }
 0x8a2   :  { %2249 = vrot.lane.b32.xlu1 %v7586_v44, %s6310_s29 }
 0x8a9   :  { %2585 = vrot.lane.b32.xlu2 %v7592_v41, %s6310_s29  ;;  %2589 = vrot.lane.b32.xlu0 %v7596_v62, %s6309_s28 }
 0x8aa   :  { %2583 = vrot.lane.b32.xlu1 %v7596_v62, %s6310_s29 }
 0x8b2   :  { %2591 = vrot.lane.b32.xlu1 %v7592_v41, %s6309_s28 }
 0x8db   :  { %v1969_v13 = vpop.permute.xlu2 %1968 }
 0x8e3   :  { %v1955_v22 = vpop.permute.xlu2 %1954 }
 0x8e4   :  { %v1959_v32 = vsel %vm133_vm1, %v1949_v60, %v1955_v22 }
 0x8e5   :  { %v1961_v38 = vmul.f32 %v1959_v32, %v6373_v5 }
 0x8e7   :  { %v1963_v23 = vpack.c.bf16 %v1961_v38, %v1961_v38 }
 0x8e9   :  { %1965 = vst.msk [vmem:[#allocation2 + $0x24] sm:$0xf] %vm108_vm0, %v1963_v23 }
 0x8eb   :  { %v1973_v25 = vpop.permute.xlu0 %1972  ;;  %v1967_v35 = vpop.permute.xlu1 %1966 }
 0x8ec   :  { %v1978_v19 = vsel %vm133_vm1, %v1967_v35, %v1973_v25  ;;  %v1925_v46 = vpop.permute.xlu2 %1924 }
 0x8ed   :  { %v1980_v48 = vmul.f32 %v1978_v19, %v6373_v5 }
 0x8ef   :  { %v1982_v45 = vpack.c.bf16 %v1980_v48, %v1980_v48 }
 0x8f0   :  { %v5679_v15 = vld [vmem:[#allocation2 + $0x20] sm:$0xff] }
 0x8f1   :  { %1984 = vst.msk [vmem:[#allocation2 + $0x28] sm:$0xf] %vm108_vm0, %v1982_v45 }
 0x8f3   :  { %v1919_v43 = vpop.permute.xlu0 %1918 }
 0x8f4   :  { %v1930_v20 = vsel %vm100_vm2, %v1919_v43, %v1925_v46  ;;  %v1975_v37 = vpop.permute.xlu1 %1974  ;;  %v1899_v30 = vpop.permute.xlu2 %1898 }
 0x8f5   :  { %v1932_v49 = vmul.f32 %v1930_v20, %v6389_v10  ;;  %v1979_v28 = vsel %vm133_vm1, %v1969_v13, %v1975_v37 }
 0x8f6   :  { %v1981_v40 = vmul.f32 %v1979_v28, %v6373_v5 }
 0x8f7   :  { %v1934_v0 = vpack.c.bf16 %v1932_v49, %v1932_v49 }
 0x8f8   :  { %v1983_v24 = vpack.c.bf16 %v1981_v40, %v1981_v40 }
 0x8f9   :  { %1936 = vst.msk [vmem:[#allocation2 + $0x8] sm:$0xf] %vm108_vm0, %v1934_v0 }
 0x8fa   :  { %1985 = vst.msk [vmem:[#allocation2 + $0x2c] sm:$0xf] %vm108_vm0, %v1983_v24 }
 0x8fb   :  { %v1927_v6 = vpop.permute.xlu0 %1926 }
 0x8fc   :  { %v1897_v27 = vpop.permute.xlu1 %1896  ;;  %v2254_v13 = vpop.permute.xlu2 %2253 }
 0x901   :  { %v5680_v42 = vld [vmem:[#allocation2 + $0x28] sm:$0xff] }
 0x902   :  { %2036 = vmatpush.bf16.msrb.mxu2 %v5680_v42 }
 0x903   :  { %v1903_v17 = vpop.permute.xlu0 %1902 }
 0x904   :  { %v1908_v51 = vsel %vm100_vm2, %v1897_v27, %v1903_v17  ;;  %v1921_v55 = vpop.permute.xlu1 %1920 }
 0x905   :  { %v1910_v57 = vmul.f32 %v1908_v51, %v6389_v10  ;;  %v1931_v53 = vsel %vm100_vm2, %v1921_v55, %v1927_v6  ;;  %v2586_v6 = vpop.permute.xlu2 %2585 }
 0x906   :  { %v1933_v58 = vmul.f32 %v1931_v53, %v6389_v10  ;;  %2037 = vmatpush.bf16.msrb.mxu2 %v5679_v15 }
 0x907   :  { %v1912_v16 = vpack.c.bf16 %v1910_v57, %v1910_v57 }
 0x908   :  { %v1935_v36 = vpack.c.bf16 %v1933_v58, %v1933_v58 }
 0x909   :  { %1914 = vst.msk [vmem:[#allocation2] sm:$0xf] %vm108_vm0, %v1912_v16 }
 0x90a   :  { %1937 = vst.msk [vmem:[#allocation2 + $0xc] sm:$0xf] %vm108_vm0, %v1935_v36  ;;  %2038 = vmatpush.bf16.msrb.mxu2 %v5678_v50 }
 0x90b   :  { %v2248_v60 = vpop.permute.xlu0 %2247 }
 0x90c   :  { %v2259_v22 = vsel %vm133_vm1, %v2248_v60, %v2254_v13  ;;  %v1905_v32 = vpop.permute.xlu1 %1904 }
 0x90d   :  { %v2261_v38 = vmul.f32 %v2259_v22, %v6373_v5  ;;  %v1909_v23 = vsel %vm100_vm2, %v1899_v30, %v1905_v32 }
 0x90e   :  { %v1911_v25 = vmul.f32 %v1909_v23, %v6389_v10  ;;  %2039 = vmatpush.bf16.msrb.mxu2 %v6643_v21 }
 0x90f   :  { %v2263_v35 = vpack.c.bf16 %v2261_v38, %v2261_v38 }
 0x910   :  { %v1913_v19 = vpack.c.bf16 %v1911_v25, %v1911_v25 }
 0x911   :  { %2265 = vst.msk [vmem:[#allocation2 + $0x20] sm:$0xf] %vm108_vm0, %v2263_v35  ;;  %v5676_v48 = vld [vmem:[#allocation2 + $0x8] sm:$0xff] }
 0x912   :  { %1915 = vst.msk [vmem:[#allocation2 + $0x4] sm:$0xf] %vm108_vm0, %v1913_v19  ;;  %2040 = vmatpush.bf16.msrb.mxu2 %v5676_v48 }
 0x913   :  { %v2256_v45 = vpop.permute.xlu0 %2255 }
 0x914   :  { %v2250_v46 = vpop.permute.xlu1 %2249 }
 0x915   :  { %v2260_v43 = vsel %vm133_vm1, %v2250_v46, %v2256_v45 }
 0x916   :  { %v2262_v20 = vmul.f32 %v2260_v43, %v6373_v5 }
 0x918   :  { %v2264_v37 = vpack.c.bf16 %v2262_v20, %v2262_v20 }
 0x919   :  { %v5675_v49 = vld [vmem:[#allocation2] sm:$0xff] }
 0x91a   :  { %2266 = vst.msk [vmem:[#allocation2 + $0x24] sm:$0xf] %vm108_vm0, %v2264_v37  ;;  %2041 = vmatpush.bf16.msrb.mxu2 %v5675_v49 }
 0x91b   :  { %v2590_v28 = vpop.permute.xlu0 %2589 }
 0x91c   :  { %v2584_v21 = vpop.permute.xlu1 %2583 }
 0x91d   :  { %v2595_v40 = vsel %vm133_vm1, %v2584_v21, %v2590_v28  ;;  %5282 = vmatmul.msk.bf16.vlgmr.msrb.gmra.mxu2 %vm215_vm3, %v7431_v54 }
 0x91e   :  { %v2597_v0 = vmul.f32 %v2595_v40, %v6373_v5 }
 0x920   :  { %v2599_v24 = vpack.c.bf16 %v2597_v0, %v2597_v0 }
 0x922   :  { %2601 = vst.msk [vmem:[#allocation2 + $0x20] sm:$0xf] %vm108_vm0, %v2599_v24 }
 0x924   :  { %v2592_v27 = vpop.permute.xlu1 %2591 }
 0x925   :  { %v2596_v30 = vsel %vm133_vm1, %v2586_v6, %v2592_v27 }
 0x926   :  { %v2598_v42 = vmul.f32 %v2596_v30, %v6373_v5 }
 0x928   :  { %v2600_v51 = vpack.c.bf16 %v2598_v42, %v2598_v42 }
 0x929   :  { %v7642_v17 = vld [vmem:[#allocation2 + $0x20] sm:$0xff] }
 0x92a   :  { %2602 = vst.msk [vmem:[#allocation2 + $0x24] sm:$0xf] %vm108_vm0, %v2600_v51 }
 0x92d   :  { %5283 = vmatmul.msk.bf16.gmra.mxu2 %vm215_vm3, %v7438_v52 }
 0x93d   :  { %5284 = vmatmul.msk.bf16.gmra.mxu2 %vm215_vm3, %v7445_v29 }
 0x94d   :  { %5285 = vmatmul.msk.bf16.gmra.mxu2 %vm215_vm3, %v7452_v3 }
 0x9a0   :  { %v2043_v54 = vpop.f32.mrf.mxu2 }
 0x9a1   :  { %v2044_v55 = vadd.f32 %v2043_v54, %v6483_v61 }
 0x9a3   :  { %v5286_v53 = vmul.f32 -1.442695, %v2044_v55 }
 0x9a5   :  { %5939 = vpow2.f32 %v5286_v53 }
 0x9a8   :  { %v2045_v57 = vpop.f32.mrf.mxu2 }
 0x9a9   :  { %v2046_v15 = vadd.f32 %v2045_v57, %v6501_v4 }
 0x9ab   :  { %v5287_v58 = vmul.f32 -1.442695, %v2046_v15  ;;  %v5940_v52 = vpop.eup %5939 }
 0x9ac   :  { %v2081_v29 = vadd.f32 1.0, %v5940_v52 }
 0x9ad   :  { %5941 = vpow2.f32 %v5287_v58 }
 0x9ae   :  { %v2098_v58 = vand.u32 2147483648, %v2081_v29  ;;  %vm2092_vm5 = vweird.f32 %v2081_v29 }
 0x9b0   :  { %v2048_v16 = vpop.f32.mrf.mxu2 }
 0x9b1   :  { %v2049_v36 = vadd.f32 %v2048_v16, %v6510_v14 }
 0x9b3   :  { %v5288_v50 = vmul.f32 -1.442695, %v2049_v36  ;;  %v5942_v60 = vpop.eup %5941  ;;  %v2096_v36 = vand.u32 2147483647, %v2081_v29 }
 0x9b4   :  { %v7657_v23 = vadd.f32 1.0, %v5942_v60 }
 0x9b5   :  { %5943 = vpow2.f32 %v5288_v50  ;;  %vm2097_vm9 = vcmp.eq.f32.partialorder %v2096_v36, 8.507059e+37 }
 0x9b6   :  { %5945 = vrcp.f32 %v2081_v29  ;;  %vm2107_vm13 = vweird.f32 %v7657_v23 }
 0x9b8   :  { %v2050_v13 = vpop.f32.mrf.mxu2 }
 0x9b9   :  { %v2051_v3 = vadd.f32 %v2050_v13, %v6533_v26 }
 0x9bb   :  { %v5944_v22 = vpop.eup %5943  ;;  %v5289_v32 = vmul.f32 -1.442695, %v2051_v3 }
 0x9bc   :  { %v7655_v38 = vadd.f32 1.0, %v5944_v22  ;;  %v5946_v35 = vpop.eup %5945 }
 0x9bd   :  { %5947 = vpow2.f32 %v5289_v32  ;;  %v2088_v43 = vmul.f32 %v5946_v35, %v2081_v29  ;;  %vm2093_vm4 = vweird.f32 %v5946_v35 }
 0x9be   :  { %5949 = vrcp.f32 %v7655_v38  ;;  %vm7679_vm7 = vmor %vm2092_vm5, %vm2093_vm4  ;;  %v2128_v22 = vand.u32 2147483648, %v7655_v38  ;;  %vm2122_vm8 = vweird.f32 %v7655_v38 }
 0x9bf   :  { %5951 = vrcp.f32 %v7657_v23  ;;  %v2089_v28 = vsub.f32 1.0, %v2088_v43 }
 0x9c0   :  { %v2053_v25 = vpop.f32.mrf.mxu2 }
 0x9c1   :  { %v2054_v19 = vadd.f32 %v2053_v25, %v6552_v39  ;;  %v2090_v42 = vmul.f32 %v5946_v35, %v2089_v28 }
 0x9c3   :  { %v5948_v48 = vpop.eup %5947  ;;  %v5290_v45 = vmul.f32 -1.442695, %v2054_v19  ;;  %v2091_v15 = vadd.f32 %v5946_v35, %v2090_v42  ;;  %v2126_v19 = vand.u32 2147483647, %v7655_v38 }
 0x9c4   :  { %v5950_v46 = vpop.eup %5949  ;;  %v7662_v20 = vadd.f32 1.0, %v5948_v48  ;;  %v2099_v48 = vor.u32 1.1754944e-38, %v2098_v58 }
 0x9c5   :  { %5953 = vpow2.f32 %v5290_v45  ;;  %v2118_v37 = vmul.f32 %v5950_v46, %v7655_v38  ;;  %v7666_v49 = vpop.eup %5951  ;;  %vm2123_vm6 = vweird.f32 %v5950_v46  ;;  %v2095_v29 = vsel %vm7679_vm7, %v5946_v35, %v2091_v15 }
 0x9c6   :  { %5955 = vrcp.f32 %v7662_v20  ;;  %v2103_v6 = vmul.f32 %v7666_v49, %v7657_v23  ;;  %vm7695_vm10 = vmor %vm2122_vm8, %vm2123_vm6  ;;  %vm2108_vm11 = vweird.f32 %v7666_v49  ;;  %v2100_v38 = vsel %vm2097_vm9, %v2099_v48, %v2095_v29 }
 0x9c7   :  { %v2119_v0 = vsub.f32 1.0, %v2118_v37  ;;  %vm2127_vm14 = vcmp.eq.f32.partialorder %v2126_v19, 8.507059e+37  ;;  %vm7712_vm15 = vmor %vm2107_vm13, %vm2108_vm11  ;;  %vm2137_vm5 = vweird.f32 %v7662_v20 }
 0x9c8   :  { %v2055_v21 = vpop.f32.mrf.mxu2  ;;  %v2104_v57 = vsub.f32 1.0, %v2103_v6 }
 0x9c9   :  { %v2056_v40 = vadd.f32 %v2055_v21, %v6579_v1  ;;  %v2120_v55 = vmul.f32 %v5950_v46, %v2119_v0  ;;  %v2129_v21 = vor.u32 1.1754944e-38, %v2128_v22  ;;  %v2113_v0 = vand.u32 2147483648, %v7657_v23 }
 0x9ca   :  { %v2105_v60 = vmul.f32 %v7666_v49, %v2104_v57  ;;  %v2179_v57 = vmul.f32 %v2100_v38, %v7528_v63  ;;  %v2141_v63 = vand.u32 2147483647, %v7662_v20 }
 0x9cb   :  { %v5954_v24 = vpop.eup %5953  ;;  %v5291_v27 = vmul.f32 -1.442695, %v2056_v40  ;;  %v2121_v52 = vadd.f32 %v5950_v46, %v2120_v55  ;;  %v2114_v36 = vor.u32 1.1754944e-38, %v2113_v0 }
 0x9cc   :  { %v7671_v30 = vpop.eup %5955  ;;  %v7673_v51 = vadd.f32 1.0, %v5954_v24  ;;  %v2106_v40 = vadd.f32 %v7666_v49, %v2105_v60  ;;  %vm2142_vm11 = vcmp.eq.f32.partialorder %v2141_v63, 8.507059e+37  ;;  %v5343_v63 = vld [vmem:[%s9583_s3 + $0x78] sm:$0xff] }
 0x9cd   :  { %5957 = vpow2.f32 %v5291_v27  ;;  %v2133_v54 = vmul.f32 %v7671_v30, %v7662_v20  ;;  %v2125_v35 = vsel %vm7695_vm10, %v5950_v46, %v2121_v52  ;;  %v2111_v46 = vand.u32 2147483647, %v7657_v23 }
 0x9ce   :  { %5959 = vrcp.f32 %v7673_v51  ;;  %v2130_v42 = vsel %vm2127_vm14, %v2129_v21, %v2125_v35  ;;  %vm2138_vm4 = vweird.f32 %v7671_v30  ;;  %v2110_v58 = vsel %vm7712_vm15, %v7666_v49, %v2106_v40 }
 0x9cf   :  { %v2134_v50 = vsub.f32 1.0, %v2133_v54  ;;  %vm2112_vm7 = vcmp.eq.f32.partialorder %v2111_v46, 8.507059e+37  ;;  %vm2139_vm8 = vmor %vm2137_vm5, %vm2138_vm4  ;;  %v2158_v49 = vand.u32 2147483648, %v7673_v51  ;;  %vm2152_vm9 = vweird.f32 %v7673_v51 }
 0x9d0   :  { %v2058_v53 = vpop.f32.mrf.mxu2  ;;  %v2115_v3 = vsel %vm2112_vm7, %v2114_v36, %v2110_v58  ;;  %v2156_v22 = vand.u32 2147483647, %v7673_v51  ;;  %v5342_v36 = vld [vmem:[%s9583_s3 + $0x70] sm:$0xff] }
 0x9d1   :  { %v2059_v16 = vadd.f32 %v2058_v53, %v6603_v33  ;;  %v2135_v37 = vmul.f32 %v7671_v30, %v2134_v50  ;;  %v2159_v35 = vor.u32 1.1754944e-38, %v2158_v49 }
 0x9d2   :  { %vm2157_vm13 = vcmp.eq.f32.partialorder %v2156_v22, 8.507059e+37 }
 0x9d3   :  { %v5958_v13 = vpop.eup %5957  ;;  %5961 = vtanh.f32 %v2059_v16  ;;  %v2136_v15 = vadd.f32 %v7671_v30, %v2135_v37  ;;  %v2143_v16 = vand.u32 2147483648, %v7662_v20  ;;  %v2180_v37 = vmul.f32 %v2115_v3, %v7542_v8 }
 0x9d4   :  { %v7685_v32 = vpop.eup %5959  ;;  %v7687_v25 = vadd.f32 1.0, %v5958_v13 }
 0x9d5   :  { %v2148_v45 = vmul.f32 %v7685_v32, %v7673_v51  ;;  %vm2153_vm6 = vweird.f32 %v7685_v32  ;;  %v2140_v60 = vsel %vm2139_vm8, %v7671_v30, %v2136_v15  ;;  %v2144_v29 = vor.u32 1.1754944e-38, %v2143_v16  ;;  %v5341_v16 = vld [vmem:[%s9583_s3 + $0x68] sm:$0xff] }
 0x9d6   :  { %5963 = vrcp.f32 %v7687_v25  ;;  %vm2154_vm10 = vmor %vm2152_vm9, %vm2153_vm6  ;;  %v2173_v0 = vand.u32 2147483648, %v7687_v25  ;;  %vm2167_vm15 = vweird.f32 %v7687_v25 }
 0x9d7   :  { %v2149_v28 = vsub.f32 1.0, %v2148_v45  ;;  %v2145_v43 = vsel %vm2142_vm11, %v2144_v29, %v2140_v60 }
 0x9d8   :  { %v2060_v24 = vpop.f32.mrf.mxu2 }
 0x9d9   :  { %v5962_v6 = vpop.eup %5961  ;;  %v2150_v27 = vmul.f32 %v7685_v32, %v2149_v28  ;;  %v2061_v54 = vadd.f32 %v2060_v24, %v6655_v34 }
 0x9da   :  { %v2181_v53 = vmul.f32 %v5962_v6, %v2130_v42  ;;  %v2174_v6 = vor.u32 1.1754944e-38, %v2173_v0 }
 0x9db   :  { %5965 = vtanh.f32 %v2061_v54  ;;  %v2151_v52 = vadd.f32 %v7685_v32, %v2150_v27 }
 0x9dc   :  { %v5964_v23 = vpop.eup %5963  ;;  %v7723_v50 = vadd.f32 %v2181_v53, %v2179_v57 }
 0x9dd   :  { %v2163_v13 = vmul.f32 %v5964_v23, %v7687_v25  ;;  %v2155_v48 = vsel %vm2154_vm10, %v7685_v32, %v2151_v52  ;;  %vm2168_vm14 = vweird.f32 %v5964_v23  ;;  %v2171_v32 = vand.u32 2147483647, %v7687_v25  ;;  %v7811_v52 = vld [vmem:[#allocation3 + $0x18] sm:$0xff] }
 0x9de   :  { %5967 = vtanh.f32 %v7723_v50  ;;  %v2160_v21 = vsel %vm2157_vm13, %v2159_v35, %v2155_v48  ;;  %vm2169_vm4 = vmor %vm2167_vm15, %vm2168_vm14 }
 0x9df   :  { %v2164_v20 = vsub.f32 1.0, %v2163_v13  ;;  %vm2172_vm5 = vcmp.eq.f32.partialorder %v2171_v32, 8.507059e+37 }
 0x9e1   :  { %v5966_v19 = vpop.eup %5965  ;;  %v2165_v45 = vmul.f32 %v5964_v23, %v2164_v20 }
 0x9e2   :  { %v2182_v28 = vmul.f32 %v5966_v19, %v2145_v43 }
 0x9e3   :  { %v2166_v40 = vadd.f32 %v5964_v23, %v2165_v45 }
 0x9e4   :  { %v5968_v38 = vpop.eup %5967  ;;  %v7737_v30 = vadd.f32 %v2182_v28, %v2180_v37 }
 0x9e5   :  { %v2187_v51 = vmul.f32 %v5968_v38, %v2160_v21  ;;  %v2170_v24 = vsel %vm2169_vm4, %v5964_v23, %v2166_v40  ;;  %v7799_v23 = vld [vmem:[#allocation3 + $0x10] sm:$0xff] }
 0x9e6   :  { %5969 = vtanh.f32 %v7737_v30  ;;  %v2175_v42 = vsel %vm2172_vm5, %v2174_v6, %v2170_v24 }
 0x9e7   :  { %2267 = vrot.lane.b32.xlu2 %v2187_v51, %s6310_s29  ;;  %2190 = vst.msk [vmem:[#allocation3 + $0x60] sm:$0xff] %vm383_vm12, %v2187_v51  ;;  %v2243_v8 = vpack.c.bf16 %v2187_v51, %v2187_v51  ;;  %2273 = vrot.lane.b32.xlu1 %v2187_v51, %s6309_s28 }
 0x9e9   :  { %2245 = vst.msk [vmem:[#allocation2 + $0x18] sm:$0xf] %vm108_vm0, %v2243_v8 }
 0x9ea   :  { %2581 = vst.msk [vmem:[#allocation2 + $0x18] sm:$0xf] %vm108_vm0, %v6313_v9 }
 0x9ec   :  { %v5970_v27 = vpop.eup %5969 }
 0x9ed   :  { %v2188_v54 = vmul.f32 %v5970_v27, %v2175_v42 }
 0x9ee   :  { %v4335_v25 = vld [vmem:[#allocation3 + $0x60] sm:$0xff] }
 0x9ef   :  { %2191 = vst.msk [vmem:[#allocation3 + $0x68] sm:$0xff] %vm383_vm12, %v2188_v54  ;;  %v2244_v46 = vpack.c.bf16 %v2188_v54, %v2188_v54  ;;  %2275 = vrot.lane.b32.xlu2 %v2188_v54, %s6309_s28  ;;  %2269 = vrot.lane.b32.xlu0 %v2188_v54, %s6310_s29  ;;  %v4381_v55 = vpack.c.bf16 %v4335_v25, %v4335_v25 }
 0x9f0   :  { %2225 = vrot.lane.b32.xlu1 %v2187_v51, %s6312_s8 }
 0x9f1   :  { %2246 = vst.msk [vmem:[#allocation2 + $0x1c] sm:$0xf] %vm108_vm0, %v2244_v46 }
 0x9f2   :  { %4383 = vst.msk [vmem:[#allocation2 + $0x10] sm:$0xf] %vm108_vm0, %v4381_v55 }
 0x9f6   :  { %v4336_v57 = vld [vmem:[#allocation3 + $0x68] sm:$0xff] }
 0x9f7   :  { %2219 = vrot.lane.b32.xlu2 %v2187_v51, %s6311_s30  ;;  %2197 = vrot.lane.b32.xlu0 %v7575_v18, %s6311_s30  ;;  %v4382_v53 = vpack.c.bf16 %v4336_v57, %v4336_v57 }
 0x9f8   :  { %2199 = vrot.lane.b32.xlu1 %v7586_v44, %s6311_s30  ;;  %v7760_v15 = vld [vmem:[#allocation2 + $0x18] sm:$0xff] }
 0x9f9   :  { %2582 = vst.msk [vmem:[#allocation2 + $0x1c] sm:$0xf] %vm108_vm0, %v6313_v9  ;;  %v7764_v58 = vld [vmem:[#allocation2 + $0x10] sm:$0xff] }
 0x9fa   :  { %4384 = vst.msk [vmem:[#allocation2 + $0x14] sm:$0xf] %vm108_vm0, %v4382_v53  ;;  %v5338_v9 = vld [vmem:[%s9583_s3 + $0x50] sm:$0xff] }
 0x9ff   :  { %2227 = vrot.lane.b32.xlu2 %v2188_v54, %s6312_s8  ;;  %2221 = vrot.lane.b32.xlu0 %v2188_v54, %s6311_s30 }
 0xa00   :  { %2555 = vrot.lane.b32.xlu1 %v7596_v62, %s6311_s30 }
 0xa07   :  { %2203 = vrot.lane.b32.xlu2 %v7575_v18, %s6312_s8  ;;  %2205 = vrot.lane.b32.xlu0 %v7586_v44, %s6312_s8  ;;  %v5336_v18 = vld [vmem:[%s9583_s3 + $0x40] sm:$0xff]  ;;  %v5337_v44 = vld [vmem:[%s9583_s3 + $0x48] sm:$0xff] }
 0xa08   :  { %2563 = vrot.lane.b32.xlu1 %v7592_v41, %s6312_s8 }
 0xa0f   :  { %2557 = vrot.lane.b32.xlu2 %v7592_v41, %s6311_s30  ;;  %2561 = vrot.lane.b32.xlu0 %v7596_v62, %s6312_s8  ;;  %v5339_v41 = vld [vmem:[%s9583_s3 + $0x58] sm:$0xff]  ;;  %v5340_v62 = vld [vmem:[%s9583_s3 + $0x60] sm:$0xff] }
 0xa10   :  { %2523 = vperm.xlu1 %5746, %v5338_v9  }
 0xa17   :  { %2513 = vperm.xlu2 %5744, %v5336_v18   ;;  %2518 = vperm.xlu0 %5745, %v5337_v44  }
 0xa18   :  { %2538 = vperm.xlu1 %5746, %v5341_v16   ;;  %v5695_v16 = vld [vmem:[#allocation2 + $0x20] sm:$0xff] }
 0xa1f   :  { %2528 = vperm.xlu2 %5744, %v5339_v41   ;;  %2533 = vperm.xlu0 %5745, %v5340_v62   ;;  %v5694_v62 = vld [vmem:[#allocation2 + $0x18] sm:$0xff] }
 0xa20   :  { %2900 = vrot.lane.b32.xlu1 %v7799_v23, %s6309_s28 }
 0xa27   :  { %2543 = vperm.xlu2 %5744, %v5342_v36   ;;  %2548 = vperm.xlu0 %5745, %v5343_v63  }
 0xa2f   :  { %2894 = vrot.lane.b32.xlu2 %v7799_v23, %s6310_s29  ;;  %2896 = vrot.lane.b32.xlu0 %v7811_v52, %s6310_s29 }
 0xa41   :  { %v2268_v13 = vpop.permute.xlu2 %2267 }
 0xa49   :  { %v2276_v49 = vpop.permute.xlu2 %2275 }
 0xa51   :  { %v2220_v3 = vpop.permute.xlu2 %2219 }
 0xa59   :  { %v2228_v60 = vpop.permute.xlu2 %2227  ;;  %v2274_v22 = vpop.permute.xlu1 %2273 }
 0xa5a   :  { %v2279_v20 = vsel %vm133_vm1, %v2268_v13, %v2274_v22 }
 0xa5b   :  { %v2281_v29 = vmul.f32 %v2279_v20, %v6373_v5 }
 0xa5d   :  { %v2283_v19 = vpack.c.bf16 %v2281_v29, %v2281_v29 }
 0xa5f   :  { %2285 = vst.msk [vmem:[#allocation2 + $0x28] sm:$0xf] %vm108_vm0, %v2283_v19 }
 0xa60   :  { %2603 = vst.msk [vmem:[#allocation2 + $0x28] sm:$0xf] %vm108_vm0, %v6376_v7 }
 0xa61   :  { %v2204_v48 = vpop.permute.xlu2 %2203  ;;  %v2270_v45 = vpop.permute.xlu0 %2269 }
 0xa62   :  { %v2280_v43 = vsel %vm133_vm1, %v2270_v45, %v2276_v49  ;;  %v2226_v35 = vpop.permute.xlu1 %2225  ;;  %v7868_v45 = vld [vmem:[%s9584_s2 + $0x20] sm:$0xff] }
 0xa63   :  { %v2282_v37 = vmul.f32 %v2280_v43, %v6373_v5  ;;  %v2231_v28 = vsel %vm100_vm2, %v2220_v3, %v2226_v35 }
 0xa64   :  { %v2233_v38 = vmul.f32 %v2231_v28, %v6389_v10 }
 0xa65   :  { %v2284_v21 = vpack.c.bf16 %v2282_v37, %v2282_v37 }
 0xa66   :  { %v2235_v40 = vpack.c.bf16 %v2233_v38, %v2233_v38 }
 0xa67   :  { %2286 = vst.msk [vmem:[#allocation2 + $0x2c] sm:$0xf] %vm108_vm0, %v2284_v21  ;;  %v6286_v21 = vld [vmem:[%s9584_s2 + $0x8] sm:$0xff] }
 0xa68   :  { %2237 = vst.msk [vmem:[#allocation2 + $0x8] sm:$0xf] %vm108_vm0, %v2235_v40  ;;  %v7882_v40 = vld [vmem:[%s9584_s2 + $0x28] sm:$0xff] }
 0xa69   :  { %v2198_v51 = vpop.permute.xlu0 %2197  ;;  %2575 = vst.msk [vmem:[#allocation2 + $0x8] sm:$0xf] %vm108_vm0, %v6392_v12  ;;  %v2558_v0 = vpop.permute.xlu2 %2557 }
 0xa6a   :  { %v2209_v32 = vsel %vm100_vm2, %v2198_v51, %v2204_v48  ;;  %v2200_v8 = vpop.permute.xlu1 %2199  ;;  %v6285_v48 = vld [vmem:[%s9584_s2] sm:$0xff]  ;;  %v6287_v51 = vld [vmem:[%s9584_s2 + $0x10] sm:$0xff] }
 0xa6b   :  { %v2211_v24 = vmul.f32 %v2209_v32, %v6389_v10  ;;  %v6288_v32 = vld [vmem:[%s9584_s2 + $0x18] sm:$0xff] }
 0xa6d   :  { %v2213_v6 = vpack.c.bf16 %v2211_v24, %v2211_v24 }
 0xa6e   :  { %v5686_v27 = vld [vmem:[#allocation2 + $0x28] sm:$0xff] }
 0xa6f   :  { %2215 = vst.msk [vmem:[#allocation2] sm:$0xf] %vm108_vm0, %v2213_v6  ;;  %2337 = vmatpush.bf16.msrb.mxu3 %v5686_v27 }
 0xa70   :  { %2604 = vst.msk [vmem:[#allocation2 + $0x2c] sm:$0xf] %vm108_vm0, %v6376_v7 }
 0xa71   :  { %v2222_v42 = vpop.permute.xlu0 %2221  ;;  %v7835_v55 = vpop.permute.xlu2 %2513 }
 0xa72   :  { %v2232_v54 = vsel %vm100_vm2, %v2222_v42, %v2228_v60  ;;  %v2556_v25 = vpop.permute.xlu1 %2555 }
 0xa73   :  { %v2234_v46 = vmul.f32 %v2232_v54, %v6389_v10  ;;  %2338 = vmatpush.bf16.msrb.mxu3 %v7642_v17 }
 0xa75   :  { %v2236_v57 = vpack.c.bf16 %v2234_v46, %v2234_v46 }
 0xa77   :  { %2238 = vst.msk [vmem:[#allocation2 + $0xc] sm:$0xf] %vm108_vm0, %v2236_v57  ;;  %v5696_v53 = vld [vmem:[#allocation2 + $0x28] sm:$0xff]  ;;  %2339 = vmatpush.bf16.msrb.mxu3 %v7760_v15 }
 0xa78   :  { %2687 = vmatpush.bf16.msra.mxu0 %v5696_v53 }
 0xa79   :  { %v2206_v9 = vpop.permute.xlu0 %2205  ;;  %v7843_v17 = vpop.permute.xlu2 %2528 }
 0xa7a   :  { %v2210_v7 = vsel %vm100_vm2, %v2200_v8, %v2206_v9  ;;  %v2564_v18 = vpop.permute.xlu1 %2563  ;;  %v7904_v8 = vld [vmem:[%s9584_s2 + $0x38] sm:$0xff] }
 0xa7b   :  { %v2212_v44 = vmul.f32 %v2210_v7, %v6389_v10  ;;  %2340 = vmatpush.bf16.msrb.mxu3 %v6701_v2  ;;  %v2568_v15 = vsel %vm100_vm2, %v2558_v0, %v2564_v18  ;;  %v7893_v0 = vld [vmem:[%s9584_s2 + $0x30] sm:$0xff] }
 0xa7c   :  { %2688 = vmatpush.bf16.msra.mxu0 %v5695_v16  ;;  %v2570_v13 = vmul.f32 %v2568_v15, %v6389_v10 }
 0xa7d   :  { %v2214_v41 = vpack.c.bf16 %v2212_v44, %v2212_v44 }
 0xa7e   :  { %v5682_v36 = vld [vmem:[#allocation2 + $0x8] sm:$0xff]  ;;  %v2572_v22 = vpack.c.bf16 %v2570_v13, %v2570_v13 }
 0xa7f   :  { %2216 = vst.msk [vmem:[#allocation2 + $0x4] sm:$0xf] %vm108_vm0, %v2214_v41  ;;  %2341 = vmatpush.bf16.msrb.mxu3 %v5682_v36 }
 0xa80   :  { %2576 = vst.msk [vmem:[#allocation2 + $0xc] sm:$0xf] %vm108_vm0, %v6392_v12  ;;  %2689 = vmatpush.bf16.msra.mxu0 %v5694_v62 }
 0xa81   :  { %v2562_v63 = vpop.permute.xlu0 %2561  ;;  %v7856_v19 = vpop.permute.xlu2 %2543 }
 0xa82   :  { %v2567_v2 = vsel %vm100_vm2, %v2556_v25, %v2562_v63  ;;  %v7851_v49 = vpop.permute.xlu1 %2523 }
 0xa83   :  { %v2569_v3 = vmul.f32 %v2567_v2, %v6389_v10 }
 0xa84   :  { %2690 = vmatpush.bf16.msra.mxu0 %v6864_v11 }
 0xa85   :  { %v2571_v60 = vpack.c.bf16 %v2569_v3, %v2569_v3 }
 0xa86   :  { %v5681_v20 = vld [vmem:[#allocation2] sm:$0xff] }
 0xa87   :  { %2573 = vst.msk [vmem:[#allocation2] sm:$0xf] %vm108_vm0, %v2571_v60  ;;  %v5692_v29 = vld [vmem:[#allocation2 + $0x8] sm:$0xff]  ;;  %2342 = vmatpush.bf16.msrb.mxu3 %v5681_v20 }
 0xa88   :  { %2574 = vst.msk [vmem:[#allocation2 + $0x4] sm:$0xf] %vm108_vm0, %v2572_v22  ;;  %2691 = vmatpush.bf16.msra.mxu0 %v5692_v29 }
 0xa89   :  { %v2895_v43 = vpop.permute.xlu2 %2894  ;;  %v7911_v9 = vpop.permute.xlu0 %2518 }
 0xa8a   :  { %v7859_v12 = vpop.permute.xlu1 %2538  ;;  %5318 = vmatmul.msk.bf16.vlgmr.msrb.gmra.mxu3 %vm215_vm3, %v6285_v48 }
 0xa8f   :  { %v5691_v11 = vld [vmem:[#allocation2] sm:$0xff] }
 0xa90   :  { %2692 = vmatpush.bf16.msra.mxu0 %v5691_v11 }
 0xa92   :  { %v2901_v35 = vpop.permute.xlu1 %2900 }
 0xa93   :  { %v2906_v37 = vsel %vm133_vm1, %v2895_v43, %v2901_v35  ;;  %5384 = vmatmul.msk.bf16.vlgmr.msra.gmra.mxu0 %vm215_vm3, %v7868_v45 }
 0xa94   :  { %v2908_v28 = vmul.f32 %v2906_v37, %v6373_v5 }
 0xa96   :  { %v2910_v38 = vpack.c.bf16 %v2908_v28, %v2908_v28 }
 0xa98   :  { %2912 = vst.msk [vmem:[#allocation2 + $0x20] sm:$0xf] %vm108_vm0, %v2910_v38 }
 0xa9a   :  { %5319 = vmatmul.msk.bf16.gmra.mxu3 %vm215_vm3, %v6286_v21 }
 0xaa3   :  { %5385 = vmatmul.msk.bf16.gmra.mxu0 %vm215_vm3, %v7882_v40 }
 0xaaa   :  { %5320 = vmatmul.msk.bf16.gmra.mxu3 %vm215_vm3, %v6287_v51 }
 0xab3   :  { %5386 = vmatmul.msk.bf16.gmra.mxu0 %vm215_vm3, %v7893_v0 }
 0xaba   :  { %5321 = vmatmul.msk.bf16.gmra.mxu3 %vm215_vm3, %v6288_v32 }
 0xac3   :  { %5387 = vmatmul.msk.bf16.gmra.mxu0 %vm215_vm3, %v7904_v8 }
 0xb0d   :  { %v2344_v24 = vpop.f32.mrf.mxu3 }
 0xb0e   :  { %v2345_v6 = vadd.f32 %v2344_v24, %v6483_v61 }
 0xb10   :  { %v5322_v27 = vmul.f32 -1.442695, %v2345_v6  ;;  %v2694_v42 = vpop.f32.mrf.mxu0 }
 0xb11   :  { %v2695_v54 = vadd.f32 %v2694_v42, %v7835_v55 }
 0xb12   :  { %5971 = vpow2.f32 %v5322_v27 }
 0xb13   :  { %v5388_v25 = vmul.f32 -1.442695, %v2695_v54 }
 0xb15   :  { %5973 = vpow2.f32 %v5388_v25  ;;  %v2346_v46 = vpop.f32.mrf.mxu3 }
 0xb16   :  { %v2347_v57 = vadd.f32 %v2346_v46, %v6501_v4 }
 0xb18   :  { %v5972_v53 = vpop.eup %5971  ;;  %v5323_v7 = vmul.f32 -1.442695, %v2347_v57  ;;  %v2696_v18 = vpop.f32.mrf.mxu0 }
 0xb19   :  { %v7913_v44 = vadd.f32 1.0, %v5972_v53  ;;  %v2697_v16 = vadd.f32 %v2696_v18, %v7911_v9 }
 0xb1a   :  { %5975 = vpow2.f32 %v5323_v7 }
 0xb1b   :  { %v5974_v61 = vpop.eup %5973  ;;  %5977 = vrcp.f32 %v7913_v44  ;;  %v5389_v41 = vmul.f32 -1.442695, %v2697_v16  ;;  %v2399_v42 = vand.u32 2147483648, %v7913_v44  ;;  %v2397_v53 = vand.u32 2147483647, %v7913_v44 }
 0xb1c   :  { %v7917_v62 = vadd.f32 1.0, %v5974_v61  ;;  %vm2393_vm6 = vweird.f32 %v7913_v44 }
 0xb1d   :  { %5979 = vpow2.f32 %v5389_v41  ;;  %v2349_v36 = vpop.f32.mrf.mxu3  ;;  %v7958_v41 = vpop.permute.xlu0 %2533  ;;  %vm7967_vm9 = vcmp.eq.f32.partialorder %v2397_v53, 8.507059e+37 }
 0xb1e   :  { %v2350_v4 = vadd.f32 %v2349_v36, %v6510_v14  ;;  %5981 = vrcp.f32 %v7917_v62  ;;  %v2749_v46 = vand.u32 2147483648, %v7917_v62  ;;  %v2400_v36 = vor.u32 1.1754944e-38, %v2399_v42 }
 0xb1f   :  { %vm2743_vm8 = vweird.f32 %v7917_v62 }
 0xb20   :  { %v5976_v15 = vpop.eup %5975  ;;  %v5324_v63 = vmul.f32 -1.442695, %v2350_v4  ;;  %v2699_v13 = vpop.f32.mrf.mxu0 }
 0xb21   :  { %v7920_v2 = vpop.eup %5977  ;;  %v7923_v3 = vadd.f32 1.0, %v5976_v15  ;;  %v2700_v60 = vadd.f32 %v2699_v13, %v7851_v49 }
 0xb22   :  { %5983 = vpow2.f32 %v5324_v63  ;;  %v2389_v20 = vmul.f32 %v7920_v2, %v7913_v44  ;;  %vm2394_vm7 = vweird.f32 %v7920_v2 }
 0xb23   :  { %v5980_v22 = vpop.eup %5979  ;;  %5985 = vrcp.f32 %v7923_v3  ;;  %v5390_v29 = vmul.f32 -1.442695, %v2700_v60  ;;  %v2414_v15 = vand.u32 2147483648, %v7923_v3  ;;  %vm7976_vm10 = vmor %vm2393_vm6, %vm2394_vm7  ;;  %vm2408_vm11 = vweird.f32 %v7923_v3 }
 0xb24   :  { %v7929_v48 = vadd.f32 1.0, %v5980_v22  ;;  %v7931_v11 = vpop.eup %5981  ;;  %v2390_v43 = vsub.f32 1.0, %v2389_v20 }
 0xb25   :  { %5987 = vpow2.f32 %v5390_v29  ;;  %v2351_v14 = vpop.f32.mrf.mxu3  ;;  %v2739_v24 = vmul.f32 %v7931_v11, %v7917_v62  ;;  %v2747_v29 = vand.u32 2147483647, %v7917_v62  ;;  %v2415_v42 = vor.u32 1.1754944e-38, %v2414_v15 }
 0xb26   :  { %v2352_v35 = vadd.f32 %v2351_v14, %v6533_v26  ;;  %5989 = vrcp.f32 %v7929_v48  ;;  %v2391_v27 = vmul.f32 %v7920_v2, %v2390_v43  ;;  %vm2744_vm13 = vweird.f32 %v7931_v11 }
 0xb27   :  { %v2740_v7 = vsub.f32 1.0, %v2739_v24  ;;  %vm8000_vm14 = vcmp.eq.f32.partialorder %v2747_v29, 8.507059e+37  ;;  %vm8033_vm6 = vmor %vm2743_vm8, %vm2744_vm13  ;;  %vm2758_vm13 = vweird.f32 %v7929_v48 }
 0xb28   :  { %v5984_v37 = vpop.eup %5983  ;;  %v2701_v28 = vpop.f32.mrf.mxu0  ;;  %v5325_v51 = vmul.f32 -1.442695, %v2352_v35  ;;  %v2392_v16 = vadd.f32 %v7920_v2, %v2391_v27 }
 0xb29   :  { %v7934_v38 = vpop.eup %5985  ;;  %v7936_v21 = vadd.f32 1.0, %v5984_v37  ;;  %v2702_v32 = vadd.f32 %v2701_v28, %v7843_v17  ;;  %v2741_v35 = vmul.f32 %v7931_v11, %v2740_v7  ;;  %v2764_v37 = vand.u32 2147483648, %v7929_v48 }
 0xb2a   :  { %v2404_v54 = vmul.f32 %v7934_v38, %v7923_v3  ;;  %v2412_v28 = vand.u32 2147483647, %v7923_v3  ;;  %v2396_v44 = vsel %vm7976_vm10, %v7920_v2, %v2392_v16  ;;  %v2762_v2 = vand.u32 2147483647, %v7929_v48 }
 0xb2b   :  { %v5988_v6 = vpop.eup %5987  ;;  %5991 = vrcp.f32 %v7936_v21  ;;  %v5391_v26 = vmul.f32 -1.442695, %v2702_v32  ;;  %vm2409_vm15 = vweird.f32 %v7934_v38  ;;  %v8006_v7 = vor.u32 1.1754944e-38, %v2764_v37 }
 0xb2c   :  { %v7947_v25 = vadd.f32 1.0, %v5988_v6  ;;  %5993 = vpow2.f32 %v5325_v51  ;;  %v7956_v61 = vpop.eup %5989  ;;  %v2405_v4 = vsub.f32 1.0, %v2404_v54  ;;  %v2401_v16 = vsel %vm7967_vm9, %v2400_v36, %v2396_v44  ;;  %vm8044_vm7 = vmor %vm2408_vm11, %vm2409_vm15 }
 0xb2d   :  { %5995 = vpow2.f32 %v5391_v26  ;;  %v2354_v57 = vpop.f32.mrf.mxu3  ;;  %vm8011_vm4 = vcmp.eq.f32.partialorder %v2412_v28, 8.507059e+37  ;;  %v2427_v28 = vand.u32 2147483647, %v7936_v21  ;;  %vm2423_vm5 = vweird.f32 %v7936_v21 }
 0xb2e   :  { %5997 = vrcp.f32 %v7947_v25  ;;  %v2355_v18 = vadd.f32 %v2354_v57, %v6552_v39  ;;  %v7964_v39 = vor.u32 1.1754944e-38, %v2749_v46  ;;  %v2406_v26 = vmul.f32 %v7934_v38, %v2405_v4 }
 0xb2f   :  { %v2754_v46 = vmul.f32 %v7956_v61, %v7929_v48  ;;  %vm8060_vm9 = vcmp.eq.f32.partialorder %v2427_v28, 8.507059e+37  ;;  %vm2773_vm10 = vweird.f32 %v7947_v25  ;;  %vm2759_vm11 = vweird.f32 %v7956_v61 }
 0xb30   :  { %v5326_v63 = vmul.f32 -1.442695, %v2355_v18  ;;  %v2704_v13 = vpop.f32.mrf.mxu0  ;;  %v2407_v36 = vadd.f32 %v7934_v38, %v2406_v26 }
 0xb31   :  { %v7961_v60 = vpop.eup %5991  ;;  %v2705_v22 = vadd.f32 %v2704_v13, %v7958_v41  ;;  %v2742_v13 = vadd.f32 %v7931_v11, %v2741_v35  ;;  %v2755_v20 = vsub.f32 1.0, %v2754_v46  ;;  %v8027_v35 = vmul.f32 %v2401_v16, %v7723_v50 }
 0xb32   :  { %v5994_v14 = vpop.eup %5993  ;;  %5999 = vpow2.f32 %v5326_v63  ;;  %v2419_v32 = vmul.f32 %v7961_v60, %v7936_v21  ;;  %v2411_v3 = vsel %vm8044_vm7, %v7934_v38, %v2407_v36  ;;  %vm2424_vm8 = vweird.f32 %v7961_v60 }
 0xb33   :  { %v5996_v51 = vpop.eup %5995  ;;  %v7985_v24 = vadd.f32 1.0, %v5994_v14  ;;  %v5392_v6 = vmul.f32 -1.442695, %v2705_v22  ;;  %v2746_v26 = vsel %vm8033_vm6, %v7931_v11, %v2742_v13  ;;  %v2777_v11 = vand.u32 2147483647, %v7947_v25  ;;  %vm8102_vm15 = vmor %vm2423_vm5, %vm2424_vm8 }
 0xb34   :  { %v7990_v27 = vpop.eup %5997  ;;  %v7994_v54 = vadd.f32 1.0, %v5996_v51  ;;  %v2420_v15 = vsub.f32 1.0, %v2419_v32  ;;  %v2779_v32 = vand.u32 2147483648, %v7947_v25 }
 0xb35   :  { %6001 = vrcp.f32 %v7985_v24  ;;  %v2356_v57 = vpop.f32.mrf.mxu3  ;;  %v2769_v63 = vmul.f32 %v7990_v27, %v7947_v25  ;;  %vm2438_vm6 = vweird.f32 %v7985_v24 }
 0xb36   :  { %v2357_v18 = vadd.f32 %v2356_v57, %v6579_v1  ;;  %6003 = vpow2.f32 %v5392_v6  ;;  %v2429_v1 = vand.u32 2147483648, %v7936_v21  ;;  %v2421_v62 = vmul.f32 %v7961_v60, %v2420_v15 }
 0xb37   :  { %6005 = vrcp.f32 %v7994_v54  ;;  %v2770_v50 = vsub.f32 1.0, %v2769_v63  ;;  %v2756_v63 = vmul.f32 %v7956_v61, %v2755_v20  ;;  %v8078_v20 = vor.u32 1.1754944e-38, %v2779_v32 }
 0xb38   :  { %v6000_v22 = vpop.eup %5999  ;;  %v5327_v29 = vmul.f32 -1.442695, %v2357_v18  ;;  %v2706_v14 = vpop.f32.mrf.mxu0  ;;  %v2430_v18 = vor.u32 1.1754944e-38, %v2429_v1  ;;  %v2422_v1 = vadd.f32 %v7961_v60, %v2421_v62 }
 0xb39   :  { %v8021_v43 = vadd.f32 1.0, %v6000_v22  ;;  %v2707_v37 = vadd.f32 %v2706_v14, %v7859_v12  ;;  %v2751_v14 = vsel %vm8000_vm14, %v7964_v39, %v2746_v26  ;;  %v2771_v36 = vmul.f32 %v7990_v27, %v2770_v50 }
 0xb3a   :  { %6007 = vpow2.f32 %v5327_v29  ;;  %vm8092_vm14 = vcmp.eq.f32.partialorder %v2777_v11, 8.507059e+37  ;;  %v8107_v26 = vmul.f32 0.0, %v2751_v14 }
 0xb3b   :  { %v8038_v6 = vpop.eup %6001  ;;  %6009 = vrcp.f32 %v8021_v43  ;;  %v5393_v57 = vmul.f32 -1.442695, %v2707_v37  ;;  %v2416_v37 = vsel %vm8011_vm4, %v2415_v42, %v2411_v3  ;;  %vm2774_vm4 = vweird.f32 %v7990_v27 }
 0xb3c   :  { %v2434_v46 = vmul.f32 %v8038_v6, %v7985_v24  ;;  %v6004_v16 = vpop.eup %6003  ;;  %v2772_v3 = vadd.f32 %v7990_v27, %v2771_v36  ;;  %v8116_v21 = vmul.f32 %v2416_v37, %v7737_v30  ;;  %v2457_v36 = vand.u32 2147483647, %v8021_v43  ;;  %vm8138_vm7 = vmor %vm2773_vm10, %vm2774_vm4 }
 0xb3d   :  { %v2359_v22 = vpop.f32.mrf.mxu3  ;;  %v8067_v13 = vpop.eup %6005  ;;  %v8070_v38 = vadd.f32 1.0, %v6004_v16  ;;  %6011 = vpow2.f32 %v5393_v57  ;;  %v2444_v57 = vand.u32 2147483648, %v7985_v24  ;;  %vm2439_vm8 = vweird.f32 %v8038_v6 }
 0xb3e   :  { %v2360_v29 = vadd.f32 %v2359_v22, %v6603_v33  ;;  %v2435_v51 = vsub.f32 1.0, %v2434_v46  ;;  %v2442_v33 = vand.u32 2147483647, %v7985_v24  ;;  %v2784_v39 = vmul.f32 %v8067_v13, %v7994_v54 }
 0xb3f   :  { %6013 = vrcp.f32 %v8070_v38  ;;  %v2426_v46 = vsel %vm8102_vm15, %v7961_v60, %v2422_v1  ;;  %v2445_v30 = vor.u32 1.1754944e-38, %v2444_v57  ;;  %vm2453_vm10 = vweird.f32 %v8021_v43 }
 0xb40   :  { %v6008_v28 = vpop.eup %6007  ;;  %v2709_v44 = vpop.f32.mrf.mxu0  ;;  %6015 = vtanh.f32 %v2360_v29  ;;  %v2436_v11 = vmul.f32 %v8038_v6, %v2435_v51  ;;  %v8120_v29 = vadd.f32 %v7956_v61, %v2756_v63  ;;  %v2785_v14 = vsub.f32 1.0, %v2784_v39 }
 0xb41   :  { %v8085_v53 = vpop.eup %6009  ;;  %v8089_v50 = vadd.f32 1.0, %v6008_v28  ;;  %v2710_v4 = vadd.f32 %v2709_v44, %v7856_v19  ;;  %v2459_v28 = vand.u32 2147483648, %v8021_v43  ;;  %vm8125_vm5 = vcmp.eq.f32.partialorder %v2442_v33, 8.507059e+37 }
 0xb42   :  { %v2449_v32 = vmul.f32 %v8085_v53, %v8021_v43  ;;  %v2431_v37 = vsel %vm8060_vm9, %v2430_v18, %v2426_v46  ;;  %v2776_v18 = vsel %vm8138_vm7, %v7990_v27, %v2772_v3  ;;  %v2437_v25 = vadd.f32 %v8038_v6, %v2436_v11  ;;  %vm8155_vm9 = vmor %vm2758_vm13, %vm2759_vm11 }
 0xb43   :  { %6017 = vrcp.f32 %v8089_v50  ;;  %v6012_v16 = vpop.eup %6011  ;;  %v2761_v27 = vsel %vm8155_vm9, %v7956_v61, %v8120_v29  ;;  %vm8167_vm15 = vcmp.eq.f32.partialorder %v2762_v2, 8.507059e+37  ;;  %v2460_v3 = vor.u32 1.1754944e-38, %v2459_v28  ;;  %vm8190_vm13 = vmor %vm2438_vm6, %vm2439_vm8 }
 0xb44   :  { %v2450_v22 = vsub.f32 1.0, %v2449_v32  ;;  %6019 = vtanh.f32 %v2710_v4  ;;  %v8123_v44 = vadd.f32 1.0, %v6012_v16  ;;  %vm8176_vm11 = vcmp.eq.f32.partialorder %v2457_v36, 8.507059e+37 }
 0xb45   :  { %v2361_v62 = vpop.f32.mrf.mxu3  ;;  %v8129_v1 = vpop.eup %6013  ;;  %v2807_v48 = vand.u32 2147483647, %v8070_v38  ;;  %v2781_v2 = vsel %vm8092_vm14, %v8078_v20, %v2776_v18  ;;  %vm2788_vm4 = vweird.f32 %v7994_v54  ;;  %v2441_v36 = vsel %vm8190_vm13, %v8038_v6, %v2437_v25 }
 0xb46   :  { %v2362_v51 = vadd.f32 %v2361_v62, %v6655_v34  ;;  %v6016_v33 = vpop.eup %6015  ;;  %v2799_v57 = vmul.f32 %v8129_v1, %v8070_v38  ;;  %6021 = vrcp.f32 %v8123_v44  ;;  %v2451_v15 = vmul.f32 %v8085_v53, %v2450_v22  ;;  %v8174_v62 = vpop.permute.xlu0 %2548 }
 0xb47   :  { %v2482_v39 = vmul.f32 %v6016_v33, %v2431_v37  ;;  %v2786_v22 = vmul.f32 %v8067_v13, %v2785_v14  ;;  %vm2454_vm14 = vweird.f32 %v8085_v53  ;;  %v2809_v33 = vand.u32 2147483648, %v8070_v38 }
 0xb48   :  { %v2711_v4 = vpop.f32.mrf.mxu0  ;;  %v2800_v16 = vsub.f32 1.0, %v2799_v57  ;;  %6023 = vtanh.f32 %v2362_v51  ;;  %v2452_v42 = vadd.f32 %v8085_v53, %v2451_v15  ;;  %vm2789_vm6 = vweird.f32 %v8067_v13  ;;  %vm8218_vm8 = vmor %vm2453_vm10, %vm2454_vm14 }
 0xb49   :  { %v8171_v46 = vpop.eup %6017  ;;  %v2484_v28 = vadd.f32 %v2482_v39, %v8027_v35  ;;  %v2712_v20 = vadd.f32 %v2711_v4, %v8174_v62  ;;  %v2787_v57 = vadd.f32 %v8067_v13, %v2786_v22  ;;  %vm2804_vm7 = vweird.f32 %v8129_v1  ;;  %vm8242_vm10 = vmor %vm2788_vm4, %vm2789_vm6 }
 0xb4a   :  { %v6020_v11 = vpop.eup %6019  ;;  %v2464_v61 = vmul.f32 %v8171_v46, %v8089_v50  ;;  %v2801_v14 = vmul.f32 %v8129_v1, %v2800_v16  ;;  %v2446_v18 = vsel %vm8125_vm5, %v2445_v30, %v2441_v36  ;;  %v2794_v4 = vand.u32 2147483648, %v7994_v54 }
 0xb4b   :  { %v2832_v63 = vmul.f32 %v6020_v11, %v2781_v2  ;;  %6025 = vtanh.f32 %v2484_v28  ;;  %v2792_v43 = vand.u32 2147483647, %v7994_v54  ;;  %vm2803_vm5 = vweird.f32 %v8070_v38  ;;  %v8325_v38 = vld [vmem:[#allocation3 + $0x20] sm:$0xff] }
 0xb4c   :  { %v2465_v24 = vsub.f32 1.0, %v2464_v61  ;;  %v8203_v51 = vpop.eup %6021  ;;  %v2802_v15 = vadd.f32 %v8129_v1, %v2801_v14  ;;  %6027 = vtanh.f32 %v2712_v20  ;;  %vm8231_vm9 = vcmp.eq.f32.partialorder %v2807_v48, 8.507059e+37  ;;  %vm8248_vm13 = vmor %vm2803_vm5, %vm2804_vm7 }
 0xb4d   :  { %v2814_v35 = vmul.f32 %v8203_v51, %v8123_v44  ;;  %v8212_v6 = vadd.f32 %v2832_v63, %v8107_v26  ;;  %v2456_v26 = vsel %vm8218_vm8, %v8085_v53, %v2452_v42  ;;  %v2766_v22 = vsel %vm8167_vm15, %v8006_v7, %v2761_v27 }
 0xb4e   :  { %v6024_v25 = vpop.eup %6023  ;;  %v2466_v39 = vmul.f32 %v8171_v46, %v2465_v24  ;;  %v2810_v11 = vor.u32 1.1754944e-38, %v2809_v33  ;;  %vm2469_vm14 = vweird.f32 %v8171_v46  ;;  %v2791_v7 = vsel %vm8242_vm10, %v8067_v13, %v2787_v57 }
 0xb4f   :  { %6029 = vtanh.f32 %v8212_v6  ;;  %v2483_v60 = vmul.f32 %v6024_v25, %v2446_v18  ;;  %v2815_v16 = vsub.f32 1.0, %v2814_v35  ;;  %v2806_v27 = vsel %vm8248_vm13, %v8129_v1, %v2802_v15 }
 0xb50   :  { %v2467_v48 = vadd.f32 %v8171_v46, %v2466_v39  ;;  %v2461_v61 = vsel %vm8176_vm11, %v2460_v3, %v2456_v26  ;;  %v2795_v2 = vor.u32 1.1754944e-38, %v2794_v4  ;;  %v2474_v29 = vand.u32 2147483648, %v8089_v50 }
 0xb51   :  { %v2485_v32 = vadd.f32 %v2483_v60, %v8116_v21  ;;  %v6026_v54 = vpop.eup %6025  ;;  %vm2793_vm15 = vcmp.eq.f32.partialorder %v2792_v43, 8.507059e+37  ;;  %vm2468_vm4 = vweird.f32 %v8089_v50  ;;  %v2472_v13 = vand.u32 2147483647, %v8089_v50 }
 0xb52   :  { %v2488_v14 = vmul.f32 %v6026_v54, %v2461_v61  ;;  %v6028_v21 = vpop.eup %6027  ;;  %v2816_v28 = vmul.f32 %v8203_v51, %v2815_v16  ;;  %v2796_v36 = vsel %vm2793_vm15, %v2795_v2, %v2791_v7  ;;  %vm8269_vm6 = vmor %vm2468_vm4, %vm2469_vm14  ;;  %v2831_v3 = vmul.f32 0.0, %v2766_v22 }
 0xb53   :  { %6031 = vtanh.f32 %v2485_v32  ;;  %v2833_v20 = vmul.f32 %v6028_v21, %v2796_v36  ;;  %v2811_v42 = vsel %vm8231_vm9, %v2810_v11, %v2806_v27  ;;  %v2471_v50 = vsel %vm8269_vm6, %v8171_v46, %v2467_v48  ;;  %v2897_v32 = vpop.permute.xlu0 %2896 }
 0xb54   :  { %2491 = vst.msk [vmem:[#allocation3 + $0x70] sm:$0xff] %vm383_vm12, %v2488_v14  ;;  %v2475_v63 = vor.u32 1.1754944e-38, %v2474_v29  ;;  %vm2473_vm11 = vcmp.eq.f32.partialorder %v2472_v13, 8.507059e+37  ;;  %v2817_v57 = vadd.f32 %v8203_v51, %v2816_v28  ;;  %vm2819_vm7 = vweird.f32 %v8203_v51 }
 0xb55   :  { %v6030_v1 = vpop.eup %6029  ;;  %v8281_v33 = vadd.f32 %v2833_v20, %v2831_v3  ;;  %v2824_v18 = vand.u32 2147483648, %v8123_v44  ;;  %vm2818_vm8 = vweird.f32 %v8123_v44  ;;  %v2822_v34 = vand.u32 2147483647, %v8123_v44 }
 0xb56   :  { %v8279_v24 = vmul.f32 %v6030_v1, %v2811_v42  ;;  %v2476_v25 = vsel %vm2473_vm11, %v2475_v63, %v2471_v50  ;;  %vm2820_vm5 = vmor %vm2818_vm8, %vm2819_vm7 }
 0xb57   :  { %6033 = vtanh.f32 %v8281_v33  ;;  %v2821_v39 = vsel %vm2820_vm5, %v8203_v51, %v2817_v57  ;;  %v2825_v26 = vor.u32 1.1754944e-38, %v2824_v18  ;;  %vm2823_vm9 = vcmp.eq.f32.partialorder %v2822_v34, 8.507059e+37 }
 0xb58   :  { %2920 = vrot.lane.b32.xlu0 %v8279_v24, %s6309_s28  ;;  %v2890_v35 = vpack.c.bf16 %v8279_v24, %v8279_v24  ;;  %2914 = vrot.lane.b32.xlu1 %v8279_v24, %s6310_s29 }
 0xb59   :  { %v6032_v46 = vpop.eup %6031  ;;  %v2826_v30 = vsel %vm2823_vm9, %v2825_v26, %v2821_v39 }
 0xb5a   :  { %v2489_v15 = vmul.f32 %v6032_v46, %v2476_v25  ;;  %2892 = vst.msk [vmem:[#allocation2 + $0x18] sm:$0xf] %vm108_vm0, %v2890_v35 }
 0xb5b   :  { %v4634_v4 = vld [vmem:[#allocation3 + $0x70] sm:$0xff] }
 0xb5c   :  { %2492 = vst.msk [vmem:[#allocation3 + $0x78] sm:$0xff] %vm383_vm12, %v2489_v15  ;;  %v4680_v60 = vpack.c.bf16 %v4634_v4, %v4634_v4 }
 0xb5d   :  { %v6034_v43 = vpop.eup %6033 }
 0xb5e   :  { %4682 = vst.msk [vmem:[#allocation2 + $0x10] sm:$0xf] %vm108_vm0, %v4680_v60  ;;  %v8299_v16 = vmul.f32 %v6034_v43, %v2826_v30 }
 0xb60   :  { %2866 = vrot.lane.b32.xlu0 %v8279_v24, %s6311_s30  ;;  %2916 = vrot.lane.b32.xlu2 %v8299_v16, %s6310_s29  ;;  %v2891_v44 = vpack.c.bf16 %v8299_v16, %v8299_v16 }
 0xb61   :  { %2922 = vrot.lane.b32.xlu1 %v8299_v16, %s6309_s28 }
 0xb62   :  { %2893 = vst.msk [vmem:[#allocation2 + $0x1c] sm:$0xf] %vm108_vm0, %v2891_v44 }
 0xb63   :  { %v4635_v51 = vld [vmem:[#allocation3 + $0x78] sm:$0xff] }
 0xb64   :  { %v4681_v22 = vpack.c.bf16 %v4635_v51, %v4635_v51 }
 0xb65   :  { %v8310_v53 = vld [vmem:[#allocation2 + $0x10] sm:$0xff] }
 0xb66   :  { %4683 = vst.msk [vmem:[#allocation2 + $0x14] sm:$0xf] %vm108_vm0, %v4681_v22 }
 0xb68   :  { %2874 = vrot.lane.b32.xlu0 %v8299_v16, %s6312_s8  ;;  %2902 = vrot.lane.b32.xlu2 %v7811_v52, %s6309_s28 }
 0xb69   :  { %2844 = vrot.lane.b32.xlu1 %v7799_v23, %s6311_s30  ;;  %v5700_v43 = vld [vmem:[#allocation2 + $0x18] sm:$0xff] }
 0xb70   :  { %2850 = vrot.lane.b32.xlu0 %v7799_v23, %s6312_s8  ;;  %2872 = vrot.lane.b32.xlu2 %v8279_v24, %s6312_s8  ;;  %v8335_v23 = vld [vmem:[#allocation3 + $0x28] sm:$0xff] }
 0xb71   :  { %2868 = vrot.lane.b32.xlu1 %v8299_v16, %s6311_s30 }
 0xb78   :  { %3193 = vrot.lane.b32.xlu0 %v8325_v38, %s6310_s29  ;;  %2846 = vrot.lane.b32.xlu2 %v7811_v52, %s6311_s30 }
 0xb79   :  { %2852 = vrot.lane.b32.xlu1 %v7811_v52, %s6312_s8 }
 0xb80   :  { %3199 = vrot.lane.b32.xlu2 %v8325_v38, %s6309_s28 }
 0xb81   :  { %3195 = vrot.lane.b32.xlu1 %v8335_v23, %s6310_s29 }
 0xbba   :  { %v2917_v11 = vpop.permute.xlu2 %2916 }
 0xbc2   :  { %v2903_v7 = vpop.permute.xlu2 %2902 }
 0xbc3   :  { %v2907_v54 = vsel %vm133_vm1, %v2897_v32, %v2903_v7 }
 0xbc4   :  { %v2909_v27 = vmul.f32 %v2907_v54, %v6373_v5 }
 0xbc6   :  { %v2911_v48 = vpack.c.bf16 %v2909_v27, %v2909_v27 }
 0xbc8   :  { %2913 = vst.msk [vmem:[#allocation2 + $0x24] sm:$0xf] %vm108_vm0, %v2911_v48 }
 0xbca   :  { %v2921_v61 = vpop.permute.xlu0 %2920  ;;  %v2915_v52 = vpop.permute.xlu1 %2914 }
 0xbcb   :  { %v2926_v2 = vsel %vm133_vm1, %v2915_v52, %v2921_v61  ;;  %v2873_v21 = vpop.permute.xlu2 %2872 }
 0xbcc   :  { %v2928_v29 = vmul.f32 %v2926_v2, %v6373_v5 }
 0xbce   :  { %v2930_v14 = vpack.c.bf16 %v2928_v29, %v2928_v29 }
 0xbcf   :  { %v5701_v39 = vld [vmem:[#allocation2 + $0x20] sm:$0xff] }
 0xbd0   :  { %2932 = vst.msk [vmem:[#allocation2 + $0x28] sm:$0xf] %vm108_vm0, %v2930_v14 }
 0xbd2   :  { %v2867_v13 = vpop.permute.xlu0 %2866 }
 0xbd3   :  { %v2878_v28 = vsel %vm100_vm2, %v2867_v13, %v2873_v21  ;;  %v2923_v1 = vpop.permute.xlu1 %2922  ;;  %v2847_v57 = vpop.permute.xlu2 %2846 }
 0xbd4   :  { %v2880_v36 = vmul.f32 %v2878_v28, %v6389_v10  ;;  %v2927_v37 = vsel %vm133_vm1, %v2917_v11, %v2923_v1 }
 0xbd5   :  { %v2929_v20 = vmul.f32 %v2927_v37, %v6373_v5 }
 0xbd6   :  { %v2882_v3 = vpack.c.bf16 %v2880_v36, %v2880_v36 }
 0xbd7   :  { %v2931_v42 = vpack.c.bf16 %v2929_v20, %v2929_v20 }
 0xbd8   :  { %2884 = vst.msk [vmem:[#allocation2 + $0x8] sm:$0xf] %vm108_vm0, %v2882_v3 }
 0xbd9   :  { %2933 = vst.msk [vmem:[#allocation2 + $0x2c] sm:$0xf] %vm108_vm0, %v2931_v42 }
 0xbda   :  { %v2875_v50 = vpop.permute.xlu0 %2874 }
 0xbdb   :  { %v2845_v63 = vpop.permute.xlu1 %2844  ;;  %v3200_v30 = vpop.permute.xlu2 %3199 }
 0xbe0   :  { %v5702_v35 = vld [vmem:[#allocation2 + $0x28] sm:$0xff] }
 0xbe1   :  { %2984 = vmatpush.bf16.msra.mxu1 %v5702_v35 }
 0xbe2   :  { %v2851_v46 = vpop.permute.xlu0 %2850 }
 0xbe3   :  { %v2856_v18 = vsel %vm100_vm2, %v2845_v63, %v2851_v46  ;;  %v2869_v34 = vpop.permute.xlu1 %2868 }
 0xbe4   :  { %v2858_v25 = vmul.f32 %v2856_v18, %v6389_v10  ;;  %v2879_v15 = vsel %vm100_vm2, %v2869_v34, %v2875_v50 }
 0xbe5   :  { %v2881_v26 = vmul.f32 %v2879_v15, %v6389_v10  ;;  %2985 = vmatpush.bf16.msra.mxu1 %v5701_v39 }
 0xbe6   :  { %v2860_v4 = vpack.c.bf16 %v2858_v25, %v2858_v25 }
 0xbe7   :  { %v2883_v60 = vpack.c.bf16 %v2881_v26, %v2881_v26 }
 0xbe8   :  { %2862 = vst.msk [vmem:[#allocation2] sm:$0xf] %vm108_vm0, %v2860_v4 }
 0xbe9   :  { %2885 = vst.msk [vmem:[#allocation2 + $0xc] sm:$0xf] %vm108_vm0, %v2883_v60  ;;  %2986 = vmatpush.bf16.msra.mxu1 %v5700_v43 }
 0xbea   :  { %v3194_v44 = vpop.permute.xlu0 %3193 }
 0xbeb   :  { %v3205_v51 = vsel %vm133_vm1, %v3194_v44, %v3200_v30  ;;  %v2853_v11 = vpop.permute.xlu1 %2852 }
 0xbec   :  { %v3207_v22 = vmul.f32 %v3205_v51, %v6373_v5  ;;  %v2857_v32 = vsel %vm100_vm2, %v2847_v57, %v2853_v11 }
 0xbed   :  { %v2859_v54 = vmul.f32 %v2857_v32, %v6389_v10  ;;  %2987 = vmatpush.bf16.msra.mxu1 %v7045_v59 }
 0xbee   :  { %v3209_v7 = vpack.c.bf16 %v3207_v22, %v3207_v22 }
 0xbef   :  { %v2861_v27 = vpack.c.bf16 %v2859_v54, %v2859_v54 }
 0xbf0   :  { %3211 = vst.msk [vmem:[#allocation2 + $0x20] sm:$0xf] %vm108_vm0, %v3209_v7  ;;  %v5698_v48 = vld [vmem:[#allocation2 + $0x8] sm:$0xff] }
 0xbf1   :  { %2863 = vst.msk [vmem:[#allocation2 + $0x4] sm:$0xf] %vm108_vm0, %v2861_v27  ;;  %2988 = vmatpush.bf16.msra.mxu1 %v5698_v48 }
 0xbf8   :  { %v5697_v61 = vld [vmem:[#allocation2] sm:$0xff] }
 0xbf9   :  { %2989 = vmatpush.bf16.msra.mxu1 %v5697_v61 }
 0xbfc   :  { %5418 = vmatmul.msk.bf16.vlgmr.msra.gmra.mxu1 %vm215_vm3, %v7868_v45 }
 0xc0c   :  { %5419 = vmatmul.msk.bf16.gmra.mxu1 %vm215_vm3, %v7882_v40 }
 0xc1c   :  { %5420 = vmatmul.msk.bf16.gmra.mxu1 %vm215_vm3, %v7893_v0 }
 0xc2c   :  { %5421 = vmatmul.msk.bf16.gmra.mxu1 %vm215_vm3, %v7904_v8 }
 0xc79   :  { %v2991_v59 = vpop.f32.mrf.mxu1 }
 0xc7a   :  { %v2992_v52 = vadd.f32 %v2991_v59, %v7835_v55 }
 0xc7c   :  { %v5422_v29 = vmul.f32 -1.442695, %v2992_v52 }
 0xc7e   :  { %6035 = vpow2.f32 %v5422_v29 }
 0xc81   :  { %v2993_v2 = vpop.f32.mrf.mxu1 }
 0xc82   :  { %v2994_v14 = vadd.f32 %v2993_v2, %v7911_v9 }
 0xc84   :  { %v5423_v21 = vmul.f32 -1.442695, %v2994_v14  ;;  %v6036_v40 = vpop.eup %6035 }
 0xc85   :  { %v3029_v0 = vadd.f32 1.0, %v6036_v40 }
 0xc86   :  { %6037 = vpow2.f32 %v5423_v21 }
 0xc87   :  { %v3046_v59 = vand.u32 2147483648, %v3029_v0  ;;  %v3044_v2 = vand.u32 2147483647, %v3029_v0  ;;  %vm3040_vm13 = vweird.f32 %v3029_v0 }
 0xc89   :  { %v2996_v13 = vpop.f32.mrf.mxu1  ;;  %vm3045_vm6 = vcmp.eq.f32.partialorder %v3044_v2, 8.507059e+37 }
 0xc8a   :  { %v2997_v45 = vadd.f32 %v2996_v13, %v7851_v49 }
 0xc8c   :  { %v5424_v28 = vmul.f32 -1.442695, %v2997_v45  ;;  %v6038_v1 = vpop.eup %6037 }
 0xc8d   :  { %v8378_v42 = vadd.f32 1.0, %v6038_v1  ;;  %v3047_v1 = vor.u32 1.1754944e-38, %v3046_v59 }
 0xc8e   :  { %6039 = vpow2.f32 %v5424_v28 }
 0xc8f   :  { %6041 = vrcp.f32 %v3029_v0  ;;  %vm3055_vm8 = vweird.f32 %v8378_v42 }
 0xc91   :  { %v2998_v36 = vpop.f32.mrf.mxu1 }
 0xc92   :  { %v2999_v8 = vadd.f32 %v2998_v36, %v7843_v17 }
 0xc94   :  { %v6040_v37 = vpop.eup %6039  ;;  %v5425_v3 = vmul.f32 -1.442695, %v2999_v8 }
 0xc95   :  { %v8376_v20 = vadd.f32 1.0, %v6040_v37  ;;  %v6042_v63 = vpop.eup %6041 }
 0xc96   :  { %6043 = vpow2.f32 %v5425_v3  ;;  %v3036_v25 = vmul.f32 %v6042_v63, %v3029_v0  ;;  %vm3041_vm10 = vweird.f32 %v6042_v63 }
 0xc97   :  { %6045 = vrcp.f32 %v8376_v20  ;;  %vm8400_vm15 = vmor %vm3040_vm13, %vm3041_vm10  ;;  %v3076_v28 = vand.u32 2147483648, %v8376_v20  ;;  %vm3070_vm4 = vweird.f32 %v8376_v20  ;;  %v3074_v8 = vand.u32 2147483647, %v8376_v20 }
 0xc98   :  { %6047 = vrcp.f32 %v8378_v42  ;;  %v3037_v4 = vsub.f32 1.0, %v3036_v25  ;;  %v3061_v25 = vand.u32 2147483648, %v8378_v42 }
 0xc99   :  { %v3001_v50 = vpop.f32.mrf.mxu1  ;;  %vm3075_vm5 = vcmp.eq.f32.partialorder %v3074_v8, 8.507059e+37 }
 0xc9a   :  { %v3002_v57 = vadd.f32 %v3001_v50, %v7958_v41  ;;  %v3038_v11 = vmul.f32 %v6042_v63, %v3037_v4 }
 0xc9c   :  { %v6044_v35 = vpop.eup %6043  ;;  %v5426_v46 = vmul.f32 -1.442695, %v3002_v57  ;;  %v3039_v61 = vadd.f32 %v6042_v63, %v3038_v11 }
 0xc9d   :  { %v6046_v18 = vpop.eup %6045  ;;  %v8383_v34 = vadd.f32 1.0, %v6044_v35  ;;  %v3077_v35 = vor.u32 1.1754944e-38, %v3076_v28 }
 0xc9e   :  { %6049 = vpow2.f32 %v5426_v46  ;;  %v3066_v15 = vmul.f32 %v6046_v18, %v8376_v20  ;;  %v8387_v39 = vpop.eup %6047  ;;  %vm3071_vm14 = vweird.f32 %v6046_v18  ;;  %v3043_v0 = vsel %vm8400_vm15, %v6042_v63, %v3039_v61 }
 0xc9f   :  { %6051 = vrcp.f32 %v8383_v34  ;;  %v3051_v44 = vmul.f32 %v8387_v39, %v8378_v42  ;;  %vm8416_vm11 = vmor %vm3070_vm4, %vm3071_vm14  ;;  %vm3056_vm7 = vweird.f32 %v8387_v39  ;;  %v3048_v20 = vsel %vm3045_vm6, %v3047_v1, %v3043_v0 }
 0xca0   :  { %v3067_v43 = vsub.f32 1.0, %v3066_v15  ;;  %vm8433_vm9 = vmor %vm3055_vm8, %vm3056_vm7  ;;  %vm3085_vm13 = vweird.f32 %v8383_v34 }
 0xca1   :  { %v3003_v26 = vpop.f32.mrf.mxu1  ;;  %v3052_v27 = vsub.f32 1.0, %v3051_v44  ;;  %v3127_v44 = vmul.f32 %v3048_v20, %v8212_v6  ;;  %v3089_v6 = vand.u32 2147483647, %v8383_v34 }
 0xca2   :  { %v3004_v60 = vadd.f32 %v3003_v26, %v7859_v12  ;;  %v3068_v54 = vmul.f32 %v6046_v18, %v3067_v43 }
 0xca3   :  { %v3053_v45 = vmul.f32 %v8387_v39, %v3052_v27  ;;  %v3062_v27 = vor.u32 1.1754944e-38, %v3061_v25  ;;  %vm3090_vm7 = vcmp.eq.f32.partialorder %v3089_v6, 8.507059e+37 }
 0xca4   :  { %v6050_v30 = vpop.eup %6049  ;;  %v5427_v51 = vmul.f32 -1.442695, %v3004_v60  ;;  %v3069_v14 = vadd.f32 %v6046_v18, %v3068_v54  ;;  %v3091_v54 = vand.u32 2147483648, %v8383_v34 }
 0xca5   :  { %v8392_v22 = vpop.eup %6051  ;;  %v8394_v32 = vadd.f32 1.0, %v6050_v30  ;;  %v3054_v46 = vadd.f32 %v8387_v39, %v3053_v45 }
 0xca6   :  { %6053 = vpow2.f32 %v5427_v51  ;;  %v3081_v7 = vmul.f32 %v8392_v22, %v8383_v34  ;;  %v3073_v50 = vsel %vm8416_vm11, %v6046_v18, %v3069_v14  ;;  %v3059_v18 = vand.u32 2147483647, %v8378_v42 }
 0xca7   :  { %6055 = vrcp.f32 %v8394_v32  ;;  %v3078_v60 = vsel %vm3075_vm5, %v3077_v35, %v3073_v50  ;;  %vm3086_vm10 = vweird.f32 %v8392_v22  ;;  %vm3100_vm6 = vweird.f32 %v8394_v32 }
 0xca8   :  { %v3082_v29 = vsub.f32 1.0, %v3081_v7  ;;  %v3058_v7 = vsel %vm8433_vm9, %v8387_v39, %v3054_v46  ;;  %vm3060_vm15 = vcmp.eq.f32.partialorder %v3059_v18, 8.507059e+37  ;;  %vm3087_vm4 = vmor %vm3085_vm13, %vm3086_vm10  ;;  %v3106_v39 = vand.u32 2147483648, %v8394_v32 }
 0xca9   :  { %v3006_v48 = vpop.f32.mrf.mxu1  ;;  %v3092_v14 = vor.u32 1.1754944e-38, %v3091_v54 }
 0xcaa   :  { %v3007_v52 = vadd.f32 %v3006_v48, %v7856_v19  ;;  %v3083_v63 = vmul.f32 %v8392_v22, %v3082_v29  ;;  %v3104_v29 = vand.u32 2147483647, %v8394_v32  ;;  %v3107_v0 = vor.u32 1.1754944e-38, %v3106_v39 }
 0xcac   :  { %v6054_v21 = vpop.eup %6053  ;;  %6057 = vtanh.f32 %v3007_v52  ;;  %v3084_v11 = vadd.f32 %v8392_v22, %v3083_v63  ;;  %v3063_v52 = vsel %vm3060_vm15, %v3062_v27, %v3058_v7  ;;  %vm3105_vm8 = vcmp.eq.f32.partialorder %v3104_v29, 8.507059e+37 }
 0xcad   :  { %v8406_v40 = vpop.eup %6055  ;;  %v8408_v36 = vadd.f32 1.0, %v6054_v21  ;;  %v3128_v8 = vmul.f32 %v3063_v52, %v8281_v33 }
 0xcae   :  { %v3096_v37 = vmul.f32 %v8406_v40, %v8394_v32  ;;  %vm3101_vm14 = vweird.f32 %v8406_v40  ;;  %v3088_v2 = vsel %vm3087_vm4, %v8392_v22, %v3084_v11 }
 0xcaf   :  { %6059 = vrcp.f32 %v8408_v36  ;;  %vm3102_vm11 = vmor %vm3100_vm6, %vm3101_vm14  ;;  %v3093_v28 = vsel %vm3090_vm7, %v3092_v14, %v3088_v2  ;;  %v3121_v63 = vand.u32 2147483648, %v8408_v36  ;;  %vm3115_vm9 = vweird.f32 %v8408_v36 }
 0xcb0   :  { %v3097_v57 = vsub.f32 1.0, %v3096_v37 }
 0xcb1   :  { %v3008_v15 = vpop.f32.mrf.mxu1  ;;  %v3122_v20 = vor.u32 1.1754944e-38, %v3121_v63 }
 0xcb2   :  { %v6058_v4 = vpop.eup %6057  ;;  %v3098_v26 = vmul.f32 %v8406_v40, %v3097_v57  ;;  %v3009_v43 = vadd.f32 %v3008_v15, %v8174_v62  ;;  %v8498_v15 = vld [vmem:[#allocation3 + $0x30] sm:$0xff] }
 0xcb3   :  { %v3129_v51 = vmul.f32 %v6058_v4, %v3078_v60  ;;  %v8506_v4 = vld [vmem:[#allocation3 + $0x38] sm:$0xff] }
 0xcb4   :  { %6061 = vtanh.f32 %v3009_v43  ;;  %v3099_v61 = vadd.f32 %v8406_v40, %v3098_v26  ;;  %v3196_v26 = vpop.permute.xlu1 %3195 }
 0xcb5   :  { %v6060_v42 = vpop.eup %6059  ;;  %v8444_v48 = vadd.f32 %v3129_v51, %v3127_v44 }
 0xcb6   :  { %v3111_v59 = vmul.f32 %v6060_v42, %v8408_v36  ;;  %v3103_v13 = vsel %vm3102_vm11, %v8406_v40, %v3099_v61  ;;  %vm3116_vm5 = vweird.f32 %v6060_v42  ;;  %v3119_v40 = vand.u32 2147483647, %v8408_v36 }
 0xcb7   :  { %6063 = vtanh.f32 %v8444_v48  ;;  %v3108_v3 = vsel %vm3105_vm8, %v3107_v0, %v3103_v13  ;;  %vm3117_vm10 = vmor %vm3115_vm9, %vm3116_vm5 }
 0xcb8   :  { %v3112_v34 = vsub.f32 1.0, %v3111_v59  ;;  %vm3120_vm13 = vcmp.eq.f32.partialorder %v3119_v40, 8.507059e+37 }
 0xcba   :  { %v6062_v21 = vpop.eup %6061  ;;  %v3113_v45 = vmul.f32 %v6060_v42, %v3112_v34 }
 0xcbb   :  { %v3130_v1 = vmul.f32 %v6062_v21, %v3093_v28 }
 0xcbc   :  { %v3114_v50 = vadd.f32 %v6060_v42, %v3113_v45 }
 0xcbd   :  { %v6064_v37 = vpop.eup %6063  ;;  %v8458_v22 = vadd.f32 %v3130_v1, %v3128_v8 }
 0xcbe   :  { %v8460_v32 = vmul.f32 %v6064_v37, %v3108_v3  ;;  %v3118_v57 = vsel %vm3117_vm10, %v6060_v42, %v3114_v50 }
 0xcbf   :  { %6065 = vtanh.f32 %v8458_v22  ;;  %v3123_v46 = vsel %vm3120_vm13, %v3122_v20, %v3118_v57 }
 0xcc0   :  { %3219 = vrot.lane.b32.xlu1 %v8460_v32, %s6309_s28  ;;  %v3189_v33 = vpack.c.bf16 %v8460_v32, %v8460_v32  ;;  %3213 = vrot.lane.b32.xlu2 %v8460_v32, %s6310_s29 }
 0xcc2   :  { %3191 = vst.msk [vmem:[#allocation2 + $0x18] sm:$0xf] %vm108_vm0, %v3189_v33 }
 0xcc5   :  { %v6066_v35 = vpop.eup %6065 }
 0xcc6   :  { %v8473_v25 = vmul.f32 %v6066_v35, %v3123_v46 }
 0xcc8   :  { %3215 = vrot.lane.b32.xlu0 %v8473_v25, %s6310_s29  ;;  %v3190_v36 = vpack.c.bf16 %v8473_v25, %v8473_v25  ;;  %3165 = vrot.lane.b32.xlu1 %v8460_v32, %s6311_s30 }
 0xcc9   :  { %3221 = vrot.lane.b32.xlu2 %v8473_v25, %s6309_s28 }
 0xcca   :  { %3192 = vst.msk [vmem:[#allocation2 + $0x1c] sm:$0xf] %vm108_vm0, %v3190_v36 }
 0xcd0   :  { %3201 = vrot.lane.b32.xlu0 %v8335_v23, %s6309_s28  ;;  %3173 = vrot.lane.b32.xlu1 %v8473_v25, %s6312_s8 }
 0xcd1   :  { %3143 = vrot.lane.b32.xlu2 %v8325_v38, %s6311_s30  ;;  %v5706_v33 = vld [vmem:[#allocation2 + $0x18] sm:$0xff] }
 0xcd8   :  { %3171 = vrot.lane.b32.xlu0 %v8460_v32, %s6312_s8  ;;  %3149 = vrot.lane.b32.xlu1 %v8325_v38, %s6312_s8 }
 0xcd9   :  { %3167 = vrot.lane.b32.xlu2 %v8473_v25, %s6311_s30 }
 0xce0   :  { %3145 = vrot.lane.b32.xlu0 %v8335_v23, %s6311_s30  ;;  %3492 = vrot.lane.b32.xlu1 %v8498_v15, %s6310_s29 }
 0xce1   :  { %3151 = vrot.lane.b32.xlu2 %v8335_v23, %s6312_s8 }
 0xce8   :  { %3498 = vrot.lane.b32.xlu0 %v8498_v15, %s6309_s28 }
 0xce9   :  { %3494 = vrot.lane.b32.xlu2 %v8506_v4, %s6310_s29 }
 0xd1a   :  { %v3214_v38 = vpop.permute.xlu2 %3213 }
 0xd23   :  { %v3222_v60 = vpop.permute.xlu2 %3221 }
 0xd2b   :  { %v3144_v51 = vpop.permute.xlu2 %3143 }
 0xd32   :  { %v3220_v43 = vpop.permute.xlu1 %3219 }
 0xd33   :  { %v3225_v18 = vsel %vm133_vm1, %v3214_v38, %v3220_v43  ;;  %v3168_v27 = vpop.permute.xlu2 %3167 }
 0xd34   :  { %v3227_v30 = vmul.f32 %v3225_v18, %v6373_v5  ;;  %v8538_v18 = vld [vmem:[%s9584_s2 + $0x20] sm:$0xff] }
 0xd36   :  { %v3229_v44 = vpack.c.bf16 %v3227_v30, %v3227_v30  ;;  %v8552_v30 = vld [vmem:[%s9584_s2 + $0x30] sm:$0xff] }
 0xd38   :  { %3231 = vst.msk [vmem:[#allocation2 + $0x28] sm:$0xf] %vm108_vm0, %v3229_v44  ;;  %v8559_v44 = vld [vmem:[%s9584_s2 + $0x38] sm:$0xff] }
 0xd3a   :  { %v3216_v23 = vpop.permute.xlu0 %3215  ;;  %v3166_v11 = vpop.permute.xlu1 %3165 }
 0xd3b   :  { %v3226_v7 = vsel %vm133_vm1, %v3216_v23, %v3222_v60  ;;  %v3152_v50 = vpop.permute.xlu2 %3151 }
 0xd3c   :  { %v3228_v54 = vmul.f32 %v3226_v7, %v6373_v5 }
 0xd3e   :  { %v3230_v42 = vpack.c.bf16 %v3228_v54, %v3228_v54 }
 0xd40   :  { %3232 = vst.msk [vmem:[#allocation2 + $0x2c] sm:$0xf] %vm108_vm0, %v3230_v42 }
 0xd42   :  { %v3202_v6 = vpop.permute.xlu0 %3201  ;;  %v3174_v61 = vpop.permute.xlu1 %3173 }
 0xd43   :  { %v3206_v59 = vsel %vm133_vm1, %v3196_v26, %v3202_v6  ;;  %v3178_v39 = vsel %vm100_vm2, %v3168_v27, %v3174_v61 }
 0xd44   :  { %v3208_v52 = vmul.f32 %v3206_v59, %v6373_v5  ;;  %v3180_v2 = vmul.f32 %v3178_v39, %v6389_v10 }
 0xd46   :  { %v3210_v29 = vpack.c.bf16 %v3208_v52, %v3208_v52  ;;  %v3182_v34 = vpack.c.bf16 %v3180_v2, %v3180_v2 }
 0xd47   :  { %v5708_v14 = vld [vmem:[#allocation2 + $0x28] sm:$0xff] }
 0xd48   :  { %3212 = vst.msk [vmem:[#allocation2 + $0x24] sm:$0xf] %vm108_vm0, %v3210_v29  ;;  %3283 = vmatpush.bf16.msra.mxu2 %v5708_v14 }
 0xd49   :  { %3184 = vst.msk [vmem:[#allocation2 + $0xc] sm:$0xf] %vm108_vm0, %v3182_v34 }
 0xd4a   :  { %v3172_v21 = vpop.permute.xlu0 %3171  ;;  %v3150_v13 = vpop.permute.xlu1 %3149 }
 0xd4b   :  { %v3177_v45 = vsel %vm100_vm2, %v3166_v11, %v3172_v21  ;;  %v3155_v28 = vsel %vm100_vm2, %v3144_v51, %v3150_v13 }
 0xd4c   :  { %v3179_v0 = vmul.f32 %v3177_v45, %v6389_v10  ;;  %v3157_v8 = vmul.f32 %v3155_v28, %v6389_v10 }
 0xd4e   :  { %v3181_v1 = vpack.c.bf16 %v3179_v0, %v3179_v0  ;;  %v3159_v37 = vpack.c.bf16 %v3157_v8, %v3157_v8 }
 0xd4f   :  { %v5707_v3 = vld [vmem:[#allocation2 + $0x20] sm:$0xff] }
 0xd50   :  { %3183 = vst.msk [vmem:[#allocation2 + $0x8] sm:$0xf] %vm108_vm0, %v3181_v1  ;;  %3284 = vmatpush.bf16.msra.mxu2 %v5707_v3 }
 0xd51   :  { %3161 = vst.msk [vmem:[#allocation2] sm:$0xf] %vm108_vm0, %v3159_v37 }
 0xd52   :  { %v3146_v63 = vpop.permute.xlu0 %3145  ;;  %v3493_v35 = vpop.permute.xlu1 %3492 }
 0xd53   :  { %v3156_v40 = vsel %vm100_vm2, %v3146_v63, %v3152_v50 }
 0xd54   :  { %v3158_v57 = vmul.f32 %v3156_v40, %v6389_v10  ;;  %3285 = vmatpush.bf16.msra.mxu2 %v5706_v33 }
 0xd56   :  { %v3160_v20 = vpack.c.bf16 %v3158_v57, %v3158_v57 }
 0xd57   :  { %v5704_v38 = vld [vmem:[#allocation2 + $0x8] sm:$0xff] }
 0xd58   :  { %3162 = vst.msk [vmem:[#allocation2 + $0x4] sm:$0xf] %vm108_vm0, %v3160_v20  ;;  %3286 = vmatpush.bf16.msra.mxu2 %v7209_v31  ;;  %v8545_v31 = vld [vmem:[%s9584_s2 + $0x28] sm:$0xff] }
 0xd5a   :  { %v3499_v46 = vpop.permute.xlu0 %3498 }
 0xd5b   :  { %v3504_v36 = vsel %vm133_vm1, %v3493_v35, %v3499_v46 }
 0xd5c   :  { %v3506_v26 = vmul.f32 %v3504_v36, %v6373_v5  ;;  %3287 = vmatpush.bf16.msra.mxu2 %v5704_v38 }
 0xd5e   :  { %v3508_v60 = vpack.c.bf16 %v3506_v26, %v3506_v26 }
 0xd5f   :  { %v5703_v43 = vld [vmem:[#allocation2] sm:$0xff] }
 0xd60   :  { %3510 = vst.msk [vmem:[#allocation2 + $0x20] sm:$0xf] %vm108_vm0, %v3508_v60  ;;  %3288 = vmatpush.bf16.msra.mxu2 %v5703_v43 }
 0xd63   :  { %5452 = vmatmul.msk.bf16.vlgmr.msra.gmra.mxu2 %vm215_vm3, %v8538_v18 }
 0xd73   :  { %5453 = vmatmul.msk.bf16.gmra.mxu2 %vm215_vm3, %v8545_v31 }
 0xd83   :  { %5454 = vmatmul.msk.bf16.gmra.mxu2 %vm215_vm3, %v8552_v30 }
 0xd93   :  { %5455 = vmatmul.msk.bf16.gmra.mxu2 %vm215_vm3, %v8559_v44 }
 0xde6   :  { %v3290_v51 = vpop.f32.mrf.mxu2 }
 0xde7   :  { %v3291_v23 = vadd.f32 %v3290_v51, %v7835_v55 }
 0xde9   :  { %v5456_v7 = vmul.f32 -1.442695, %v3291_v23 }
 0xdeb   :  { %6067 = vpow2.f32 %v5456_v7 }
 0xdee   :  { %v3292_v11 = vpop.f32.mrf.mxu2 }
 0xdef   :  { %v3293_v54 = vadd.f32 %v3292_v11, %v7911_v9 }
 0xdf1   :  { %v5457_v42 = vmul.f32 -1.442695, %v3293_v54  ;;  %v6068_v59 = vpop.eup %6067 }
 0xdf2   :  { %v3328_v39 = vadd.f32 1.0, %v6068_v59 }
 0xdf3   :  { %6069 = vpow2.f32 %v5457_v42 }
 0xdf4   :  { %v3345_v42 = vand.u32 2147483648, %v3328_v39  ;;  %vm3339_vm15 = vweird.f32 %v3328_v39 }
 0xdf6   :  { %v3295_v27 = vpop.f32.mrf.mxu2 }
 0xdf7   :  { %v3296_v6 = vadd.f32 %v3295_v27, %v7851_v49 }
 0xdf9   :  { %v5458_v61 = vmul.f32 -1.442695, %v3296_v6  ;;  %v6070_v29 = vpop.eup %6069  ;;  %v3343_v6 = vand.u32 2147483647, %v3328_v39 }
 0xdfa   :  { %v8569_v13 = vadd.f32 1.0, %v6070_v29 }
 0xdfb   :  { %6071 = vpow2.f32 %v5458_v61  ;;  %vm3344_vm7 = vcmp.eq.f32.partialorder %v3343_v6, 8.507059e+37 }
 0xdfc   :  { %6073 = vrcp.f32 %v3328_v39  ;;  %vm3354_vm9 = vweird.f32 %v8569_v13 }
 0xdfe   :  { %v3297_v52 = vpop.f32.mrf.mxu2 }
 0xdff   :  { %v3298_v2 = vadd.f32 %v3297_v52, %v7843_v17 }
 0xe01   :  { %v6072_v34 = vpop.eup %6071  ;;  %v5459_v14 = vmul.f32 -1.442695, %v3298_v2 }
 0xe02   :  { %v8567_v21 = vadd.f32 1.0, %v6072_v34  ;;  %v6074_v28 = vpop.eup %6073 }
 0xe03   :  { %6075 = vpow2.f32 %v5459_v14  ;;  %v3335_v3 = vmul.f32 %v6074_v28, %v3328_v39  ;;  %vm3340_vm14 = vweird.f32 %v6074_v28 }
 0xe04   :  { %6077 = vrcp.f32 %v8567_v21  ;;  %vm8591_vm6 = vmor %vm3339_vm15, %vm3340_vm14  ;;  %v3375_v34 = vand.u32 2147483648, %v8567_v21  ;;  %vm3369_vm11 = vweird.f32 %v8567_v21 }
 0xe05   :  { %6079 = vrcp.f32 %v8569_v13  ;;  %v3336_v33 = vsub.f32 1.0, %v3335_v3 }
 0xe06   :  { %v3300_v45 = vpop.f32.mrf.mxu2 }
 0xe07   :  { %v3301_v0 = vadd.f32 %v3300_v45, %v7958_v41  ;;  %v3337_v60 = vmul.f32 %v6074_v28, %v3336_v33 }
 0xe09   :  { %v6076_v8 = vpop.eup %6075  ;;  %v5460_v1 = vmul.f32 -1.442695, %v3301_v0  ;;  %v3338_v54 = vadd.f32 %v6074_v28, %v3337_v60  ;;  %v3373_v0 = vand.u32 2147483647, %v8567_v21 }
 0xe0a   :  { %v6078_v37 = vpop.eup %6077  ;;  %v8574_v50 = vadd.f32 1.0, %v6076_v8  ;;  %v3346_v8 = vor.u32 1.1754944e-38, %v3345_v42 }
 0xe0b   :  { %6081 = vpow2.f32 %v5460_v1  ;;  %v3365_v63 = vmul.f32 %v6078_v37, %v8567_v21  ;;  %v8578_v40 = vpop.eup %6079  ;;  %vm3370_vm4 = vweird.f32 %v6078_v37  ;;  %v3342_v39 = vsel %vm8591_vm6, %v6074_v28, %v3338_v54 }
 0xe0c   :  { %6083 = vrcp.f32 %v8574_v50  ;;  %v3350_v36 = vmul.f32 %v8578_v40, %v8569_v13  ;;  %vm8607_vm8 = vmor %vm3369_vm11, %vm3370_vm4  ;;  %vm3355_vm5 = vweird.f32 %v8578_v40  ;;  %v3347_v21 = vsel %vm3344_vm7, %v3346_v8, %v3342_v39 }
 0xe0d   :  { %v3366_v35 = vsub.f32 1.0, %v3365_v63  ;;  %vm3374_vm10 = vcmp.eq.f32.partialorder %v3373_v0, 8.507059e+37  ;;  %vm8624_vm13 = vmor %vm3354_vm9, %vm3355_vm5  ;;  %vm3384_vm15 = vweird.f32 %v8574_v50 }
 0xe0e   :  { %v3302_v57 = vpop.f32.mrf.mxu2  ;;  %v3351_v11 = vsub.f32 1.0, %v3350_v36 }
 0xe0f   :  { %v3303_v20 = vadd.f32 %v3302_v57, %v7859_v12  ;;  %v3367_v23 = vmul.f32 %v6078_v37, %v3366_v35  ;;  %v3376_v57 = vor.u32 1.1754944e-38, %v3375_v34  ;;  %v3360_v35 = vand.u32 2147483648, %v8569_v13 }
 0xe10   :  { %v3352_v29 = vmul.f32 %v8578_v40, %v3351_v11  ;;  %v3426_v11 = vmul.f32 %v3347_v21, %v8444_v48  ;;  %v3388_v48 = vand.u32 2147483647, %v8574_v50 }
 0xe11   :  { %v6082_v46 = vpop.eup %6081  ;;  %v5461_v38 = vmul.f32 -1.442695, %v3303_v20  ;;  %v3368_v59 = vadd.f32 %v6078_v37, %v3367_v23  ;;  %v3361_v6 = vor.u32 1.1754944e-38, %v3360_v35  ;;  %v3137_v35 = vmax.f32 %v8279_v24, %v8460_v32 }
 0xe12   :  { %v8583_v26 = vpop.eup %6083  ;;  %v8585_v43 = vadd.f32 1.0, %v6082_v46  ;;  %v3353_v20 = vadd.f32 %v8578_v40, %v3352_v29  ;;  %vm3389_vm5 = vcmp.eq.f32.partialorder %v3388_v48, 8.507059e+37 }
 0xe13   :  { %6085 = vpow2.f32 %v5461_v38  ;;  %v3380_v51 = vmul.f32 %v8583_v26, %v8574_v50  ;;  %v3372_v28 = vsel %vm8607_vm8, %v6078_v37, %v3368_v59  ;;  %v3358_v37 = vand.u32 2147483647, %v8569_v13 }
 0xe14   :  { %6087 = vrcp.f32 %v8585_v43  ;;  %v3377_v60 = vsel %vm3374_vm10, %v3376_v57, %v3372_v28  ;;  %vm3385_vm14 = vweird.f32 %v8583_v26  ;;  %v3357_v42 = vsel %vm8624_vm13, %v8578_v40, %v3353_v20 }
 0xe15   :  { %v3381_v61 = vsub.f32 1.0, %v3380_v51  ;;  %vm3359_vm6 = vcmp.eq.f32.partialorder %v3358_v37, 8.507059e+37  ;;  %vm3386_vm11 = vmor %vm3384_vm15, %vm3385_vm14  ;;  %v3405_v40 = vand.u32 2147483648, %v8585_v43  ;;  %vm3399_vm7 = vweird.f32 %v8585_v43 }
 0xe16   :  { %v3305_v7 = vpop.f32.mrf.mxu2  ;;  %v3362_v2 = vsel %vm3359_vm6, %v3361_v6, %v3357_v42  ;;  %v3403_v34 = vand.u32 2147483647, %v8585_v43  ;;  %v3138_v37 = vmax.f32 %v8299_v16, %v8473_v25  ;;  %v8681_v16 = vld [vmem:[#allocation3 + $0x40] sm:$0xff]  ;;  %v8689_v25 = vld [vmem:[#allocation3 + $0x48] sm:$0xff] }
 0xe17   :  { %v3306_v27 = vadd.f32 %v3305_v7, %v7856_v19  ;;  %v3382_v63 = vmul.f32 %v8583_v26, %v3381_v61  ;;  %v3406_v28 = vor.u32 1.1754944e-38, %v3405_v40 }
 0xe18   :  { %vm3404_vm9 = vcmp.eq.f32.partialorder %v3403_v34, 8.507059e+37 }
 0xe19   :  { %v6086_v52 = vpop.eup %6085  ;;  %6089 = vtanh.f32 %v3306_v27  ;;  %v3383_v54 = vadd.f32 %v8583_v26, %v3382_v63  ;;  %v3390_v27 = vand.u32 2147483648, %v8574_v50  ;;  %v3427_v63 = vmul.f32 %v3362_v2, %v8458_v22 }
 0xe1a   :  { %v8597_v14 = vpop.eup %6087  ;;  %v8599_v45 = vadd.f32 1.0, %v6086_v52 }
 0xe1b   :  { %v3395_v1 = vmul.f32 %v8597_v14, %v8585_v43  ;;  %vm3400_vm4 = vweird.f32 %v8597_v14  ;;  %v3387_v29 = vsel %vm3386_vm11, %v8583_v26, %v3383_v54  ;;  %v3391_v39 = vor.u32 1.1754944e-38, %v3390_v27 }
 0xe1c   :  { %6091 = vrcp.f32 %v8599_v45  ;;  %vm3401_vm8 = vmor %vm3399_vm7, %vm3400_vm4  ;;  %vm3414_vm13 = vweird.f32 %v8599_v45  ;;  %v3418_v22 = vand.u32 2147483647, %v8599_v45 }
 0xe1d   :  { %v3396_v33 = vsub.f32 1.0, %v3395_v1  ;;  %v3392_v3 = vsel %vm3389_vm5, %v3391_v39, %v3387_v29 }
 0xe1e   :  { %v3307_v46 = vpop.f32.mrf.mxu2  ;;  %vm3419_vm15 = vcmp.eq.f32.partialorder %v3418_v22, 8.507059e+37 }
 0xe1f   :  { %v6090_v36 = vpop.eup %6089  ;;  %v3397_v38 = vmul.f32 %v8597_v14, %v3396_v33  ;;  %v3308_v51 = vadd.f32 %v3307_v46, %v8174_v62  ;;  %v3420_v46 = vand.u32 2147483648, %v8599_v45 }
 0xe20   :  { %v3428_v7 = vmul.f32 %v6090_v36, %v3377_v60 }
 0xe21   :  { %6093 = vtanh.f32 %v3308_v51  ;;  %v3398_v59 = vadd.f32 %v8597_v14, %v3397_v38  ;;  %v3421_v24 = vor.u32 1.1754944e-38, %v3420_v46 }
 0xe22   :  { %v6092_v13 = vpop.eup %6091  ;;  %v8635_v61 = vadd.f32 %v3428_v7, %v3426_v11 }
 0xe23   :  { %v3410_v52 = vmul.f32 %v6092_v13, %v8599_v45  ;;  %v3402_v8 = vsel %vm3401_vm8, %v8597_v14, %v3398_v59  ;;  %vm3415_vm10 = vweird.f32 %v6092_v13 }
 0xe24   :  { %6095 = vtanh.f32 %v8635_v61  ;;  %v3407_v57 = vsel %vm3404_vm9, %v3406_v28, %v3402_v8  ;;  %vm3416_vm14 = vmor %vm3414_vm13, %vm3415_vm10 }
 0xe25   :  { %v3411_v50 = vsub.f32 1.0, %v3410_v52 }
 0xe27   :  { %v6094_v0 = vpop.eup %6093  ;;  %v3412_v1 = vmul.f32 %v6092_v13, %v3411_v50 }
 0xe28   :  { %v3429_v33 = vmul.f32 %v6094_v0, %v3392_v3 }
 0xe29   :  { %v3413_v20 = vadd.f32 %v6092_v13, %v3412_v1 }
 0xe2a   :  { %v6096_v21 = vpop.eup %6095  ;;  %v8649_v26 = vadd.f32 %v3429_v33, %v3427_v63 }
 0xe2b   :  { %v3434_v43 = vmul.f32 %v6096_v21, %v3407_v57  ;;  %v3417_v38 = vsel %vm3416_vm14, %v6092_v13, %v3413_v20 }
 0xe2c   :  { %6097 = vtanh.f32 %v8649_v26  ;;  %v3422_v60 = vsel %vm3419_vm15, %v3421_v24, %v3417_v38 }
 0xe2d   :  { %3518 = vrot.lane.b32.xlu2 %v3434_v43, %s6309_s28  ;;  %v3488_v14 = vpack.c.bf16 %v3434_v43, %v3434_v43  ;;  %3512 = vrot.lane.b32.xlu0 %v3434_v43, %s6310_s29  ;;  %v8659_v36 = vmax.f32 %v3137_v35, %v3434_v43 }
 0xe2f   :  { %3490 = vst.msk [vmem:[#allocation2 + $0x18] sm:$0xf] %vm108_vm0, %v3488_v14 }
 0xe32   :  { %v6098_v32 = vpop.eup %6097 }
 0xe33   :  { %v3435_v51 = vmul.f32 %v6098_v32, %v3422_v60 }
 0xe35   :  { %3514 = vrot.lane.b32.xlu1 %v3435_v51, %s6310_s29  ;;  %v3489_v45 = vpack.c.bf16 %v3435_v51, %v3435_v51  ;;  %3464 = vrot.lane.b32.xlu2 %v3434_v43, %s6311_s30  ;;  %v8666_v23 = vmax.f32 %v3138_v37, %v3435_v51 }
 0xe36   :  { %3520 = vrot.lane.b32.xlu0 %v3435_v51, %s6309_s28 }
 0xe37   :  { %3491 = vst.msk [vmem:[#allocation2 + $0x1c] sm:$0xf] %vm108_vm0, %v3489_v45 }
 0xe3d   :  { %3500 = vrot.lane.b32.xlu1 %v8506_v4, %s6309_s28  ;;  %3472 = vrot.lane.b32.xlu2 %v3435_v51, %s6312_s8 }
 0xe3e   :  { %3442 = vrot.lane.b32.xlu0 %v8498_v15, %s6311_s30  ;;  %v5712_v24 = vld [vmem:[#allocation2 + $0x18] sm:$0xff] }
 0xe45   :  { %3470 = vrot.lane.b32.xlu1 %v3434_v43, %s6312_s8  ;;  %3448 = vrot.lane.b32.xlu2 %v8498_v15, %s6312_s8  ;;  %v3495_v15 = vpop.permute.xlu2 %3494 }
 0xe46   :  { %3466 = vrot.lane.b32.xlu0 %v3435_v51, %s6311_s30 }
 0xe4d   :  { %3444 = vrot.lane.b32.xlu1 %v8506_v4, %s6311_s30  ;;  %3791 = vrot.lane.b32.xlu2 %v8681_v16, %s6310_s29 }
 0xe4e   :  { %3450 = vrot.lane.b32.xlu0 %v8506_v4, %s6312_s8 }
 0xe55   :  { %3797 = vrot.lane.b32.xlu1 %v8681_v16, %s6309_s28 }
 0xe56   :  { %3793 = vrot.lane.b32.xlu0 %v8689_v25, %s6310_s29 }
 0xe87   :  { %v3519_v11 = vpop.permute.xlu2 %3518 }
 0xe8f   :  { %v3465_v7 = vpop.permute.xlu2 %3464 }
 0xe97   :  { %v3473_v4 = vpop.permute.xlu2 %3472 }
 0xe9f   :  { %v3513_v54 = vpop.permute.xlu0 %3512  ;;  %v3449_v29 = vpop.permute.xlu2 %3448 }
 0xea0   :  { %v3524_v42 = vsel %vm133_vm1, %v3513_v54, %v3519_v11 }
 0xea1   :  { %v3526_v27 = vmul.f32 %v3524_v42, %v6373_v5 }
 0xea3   :  { %v3528_v13 = vpack.c.bf16 %v3526_v27, %v3526_v27 }
 0xea5   :  { %3530 = vst.msk [vmem:[#allocation2 + $0x28] sm:$0xf] %vm108_vm0, %v3528_v13 }
 0xea7   :  { %v3515_v6 = vpop.permute.xlu1 %3514  ;;  %v3792_v37 = vpop.permute.xlu2 %3791 }
 0xea8   :  { %v3521_v48 = vpop.permute.xlu0 %3520 }
 0xea9   :  { %v3525_v59 = vsel %vm133_vm1, %v3515_v6, %v3521_v48 }
 0xeaa   :  { %v3527_v52 = vmul.f32 %v3525_v59, %v6373_v5 }
 0xeac   :  { %v3529_v40 = vpack.c.bf16 %v3527_v52, %v3527_v52 }
 0xeae   :  { %3531 = vst.msk [vmem:[#allocation2 + $0x2c] sm:$0xf] %vm108_vm0, %v3529_v40 }
 0xeaf   :  { %v3501_v2 = vpop.permute.xlu1 %3500 }
 0xeb0   :  { %v3505_v34 = vsel %vm133_vm1, %v3495_v15, %v3501_v2  ;;  %v3443_v50 = vpop.permute.xlu0 %3442 }
 0xeb1   :  { %v3507_v39 = vmul.f32 %v3505_v34, %v6373_v5  ;;  %v3454_v0 = vsel %vm100_vm2, %v3443_v50, %v3449_v29 }
 0xeb2   :  { %v3456_v8 = vmul.f32 %v3454_v0, %v6389_v10 }
 0xeb3   :  { %v3509_v1 = vpack.c.bf16 %v3507_v39, %v3507_v39 }
 0xeb4   :  { %v3458_v3 = vpack.c.bf16 %v3456_v8, %v3456_v8 }
 0xeb5   :  { %3511 = vst.msk [vmem:[#allocation2 + $0x24] sm:$0xf] %vm108_vm0, %v3509_v1  ;;  %v5714_v28 = vld [vmem:[#allocation2 + $0x28] sm:$0xff] }
 0xeb6   :  { %3460 = vst.msk [vmem:[#allocation2] sm:$0xf] %vm108_vm0, %v3458_v3  ;;  %3582 = vmatpush.bf16.msra.mxu3 %v5714_v28 }
 0xeb7   :  { %v3471_v63 = vpop.permute.xlu1 %3470 }
 0xeb8   :  { %v3476_v33 = vsel %vm100_vm2, %v3465_v7, %v3471_v63  ;;  %v3467_v21 = vpop.permute.xlu0 %3466 }
 0xeb9   :  { %v3478_v57 = vmul.f32 %v3476_v33, %v6389_v10  ;;  %v3477_v20 = vsel %vm100_vm2, %v3467_v21, %v3473_v4 }
 0xeba   :  { %v3479_v43 = vmul.f32 %v3477_v20, %v6389_v10 }
 0xebb   :  { %v3480_v35 = vpack.c.bf16 %v3478_v57, %v3478_v57 }
 0xebc   :  { %v3481_v46 = vpack.c.bf16 %v3479_v43, %v3479_v43  ;;  %v5713_v22 = vld [vmem:[#allocation2 + $0x20] sm:$0xff] }
 0xebd   :  { %3482 = vst.msk [vmem:[#allocation2 + $0x8] sm:$0xf] %vm108_vm0, %v3480_v35  ;;  %3583 = vmatpush.bf16.msra.mxu3 %v5713_v22 }
 0xebe   :  { %3483 = vst.msk [vmem:[#allocation2 + $0xc] sm:$0xf] %vm108_vm0, %v3481_v46 }
 0xebf   :  { %v3445_v14 = vpop.permute.xlu1 %3444 }
 0xec0   :  { %v3451_v38 = vpop.permute.xlu0 %3450 }
 0xec1   :  { %v3455_v32 = vsel %vm100_vm2, %v3445_v14, %v3451_v38  ;;  %3584 = vmatpush.bf16.msra.mxu3 %v5712_v24 }
 0xec2   :  { %v3457_v60 = vmul.f32 %v3455_v32, %v6389_v10 }
 0xec4   :  { %v3459_v51 = vpack.c.bf16 %v3457_v60, %v3457_v60 }
 0xec5   :  { %3585 = vmatpush.bf16.msra.mxu3 %v7376_v56  ;;  %v5710_v11 = vld [vmem:[#allocation2 + $0x8] sm:$0xff] }
 0xec6   :  { %3461 = vst.msk [vmem:[#allocation2 + $0x4] sm:$0xf] %vm108_vm0, %v3459_v51 }
 0xec7   :  { %v3798_v45 = vpop.permute.xlu1 %3797 }
 0xec8   :  { %v3803_v15 = vsel %vm133_vm1, %v3792_v37, %v3798_v45 }
 0xec9   :  { %v3805_v7 = vmul.f32 %v3803_v15, %v6373_v5  ;;  %3586 = vmatpush.bf16.msra.mxu3 %v5710_v11 }
 0xecb   :  { %v3807_v54 = vpack.c.bf16 %v3805_v7, %v3805_v7 }
 0xecd   :  { %3809 = vst.msk [vmem:[#allocation2 + $0x20] sm:$0xf] %vm108_vm0, %v3807_v54  ;;  %v5709_v42 = vld [vmem:[#allocation2] sm:$0xff] }
 0xece   :  { %3587 = vmatpush.bf16.msra.mxu3 %v5709_v42 }
 0xed1   :  { %5486 = vmatmul.msk.bf16.vlgmr.msra.gmra.mxu3 %vm215_vm3, %v8538_v18 }
 0xee1   :  { %5487 = vmatmul.msk.bf16.gmra.mxu3 %vm215_vm3, %v8545_v31 }
 0xef1   :  { %5488 = vmatmul.msk.bf16.gmra.mxu3 %vm215_vm3, %v8552_v30 }
 0xf01   :  { %5489 = vmatmul.msk.bf16.gmra.mxu3 %vm215_vm3, %v8559_v44 }
 0xf54   :  { %v3589_v56 = vpop.f32.mrf.mxu3 }
 0xf55   :  { %v3590_v27 = vadd.f32 %v3589_v56, %v7835_v55 }
 0xf57   :  { %v5490_v4 = vmul.f32 -1.442695, %v3590_v27 }
 0xf59   :  { %6099 = vpow2.f32 %v5490_v4 }
 0xf5c   :  { %v3591_v13 = vpop.f32.mrf.mxu3 }
 0xf5d   :  { %v3592_v6 = vadd.f32 %v3591_v13, %v7911_v9 }
 0xf5f   :  { %v5491_v48 = vmul.f32 -1.442695, %v3592_v6  ;;  %v6100_v2 = vpop.eup %6099 }
 0xf60   :  { %v3627_v29 = vadd.f32 1.0, %v6100_v2 }
 0xf61   :  { %6101 = vpow2.f32 %v5491_v48 }
 0xf62   :  { %v3644_v13 = vand.u32 2147483648, %v3627_v29  ;;  %v3642_v6 = vand.u32 2147483647, %v3627_v29  ;;  %vm3638_vm6 = vweird.f32 %v3627_v29 }
 0xf64   :  { %v3594_v59 = vpop.f32.mrf.mxu3  ;;  %vm3643_vm5 = vcmp.eq.f32.partialorder %v3642_v6, 8.507059e+37 }
 0xf65   :  { %v3595_v52 = vadd.f32 %v3594_v59, %v7851_v49 }
 0xf67   :  { %v5492_v40 = vmul.f32 -1.442695, %v3595_v52  ;;  %v6102_v39 = vpop.eup %6101 }
 0xf68   :  { %v8732_v3 = vadd.f32 1.0, %v6102_v39 }
 0xf69   :  { %6103 = vpow2.f32 %v5492_v40 }
 0xf6a   :  { %6105 = vrcp.f32 %v3627_v29  ;;  %vm3653_vm13 = vweird.f32 %v8732_v3 }
 0xf6c   :  { %v3596_v34 = vpop.f32.mrf.mxu3 }
 0xf6d   :  { %v3597_v50 = vadd.f32 %v3596_v34, %v7843_v17 }
 0xf6f   :  { %v6104_v0 = vpop.eup %6103  ;;  %v5493_v8 = vmul.f32 -1.442695, %v3597_v50 }
 0xf70   :  { %v8730_v1 = vadd.f32 1.0, %v6104_v0  ;;  %v6106_v63 = vpop.eup %6105 }
 0xf71   :  { %6107 = vpow2.f32 %v5493_v8  ;;  %v3634_v43 = vmul.f32 %v6106_v63, %v3627_v29  ;;  %vm3639_vm4 = vweird.f32 %v6106_v63  ;;  %v3645_v8 = vor.u32 1.1754944e-38, %v3644_v13 }
 0xf72   :  { %6109 = vrcp.f32 %v8730_v1  ;;  %vm8754_vm7 = vmor %vm3638_vm6, %vm3639_vm4  ;;  %v3674_v34 = vand.u32 2147483648, %v8730_v1  ;;  %vm3668_vm8 = vweird.f32 %v8730_v1  ;;  %v3672_v0 = vand.u32 2147483647, %v8730_v1 }
 0xf73   :  { %6111 = vrcp.f32 %v8732_v3  ;;  %v3635_v14 = vsub.f32 1.0, %v3634_v43 }
 0xf74   :  { %v3599_v28 = vpop.f32.mrf.mxu3  ;;  %v3675_v43 = vor.u32 1.1754944e-38, %v3674_v34  ;;  %vm3673_vm14 = vcmp.eq.f32.partialorder %v3672_v0, 8.507059e+37 }
 0xf75   :  { %v3600_v33 = vadd.f32 %v3599_v28, %v7958_v41  ;;  %v3636_v15 = vmul.f32 %v6106_v63, %v3635_v14  ;;  %v3659_v14 = vand.u32 2147483648, %v8732_v3 }
 0xf77   :  { %v6108_v21 = vpop.eup %6107  ;;  %v5494_v57 = vmul.f32 -1.442695, %v3600_v33  ;;  %v3637_v27 = vadd.f32 %v6106_v63, %v3636_v15 }
 0xf78   :  { %v6110_v20 = vpop.eup %6109  ;;  %v8737_v35 = vadd.f32 1.0, %v6108_v21 }
 0xf79   :  { %6113 = vpow2.f32 %v5494_v57  ;;  %v3664_v46 = vmul.f32 %v6110_v20, %v8730_v1  ;;  %v8741_v22 = vpop.eup %6111  ;;  %vm3669_vm11 = vweird.f32 %v6110_v20  ;;  %v3641_v29 = vsel %vm8754_vm7, %v6106_v63, %v3637_v27 }
 0xf7a   :  { %6115 = vrcp.f32 %v8737_v35  ;;  %v3649_v51 = vmul.f32 %v8741_v22, %v8732_v3  ;;  %vm8770_vm9 = vmor %vm3668_vm8, %vm3669_vm11  ;;  %vm3654_vm10 = vweird.f32 %v8741_v22  ;;  %v3646_v1 = vsel %vm3643_vm5, %v3645_v8, %v3641_v29 }
 0xf7b   :  { %v3665_v32 = vsub.f32 1.0, %v3664_v46  ;;  %vm8787_vm15 = vmor %vm3653_vm13, %vm3654_vm10  ;;  %v3725_v15 = vmul.f32 %v3646_v1, %v8635_v61  ;;  %v3660_v27 = vor.u32 1.1754944e-38, %v3659_v14  ;;  %vm3683_vm6 = vweird.f32 %v8737_v35 }
 0xf7c   :  { %v3601_v38 = vpop.f32.mrf.mxu3  ;;  %v3650_v42 = vsub.f32 1.0, %v3649_v51  ;;  %v3687_v61 = vand.u32 2147483647, %v8737_v35 }
 0xf7d   :  { %v3602_v24 = vadd.f32 %v3601_v38, %v7859_v12  ;;  %v3666_v54 = vmul.f32 %v6110_v20, %v3665_v32 }
 0xf7e   :  { %v3651_v2 = vmul.f32 %v8741_v22, %v3650_v42  ;;  %vm3688_vm10 = vcmp.eq.f32.partialorder %v3687_v61, 8.507059e+37 }
 0xf7f   :  { %v6114_v60 = vpop.eup %6113  ;;  %v5495_v37 = vmul.f32 -1.442695, %v3602_v24  ;;  %v3667_v59 = vadd.f32 %v6110_v20, %v3666_v54 }
 0xf80   :  { %v8746_v45 = vpop.eup %6115  ;;  %v8748_v11 = vadd.f32 1.0, %v6114_v60  ;;  %v3652_v46 = vadd.f32 %v8741_v22, %v3651_v2 }
 0xf81   :  { %6117 = vpow2.f32 %v5495_v37  ;;  %v3679_v7 = vmul.f32 %v8746_v45, %v8737_v35  ;;  %v3671_v63 = vsel %vm8770_vm9, %v6110_v20, %v3667_v59  ;;  %v3657_v20 = vand.u32 2147483647, %v8732_v3  ;;  %v3794_v37 = vpop.permute.xlu0 %3793 }
 0xf82   :  { %6119 = vrcp.f32 %v8748_v11  ;;  %v3676_v60 = vsel %vm3673_vm14, %v3675_v43, %v3671_v63  ;;  %vm3684_vm4 = vweird.f32 %v8746_v45  ;;  %v3656_v42 = vsel %vm8787_vm15, %v8741_v22, %v3652_v46 }
 0xf83   :  { %v3680_v48 = vsub.f32 1.0, %v3679_v7  ;;  %vm3658_vm7 = vcmp.eq.f32.partialorder %v3657_v20, 8.507059e+37  ;;  %vm3685_vm8 = vmor %vm3683_vm6, %vm3684_vm4  ;;  %v3704_v22 = vand.u32 2147483648, %v8748_v11  ;;  %vm3698_vm5 = vweird.f32 %v8748_v11  ;;  %v8864_v20 = vld [vmem:[#allocation3 + $0x58] sm:$0xff] }
 0xf84   :  { %v3604_v56 = vpop.f32.mrf.mxu3 }
 0xf85   :  { %v3605_v4 = vadd.f32 %v3604_v56, %v7856_v19  ;;  %v3681_v21 = vmul.f32 %v8746_v45, %v3680_v48  ;;  %v3689_v56 = vand.u32 2147483648, %v8737_v35  ;;  %v3661_v48 = vsel %vm3658_vm7, %v3660_v27, %v3656_v42 }
 0xf86   :  { %v3705_v8 = vor.u32 1.1754944e-38, %v3704_v22 }
 0xf87   :  { %v6118_v52 = vpop.eup %6117  ;;  %6121 = vtanh.f32 %v3605_v4  ;;  %v3682_v54 = vadd.f32 %v8746_v45, %v3681_v21  ;;  %v3690_v40 = vor.u32 1.1754944e-38, %v3689_v56 }
 0xf88   :  { %v8760_v50 = vpop.eup %6119  ;;  %v8762_v39 = vadd.f32 1.0, %v6118_v52  ;;  %v3702_v52 = vand.u32 2147483647, %v8748_v11 }
 0xf89   :  { %v3694_v28 = vmul.f32 %v8760_v50, %v8748_v11  ;;  %vm3699_vm11 = vweird.f32 %v8760_v50  ;;  %v3686_v59 = vsel %vm3685_vm8, %v8746_v45, %v3682_v54 }
 0xf8a   :  { %6123 = vrcp.f32 %v8762_v39  ;;  %vm3700_vm9 = vmor %vm3698_vm5, %vm3699_vm11  ;;  %v3691_v0 = vsel %vm3688_vm10, %v3690_v40, %v3686_v59  ;;  %vm3703_vm13 = vcmp.eq.f32.partialorder %v3702_v52, 8.507059e+37  ;;  %v3719_v1 = vand.u32 2147483648, %v8762_v39 }
 0xf8b   :  { %v3695_v57 = vsub.f32 1.0, %v3694_v28  ;;  %v3726_v28 = vmul.f32 %v3661_v48, %v8649_v26  ;;  %vm3713_vm15 = vweird.f32 %v8762_v39 }
 0xf8c   :  { %v3606_v38 = vpop.f32.mrf.mxu3  ;;  %v3720_v14 = vor.u32 1.1754944e-38, %v3719_v1 }
 0xf8d   :  { %v6122_v24 = vpop.eup %6121  ;;  %v3696_v32 = vmul.f32 %v8760_v50, %v3695_v57  ;;  %v3607_v51 = vadd.f32 %v3606_v38, %v8174_v62 }
 0xf8e   :  { %v3727_v7 = vmul.f32 %v6122_v24, %v3676_v60 }
 0xf8f   :  { %6125 = vtanh.f32 %v3607_v51  ;;  %v3697_v4 = vadd.f32 %v8760_v50, %v3696_v32  ;;  %v8856_v51 = vld [vmem:[#allocation3 + $0x50] sm:$0xff] }
 0xf90   :  { %v6124_v3 = vpop.eup %6123  ;;  %v8798_v13 = vadd.f32 %v3727_v7, %v3725_v15 }
 0xf91   :  { %v3709_v6 = vmul.f32 %v6124_v3, %v8762_v39  ;;  %v3701_v34 = vsel %vm3700_vm9, %v8760_v50, %v3697_v4  ;;  %vm3714_vm14 = vweird.f32 %v6124_v3  ;;  %v3717_v50 = vand.u32 2147483647, %v8762_v39 }
 0xf92   :  { %6127 = vtanh.f32 %v8798_v13  ;;  %v3706_v21 = vsel %vm3703_vm13, %v3705_v8, %v3701_v34  ;;  %vm3715_vm4 = vmor %vm3713_vm15, %vm3714_vm14 }
 0xf93   :  { %v3710_v35 = vsub.f32 1.0, %v3709_v6  ;;  %vm3718_vm6 = vcmp.eq.f32.partialorder %v3717_v50, 8.507059e+37 }
 0xf95   :  { %v6126_v2 = vpop.eup %6125  ;;  %v3711_v29 = vmul.f32 %v6124_v3, %v3710_v35 }
 0xf96   :  { %v3728_v33 = vmul.f32 %v6126_v2, %v3691_v0 }
 0xf97   :  { %v3712_v57 = vadd.f32 %v6124_v3, %v3711_v29 }
 0xf98   :  { %v6128_v63 = vpop.eup %6127  ;;  %v8812_v45 = vadd.f32 %v3728_v33, %v3726_v28 }
 0xf99   :  { %v8814_v11 = vmul.f32 %v6128_v63, %v3706_v21  ;;  %v3716_v46 = vsel %vm3715_vm4, %v6124_v3, %v3712_v57 }
 0xf9a   :  { %6129 = vtanh.f32 %v8812_v45  ;;  %v3721_v39 = vsel %vm3718_vm6, %v3720_v14, %v3716_v46 }
 0xf9b   :  { %3817 = vrot.lane.b32.xlu0 %v8814_v11, %s6309_s28  ;;  %v3787_v26 = vpack.c.bf16 %v8814_v11, %v8814_v11  ;;  %3811 = vrot.lane.b32.xlu1 %v8814_v11, %s6310_s29  ;;  %v3735_v43 = vmax.f32 %v8659_v36, %v8814_v11 }
 0xf9d   :  { %3789 = vst.msk [vmem:[#allocation2 + $0x18] sm:$0xf] %vm108_vm0, %v3787_v26 }
 0xfa0   :  { %v6130_v38 = vpop.eup %6129 }
 0xfa1   :  { %v8829_v24 = vmul.f32 %v6130_v38, %v3721_v39 }
 0xfa3   :  { %3813 = vrot.lane.b32.xlu2 %v8829_v24, %s6310_s29  ;;  %v3788_v32 = vpack.c.bf16 %v8829_v24, %v8829_v24  ;;  %3763 = vrot.lane.b32.xlu0 %v8814_v11, %s6311_s30  ;;  %v3736_v60 = vmax.f32 %v8666_v23, %v8829_v24  ;;  %v9021_v23 = vld [vmem:[#allocation3 + $0x60] sm:$0xff] }
 0xfa4   :  { %3819 = vrot.lane.b32.xlu1 %v8829_v24, %s6309_s28 }
 0xfa5   :  { %3790 = vst.msk [vmem:[#allocation2 + $0x1c] sm:$0xf] %vm108_vm0, %v3788_v32 }
 0xfab   :  { %3799 = vrot.lane.b32.xlu2 %v8689_v25, %s6309_s28  ;;  %3771 = vrot.lane.b32.xlu0 %v8829_v24, %s6312_s8 }
 0xfac   :  { %3741 = vrot.lane.b32.xlu1 %v8681_v16, %s6311_s30  ;;  %v5718_v14 = vld [vmem:[#allocation2 + $0x18] sm:$0xff] }
 0xfb3   :  { %3769 = vrot.lane.b32.xlu2 %v8814_v11, %s6312_s8  ;;  %3747 = vrot.lane.b32.xlu0 %v8681_v16, %s6312_s8  ;;  %v9029_v11 = vld [vmem:[#allocation3 + $0x68] sm:$0xff] }
 0xfb4   :  { %3765 = vrot.lane.b32.xlu1 %v8829_v24, %s6311_s30 }
 0xfbb   :  { %3743 = vrot.lane.b32.xlu2 %v8689_v25, %s6311_s30  ;;  %4090 = vrot.lane.b32.xlu0 %v8856_v51, %s6310_s29 }
 0xfbc   :  { %3749 = vrot.lane.b32.xlu1 %v8689_v25, %s6312_s8 }
 0xfc3   :  { %4096 = vrot.lane.b32.xlu2 %v8856_v51, %s6309_s28 }
 0xfc4   :  { %4092 = vrot.lane.b32.xlu1 %v8864_v20, %s6310_s29 }
 0xffd   :  { %v3814_v16 = vpop.permute.xlu2 %3813 }
0x1005   :  { %v3800_v15 = vpop.permute.xlu2 %3799 }
0x1006   :  { %v3804_v7 = vsel %vm133_vm1, %v3794_v37, %v3800_v15 }
0x1007   :  { %v3806_v54 = vmul.f32 %v3804_v7, %v6373_v5 }
0x1009   :  { %v3808_v42 = vpack.c.bf16 %v3806_v54, %v3806_v54 }
0x100b   :  { %3810 = vst.msk [vmem:[#allocation2 + $0x24] sm:$0xf] %vm108_vm0, %v3808_v42 }
0x100d   :  { %v3818_v56 = vpop.permute.xlu0 %3817  ;;  %v3812_v25 = vpop.permute.xlu1 %3811 }
0x100e   :  { %v3823_v3 = vsel %vm133_vm1, %v3812_v25, %v3818_v56  ;;  %v3770_v4 = vpop.permute.xlu2 %3769 }
0x100f   :  { %v3825_v27 = vmul.f32 %v3823_v3, %v6373_v5 }
0x1011   :  { %v3827_v61 = vpack.c.bf16 %v3825_v27, %v3825_v27 }
0x1012   :  { %v5719_v1 = vld [vmem:[#allocation2 + $0x20] sm:$0xff] }
0x1013   :  { %3829 = vst.msk [vmem:[#allocation2 + $0x28] sm:$0xf] %vm108_vm0, %v3827_v61 }
0x1015   :  { %v3764_v6 = vpop.permute.xlu0 %3763 }
0x1016   :  { %v3775_v22 = vsel %vm100_vm2, %v3764_v6, %v3770_v4  ;;  %v3820_v48 = vpop.permute.xlu1 %3819  ;;  %v3744_v0 = vpop.permute.xlu2 %3743 }
0x1017   :  { %v3777_v59 = vmul.f32 %v3775_v22, %v6389_v10  ;;  %v3824_v52 = vsel %vm133_vm1, %v3814_v16, %v3820_v48 }
0x1018   :  { %v3826_v35 = vmul.f32 %v3824_v52, %v6373_v5 }
0x1019   :  { %v3779_v40 = vpack.c.bf16 %v3777_v59, %v3777_v59 }
0x101a   :  { %v3828_v2 = vpack.c.bf16 %v3826_v35, %v3826_v35 }
0x101b   :  { %3781 = vst.msk [vmem:[#allocation2 + $0x8] sm:$0xf] %vm108_vm0, %v3779_v40 }
0x101c   :  { %3830 = vst.msk [vmem:[#allocation2 + $0x2c] sm:$0xf] %vm108_vm0, %v3828_v2 }
0x101d   :  { %v3772_v34 = vpop.permute.xlu0 %3771 }
0x101e   :  { %v3742_v29 = vpop.permute.xlu1 %3741  ;;  %v4097_v38 = vpop.permute.xlu2 %4096 }
0x1023   :  { %v5720_v8 = vld [vmem:[#allocation2 + $0x28] sm:$0xff] }
0x1024   :  { %3881 = vmatpush.bf16.msrb.mxu0 %v5720_v8 }
0x1025   :  { %v3748_v28 = vpop.permute.xlu0 %3747 }
0x1026   :  { %v3753_v33 = vsel %vm100_vm2, %v3742_v29, %v3748_v28  ;;  %v3766_v63 = vpop.permute.xlu1 %3765 }
0x1027   :  { %v3755_v21 = vmul.f32 %v3753_v33, %v6389_v10  ;;  %v3776_v57 = vsel %vm100_vm2, %v3766_v63, %v3772_v34 }
0x1028   :  { %v3778_v50 = vmul.f32 %v3776_v57, %v6389_v10  ;;  %3882 = vmatpush.bf16.msrb.mxu0 %v5719_v1 }
0x1029   :  { %v3757_v26 = vpack.c.bf16 %v3755_v21, %v3755_v21 }
0x102a   :  { %v3780_v46 = vpack.c.bf16 %v3778_v50, %v3778_v50 }
0x102b   :  { %3759 = vst.msk [vmem:[#allocation2] sm:$0xf] %vm108_vm0, %v3757_v26 }
0x102c   :  { %3782 = vst.msk [vmem:[#allocation2 + $0xc] sm:$0xf] %vm108_vm0, %v3780_v46  ;;  %3883 = vmatpush.bf16.msrb.mxu0 %v5718_v14 }
0x102d   :  { %v4091_v39 = vpop.permute.xlu0 %4090 }
0x102e   :  { %v4102_v32 = vsel %vm133_vm1, %v4091_v39, %v4097_v38  ;;  %v3750_v16 = vpop.permute.xlu1 %3749 }
0x102f   :  { %v4104_v37 = vmul.f32 %v4102_v32, %v6373_v5  ;;  %v3754_v15 = vsel %vm100_vm2, %v3744_v0, %v3750_v16 }
0x1030   :  { %v3756_v7 = vmul.f32 %v3754_v15, %v6389_v10  ;;  %3884 = vmatpush.bf16.msrb.mxu0 %v7563_v47 }
0x1031   :  { %v4106_v54 = vpack.c.bf16 %v4104_v37, %v4104_v37 }
0x1032   :  { %v3758_v42 = vpack.c.bf16 %v3756_v7, %v3756_v7 }
0x1033   :  { %4108 = vst.msk [vmem:[#allocation2 + $0x20] sm:$0xf] %vm108_vm0, %v4106_v54  ;;  %v5716_v56 = vld [vmem:[#allocation2 + $0x8] sm:$0xff] }
0x1034   :  { %3760 = vst.msk [vmem:[#allocation2 + $0x4] sm:$0xf] %vm108_vm0, %v3758_v42  ;;  %3885 = vmatpush.bf16.msrb.mxu0 %v5716_v56 }
0x1036   :  { %v4093_v24 = vpop.permute.xlu1 %4092 }
0x103b   :  { %v5715_v25 = vld [vmem:[#allocation2] sm:$0xff] }
0x103c   :  { %3886 = vmatpush.bf16.msrb.mxu0 %v5715_v25 }
0x103f   :  { %5520 = vmatmul.msk.bf16.vlgmr.msrb.gmra.mxu0 %vm215_vm3, %v8538_v18 }
0x104f   :  { %5521 = vmatmul.msk.bf16.gmra.mxu0 %vm215_vm3, %v8545_v31 }
0x105f   :  { %5522 = vmatmul.msk.bf16.gmra.mxu0 %vm215_vm3, %v8552_v30 }
0x106f   :  { %5523 = vmatmul.msk.bf16.gmra.mxu0 %vm215_vm3, %v8559_v44 }
0x10bc   :  { %v3888_v47 = vpop.f32.mrf.mxu0 }
0x10bd   :  { %v3889_v3 = vadd.f32 %v3888_v47, %v7835_v55 }
0x10bf   :  { %v5524_v61 = vmul.f32 -1.442695, %v3889_v3 }
0x10c1   :  { %6131 = vpow2.f32 %v5524_v61 }
0x10c4   :  { %v3890_v27 = vpop.f32.mrf.mxu0 }
0x10c5   :  { %v3891_v4 = vadd.f32 %v3890_v27, %v7911_v9 }
0x10c7   :  { %v5525_v6 = vmul.f32 -1.442695, %v3891_v4  ;;  %v6132_v31 = vpop.eup %6131 }
0x10c8   :  { %v3926_v30 = vadd.f32 1.0, %v6132_v31 }
0x10c9   :  { %6133 = vpow2.f32 %v5525_v6 }
0x10ca   :  { %v3943_v3 = vand.u32 2147483648, %v3926_v30  ;;  %v3941_v61 = vand.u32 2147483647, %v3926_v30  ;;  %vm3937_vm7 = vweird.f32 %v3926_v30 }
0x10cc   :  { %v3893_v22 = vpop.f32.mrf.mxu0  ;;  %vm3942_vm10 = vcmp.eq.f32.partialorder %v3941_v61, 8.507059e+37 }
0x10cd   :  { %v3894_v18 = vadd.f32 %v3893_v22, %v7851_v49 }
0x10cf   :  { %v5526_v48 = vmul.f32 -1.442695, %v3894_v18  ;;  %v6134_v52 = vpop.eup %6133 }
0x10d0   :  { %v8907_v34 = vadd.f32 1.0, %v6134_v52 }
0x10d1   :  { %6135 = vpow2.f32 %v5526_v48 }
0x10d2   :  { %6137 = vrcp.f32 %v3926_v30  ;;  %vm3952_vm15 = vweird.f32 %v8907_v34 }
0x10d4   :  { %v3895_v59 = vpop.f32.mrf.mxu0 }
0x10d5   :  { %v3896_v44 = vadd.f32 %v3895_v59, %v7843_v17 }
0x10d7   :  { %v6136_v35 = vpop.eup %6135  ;;  %v5527_v40 = vmul.f32 -1.442695, %v3896_v44 }
0x10d8   :  { %v8905_v2 = vadd.f32 1.0, %v6136_v35  ;;  %v6138_v0 = vpop.eup %6137  ;;  %v3944_v35 = vor.u32 1.1754944e-38, %v3943_v3 }
0x10d9   :  { %6139 = vpow2.f32 %v5527_v40  ;;  %v3933_v21 = vmul.f32 %v6138_v0, %v3926_v30  ;;  %vm3938_vm11 = vweird.f32 %v6138_v0 }
0x10da   :  { %6141 = vrcp.f32 %v8905_v2  ;;  %vm8929_vm5 = vmor %vm3937_vm7, %vm3938_vm11  ;;  %v3973_v31 = vand.u32 2147483648, %v8905_v2  ;;  %vm3967_vm9 = vweird.f32 %v8905_v2  ;;  %v3971_v52 = vand.u32 2147483647, %v8905_v2 }
0x10db   :  { %6143 = vrcp.f32 %v8907_v34  ;;  %v3934_v26 = vsub.f32 1.0, %v3933_v21 }
0x10dc   :  { %v3898_v29 = vpop.f32.mrf.mxu0  ;;  %vm3972_vm4 = vcmp.eq.f32.partialorder %v3971_v52, 8.507059e+37 }
0x10dd   :  { %v3899_v8 = vadd.f32 %v3898_v29, %v7958_v41  ;;  %v3935_v15 = vmul.f32 %v6138_v0, %v3934_v26 }
0x10df   :  { %v6140_v28 = vpop.eup %6139  ;;  %v5528_v33 = vmul.f32 -1.442695, %v3899_v8  ;;  %v3936_v47 = vadd.f32 %v6138_v0, %v3935_v15 }
0x10e0   :  { %v6142_v63 = vpop.eup %6141  ;;  %v8912_v57 = vadd.f32 1.0, %v6140_v28 }
0x10e1   :  { %6145 = vpow2.f32 %v5528_v33  ;;  %v3963_v1 = vmul.f32 %v6142_v63, %v8905_v2  ;;  %v8916_v50 = vpop.eup %6143  ;;  %vm3968_vm8 = vweird.f32 %v6142_v63  ;;  %v3940_v30 = vsel %vm8929_vm5, %v6138_v0, %v3936_v47 }
0x10e2   :  { %6147 = vrcp.f32 %v8912_v57  ;;  %v3948_v32 = vmul.f32 %v8916_v50, %v8907_v34  ;;  %vm8945_vm13 = vmor %vm3967_vm9, %vm3968_vm8  ;;  %vm3953_vm14 = vweird.f32 %v8916_v50  ;;  %v3945_v2 = vsel %vm3942_vm10, %v3944_v35, %v3940_v30 }
0x10e3   :  { %v3964_v38 = vsub.f32 1.0, %v3963_v1  ;;  %v3974_v33 = vor.u32 1.1754944e-38, %v3973_v31  ;;  %v3958_v1 = vand.u32 2147483648, %v8907_v34  ;;  %vm8962_vm6 = vmor %vm3952_vm15, %vm3953_vm14  ;;  %vm3982_vm7 = vweird.f32 %v8912_v57 }
0x10e4   :  { %v3900_v46 = vpop.f32.mrf.mxu0  ;;  %v3949_v56 = vsub.f32 1.0, %v3948_v32 }
0x10e5   :  { %v3901_v14 = vadd.f32 %v3900_v46, %v7859_v12  ;;  %v3965_v42 = vmul.f32 %v6142_v63, %v3964_v38 }
0x10e6   :  { %v3950_v48 = vmul.f32 %v8916_v50, %v3949_v56  ;;  %v3988_v56 = vand.u32 2147483648, %v8912_v57 }
0x10e7   :  { %v6146_v39 = vpop.eup %6145  ;;  %v5529_v16 = vmul.f32 -1.442695, %v3901_v14  ;;  %v3966_v6 = vadd.f32 %v6142_v63, %v3965_v42 }
0x10e8   :  { %v8921_v37 = vpop.eup %6147  ;;  %v8923_v7 = vadd.f32 1.0, %v6146_v39  ;;  %v3951_v21 = vadd.f32 %v8916_v50, %v3950_v48 }
0x10e9   :  { %6149 = vpow2.f32 %v5529_v16  ;;  %v3978_v54 = vmul.f32 %v8921_v37, %v8912_v57  ;;  %v3970_v0 = vsel %vm8945_vm13, %v6142_v63, %v3966_v6  ;;  %v3956_v63 = vand.u32 2147483647, %v8907_v34 }
0x10ea   :  { %6151 = vrcp.f32 %v8923_v7  ;;  %v3975_v38 = vsel %vm3972_vm4, %v3974_v33, %v3970_v0  ;;  %v4024_v16 = vmul.f32 %v3945_v2, %v8798_v13  ;;  %vm3983_vm11 = vweird.f32 %v8921_v37 }
0x10eb   :  { %v3979_v4 = vsub.f32 1.0, %v3978_v54  ;;  %v3955_v42 = vsel %vm8962_vm6, %v8916_v50, %v3951_v21  ;;  %v3986_v13 = vand.u32 2147483647, %v8912_v57  ;;  %vm3957_vm5 = vcmp.eq.f32.partialorder %v3956_v63, 8.507059e+37  ;;  %vm3984_vm9 = vmor %vm3982_vm7, %vm3983_vm11 }
0x10ec   :  { %v3903_v25 = vpop.f32.mrf.mxu0  ;;  %v4003_v50 = vand.u32 2147483648, %v8923_v7  ;;  %vm3997_vm10 = vweird.f32 %v8923_v7  ;;  %v4001_v6 = vand.u32 2147483647, %v8923_v7 }
0x10ed   :  { %v3904_v27 = vadd.f32 %v3903_v25, %v7856_v19  ;;  %v3980_v8 = vmul.f32 %v8921_v37, %v3979_v4  ;;  %v3959_v25 = vor.u32 1.1754944e-38, %v3958_v1  ;;  %vm3987_vm14 = vcmp.eq.f32.partialorder %v3986_v13, 8.507059e+37 }
0x10ee   :  { %v4004_v52 = vor.u32 1.1754944e-38, %v4003_v50  ;;  %vm4002_vm15 = vcmp.eq.f32.partialorder %v4001_v6, 8.507059e+37 }
0x10ef   :  { %v6150_v22 = vpop.eup %6149  ;;  %6153 = vtanh.f32 %v3904_v27  ;;  %v3981_v54 = vadd.f32 %v8921_v37, %v3980_v8  ;;  %v3960_v61 = vsel %vm3957_vm5, %v3959_v25, %v3955_v42 }
0x10f0   :  { %v8935_v59 = vpop.eup %6151  ;;  %v8937_v44 = vadd.f32 1.0, %v6150_v22  ;;  %v3989_v22 = vor.u32 1.1754944e-38, %v3988_v56  ;;  %v4025_v35 = vmul.f32 %v3960_v61, %v8812_v45 }
0x10f1   :  { %v3993_v40 = vmul.f32 %v8935_v59, %v8923_v7  ;;  %vm3998_vm8 = vweird.f32 %v8935_v59  ;;  %v3985_v4 = vsel %vm3984_vm9, %v8921_v37, %v3981_v54 }
0x10f2   :  { %6155 = vrcp.f32 %v8937_v44  ;;  %vm3999_vm13 = vmor %vm3997_vm10, %vm3998_vm8  ;;  %v3990_v30 = vsel %vm3987_vm14, %v3989_v22, %v3985_v4  ;;  %vm4012_vm6 = vweird.f32 %v8937_v44 }
0x10f3   :  { %v3994_v28 = vsub.f32 1.0, %v3993_v40 }
0x10f4   :  { %v3905_v26 = vpop.f32.mrf.mxu0 }
0x10f5   :  { %v6154_v46 = vpop.eup %6153  ;;  %v3995_v14 = vmul.f32 %v8935_v59, %v3994_v28  ;;  %v3906_v39 = vadd.f32 %v3905_v26, %v8174_v62  ;;  %v4018_v28 = vand.u32 2147483648, %v8937_v44 }
0x10f6   :  { %v4026_v15 = vmul.f32 %v6154_v46, %v3975_v38 }
0x10f7   :  { %6157 = vtanh.f32 %v3906_v39  ;;  %v3996_v3 = vadd.f32 %v8935_v59, %v3995_v14  ;;  %v4019_v21 = vor.u32 1.1754944e-38, %v4018_v28 }
0x10f8   :  { %v6156_v34 = vpop.eup %6155  ;;  %v8973_v47 = vadd.f32 %v4026_v15, %v4024_v16 }
0x10f9   :  { %v4008_v27 = vmul.f32 %v6156_v34, %v8937_v44  ;;  %v4000_v48 = vsel %vm3999_vm13, %v8935_v59, %v3996_v3  ;;  %vm4013_vm4 = vweird.f32 %v6156_v34  ;;  %v4016_v59 = vand.u32 2147483647, %v8937_v44 }
0x10fa   :  { %6159 = vtanh.f32 %v8973_v47  ;;  %v4005_v0 = vsel %vm4002_vm15, %v4004_v52, %v4000_v48  ;;  %vm4014_vm11 = vmor %vm4012_vm6, %vm4013_vm4 }
0x10fb   :  { %v4009_v57 = vsub.f32 1.0, %v4008_v27  ;;  %vm4017_vm7 = vcmp.eq.f32.partialorder %v4016_v59, 8.507059e+37 }
0x10fd   :  { %v6158_v18 = vpop.eup %6157  ;;  %v4010_v31 = vmul.f32 %v6156_v34, %v4009_v57 }
0x10fe   :  { %v4027_v40 = vmul.f32 %v6158_v18, %v3990_v30 }
0x10ff   :  { %v4011_v8 = vadd.f32 %v6156_v34, %v4010_v31 }
0x1100   :  { %v6160_v29 = vpop.eup %6159  ;;  %v8987_v37 = vadd.f32 %v4027_v40, %v4025_v35 }
0x1101   :  { %v4032_v7 = vmul.f32 %v6160_v29, %v4005_v0  ;;  %v4015_v33 = vsel %vm4014_vm11, %v6156_v34, %v4011_v8 }
0x1102   :  { %6161 = vtanh.f32 %v8987_v37  ;;  %v4020_v26 = vsel %vm4017_vm7, %v4019_v21, %v4015_v33 }
0x1103   :  { %4116 = vrot.lane.b32.xlu1 %v4032_v7, %s6309_s28  ;;  %v4086_v45 = vpack.c.bf16 %v4032_v7, %v4032_v7  ;;  %4110 = vrot.lane.b32.xlu2 %v4032_v7, %s6310_s29  ;;  %v8998_v2 = vmax.f32 %v3735_v43, %v4032_v7 }
0x1105   :  { %4088 = vst.msk [vmem:[#allocation2 + $0x18] sm:$0xf] %vm108_vm0, %v4086_v45 }
0x1108   :  { %v6162_v1 = vpop.eup %6161 }
0x1109   :  { %v4033_v46 = vmul.f32 %v6162_v1, %v4020_v26 }
0x110b   :  { %4112 = vrot.lane.b32.xlu0 %v4033_v46, %s6310_s29  ;;  %v4087_v44 = vpack.c.bf16 %v4033_v46, %v4033_v46  ;;  %4062 = vrot.lane.b32.xlu1 %v4032_v7, %s6311_s30  ;;  %v9006_v36 = vmax.f32 %v3736_v60, %v4033_v46 }
0x110c   :  { %4118 = vrot.lane.b32.xlu2 %v4033_v46, %s6309_s28 }
0x110d   :  { %4089 = vst.msk [vmem:[#allocation2 + $0x1c] sm:$0xf] %vm108_vm0, %v4087_v44  ;;  %v9061_v44 = vld [vmem:[%s9584_s2 + $0x20] sm:$0xff] }
0x1113   :  { %4098 = vrot.lane.b32.xlu0 %v8864_v20, %s6309_s28  ;;  %4070 = vrot.lane.b32.xlu1 %v4033_v46, %s6312_s8 }
0x1114   :  { %4040 = vrot.lane.b32.xlu2 %v8856_v51, %s6311_s30  ;;  %v5724_v8 = vld [vmem:[#allocation2 + $0x18] sm:$0xff] }
0x111b   :  { %4068 = vrot.lane.b32.xlu0 %v4032_v7, %s6312_s8  ;;  %4046 = vrot.lane.b32.xlu1 %v8856_v51, %s6312_s8 }
0x111c   :  { %4064 = vrot.lane.b32.xlu2 %v4033_v46, %s6311_s30 }
0x1123   :  { %4042 = vrot.lane.b32.xlu0 %v8864_v20, %s6311_s30  ;;  %4389 = vrot.lane.b32.xlu1 %v9021_v23, %s6310_s29 }
0x1124   :  { %4048 = vrot.lane.b32.xlu2 %v8864_v20, %s6312_s8 }
0x112b   :  { %4395 = vrot.lane.b32.xlu0 %v9021_v23, %s6309_s28 }
0x112c   :  { %4391 = vrot.lane.b32.xlu2 %v9029_v11, %s6310_s29 }
0x115d   :  { %v4111_v43 = vpop.permute.xlu2 %4110 }
0x1166   :  { %v4119_v60 = vpop.permute.xlu2 %4118 }
0x116e   :  { %v4041_v63 = vpop.permute.xlu2 %4040 }
0x1175   :  { %v4117_v51 = vpop.permute.xlu1 %4116 }
0x1176   :  { %v4122_v14 = vsel %vm133_vm1, %v4111_v43, %v4117_v51  ;;  %v4065_v42 = vpop.permute.xlu2 %4064  ;;  %v9075_v43 = vld [vmem:[%s9584_s2 + $0x30] sm:$0xff] }
0x1177   :  { %v4124_v38 = vmul.f32 %v4122_v14, %v6373_v5 }
0x1179   :  { %v4126_v39 = vpack.c.bf16 %v4124_v38, %v4124_v38 }
0x117b   :  { %4128 = vst.msk [vmem:[#allocation2 + $0x28] sm:$0xf] %vm108_vm0, %v4126_v39 }
0x117d   :  { %v4113_v20 = vpop.permute.xlu0 %4112  ;;  %v4063_v32 = vpop.permute.xlu1 %4062 }
0x117e   :  { %v4123_v16 = vsel %vm133_vm1, %v4113_v20, %v4119_v60  ;;  %v4049_v40 = vpop.permute.xlu2 %4048 }
0x117f   :  { %v4125_v15 = vmul.f32 %v4123_v16, %v6373_v5 }
0x1181   :  { %v4127_v54 = vpack.c.bf16 %v4125_v15, %v4125_v15 }
0x1183   :  { %4129 = vst.msk [vmem:[#allocation2 + $0x2c] sm:$0xf] %vm108_vm0, %v4127_v54 }
0x1185   :  { %v4099_v56 = vpop.permute.xlu0 %4098  ;;  %v4071_v34 = vpop.permute.xlu1 %4070 }
0x1186   :  { %v4103_v25 = vsel %vm133_vm1, %v4093_v24, %v4099_v56  ;;  %v4075_v13 = vsel %vm100_vm2, %v4065_v42, %v4071_v34  ;;  %v9082_v24 = vld [vmem:[%s9584_s2 + $0x38] sm:$0xff] }
0x1187   :  { %v4105_v3 = vmul.f32 %v4103_v25, %v6373_v5  ;;  %v4077_v27 = vmul.f32 %v4075_v13, %v6389_v10 }
0x1189   :  { %v4107_v50 = vpack.c.bf16 %v4105_v3, %v4105_v3  ;;  %v4079_v61 = vpack.c.bf16 %v4077_v27, %v4077_v27 }
0x118a   :  { %v5726_v4 = vld [vmem:[#allocation2 + $0x28] sm:$0xff] }
0x118b   :  { %4109 = vst.msk [vmem:[#allocation2 + $0x24] sm:$0xf] %vm108_vm0, %v4107_v50  ;;  %4180 = vmatpush.bf16.msrb.mxu1 %v5726_v4 }
0x118c   :  { %4081 = vst.msk [vmem:[#allocation2 + $0xc] sm:$0xf] %vm108_vm0, %v4079_v61 }
0x118d   :  { %v4069_v6 = vpop.permute.xlu0 %4068  ;;  %v4047_v57 = vpop.permute.xlu1 %4046 }
0x118e   :  { %v4074_v22 = vsel %vm100_vm2, %v4063_v32, %v4069_v6  ;;  %v4052_v18 = vsel %vm100_vm2, %v4041_v63, %v4047_v57 }
0x118f   :  { %v4076_v48 = vmul.f32 %v4074_v22, %v6389_v10  ;;  %v4054_v31 = vmul.f32 %v4052_v18, %v6389_v10 }
0x1191   :  { %v4078_v30 = vpack.c.bf16 %v4076_v48, %v4076_v48  ;;  %v4056_v52 = vpack.c.bf16 %v4054_v31, %v4054_v31 }
0x1192   :  { %v5725_v35 = vld [vmem:[#allocation2 + $0x20] sm:$0xff] }
0x1193   :  { %4080 = vst.msk [vmem:[#allocation2 + $0x8] sm:$0xf] %vm108_vm0, %v4078_v30  ;;  %4181 = vmatpush.bf16.msrb.mxu1 %v5725_v35 }
0x1194   :  { %4058 = vst.msk [vmem:[#allocation2] sm:$0xf] %vm108_vm0, %v4056_v52 }
0x1195   :  { %v4043_v29 = vpop.permute.xlu0 %4042  ;;  %v4390_v59 = vpop.permute.xlu1 %4389 }
0x1196   :  { %v4053_v0 = vsel %vm100_vm2, %v4043_v29, %v4049_v40 }
0x1197   :  { %v4055_v7 = vmul.f32 %v4053_v0, %v6389_v10  ;;  %4182 = vmatpush.bf16.msrb.mxu1 %v5724_v8 }
0x1199   :  { %v4057_v28 = vpack.c.bf16 %v4055_v7, %v4055_v7 }
0x119a   :  { %v5722_v21 = vld [vmem:[#allocation2 + $0x8] sm:$0xff] }
0x119b   :  { %4059 = vst.msk [vmem:[#allocation2 + $0x4] sm:$0xf] %vm108_vm0, %v4057_v28  ;;  %4183 = vmatpush.bf16.msrb.mxu1 %v7764_v58  ;;  %v9068_v58 = vld [vmem:[%s9584_s2 + $0x28] sm:$0xff] }
0x119d   :  { %v4396_v45 = vpop.permute.xlu0 %4395 }
0x119e   :  { %v4401_v33 = vsel %vm133_vm1, %v4390_v59, %v4396_v45 }
0x119f   :  { %v4403_v1 = vmul.f32 %v4401_v33, %v6373_v5  ;;  %4184 = vmatpush.bf16.msrb.mxu1 %v5722_v21 }
0x11a1   :  { %v4405_v26 = vpack.c.bf16 %v4403_v1, %v4403_v1 }
0x11a2   :  { %v5721_v46 = vld [vmem:[#allocation2] sm:$0xff] }
0x11a3   :  { %4407 = vst.msk [vmem:[#allocation2 + $0x20] sm:$0xf] %vm108_vm0, %v4405_v26  ;;  %4185 = vmatpush.bf16.msrb.mxu1 %v5721_v46 }
0x11a6   :  { %5554 = vmatmul.msk.bf16.vlgmr.msrb.gmra.mxu1 %vm215_vm3, %v9061_v44 }
0x11b6   :  { %5555 = vmatmul.msk.bf16.gmra.mxu1 %vm215_vm3, %v9068_v58 }
0x11c6   :  { %5556 = vmatmul.msk.bf16.gmra.mxu1 %vm215_vm3, %v9075_v43 }
0x11d6   :  { %5557 = vmatmul.msk.bf16.gmra.mxu1 %vm215_vm3, %v9082_v24 }
0x1223   :  { %v4187_v60 = vpop.f32.mrf.mxu1 }
0x1224   :  { %v4188_v51 = vadd.f32 %v4187_v60, %v7835_v55 }
0x1226   :  { %v5558_v38 = vmul.f32 -1.442695, %v4188_v51 }
0x1228   :  { %6163 = vpow2.f32 %v5558_v38 }
0x122b   :  { %v4189_v14 = vpop.f32.mrf.mxu1 }
0x122c   :  { %v4190_v39 = vadd.f32 %v4189_v14, %v7911_v9 }
0x122e   :  { %v5559_v63 = vmul.f32 -1.442695, %v4190_v39  ;;  %v6164_v15 = vpop.eup %6163 }
0x122f   :  { %v4225_v54 = vadd.f32 1.0, %v6164_v15 }
0x1230   :  { %6165 = vpow2.f32 %v5559_v63 }
0x1231   :  { %v4242_v60 = vand.u32 2147483648, %v4225_v54  ;;  %v4240_v14 = vand.u32 2147483647, %v4225_v54  ;;  %vm4236_vm5 = vweird.f32 %v4225_v54 }
0x1233   :  { %v4192_v20 = vpop.f32.mrf.mxu1  ;;  %vm4241_vm14 = vcmp.eq.f32.partialorder %v4240_v14, 8.507059e+37 }
0x1234   :  { %v4193_v32 = vadd.f32 %v4192_v20, %v7851_v49 }
0x1236   :  { %v5560_v16 = vmul.f32 -1.442695, %v4193_v32  ;;  %v6166_v34 = vpop.eup %6165 }
0x1237   :  { %v9092_v27 = vadd.f32 1.0, %v6166_v34  ;;  %v4243_v34 = vor.u32 1.1754944e-38, %v4242_v60 }
0x1238   :  { %6167 = vpow2.f32 %v5560_v16 }
0x1239   :  { %6169 = vrcp.f32 %v4225_v54  ;;  %vm4251_vm6 = vweird.f32 %v9092_v27 }
0x123b   :  { %v4194_v42 = vpop.f32.mrf.mxu1 }
0x123c   :  { %v4195_v56 = vadd.f32 %v4194_v42, %v7843_v17 }
0x123e   :  { %v6168_v25 = vpop.eup %6167  ;;  %v5561_v13 = vmul.f32 -1.442695, %v4195_v56 }
0x123f   :  { %v9090_v3 = vadd.f32 1.0, %v6168_v25  ;;  %v6170_v61 = vpop.eup %6169 }
0x1240   :  { %6171 = vpow2.f32 %v5561_v13  ;;  %v4232_v18 = vmul.f32 %v6170_v61, %v4225_v54  ;;  %vm4237_vm8 = vweird.f32 %v6170_v61 }
0x1241   :  { %6173 = vrcp.f32 %v9090_v3  ;;  %vm9114_vm10 = vmor %vm4236_vm5, %vm4237_vm8  ;;  %v4272_v16 = vand.u32 2147483648, %v9090_v3  ;;  %vm4266_vm13 = vweird.f32 %v9090_v3  ;;  %v4270_v56 = vand.u32 2147483647, %v9090_v3 }
0x1242   :  { %6175 = vrcp.f32 %v9092_v27  ;;  %v4233_v52 = vsub.f32 1.0, %v4232_v18  ;;  %v4257_v18 = vand.u32 2147483648, %v9092_v27 }
0x1243   :  { %v4197_v50 = vpop.f32.mrf.mxu1  ;;  %vm4271_vm11 = vcmp.eq.f32.partialorder %v4270_v56, 8.507059e+37 }
0x1244   :  { %v4198_v4 = vadd.f32 %v4197_v50, %v7958_v41  ;;  %v4234_v59 = vmul.f32 %v6170_v61, %v4233_v52 }
0x1246   :  { %v6172_v6 = vpop.eup %6171  ;;  %v5562_v57 = vmul.f32 -1.442695, %v4198_v4  ;;  %v4235_v46 = vadd.f32 %v6170_v61, %v4234_v59 }
0x1247   :  { %v6174_v22 = vpop.eup %6173  ;;  %v9097_v48 = vadd.f32 1.0, %v6172_v6  ;;  %v4273_v6 = vor.u32 1.1754944e-38, %v4272_v16 }
0x1248   :  { %6177 = vpow2.f32 %v5562_v57  ;;  %v4262_v31 = vmul.f32 %v6174_v22, %v9090_v3  ;;  %v9101_v30 = vpop.eup %6175  ;;  %vm4267_vm9 = vweird.f32 %v6174_v22  ;;  %v4239_v54 = vsel %vm9114_vm10, %v6170_v61, %v4235_v46 }
0x1249   :  { %6179 = vrcp.f32 %v9097_v48  ;;  %v4247_v8 = vmul.f32 %v9101_v30, %v9092_v27  ;;  %vm9130_vm15 = vmor %vm4266_vm13, %vm4267_vm9  ;;  %vm4252_vm4 = vweird.f32 %v9101_v30  ;;  %v4244_v3 = vsel %vm4241_vm14, %v4243_v34, %v4239_v54 }
0x124a   :  { %v4263_v29 = vsub.f32 1.0, %v4262_v31  ;;  %vm9147_vm7 = vmor %vm4251_vm6, %vm4252_vm4  ;;  %vm4281_vm5 = vweird.f32 %v9097_v48 }
0x124b   :  { %v4199_v35 = vpop.f32.mrf.mxu1  ;;  %v4248_v1 = vsub.f32 1.0, %v4247_v8  ;;  %v4323_v8 = vmul.f32 %v4244_v3, %v8973_v47  ;;  %v4285_v47 = vand.u32 2147483647, %v9097_v48 }
0x124c   :  { %v4200_v40 = vadd.f32 %v4199_v35, %v7859_v12  ;;  %v4264_v21 = vmul.f32 %v6174_v22, %v4263_v29 }
0x124d   :  { %v4249_v32 = vmul.f32 %v9101_v30, %v4248_v1  ;;  %v4258_v1 = vor.u32 1.1754944e-38, %v4257_v18  ;;  %vm4286_vm4 = vcmp.eq.f32.partialorder %v4285_v47, 8.507059e+37 }
0x124e   :  { %v6178_v0 = vpop.eup %6177  ;;  %v5563_v7 = vmul.f32 -1.442695, %v4200_v40  ;;  %v4265_v39 = vadd.f32 %v6174_v22, %v4264_v21  ;;  %v4287_v21 = vand.u32 2147483648, %v9097_v48 }
0x124f   :  { %v9106_v28 = vpop.eup %6179  ;;  %v9108_v45 = vadd.f32 1.0, %v6178_v0  ;;  %v4250_v57 = vadd.f32 %v9101_v30, %v4249_v32 }
0x1250   :  { %6181 = vpow2.f32 %v5563_v7  ;;  %v4277_v33 = vmul.f32 %v9106_v28, %v9097_v48  ;;  %v4269_v50 = vsel %vm9130_vm15, %v6174_v22, %v4265_v39  ;;  %v4255_v22 = vand.u32 2147483647, %v9092_v27 }
0x1251   :  { %6183 = vrcp.f32 %v9108_v45  ;;  %v4274_v40 = vsel %vm4271_vm11, %v4273_v6, %v4269_v50  ;;  %vm4282_vm8 = vweird.f32 %v9106_v28  ;;  %vm4296_vm14 = vweird.f32 %v9108_v45 }
0x1252   :  { %v4278_v38 = vsub.f32 1.0, %v4277_v33  ;;  %v4254_v33 = vsel %vm9147_vm7, %v9101_v30, %v4250_v57  ;;  %vm4256_vm10 = vcmp.eq.f32.partialorder %v4255_v22, 8.507059e+37  ;;  %vm4283_vm13 = vmor %vm4281_vm5, %vm4282_vm8  ;;  %v4302_v30 = vand.u32 2147483648, %v9108_v45 }
0x1253   :  { %v4202_v26 = vpop.f32.mrf.mxu1  ;;  %v4288_v39 = vor.u32 1.1754944e-38, %v4287_v21 }
0x1254   :  { %v4203_v51 = vadd.f32 %v4202_v26, %v7856_v19  ;;  %v4279_v61 = vmul.f32 %v9106_v28, %v4278_v38  ;;  %v4300_v38 = vand.u32 2147483647, %v9108_v45  ;;  %v4303_v54 = vor.u32 1.1754944e-38, %v4302_v30 }
0x1256   :  { %v6182_v63 = vpop.eup %6181  ;;  %6185 = vtanh.f32 %v4203_v51  ;;  %v4280_v59 = vadd.f32 %v9106_v28, %v4279_v61  ;;  %v4259_v51 = vsel %vm4256_vm10, %v4258_v1, %v4254_v33  ;;  %vm4301_vm6 = vcmp.eq.f32.partialorder %v4300_v38, 8.507059e+37 }
0x1257   :  { %v9120_v15 = vpop.eup %6183  ;;  %v9122_v42 = vadd.f32 1.0, %v6182_v63  ;;  %v4324_v56 = vmul.f32 %v4259_v51, %v8987_v37 }
0x1258   :  { %v4292_v25 = vmul.f32 %v9120_v15, %v9108_v45  ;;  %vm4297_vm9 = vweird.f32 %v9120_v15  ;;  %v4284_v14 = vsel %vm4283_vm13, %v9106_v28, %v4280_v59 }
0x1259   :  { %6187 = vrcp.f32 %v9122_v42  ;;  %vm4298_vm15 = vmor %vm4296_vm14, %vm4297_vm9  ;;  %v4289_v16 = vsel %vm4286_vm4, %v4288_v39, %v4284_v14  ;;  %v4317_v61 = vand.u32 2147483648, %v9122_v42  ;;  %vm4311_vm7 = vweird.f32 %v9122_v42 }
0x125a   :  { %v4293_v4 = vsub.f32 1.0, %v4292_v25 }
0x125b   :  { %v4204_v31 = vpop.f32.mrf.mxu1  ;;  %v4318_v6 = vor.u32 1.1754944e-38, %v4317_v61 }
0x125c   :  { %v6186_v52 = vpop.eup %6185  ;;  %v4294_v35 = vmul.f32 %v9120_v15, %v4293_v4  ;;  %v4205_v29 = vadd.f32 %v4204_v31, %v8174_v62 }
0x125d   :  { %v4325_v7 = vmul.f32 %v6186_v52, %v4274_v40  ;;  %v9224_v40 = vld [vmem:[#allocation3 + $0x78] sm:$0xff] }
0x125e   :  { %6189 = vtanh.f32 %v4205_v29  ;;  %v4295_v46 = vadd.f32 %v9120_v15, %v4294_v35  ;;  %v9216_v35 = vld [vmem:[#allocation3 + $0x70] sm:$0xff] }
0x125f   :  { %v6188_v27 = vpop.eup %6187  ;;  %v9158_v26 = vadd.f32 %v4325_v7, %v4323_v8 }
0x1260   :  { %v4307_v60 = vmul.f32 %v6188_v27, %v9122_v42  ;;  %v4299_v20 = vsel %vm4298_vm15, %v9120_v15, %v4295_v46  ;;  %vm4312_vm11 = vweird.f32 %v6188_v27  ;;  %v4315_v15 = vand.u32 2147483647, %v9122_v42 }
0x1261   :  { %6191 = vtanh.f32 %v9158_v26  ;;  %v4304_v13 = vsel %vm4301_vm6, %v4303_v54, %v4299_v20  ;;  %vm4313_vm8 = vmor %vm4311_vm7, %vm4312_vm11 }
0x1262   :  { %v4308_v48 = vsub.f32 1.0, %v4307_v60  ;;  %vm4316_vm5 = vcmp.eq.f32.partialorder %v4315_v15, 8.507059e+37 }
0x1264   :  { %v6190_v63 = vpop.eup %6189  ;;  %v4309_v32 = vmul.f32 %v6188_v27, %v4308_v48 }
0x1265   :  { %v4326_v34 = vmul.f32 %v6190_v63, %v4289_v16 }
0x1266   :  { %v4310_v50 = vadd.f32 %v6188_v27, %v4309_v32 }
0x1267   :  { %v6192_v25 = vpop.eup %6191  ;;  %v9172_v28 = vadd.f32 %v4326_v34, %v4324_v56 }
0x1268   :  { %v9174_v45 = vmul.f32 %v6192_v25, %v4304_v13  ;;  %v4314_v3 = vsel %vm4313_vm8, %v6188_v27, %v4310_v50 }
0x1269   :  { %6193 = vtanh.f32 %v9172_v28  ;;  %v4319_v42 = vsel %vm4316_vm5, %v4318_v6, %v4314_v3 }
0x126a   :  { %4415 = vrot.lane.b32.xlu2 %v9174_v45, %s6309_s28  ;;  %v4385_v37 = vpack.c.bf16 %v9174_v45, %v9174_v45  ;;  %4409 = vrot.lane.b32.xlu0 %v9174_v45, %s6310_s29  ;;  %v4333_v4 = vmax.f32 %v8998_v2, %v9174_v45 }
0x126c   :  { %4387 = vst.msk [vmem:[#allocation2 + $0x18] sm:$0xf] %vm108_vm0, %v4385_v37 }
0x126f   :  { %v6194_v57 = vpop.eup %6193 }
0x1270   :  { %v9189_v18 = vmul.f32 %v6194_v57, %v4319_v42 }
0x1272   :  { %4411 = vrot.lane.b32.xlu1 %v9189_v18, %s6310_s29  ;;  %v4386_v31 = vpack.c.bf16 %v9189_v18, %v9189_v18  ;;  %4361 = vrot.lane.b32.xlu2 %v9174_v45, %s6311_s30  ;;  %v4334_v52 = vmax.f32 %v9006_v36, %v9189_v18  ;;  %v4970_v36 = vld [vmem:[%s9585_s6] sm:$0x3] }
0x1273   :  { %4417 = vrot.lane.b32.xlu0 %v9189_v18, %s6309_s28 }
0x1274   :  { %4388 = vst.msk [vmem:[#allocation2 + $0x1c] sm:$0xf] %vm108_vm0, %v4386_v31 }
0x127a   :  { %4397 = vrot.lane.b32.xlu1 %v9029_v11, %s6309_s28  ;;  %4369 = vrot.lane.b32.xlu2 %v9189_v18, %s6312_s8 }
0x127b   :  { %4339 = vrot.lane.b32.xlu0 %v9021_v23, %s6311_s30  ;;  %v5730_v3 = vld [vmem:[#allocation2 + $0x18] sm:$0xff] }
0x1282   :  { %4367 = vrot.lane.b32.xlu1 %v9174_v45, %s6312_s8  ;;  %4345 = vrot.lane.b32.xlu2 %v9021_v23, %s6312_s8  ;;  %v4392_v23 = vpop.permute.xlu2 %4391 }
0x1283   :  { %4363 = vrot.lane.b32.xlu0 %v9189_v18, %s6311_s30 }
0x128a   :  { %4341 = vrot.lane.b32.xlu1 %v9029_v11, %s6311_s30  ;;  %4688 = vrot.lane.b32.xlu2 %v9216_v35, %s6310_s29 }
0x128b   :  { %4347 = vrot.lane.b32.xlu0 %v9029_v11, %s6312_s8 }
0x1292   :  { %4694 = vrot.lane.b32.xlu1 %v9216_v35, %s6309_s28 }
0x1293   :  { %4690 = vrot.lane.b32.xlu0 %v9224_v40, %s6310_s29 }
0x12c4   :  { %v4416_v29 = vpop.permute.xlu2 %4415 }
0x12cc   :  { %v4362_v22 = vpop.permute.xlu2 %4361 }
0x12d4   :  { %v4370_v11 = vpop.permute.xlu2 %4369 }
0x12dc   :  { %v4410_v0 = vpop.permute.xlu0 %4409  ;;  %v4346_v60 = vpop.permute.xlu2 %4345 }
0x12dd   :  { %v4421_v8 = vsel %vm133_vm1, %v4410_v0, %v4416_v29 }
0x12de   :  { %v4423_v7 = vmul.f32 %v4421_v8, %v6373_v5 }
0x12e0   :  { %v4425_v59 = vpack.c.bf16 %v4423_v7, %v4423_v7 }
0x12e2   :  { %4427 = vst.msk [vmem:[#allocation2 + $0x28] sm:$0xf] %vm108_vm0, %v4425_v59 }
0x12e4   :  { %v4412_v33 = vpop.permute.xlu1 %4411  ;;  %v4689_v31 = vpop.permute.xlu2 %4688 }
0x12e5   :  { %v4418_v21 = vpop.permute.xlu0 %4417 }
0x12e6   :  { %v4422_v27 = vsel %vm133_vm1, %v4412_v33, %v4418_v21 }
0x12e7   :  { %v4424_v1 = vmul.f32 %v4422_v27, %v6373_v5 }
0x12e9   :  { %v4426_v47 = vpack.c.bf16 %v4424_v1, %v4424_v1 }
0x12eb   :  { %4428 = vst.msk [vmem:[#allocation2 + $0x2c] sm:$0xf] %vm108_vm0, %v4426_v47 }
0x12ec   :  { %v4398_v46 = vpop.permute.xlu1 %4397 }
0x12ed   :  { %v4402_v30 = vsel %vm133_vm1, %v4392_v23, %v4398_v46  ;;  %v4340_v51 = vpop.permute.xlu0 %4339 }
0x12ee   :  { %v4404_v14 = vmul.f32 %v4402_v30, %v6373_v5  ;;  %v4351_v38 = vsel %vm100_vm2, %v4340_v51, %v4346_v60 }
0x12ef   :  { %v4353_v48 = vmul.f32 %v4351_v38, %v6389_v10 }
0x12f0   :  { %v4406_v39 = vpack.c.bf16 %v4404_v14, %v4404_v14 }
0x12f1   :  { %v4355_v63 = vpack.c.bf16 %v4353_v48, %v4353_v48 }
0x12f2   :  { %4408 = vst.msk [vmem:[#allocation2 + $0x24] sm:$0xf] %vm108_vm0, %v4406_v39  ;;  %v5732_v20 = vld [vmem:[#allocation2 + $0x28] sm:$0xff] }
0x12f3   :  { %4357 = vst.msk [vmem:[#allocation2] sm:$0xf] %vm108_vm0, %v4355_v63  ;;  %4479 = vmatpush.bf16.msrb.mxu2 %v5732_v20 }
0x12f4   :  { %v4368_v32 = vpop.permute.xlu1 %4367 }
0x12f5   :  { %v4373_v16 = vsel %vm100_vm2, %v4362_v22, %v4368_v32  ;;  %v4364_v54 = vpop.permute.xlu0 %4363 }
0x12f6   :  { %v4375_v56 = vmul.f32 %v4373_v16, %v6389_v10  ;;  %v4374_v34 = vsel %vm100_vm2, %v4364_v54, %v4370_v11 }
0x12f7   :  { %v4376_v25 = vmul.f32 %v4374_v34, %v6389_v10 }
0x12f8   :  { %v4377_v13 = vpack.c.bf16 %v4375_v56, %v4375_v56 }
0x12f9   :  { %v4378_v50 = vpack.c.bf16 %v4376_v25, %v4376_v25  ;;  %v5731_v61 = vld [vmem:[#allocation2 + $0x20] sm:$0xff] }
0x12fa   :  { %4379 = vst.msk [vmem:[#allocation2 + $0x8] sm:$0xf] %vm108_vm0, %v4377_v13  ;;  %4480 = vmatpush.bf16.msrb.mxu2 %v5731_v61 }
0x12fb   :  { %4380 = vst.msk [vmem:[#allocation2 + $0xc] sm:$0xf] %vm108_vm0, %v4378_v50 }
0x12fc   :  { %v4342_v15 = vpop.permute.xlu1 %4341 }
0x12fd   :  { %v4348_v37 = vpop.permute.xlu0 %4347 }
0x12fe   :  { %v4352_v6 = vsel %vm100_vm2, %v4342_v15, %v4348_v37  ;;  %4481 = vmatpush.bf16.msrb.mxu2 %v5730_v3 }
0x12ff   :  { %v4354_v57 = vmul.f32 %v4352_v6, %v6389_v10 }
0x1301   :  { %v4356_v42 = vpack.c.bf16 %v4354_v57, %v4354_v57 }
0x1302   :  { %4482 = vmatpush.bf16.msrb.mxu2 %v8310_v53  ;;  %v5728_v22 = vld [vmem:[#allocation2 + $0x8] sm:$0xff] }
0x1303   :  { %4358 = vst.msk [vmem:[#allocation2 + $0x4] sm:$0xf] %vm108_vm0, %v4356_v42 }
0x1304   :  { %v4695_v23 = vpop.permute.xlu1 %4694 }
0x1305   :  { %v4700_v29 = vsel %vm133_vm1, %v4689_v31, %v4695_v23 }
0x1306   :  { %v4702_v0 = vmul.f32 %v4700_v29, %v6373_v5  ;;  %4483 = vmatpush.bf16.msrb.mxu2 %v5728_v22 }
0x1308   :  { %v4704_v8 = vpack.c.bf16 %v4702_v0, %v4702_v0 }
0x130a   :  { %4706 = vst.msk [vmem:[#allocation2 + $0x20] sm:$0xf] %vm108_vm0, %v4704_v8  ;;  %v5727_v7 = vld [vmem:[#allocation2] sm:$0xff] }
0x130b   :  { %4484 = vmatpush.bf16.msrb.mxu2 %v5727_v7 }
0x130e   :  { %5588 = vmatmul.msk.bf16.vlgmr.msrb.gmra.mxu2 %vm215_vm3, %v9061_v44 }
0x131e   :  { %5589 = vmatmul.msk.bf16.gmra.mxu2 %vm215_vm3, %v9068_v58 }
0x132e   :  { %5590 = vmatmul.msk.bf16.gmra.mxu2 %vm215_vm3, %v9075_v43 }
0x133e   :  { %5591 = vmatmul.msk.bf16.gmra.mxu2 %vm215_vm3, %v9082_v24 }
0x1391   :  { %v4486_v53 = vpop.f32.mrf.mxu2 }
0x1392   :  { %v4487_v59 = vadd.f32 %v4486_v53, %v7835_v55 }
0x1394   :  { %v5592_v33 = vmul.f32 -1.442695, %v4487_v59 }
0x1396   :  { %6195 = vpow2.f32 %v5592_v33 }
0x1399   :  { %v4488_v11 = vpop.f32.mrf.mxu2 }
0x139a   :  { %v4489_v21 = vadd.f32 %v4488_v11, %v7911_v9 }
0x139c   :  { %v5593_v27 = vmul.f32 -1.442695, %v4489_v21  ;;  %v6196_v60 = vpop.eup %6195 }
0x139d   :  { %v4524_v30 = vadd.f32 1.0, %v6196_v60 }
0x139e   :  { %6197 = vpow2.f32 %v5593_v27 }
0x139f   :  { %v4541_v33 = vand.u32 2147483648, %v4524_v30  ;;  %v4539_v27 = vand.u32 2147483647, %v4524_v30  ;;  %vm4535_vm10 = vweird.f32 %v4524_v30 }
0x13a1   :  { %v4491_v1 = vpop.f32.mrf.mxu2  ;;  %vm4540_vm4 = vcmp.eq.f32.partialorder %v4539_v27, 8.507059e+37 }
0x13a2   :  { %v4492_v47 = vadd.f32 %v4491_v1, %v7851_v49 }
0x13a4   :  { %v5594_v46 = vmul.f32 -1.442695, %v4492_v47  ;;  %v6198_v38 = vpop.eup %6197 }
0x13a5   :  { %v9267_v20 = vadd.f32 1.0, %v6198_v38 }
0x13a6   :  { %6199 = vpow2.f32 %v5594_v46 }
0x13a7   :  { %6201 = vrcp.f32 %v4524_v30  ;;  %vm4550_vm7 = vweird.f32 %v9267_v20 }
0x13a9   :  { %v4493_v51 = vpop.f32.mrf.mxu2 }
0x13aa   :  { %v4494_v14 = vadd.f32 %v4493_v51, %v7843_v17 }
0x13ac   :  { %v6200_v48 = vpop.eup %6199  ;;  %v5595_v39 = vmul.f32 -1.442695, %v4494_v14 }
0x13ad   :  { %v9265_v63 = vadd.f32 1.0, %v6200_v48  ;;  %v6202_v16 = vpop.eup %6201 }
0x13ae   :  { %6203 = vpow2.f32 %v5595_v39  ;;  %v4531_v13 = vmul.f32 %v6202_v16, %v4524_v30  ;;  %vm4536_vm9 = vweird.f32 %v6202_v16 }
0x13af   :  { %6205 = vrcp.f32 %v9265_v63  ;;  %vm9289_vm14 = vmor %vm4535_vm10, %vm4536_vm9  ;;  %v4571_v14 = vand.u32 2147483648, %v9265_v63  ;;  %vm4565_vm15 = vweird.f32 %v9265_v63  ;;  %v4569_v39 = vand.u32 2147483647, %v9265_v63 }
0x13b0   :  { %6207 = vrcp.f32 %v9267_v20  ;;  %v4532_v37 = vsub.f32 1.0, %v4531_v13 }
0x13b1   :  { %v4496_v32 = vpop.f32.mrf.mxu2  ;;  %vm4570_vm8 = vcmp.eq.f32.partialorder %v4569_v39, 8.507059e+37 }
0x13b2   :  { %v4497_v54 = vadd.f32 %v4496_v32, %v7958_v41  ;;  %v4533_v22 = vmul.f32 %v6202_v16, %v4532_v37  ;;  %v4542_v32 = vor.u32 1.1754944e-38, %v4541_v33 }
0x13b4   :  { %v6204_v56 = vpop.eup %6203  ;;  %v5596_v34 = vmul.f32 -1.442695, %v4497_v54  ;;  %v4534_v11 = vadd.f32 %v6202_v16, %v4533_v22 }
0x13b5   :  { %v6206_v25 = vpop.eup %6205  ;;  %v9272_v50 = vadd.f32 1.0, %v6204_v56 }
0x13b6   :  { %6209 = vpow2.f32 %v5596_v34  ;;  %v4561_v61 = vmul.f32 %v6206_v25, %v9265_v63  ;;  %v9276_v15 = vpop.eup %6207  ;;  %vm4566_vm13 = vweird.f32 %v6206_v25  ;;  %v4538_v30 = vsel %vm9289_vm14, %v6202_v16, %v4534_v11 }
0x13b7   :  { %6211 = vrcp.f32 %v9272_v50  ;;  %v4546_v31 = vmul.f32 %v9276_v15, %v9267_v20  ;;  %vm9305_vm6 = vmor %vm4565_vm15, %vm4566_vm13  ;;  %vm4551_vm11 = vweird.f32 %v9276_v15  ;;  %v4543_v63 = vsel %vm4540_vm4, %v4542_v32, %v4538_v30 }
0x13b8   :  { %v4562_v57 = vsub.f32 1.0, %v4561_v61  ;;  %v4572_v61 = vor.u32 1.1754944e-38, %v4571_v14  ;;  %vm9322_vm5 = vmor %vm4550_vm7, %vm4551_vm11  ;;  %v4586_v11 = vand.u32 2147483648, %v9272_v50  ;;  %vm4580_vm10 = vweird.f32 %v9272_v50 }
0x13b9   :  { %v4498_v3 = vpop.f32.mrf.mxu2  ;;  %v4547_v53 = vsub.f32 1.0, %v4546_v31 }
0x13ba   :  { %v4499_v6 = vadd.f32 %v4498_v3, %v7859_v12  ;;  %v4563_v7 = vmul.f32 %v6206_v25, %v4562_v57  ;;  %v4556_v3 = vand.u32 2147483648, %v9267_v20 }
0x13bb   :  { %v4548_v51 = vmul.f32 %v9276_v15, %v4547_v53 }
0x13bc   :  { %v6210_v42 = vpop.eup %6209  ;;  %v5597_v23 = vmul.f32 -1.442695, %v4499_v6  ;;  %v4564_v47 = vadd.f32 %v6206_v25, %v4563_v7  ;;  %v4557_v33 = vor.u32 1.1754944e-38, %v4556_v3 }
0x13bd   :  { %v9281_v29 = vpop.eup %6211  ;;  %v9283_v0 = vadd.f32 1.0, %v6210_v42  ;;  %v4549_v37 = vadd.f32 %v9276_v15, %v4548_v51  ;;  %v4587_v51 = vor.u32 1.1754944e-38, %v4586_v11 }
0x13be   :  { %6213 = vpow2.f32 %v5597_v23  ;;  %v4576_v8 = vmul.f32 %v9281_v29, %v9272_v50  ;;  %v4568_v16 = vsel %vm9305_vm6, %v6206_v25, %v4564_v47  ;;  %v4554_v25 = vand.u32 2147483647, %v9267_v20 }
0x13bf   :  { %6215 = vrcp.f32 %v9283_v0  ;;  %v4573_v31 = vsel %vm4570_vm8, %v4572_v61, %v4568_v16  ;;  %vm4581_vm9 = vweird.f32 %v9281_v29  ;;  %vm4595_vm4 = vweird.f32 %v9283_v0 }
0x13c0   :  { %v4577_v1 = vsub.f32 1.0, %v4576_v8  ;;  %v4622_v8 = vmul.f32 %v4543_v63, %v9158_v26  ;;  %v4584_v26 = vand.u32 2147483647, %v9272_v50  ;;  %vm4555_vm14 = vcmp.eq.f32.partialorder %v4554_v25, 8.507059e+37  ;;  %vm4582_vm15 = vmor %vm4580_vm10, %vm4581_vm9 }
0x13c1   :  { %v4501_v59 = vpop.f32.mrf.mxu2  ;;  %v4599_v60 = vand.u32 2147483647, %v9283_v0 }
0x13c2   :  { %v4502_v21 = vadd.f32 %v4501_v59, %v7856_v19  ;;  %v4578_v34 = vmul.f32 %v9281_v29, %v4577_v1  ;;  %v4553_v59 = vsel %vm9322_vm5, %v9276_v15, %v4549_v37  ;;  %v4601_v15 = vand.u32 2147483648, %v9283_v0 }
0x13c3   :  { %v4558_v47 = vsel %vm4555_vm14, %v4557_v33, %v4553_v59  ;;  %vm4585_vm11 = vcmp.eq.f32.partialorder %v4584_v26, 8.507059e+37  ;;  %vm4600_vm7 = vcmp.eq.f32.partialorder %v4599_v60, 8.507059e+37 }
0x13c4   :  { %v6214_v46 = vpop.eup %6213  ;;  %6217 = vtanh.f32 %v4502_v21  ;;  %v4579_v53 = vadd.f32 %v9281_v29, %v4578_v34  ;;  %v4623_v56 = vmul.f32 %v4558_v47, %v9172_v28 }
0x13c5   :  { %v9295_v38 = vpop.eup %6215  ;;  %v9297_v48 = vadd.f32 1.0, %v6214_v46 }
0x13c6   :  { %v4591_v54 = vmul.f32 %v9295_v38, %v9283_v0  ;;  %vm4596_vm13 = vweird.f32 %v9295_v38  ;;  %v4583_v46 = vsel %vm4582_vm15, %v9281_v29, %v4579_v53 }
0x13c7   :  { %6219 = vrcp.f32 %v9297_v48  ;;  %vm4597_vm6 = vmor %vm4595_vm4, %vm4596_vm13  ;;  %v4588_v32 = vsel %vm4585_vm11, %v4587_v51, %v4583_v46  ;;  %v4616_v61 = vand.u32 2147483648, %v9297_v48  ;;  %vm4610_vm5 = vweird.f32 %v9297_v48 }
0x13c8   :  { %v4592_v13 = vsub.f32 1.0, %v4591_v54  ;;  %v4602_v54 = vor.u32 1.1754944e-38, %v4601_v15 }
0x13c9   :  { %v4503_v6 = vpop.f32.mrf.mxu2 }
0x13ca   :  { %v6218_v57 = vpop.eup %6217  ;;  %v4593_v42 = vmul.f32 %v9295_v38, %v4592_v13  ;;  %v4504_v23 = vadd.f32 %v4503_v6, %v8174_v62  ;;  %v4617_v6 = vor.u32 1.1754944e-38, %v4616_v61 }
0x13cb   :  { %v4624_v7 = vmul.f32 %v6218_v57, %v4573_v31 }
0x13cc   :  { %6221 = vtanh.f32 %v4504_v23  ;;  %v4594_v27 = vadd.f32 %v9295_v38, %v4593_v42 }
0x13cd   :  { %v6220_v20 = vpop.eup %6219  ;;  %v9333_v21 = vadd.f32 %v4624_v7, %v4622_v8 }
0x13ce   :  { %v4606_v1 = vmul.f32 %v6220_v20, %v9297_v48  ;;  %v4598_v30 = vsel %vm4597_vm6, %v9295_v38, %v4594_v27  ;;  %vm4611_vm8 = vweird.f32 %v6220_v20  ;;  %v4614_v38 = vand.u32 2147483647, %v9297_v48 }
0x13cf   :  { %6223 = vtanh.f32 %v9333_v21  ;;  %v4603_v13 = vsel %vm4600_vm7, %v4602_v54, %v4598_v30  ;;  %vm4612_vm9 = vmor %vm4610_vm5, %vm4611_vm8 }
0x13d0   :  { %v4607_v50 = vsub.f32 1.0, %v4606_v1  ;;  %vm4615_vm10 = vcmp.eq.f32.partialorder %v4614_v38, 8.507059e+37 }
0x13d2   :  { %v6222_v14 = vpop.eup %6221  ;;  %v4608_v39 = vmul.f32 %v6220_v20, %v4607_v50 }
0x13d3   :  { %v4625_v16 = vmul.f32 %v6222_v14, %v4588_v32 }
0x13d4   :  { %v4609_v63 = vadd.f32 %v6220_v20, %v4608_v39 }
0x13d5   :  { %v6224_v34 = vpop.eup %6223  ;;  %v9347_v29 = vadd.f32 %v4625_v16, %v4623_v56 }
0x13d6   :  { %v4630_v0 = vmul.f32 %v6224_v34, %v4603_v13  ;;  %v4613_v3 = vsel %vm4612_vm9, %v6220_v20, %v4609_v63 }
0x13d7   :  { %6225 = vtanh.f32 %v9347_v29  ;;  %v4618_v42 = vsel %vm4615_vm10, %v4617_v6, %v4613_v3 }
0x13d8   :  { %4714 = vrot.lane.b32.xlu0 %v4630_v0, %s6309_s28  ;;  %v4684_v28 = vpack.c.bf16 %v4630_v0, %v4630_v0  ;;  %4708 = vrot.lane.b32.xlu1 %v4630_v0, %s6310_s29  ;;  %v9358_v37 = vmax.f32 %v4333_v4, %v4630_v0  ;;  %v4691_v4 = vpop.permute.xlu0 %4690 }
0x13da   :  { %4686 = vst.msk [vmem:[#allocation2 + $0x18] sm:$0xf] %vm108_vm0, %v4684_v28 }
0x13dd   :  { %v6226_v57 = vpop.eup %6225 }
0x13de   :  { %v4631_v31 = vmul.f32 %v6226_v57, %v4618_v42 }
0x13e0   :  { %4710 = vrot.lane.b32.xlu2 %v4631_v31, %s6310_s29  ;;  %v4685_v48 = vpack.c.bf16 %v4631_v31, %v4631_v31  ;;  %4660 = vrot.lane.b32.xlu0 %v4630_v0, %s6311_s30  ;;  %v9366_v2 = vmax.f32 %v4334_v52, %v4631_v31 }
0x13e1   :  { %4716 = vrot.lane.b32.xlu1 %v4631_v31, %s6309_s28 }
0x13e2   :  { %4687 = vst.msk [vmem:[#allocation2 + $0x1c] sm:$0xf] %vm108_vm0, %v4685_v48 }
0x13e8   :  { %4696 = vrot.lane.b32.xlu2 %v9224_v40, %s6309_s28  ;;  %4668 = vrot.lane.b32.xlu0 %v4631_v31, %s6312_s8 }
0x13e9   :  { %4638 = vrot.lane.b32.xlu1 %v9216_v35, %s6311_s30  ;;  %v5736_v16 = vld [vmem:[#allocation2 + $0x18] sm:$0xff] }
0x13f0   :  { %4666 = vrot.lane.b32.xlu2 %v4630_v0, %s6312_s8  ;;  %4644 = vrot.lane.b32.xlu0 %v9216_v35, %s6312_s8  ;;  %v5735_v0 = vld [vmem:[#allocation2 + $0x10] sm:$0xff] }
0x13f1   :  { %4662 = vrot.lane.b32.xlu1 %v4631_v31, %s6311_s30 }
0x13f8   :  { %4640 = vrot.lane.b32.xlu2 %v9224_v40, %s6311_s30 }
0x13f9   :  { %4646 = vrot.lane.b32.xlu1 %v9224_v40, %s6312_s8 }
0x1400   :  { %4973 = vperm.xlu2 %5744, %v4970_v36  }
0x143a   :  { %v4711_v45 = vpop.permute.xlu2 %4710 }
0x1442   :  { %v4697_v18 = vpop.permute.xlu2 %4696 }
0x1443   :  { %v4701_v52 = vsel %vm133_vm1, %v4691_v4, %v4697_v18 }
0x1444   :  { %v4703_v35 = vmul.f32 %v4701_v52, %v6373_v5 }
0x1446   :  { %v4705_v23 = vpack.c.bf16 %v4703_v35, %v4703_v35 }
0x1448   :  { %4707 = vst.msk [vmem:[#allocation2 + $0x24] sm:$0xf] %vm108_vm0, %v4705_v23 }
0x144a   :  { %v4715_v25 = vpop.permute.xlu0 %4714  ;;  %v4709_v22 = vpop.permute.xlu1 %4708 }
0x144b   :  { %v4720_v8 = vsel %vm133_vm1, %v4709_v22, %v4715_v25  ;;  %v4667_v53 = vpop.permute.xlu2 %4666 }
0x144c   :  { %v4722_v40 = vmul.f32 %v4720_v8, %v6373_v5 }
0x144e   :  { %v4724_v7 = vpack.c.bf16 %v4722_v40, %v4722_v40 }
0x144f   :  { %v5737_v32 = vld [vmem:[#allocation2 + $0x20] sm:$0xff] }
0x1450   :  { %4726 = vst.msk [vmem:[#allocation2 + $0x28] sm:$0xf] %vm108_vm0, %v4724_v7 }
0x1452   :  { %v4661_v59 = vpop.permute.xlu0 %4660 }
0x1453   :  { %v4672_v11 = vsel %vm100_vm2, %v4661_v59, %v4667_v53  ;;  %v4717_v20 = vpop.permute.xlu1 %4716  ;;  %v4641_v34 = vpop.permute.xlu2 %4640 }
0x1454   :  { %v4674_v33 = vmul.f32 %v4672_v11, %v6389_v10  ;;  %v4721_v26 = vsel %vm133_vm1, %v4711_v45, %v4717_v20 }
0x1455   :  { %v4723_v27 = vmul.f32 %v4721_v26, %v6373_v5 }
0x1456   :  { %v4676_v1 = vpack.c.bf16 %v4674_v33, %v4674_v33 }
0x1457   :  { %v4725_v15 = vpack.c.bf16 %v4723_v27, %v4723_v27 }
0x1458   :  { %4678 = vst.msk [vmem:[#allocation2 + $0x8] sm:$0xf] %vm108_vm0, %v4676_v1 }
0x1459   :  { %4727 = vst.msk [vmem:[#allocation2 + $0x2c] sm:$0xf] %vm108_vm0, %v4725_v15 }
0x145a   :  { %v4669_v47 = vpop.permute.xlu0 %4668 }
0x145b   :  { %v4639_v46 = vpop.permute.xlu1 %4638 }
0x1460   :  { %v5738_v60 = vld [vmem:[#allocation2 + $0x28] sm:$0xff] }
0x1461   :  { %4778 = vmatpush.bf16.msrb.mxu3 %v5738_v60 }
0x1462   :  { %v4645_v50 = vpop.permute.xlu0 %4644 }
0x1463   :  { %v4650_v51 = vsel %vm100_vm2, %v4639_v46, %v4645_v50  ;;  %v4663_v14 = vpop.permute.xlu1 %4662 }
0x1464   :  { %v4652_v30 = vmul.f32 %v4650_v51, %v6389_v10  ;;  %v4673_v39 = vsel %vm100_vm2, %v4663_v14, %v4669_v47 }
0x1465   :  { %v4675_v5 = vmul.f32 %v4673_v39, %v6389_v10  ;;  %4779 = vmatpush.bf16.msrb.mxu3 %v5737_v32 }
0x1466   :  { %v4654_v54 = vpack.c.bf16 %v4652_v30, %v4652_v30 }
0x1467   :  { %v4677_v56 = vpack.c.bf16 %v4675_v5, %v4675_v5  ;;  %v4969_v5 = vld [vmem:[%s9586_s5 + $0x38] sm:$0xff] }
0x1468   :  { %4656 = vst.msk [vmem:[#allocation2] sm:$0xf] %vm108_vm0, %v4654_v54  ;;  %v4968_v54 = vld [vmem:[%s9586_s5 + $0x30] sm:$0xff]  ;;  %4987 = vmatpush.msra.mxu0 %v4969_v5 }
0x1469   :  { %4679 = vst.msk [vmem:[#allocation2 + $0xc] sm:$0xf] %vm108_vm0, %v4677_v56  ;;  %4780 = vmatpush.bf16.msrb.mxu3 %v5736_v16 }
0x146a   :  { %4988 = vmatpush.msra.mxu0 %v4968_v54 }
0x146b   :  { %v4647_v13 = vpop.permute.xlu1 %4646 }
0x146c   :  { %v4651_v63 = vsel %vm100_vm2, %v4641_v34, %v4647_v13 }
0x146d   :  { %v4653_v61 = vmul.f32 %v4651_v63, %v6389_v10  ;;  %4781 = vmatpush.bf16.msrb.mxu3 %v5735_v0  ;;  %v4967_v0 = vld [vmem:[%s9586_s5 + $0x28] sm:$0xff] }
0x146e   :  { %4989 = vmatpush.msra.mxu0 %v4967_v0 }
0x146f   :  { %v4655_v38 = vpack.c.bf16 %v4653_v61, %v4653_v61 }
0x1470   :  { %v5734_v28 = vld [vmem:[#allocation2 + $0x8] sm:$0xff] }
0x1471   :  { %4657 = vst.msk [vmem:[#allocation2 + $0x4] sm:$0xf] %vm108_vm0, %v4655_v38  ;;  %4782 = vmatpush.bf16.msrb.mxu3 %v5734_v28 }
0x1478   :  { %v5733_v3 = vld [vmem:[#allocation2] sm:$0xff] }
0x1479   :  { %4783 = vmatpush.bf16.msrb.mxu3 %v5733_v3 }
0x147c   :  { %5622 = vmatmul.msk.bf16.vlgmr.msrb.gmra.mxu3 %vm215_vm3, %v9061_v44 }
0x148c   :  { %5623 = vmatmul.msk.bf16.gmra.mxu3 %vm215_vm3, %v9068_v58 }
0x149c   :  { %5624 = vmatmul.msk.bf16.gmra.mxu3 %vm215_vm3, %v9075_v43 }
0x14ac   :  { %5625 = vmatmul.msk.bf16.gmra.mxu3 %vm215_vm3, %v9082_v24 }
0x14ff   :  { %v4785_v10 = vpop.f32.mrf.mxu3 }
0x1500   :  { %v4786_v6 = vadd.f32 %v4785_v10, %v7835_v55 }
0x1502   :  { %v5626_v42 = vmul.f32 -1.442695, %v4786_v6 }
0x1504   :  { %6227 = vpow2.f32 %v5626_v42  ;;  %v4966_v42 = vld [vmem:[%s9586_s5 + $0x20] sm:$0xff] }
0x1505   :  { %4990 = vmatpush.msra.mxu0 %v4966_v42 }
0x1507   :  { %v4787_v57 = vpop.f32.mrf.mxu3 }
0x1508   :  { %v4788_v31 = vadd.f32 %v4787_v57, %v7911_v9 }
0x150a   :  { %v5627_v48 = vmul.f32 -1.442695, %v4788_v31  ;;  %v6228_v58 = vpop.eup %6227 }
0x150b   :  { %v9418_v43 = vadd.f32 1.0, %v6228_v58 }
0x150c   :  { %6229 = vpow2.f32 %v5627_v48 }
0x150d   :  { %v4840_v30 = vand.u32 2147483648, %v9418_v43  ;;  %v4838_v32 = vand.u32 2147483647, %v9418_v43  ;;  %vm4834_vm1 = vweird.f32 %v9418_v43 }
0x150f   :  { %v4790_v36 = vpop.f32.mrf.mxu3  ;;  %v4841_v10 = vor.u32 1.1754944e-38, %v4840_v30  ;;  %vm4839_vm14 = vcmp.eq.f32.partialorder %v4838_v32, 8.507059e+37 }
0x1510   :  { %v4791_v44 = vadd.f32 %v4790_v36, %v7851_v49 }
0x1512   :  { %v5628_v45 = vmul.f32 -1.442695, %v4791_v44  ;;  %v6230_v18 = vpop.eup %6229 }
0x1513   :  { %v9424_v35 = vadd.f32 1.0, %v6230_v18 }
0x1514   :  { %6231 = vpow2.f32 %v5628_v45 }
0x1515   :  { %6233 = vrcp.f32 %v9418_v43  ;;  %vm4849_vm11 = vweird.f32 %v9424_v35 }
0x1517   :  { %v4792_v4 = vpop.f32.mrf.mxu3 }
0x1518   :  { %v4793_v24 = vadd.f32 %v4792_v4, %v7843_v17  ;;  %v4855_v4 = vand.u32 2147483648, %v9424_v35 }
0x151a   :  { %v6232_v55 = vpop.eup %6231  ;;  %v5629_v52 = vmul.f32 -1.442695, %v4793_v24 }
0x151b   :  { %v9422_v9 = vadd.f32 1.0, %v6232_v55  ;;  %v9427_v23 = vpop.eup %6233 }
0x151c   :  { %6235 = vpow2.f32 %v5629_v52  ;;  %v4830_v40 = vmul.f32 %v9427_v23, %v9418_v43  ;;  %vm4835_vm0 = vweird.f32 %v9427_v23  ;;  %v4965_v43 = vld [vmem:[%s9586_s5 + $0x18] sm:$0xff] }
0x151d   :  { %6237 = vrcp.f32 %v9422_v9  ;;  %vm9468_vm3 = vmor %vm4834_vm1, %vm4835_vm0  ;;  %v4870_v63 = vand.u32 2147483648, %v9422_v9  ;;  %vm4864_vm13 = vweird.f32 %v9422_v9  ;;  %v4868_v3 = vand.u32 2147483647, %v9422_v9  ;;  %4991 = vmatpush.msra.mxu0 %v4965_v43 }
0x151e   :  { %6239 = vrcp.f32 %v9424_v35 }
0x151f   :  { %v4795_v49 = vpop.f32.mrf.mxu3  ;;  %v4871_v45 = vor.u32 1.1754944e-38, %v4870_v63  ;;  %vm4869_vm6 = vcmp.eq.f32.partialorder %v4868_v3, 8.507059e+37 }
0x1520   :  { %v4796_v25 = vadd.f32 %v4795_v49, %v7958_v41  ;;  %v4831_v41 = vsub.f32 1.0, %v4830_v40  ;;  %v4964_v49 = vld [vmem:[%s9586_s5 + $0x10] sm:$0xff]  ;;  %v4963_v40 = vld [vmem:[%s9586_s5 + $0x8] sm:$0xff] }
0x1521   :  { %4992 = vmatpush.msra.mxu0 %v4964_v49 }
0x1522   :  { %v6236_v17 = vpop.eup %6235  ;;  %v5630_v22 = vmul.f32 -1.442695, %v4796_v25  ;;  %v4832_v47 = vmul.f32 %v9427_v23, %v4831_v41 }
0x1523   :  { %v9431_v8 = vpop.eup %6237  ;;  %v9435_v7 = vadd.f32 1.0, %v6236_v17  ;;  %4993 = vmatpush.msra.mxu0 %v4963_v40 }
0x1524   :  { %6241 = vpow2.f32 %v5630_v22  ;;  %v4860_v53 = vmul.f32 %v9431_v8, %v9422_v9  ;;  %v9440_v59 = vpop.eup %6239  ;;  %v4833_v14 = vadd.f32 %v9427_v23, %v4832_v47  ;;  %vm4865_vm2 = vweird.f32 %v9431_v8 }
0x1525   :  { %6243 = vrcp.f32 %v9435_v7  ;;  %v4845_v27 = vmul.f32 %v9440_v59, %v9424_v35  ;;  %vm9490_vm15 = vmor %vm4864_vm13, %vm4865_vm2  ;;  %vm4850_vm4 = vweird.f32 %v9440_v59  ;;  %v4853_v9 = vand.u32 2147483647, %v9424_v35 }
0x1526   :  { %v4861_v33 = vsub.f32 1.0, %v4860_v53  ;;  %v4837_v28 = vsel %vm9468_vm3, %v9427_v23, %v4833_v14  ;;  %vm9516_vm7 = vmor %vm4849_vm11, %vm4850_vm4  ;;  %v4856_v53 = vor.u32 1.1754944e-38, %v4855_v4  ;;  %vm4879_vm5 = vweird.f32 %v9435_v7 }
0x1527   :  { %v4797_v11 = vpop.f32.mrf.mxu3  ;;  %v4846_v50 = vsub.f32 1.0, %v4845_v27  ;;  %v4842_v44 = vsel %vm4839_vm14, %v4841_v10, %v4837_v28  ;;  %vm4854_vm9 = vcmp.eq.f32.partialorder %v4853_v9, 8.507059e+37  ;;  %v5632_v28 = vld [vmem:[%s9587_s4 + $0x10] sm:$0xff]  ;;  %vm4960_vm11 = vcmask 1040384  }
0x1528   :  { %v4798_v20 = vadd.f32 %v4797_v11, %v7859_v12  ;;  %v4862_v12 = vmul.f32 %v9431_v8, %v4861_v33  ;;  %v4921_v25 = vmul.f32 %v4842_v44, %v9333_v21  ;;  %v4883_v11 = vand.u32 2147483647, %v9435_v7  ;;  %v4962_v33 = vld [vmem:[%s9586_s5] sm:$0xff] }
0x1529   :  { %v4847_v13 = vmul.f32 %v9440_v59, %v4846_v50  ;;  %4994 = vmatpush.msra.mxu0 %v4962_v33 }
0x152a   :  { %v6242_v26 = vpop.eup %6241  ;;  %v5631_v1 = vmul.f32 -1.442695, %v4798_v20  ;;  %v4863_v16 = vadd.f32 %v9431_v8, %v4862_v12  ;;  %vm4884_vm1 = vcmp.eq.f32.partialorder %v4883_v11, 8.507059e+37 }
0x152b   :  { %v9445_v15 = vpop.eup %6243  ;;  %v9448_v46 = vadd.f32 1.0, %v6242_v26  ;;  %v4848_v58 = vadd.f32 %v9440_v59, %v4847_v13 }
0x152c   :  { %6245 = vpow2.f32 %v5631_v1  ;;  %v4875_v60 = vmul.f32 %v9445_v15, %v9435_v7  ;;  %v4867_v31 = vsel %vm9490_vm15, %v9431_v8, %v4863_v16  ;;  %vm4880_vm8 = vweird.f32 %v9445_v15 }
0x152d   :  { %6247 = vrcp.f32 %v9448_v46  ;;  %v4872_v55 = vsel %vm4869_vm6, %v4871_v45, %v4867_v31  ;;  %v4852_v35 = vsel %vm9516_vm7, %v9440_v59, %v4848_v58  ;;  %v4885_v8 = vand.u32 2147483648, %v9435_v7  ;;  %vm9536_vm10 = vmor %vm4879_vm5, %vm4880_vm8 }
0x152e   :  { %v4876_v56 = vsub.f32 1.0, %v4875_v60  ;;  %v4857_v26 = vsel %vm4854_vm9, %v4856_v53, %v4852_v35  ;;  %v4900_v60 = vand.u32 2147483648, %v9448_v46  ;;  %vm4894_vm2 = vweird.f32 %v9448_v46 }
0x152f   :  { %v4800_v51 = vpop.f32.mrf.mxu3  ;;  %v4886_v47 = vor.u32 1.1754944e-38, %v4885_v8  ;;  %v4898_v50 = vand.u32 2147483647, %v9448_v46  ;;  %v4974_v8 = vpop.permute.xlu2 %4973  ;;  %vm4999_vm7 = vcmask 9216  }
0x1530   :  { %v4801_v39 = vadd.f32 %v4800_v51, %v7856_v19  ;;  %v4877_v48 = vmul.f32 %v9445_v15, %v4876_v56  ;;  %v4901_v5 = vor.u32 1.1754944e-38, %v4900_v60 }
0x1531   :  { %vm4899_vm13 = vcmp.eq.f32.partialorder %v4898_v50, 8.507059e+37 }
0x1532   :  { %v6246_v34 = vpop.eup %6245  ;;  %6249 = vtanh.f32 %v4801_v39  ;;  %v4878_v22 = vadd.f32 %v9445_v15, %v4877_v48 }
0x1533   :  { %v9477_v61 = vpop.eup %6247  ;;  %v9479_v38 = vadd.f32 1.0, %v6246_v34 }
0x1534   :  { %v4890_v6 = vmul.f32 %v9477_v61, %v9448_v46  ;;  %v4882_v7 = vsel %vm9536_vm10, %v9445_v15, %v4878_v22  ;;  %vm4895_vm0 = vweird.f32 %v9477_v61  ;;  %v4922_v15 = vmul.f32 %v4857_v26, %v9347_v29 }
0x1535   :  { %6251 = vrcp.f32 %v9479_v38  ;;  %v4887_v14 = vsel %vm4884_vm1, %v4886_v47, %v4882_v7  ;;  %vm4896_vm3 = vmor %vm4894_vm2, %vm4895_vm0  ;;  %v4915_v16 = vand.u32 2147483648, %v9479_v38  ;;  %vm4909_vm15 = vweird.f32 %v9479_v38 }
0x1536   :  { %v4891_v36 = vsub.f32 1.0, %v4890_v6  ;;  %v4913_v46 = vand.u32 2147483647, %v9479_v38  ;;  %v5633_v6 = vld [vmem:[%s9587_s4 + $0x18] sm:$0xff] }
0x1537   :  { %v4802_v24 = vpop.f32.mrf.mxu3  ;;  %v4916_v13 = vor.u32 1.1754944e-38, %v4915_v16 }
0x1538   :  { %v6250_v18 = vpop.eup %6249  ;;  %v4803_v52 = vadd.f32 %v4802_v24, %v8174_v62  ;;  %v4892_v62 = vmul.f32 %v9477_v61, %v4891_v36  ;;  %vm4914_vm6 = vcmp.eq.f32.partialorder %v4913_v46, 8.507059e+37 }
0x1539   :  { %v4923_v17 = vmul.f32 %v6250_v18, %v4872_v55 }
0x153a   :  { %6253 = vtanh.f32 %v4803_v52  ;;  %v4893_v27 = vadd.f32 %v9477_v61, %v4892_v62 }
0x153b   :  { %v6252_v21 = vpop.eup %6251  ;;  %v4925_v41 = vadd.f32 %v4923_v17, %v4921_v25 }
0x153c   :  { %v4905_v20 = vmul.f32 %v6252_v21, %v9479_v38  ;;  %v4897_v39 = vsel %vm4896_vm3, %v9477_v61, %v4893_v27  ;;  %vm4910_vm14 = vweird.f32 %v6252_v21  ;;  %v4933_v61 = vld [vmem:[%s9587_s4] sm:$0xff]  ;;  %v4934_v38 = vld [vmem:[%s9587_s4 + $0x8] sm:$0xff] }
0x153d   :  { %6255 = vtanh.f32 %v4925_v41  ;;  %v4902_v34 = vsel %vm4899_vm13, %v4901_v5, %v4897_v39  ;;  %vm4911_vm4 = vmor %vm4909_vm15, %vm4910_vm14 }
0x153e   :  { %v4906_v1 = vsub.f32 1.0, %v4905_v20 }
0x1540   :  { %v6254_v12 = vpop.eup %6253  ;;  %v4907_v51 = vmul.f32 %v6252_v21, %v4906_v1 }
0x1541   :  { %v4924_v30 = vmul.f32 %v6254_v12, %v4887_v14 }
0x1542   :  { %v4908_v56 = vadd.f32 %v6252_v21, %v4907_v51 }
0x1543   :  { %v6256_v32 = vpop.eup %6255  ;;  %v4926_v54 = vadd.f32 %v4924_v30, %v4922_v15 }
0x1544   :  { %v4929_v19 = vmul.f32 %v6256_v32, %v4902_v34  ;;  %v4912_v29 = vsel %vm4911_vm4, %v6252_v21, %v4908_v56 }
0x1545   :  { %6257 = vtanh.f32 %v4926_v54  ;;  %v4917_v3 = vsel %vm4914_vm6, %v4916_v13, %v4912_v29 }
0x1546   :  { %v4931_v63 = vmax.f32 %v9358_v37, %v4929_v19 }
0x1548   :  { %v4935_v37 = vmul.f32 %v4933_v61, %v4931_v63  ;;  %v4949_v57 = vmul.f32 %v5632_v28, %v4931_v63 }
0x154a   :  { %v4937_v36 = vsel %vm383_vm12, %v4935_v37, 0.0  ;;  %v4951_v45 = vsel %vm383_vm12, %v4949_v57, 0.0 }
0x154b   :  { %v6258_v0 = vpop.eup %6257 }
0x154c   :  { %v4930_v10 = vmul.f32 %v6258_v0, %v4917_v3 }
0x154e   :  { %v4932_v42 = vmax.f32 %v9366_v2, %v4930_v10 }
0x1550   :  { %v4936_v31 = vmul.f32 %v4934_v38, %v4932_v42  ;;  %v4950_v48 = vmul.f32 %v5633_v6, %v4932_v42 }
0x1552   :  { %v4938_v44 = vsel %vm383_vm12, %v4936_v31, 0.0  ;;  %v4952_v58 = vsel %vm383_vm12, %v4950_v48, 0.0 }
0x1553   :  { %v4939_v43 = vadd.f32 %v4938_v44, %v4937_v36  ;;  %v4953_v4 = vadd.f32 %v4952_v58, %v4951_v45 }
0x1555   :  { %v4940_v24 = vrot.slane %v4939_v43, 4  ;;  %v4954_v18 = vrot.slane %v4953_v4, 4 }
0x1557   :  { %v4941_v55 = vadd.f32 %v4940_v24, %v4939_v43  ;;  %v4955_v52 = vadd.f32 %v4954_v18, %v4953_v4 }
0x1559   :  { %v4942_v9 = vrot.slane %v4941_v55, 2  ;;  %v4956_v49 = vrot.slane %v4955_v52, 2 }
0x155b   :  { %v4943_v23 = vadd.f32 %v4942_v9, %v4941_v55  ;;  %v4957_v2 = vadd.f32 %v4956_v49, %v4955_v52 }
0x155d   :  { %v4944_v25 = vrot.slane %v4943_v23, 1  ;;  %v4958_v17 = vrot.slane %v4957_v2, 1 }
0x155f   :  { %v4945_v22 = vadd.f32 %v4944_v25, %v4943_v23  ;;  %v4959_v62 = vadd.f32 %v4958_v17, %v4957_v2 }
0x1561   :  { %v4961_v35 = vsel %vm4960_vm11, %v4945_v22, %v4959_v62 }
0x1562   :  { %5634 = vmatmul.msk.f32.vlgmr.msra.gmra.mxu0 %vm383_vm12, %v4961_v35 }
0x15df   :  { %v4996_v40 = vpop.f32.mrf.mxu0 }
0x15e0   :  { %v4997_v21 = vadd.f32 %v4996_v40, %v4974_v8 }
0x15e2   :  { %v5000_v53 = vsel %vm4999_vm7, %v4997_v21, -inf }
0x15e3   :  { %v5001_v41 = vrot.slane %v5000_v53, 4 }
0x15e5   :  { %v5002_v11 = vmax.f32 %v5000_v53, %v5001_v41 }
0x15e7   :  { %v5003_v20 = vrot.slane %v5002_v11, 2 }
0x15e9   :  { %v5004_v59 = vmax.f32 %v5002_v11, %v5003_v20 }
0x15eb   :  { %v5005_v33 = vrot.slane %v5004_v59, 1 }
0x15ed   :  { %v5006_v26 = vmax.f32 %v5004_v59, %v5005_v33 }
0x15ef   :  { %v5007_v7 = vsub.f32 %v4997_v21, %v5006_v26 }
0x15f1   :  { %v5008_v27 = vmul.f32 1.442695, %v5007_v7 }
0x15f3   :  { %6259 = vpow2.f32 %v5008_v27 }
0x15f9   :  { %v6260_v1 = vpop.eup %6259 }
0x15fa   :  { %v5010_v47 = vsel %vm4999_vm7, %v6260_v1, 0.0 }
0x15fb   :  { %v5011_v60 = vrot.slane %v5010_v47, 4 }
0x15fd   :  { %v5012_v12 = vadd.f32 %v5011_v60, %v5010_v47 }
0x15ff   :  { %v5013_v50 = vrot.slane %v5012_v12, 2 }
0x1601   :  { %v5014_v51 = vadd.f32 %v5013_v50, %v5012_v12 }
0x1603   :  { %v5015_v14 = vrot.slane %v5014_v51, 1 }
0x1605   :  { %v5016_v15 = vadd.f32 %v5015_v14, %v5014_v51 }
0x1607   :  { %6261 = vlog2.f32 %v5016_v15 }
0x160d   :  { %v6262_v30 = vpop.eup %6261 }
0x160e   :  { %v5018_v39 = vmul.f32 0.6931472, %v6262_v30 }
0x1610   :  { %v5019_v32 = vadd.f32 %v5018_v39, %v5006_v26 }
0x1612   :  { %v5020_v5 = vsub.f32 %v4997_v21, %v5019_v32 }
0x1614   :  { %5021 = vst.msk [vmem:[%s9588_s7] sm:$0x3] %vm4999_vm7, %v5020_v5 }

</bundles_post_ra>
